<compile_context>
chip_gen: v6e
topology: v6e:2x2x1
jax: 0.10.0
libtpu: 0.0.40
codegen_flags: <defaults>
</compile_context>

<pallas_src>
import jax
import jax.numpy as jnp
from jax.experimental import pallas as pl
from jax.experimental.pallas import tpu as pltpu

# torchvision vgg16 "D" config: 13 convs + 5 maxpools -> 31 feature layers
VGG16_CFG = [64, 64, 'M', 128, 128, 'M', 256, 256, 256, 'M',
             512, 512, 512, 'M', 512, 512, 512, 'M']

_VMEM_LIMIT_CACHE = [None]


def _vmem_limit_bytes():
    if _VMEM_LIMIT_CACHE[0] is None:
        try:
            cap = int(pltpu.get_tpu_info().vmem_capacity_bytes)
        except Exception:
            cap = 64 * 1024 * 1024
        # ~3/4 of physical VMEM, capped at 100 MiB (v5e/v6e ~96 MiB, v7x ~48 MiB).
        _VMEM_LIMIT_CACHE[0] = int(min(100 * 1024 * 1024,
                                       max(cap * 3 // 4, 32 * 1024 * 1024)))
    return _VMEM_LIMIT_CACHE[0]


def _compiler_params(n_parallel_axes):
    return pltpu.CompilerParams(
        dimension_semantics=("parallel",) * n_parallel_axes,
        vmem_limit_bytes=_vmem_limit_bytes(),
    )


def _pick_row_tile(H, W, even=False):
    """Largest divisor of H with TH*W <= ~512 so the matmul M dim is 256-512
    (MXU friendly) while the f32 accumulator stays in-vreg sized."""
    target = max(1, 512 // W)
    best = 2 if (even and H % 2 == 0) else 1
    for d in range(1, H + 1):
        if H % d:
            continue
        if even and d % 2:
            continue
        if d <= target:
            best = max(best, d)
    return best


# ---------------------------------------------------------------- conv 3x3, pad 1
def _make_conv_kernel(H, W, Cin, TCout, TH, fuse_relu, fuse_pool, full_im2col):
    n_strips = H // TH
    THo = TH // 2 if fuse_pool else TH
    Wo = W // 2 if fuse_pool else W

    def kernel(x_ref, w_ref, b_ref, o_ref, pad_ref):
        cdt = x_ref.dtype
        # --- zero-padded image built once per grid step into VMEM scratch ---
        zrow = jnp.zeros((1, W + 2, Cin), cdt)
        pad_ref[0:1, :, :] = zrow
        pad_ref[H + 1:H + 2, :, :] = zrow
        zcol = jnp.zeros((H, 1, Cin), cdt)
        pad_ref[1:H + 1, 0:1, :] = zcol
        pad_ref[1:H + 1, W + 1:W + 2, :] = zcol
        pad_ref[1:H + 1, 1:W + 1, :] = x_ref[0]

        bias = b_ref[...]                               # (1, TCout) f32, hoisted
        w27 = w_ref[...] if full_im2col else None       # (9*Cin, TCout), tiny

        def strip(s):
            h0 = s * TH
            if not isinstance(s, int):
                h0 = pl.multiple_of(h0, TH)
            xps = pad_ref[pl.ds(h0, TH + 2), :, :]      # (TH+2, W+2, Cin)
            if full_im2col:
                # Cin=3 first layer: one matmul with K=27 instead of 9 K=3 ones.
                pieces = [xps[dy:dy + TH, dx:dx + W, :]
                          for dy in range(3) for dx in range(3)]
                slab = jnp.concatenate(pieces, axis=-1).reshape(TH * W, 9 * Cin)
                acc = jnp.dot(slab, w27, preferred_element_type=jnp.float32)
            else:
                acc = jnp.zeros((TH * W, TCout), jnp.float32)
                for dy in range(3):
                    rows = xps[dy:dy + TH]              # (TH, W+2, Cin)
                    slab = jnp.concatenate(
                        [rows[:, 0:W, :], rows[:, 1:W + 1, :], rows[:, 2:W + 2, :]],
                        axis=-1).reshape(TH * W, 3 * Cin)   # dx folded into K
                    acc = acc + jnp.dot(slab, w_ref[dy],
                                        preferred_element_type=jnp.float32)
            acc = acc + bias                            # f32 epilogue
            if fuse_relu:
                acc = jnp.maximum(acc, 0.0)             # fused ReLU
            if fuse_pool:
                a = acc.reshape(THo, 2, W, TCout)
                a = jnp.maximum(a[:, 0], a[:, 1])       # H-pair max
                a = a.reshape(THo, Wo, 2, TCout)
                a = jnp.maximum(a[:, :, 0], a[:, :, 1])  # W-pair max
                ho = s * THo
                if not isinstance(s, int):
                    ho = pl.multiple_of(ho, THo)
                o_ref[0, pl.ds(ho, THo), :, :] = a.astype(o_ref.dtype)
            else:
                o_ref[0, pl.ds(h0, TH), :, :] = \
                    acc.reshape(TH, W, TCout).astype(o_ref.dtype)

        if n_strips == 1:
            strip(0)
        else:
            jax.lax.fori_loop(0, n_strips,
                              lambda s, c: (strip(s), c)[1], 0,
                              unroll=n_strips <= 4)

    return kernel


def conv3x3(x, w, b, fuse_relu=True, fuse_pool=False):
    """x: (N,H,W,Cin) bf16, w: (3,3,Cin,Cout) bf16, b: (Cout,) f32.
    Bias, ReLU (when fuse_relu) and 2x2 maxpool (when fuse_pool) are applied in
    the kernel epilogue. Output dtype is bf16."""
    N, H, W, Cin = x.shape
    Cout = w.shape[-1]
    if fuse_pool:
        assert H % 2 == 0 and W % 2 == 0
    cdt = jnp.bfloat16
    x = x.astype(cdt)
    w = w.astype(cdt)
    TCout = min(Cout, 128)
    n_co = Cout // TCout
    TH = _pick_row_tile(H, W, even=fuse_pool)
    full_im2col = Cin < 8                       # conv1_1 special case (Cin = 3)
    if full_im2col:
        wr = w.reshape(9 * Cin, Cout)           # (dy, dx, c) folded into K
    else:
        wr = w.reshape(3, 3 * Cin, Cout)        # dx folded into K (matches slab)
    Ho, Wo = (H // 2, W // 2) if fuse_pool else (H, W)

    # Per-layer grid ordering: fetch the dominant operand only once.
    weight_bytes = int(wr.size) * 2
    x_bytes = int(x.size) * 2
    weight_first = n_co > 1 and (N - 1) * weight_bytes > (n_co - 1) * x_bytes

    if weight_first:
        grid = (n_co, N)
        x_map = lambda co, n: (n, 0, 0, 0)
        w_spec = (pl.BlockSpec((9 * Cin, TCout), lambda co, n: (0, co))
                  if full_im2col else
                  pl.BlockSpec((3, 3 * Cin, TCout), lambda co, n: (0, 0, co)))
        b_map = lambda co, n: (0, co)
        o_map = lambda co, n: (n, 0, 0, co)
    else:
        grid = (N, n_co)
        x_map = lambda n, co: (n, 0, 0, 0)
        w_spec = (pl.BlockSpec((9 * Cin, TCout), lambda n, co: (0, co))
                  if full_im2col else
                  pl.BlockSpec((3, 3 * Cin, TCout), lambda n, co: (0, 0, co)))
        b_map = lambda n, co: (0, co)
        o_map = lambda n, co: (n, 0, 0, co)

    kernel = _make_conv_kernel(H, W, Cin, TCout, TH, fuse_relu, fuse_pool,
                               full_im2col)
    return pl.pallas_call(
        kernel,
        out_shape=jax.ShapeDtypeStruct((N, Ho, Wo, Cout), cdt),
        grid=grid,
        in_specs=[
            pl.BlockSpec((1, H, W, Cin), x_map),
            w_spec,
            pl.BlockSpec((1, TCout), b_map),
        ],
        out_specs=pl.BlockSpec((1, Ho, Wo, TCout), o_map),
        scratch_shapes=[pltpu.VMEM((H + 2, W + 2, Cin), cdt)],
        compiler_params=_compiler_params(2),
    )(x, wr, b.reshape(1, Cout).astype(jnp.float32))


# ----------------------------------------------------------------- maxpool 2x2 s=2
def _maxpool_kernel(x_ref, o_ref):
    # x_ref: (1, Ho, 2, W, C) -- trailing dims (W, C) stay lane/sublane dense
    _, Ho, _, W, C = x_ref.shape
    Wo = W // 2
    x = x_ref[0]                                        # (Ho, 2, W, C)
    mh = jnp.maximum(x[:, 0], x[:, 1])                  # H-pair max -> (Ho, W, C)
    mw = mh.reshape(Ho, Wo, 2, C)                       # split W into pairs
    o_ref[0] = jnp.maximum(mw[:, :, 0], mw[:, :, 1])    # W-pair max -> (Ho, Wo, C)


def maxpool2x2(x):
    N, H, W, C = x.shape
    Ho, Wo = H // 2, W // 2
    if H % 2 or W % 2:
        x = x[:, :Ho * 2, :Wo * 2, :]                   # floor mode (MaxPool2d)
    xr = x.reshape(N, Ho, 2, Wo * 2, C)                 # glue: metadata reshape
    return pl.pallas_call(
        _maxpool_kernel,
        out_shape=jax.ShapeDtypeStruct((N, Ho, Wo, C), x.dtype),
        grid=(N,),
        in_specs=[pl.BlockSpec((1, Ho, 2, Wo * 2, C), lambda n: (n, 0, 0, 0, 0))],
        out_specs=pl.BlockSpec((1, Ho, Wo, C), lambda n: (n, 0, 0, 0)),
        compiler_params=_compiler_params(1),
    )(xr)


# ------------------------------------------------------------------ VGG16 features
class VGG16PallasFeatures:
    """Pallas re-implementation of torchvision vgg16().features with outputs
    collected at `layer_ids`, mirroring VGG16_Pretrained.forward.
    # TODO(synk): IMAGENET1K_V1 pretrained weights cannot be loaded here (no file
    # or network access); parameters are deterministic He-style synthetic inits
    # with identical shapes, so values differ numerically from torchvision.
    """

    def __init__(self, layer_ids, key):
        self.layer_ids = set(layer_ids)
        self.layers = []                 # ('conv', w, b) | ('relu',) | ('pool',)
        cin = 3
        for v in VGG16_CFG:
            if v == 'M':
                self.layers.append(('pool',))
            else:
                key, kw = jax.random.split(key)
                std = (2.0 / (9.0 * cin)) ** 0.5
                w = (std * jax.random.normal(kw, (3, 3, cin, v), jnp.float32)
                     ).astype(jnp.bfloat16)
                b = 0.01 * jnp.ones((v,), jnp.float32)
                self.layers.append(('conv', w, b))
                self.layers.append(('relu',))
                cin = v
        assert len(self.layers) == 31    # same length as vgg16.features

    def __len__(self):
        return len(self.layers)

    def __getitem__(self, idx):
        return self.layers[idx]

    def __call__(self, x_nchw):
        x = jnp.transpose(x_nchw, (0, 2, 3, 1)).astype(jnp.bfloat16)  # NCHW->NHWC
        outputs = {}
        L = self.layers
        idx = 0
        while idx < len(L):
            kind = L[idx][0]
            if kind == 'conv':
                _, w, b = L[idx]
                relu_idx = idx + 1
                pool_follows = idx + 2 < len(L) and L[idx + 2][0] == 'pool'
                pre_act = idx in self.layer_ids
                can_fuse_pool = (not pre_act and pool_follows
                                 and relu_idx not in self.layer_ids
                                 and x.shape[1] % 2 == 0 and x.shape[2] % 2 == 0)
                if pre_act:
                    # Pre-activation output requested: emit it, ReLU done by XLA
                    # (cheap elementwise, fuses with the surrounding ops).
                    x = conv3x3(x, w, b, fuse_relu=False)
                    outputs[idx] = x
                    x = jnp.maximum(x, 0)
                    if relu_idx in self.layer_ids:
                        outputs[relu_idx] = x
                    idx += 2
                elif can_fuse_pool:
                    # conv + bias + ReLU + maxpool fused in one kernel epilogue.
                    x = conv3x3(x, w, b, fuse_relu=True, fuse_pool=True)
                    if idx + 2 in self.layer_ids:
                        outputs[idx + 2] = x
                    idx += 3
                else:
                    x = conv3x3(x, w, b, fuse_relu=True)
                    if relu_idx in self.layer_ids:
                        outputs[relu_idx] = x
                    idx += 2
            else:  # unfused pool (its pre-pool activation was requested)
                x = maxpool2x2(x)
                if idx in self.layer_ids:
                    outputs[idx] = x
                idx += 1
        # NCHW f32 like PyTorch, in increasing layer-index order.
        return [jnp.transpose(outputs[i], (0, 3, 1, 2)).astype(jnp.float32)
                for i in sorted(self.layer_ids) if i in outputs]


if __name__ == "__main__":
    key = jax.random.PRNGKey(0)
    key, kx = jax.random.split(key)
    # NCHW input, 3 channels as VGG expects, small 32x32 spatial
    x = jax.random.normal(kx, (2, 3, 32, 32), jnp.float32)

    # layer 0 (a conv index) exercises the pre-activation path; 3/8/15/22 are the
    # usual post-ReLU taps. conv5_3 (idx 28) + pool 30 exercises the fused
    # conv+relu+pool kernel since neither is tapped.
    model = VGG16PallasFeatures(layer_ids=[0, 3, 8, 15, 22], key=key)
    outs = model(x)
    outs = jax.block_until_ready(outs)

    expected = [(2, 64, 32, 32), (2, 64, 32, 32), (2, 128, 16, 16),
                (2, 256, 8, 8), (2, 512, 4, 4)]
    assert [tuple(o.shape) for o in outs] == expected, \
        [tuple(o.shape) for o in outs]
    assert all(bool(jnp.all(jnp.isfinite(o))) for o in outs)
    assert bool(jnp.any(outs[0] < 0))        # conv-index output is pre-ReLU
    assert bool(jnp.all(outs[1] >= 0))       # relu-index output is post-ReLU
    print("KERNEL_OK")
</pallas_src>

<mosaic_0001>
module attributes {stable_mosaic.version = 11 : i64} {
  func.func @kernel(%arg0: i32, %arg1: i32, %arg2: memref<1x32x32x3xbf16, #tpu.memory_space<vmem>>, %arg3: memref<27x64xbf16, #tpu.memory_space<vmem>>, %arg4: memref<1x64xf32, #tpu.memory_space<vmem>>, %arg5: memref<1x32x32x64xbf16, #tpu.memory_space<vmem>>, %arg6: memref<34x34x3xbf16, #tpu.memory_space<vmem>>) attributes {dimension_semantics = [#tpu.dimension_semantics<parallel>, #tpu.dimension_semantics<parallel>], iteration_bounds = array<i64: 2, 1>, scalar_prefetch = 0 : i64, scratch_operands = 1 : i64, tpu.core_type = #tpu.core_type<tc>, window_params = [{transform_indices = @transform_0, window_bounds = array<i64: 1, 32, 32, 3>}, {transform_indices = @transform_1, window_bounds = array<i64: 27, 64>}, {transform_indices = @transform_2, window_bounds = array<i64: 1, 64>}, {transform_indices = @transform_3, window_bounds = array<i64: 1, 32, 32, 64>}]} {
    %cst = arith.constant 0.000000e+00 : bf16
    %0 = vector.broadcast %cst : bf16 to vector<1x34x3xbf16>
    %c0 = arith.constant 0 : index
    %c0_0 = arith.constant 0 : index
    %c0_1 = arith.constant 0 : index
    %1 = vector.load %arg6[%c0, %c0_0, %c0_1] : memref<34x34x3xbf16, #tpu.memory_space<vmem>>, vector<1x34x3xbf16>
    tpu.vector_store %arg6[%c0, %c0_0, %c0_1], %0 {strides = array<i32>} : memref<34x34x3xbf16, #tpu.memory_space<vmem>>, vector<1x34x3xbf16>,
    %c33 = arith.constant 33 : index
    %c0_2 = arith.constant 0 : index
    %c0_3 = arith.constant 0 : index
    %2 = vector.load %arg6[%c33, %c0_2, %c0_3] : memref<34x34x3xbf16, #tpu.memory_space<vmem>>, vector<1x34x3xbf16>
    tpu.vector_store %arg6[%c33, %c0_2, %c0_3], %0 {strides = array<i32>} : memref<34x34x3xbf16, #tpu.memory_space<vmem>>, vector<1x34x3xbf16>,
    %cst_4 = arith.constant 0.000000e+00 : bf16
    %3 = vector.broadcast %cst_4 : bf16 to vector<32x1x3xbf16>
    %c1 = arith.constant 1 : index
    %c0_5 = arith.constant 0 : index
    %c0_6 = arith.constant 0 : index
    %4 = vector.load %arg6[%c1, %c0_5, %c0_6] : memref<34x34x3xbf16, #tpu.memory_space<vmem>>, vector<32x1x3xbf16>
    tpu.vector_store %arg6[%c1, %c0_5, %c0_6], %3 {strides = array<i32>} : memref<34x34x3xbf16, #tpu.memory_space<vmem>>, vector<32x1x3xbf16>,
    %c1_7 = arith.constant 1 : index
    %c33_8 = arith.constant 33 : index
    %c0_9 = arith.constant 0 : index
    %5 = vector.load %arg6[%c1_7, %c33_8, %c0_9] : memref<34x34x3xbf16, #tpu.memory_space<vmem>>, vector<32x1x3xbf16>
    tpu.vector_store %arg6[%c1_7, %c33_8, %c0_9], %3 {strides = array<i32>} : memref<34x34x3xbf16, #tpu.memory_space<vmem>>, vector<32x1x3xbf16>,
    %c0_10 = arith.constant 0 : index
    %c0_11 = arith.constant 0 : index
    %c0_12 = arith.constant 0 : index
    %c0_13 = arith.constant 0 : index
    %6 = vector.load %arg2[%c0_10, %c0_11, %c0_12, %c0_13] : memref<1x32x32x3xbf16, #tpu.memory_space<vmem>>, vector<1x32x32x3xbf16>
    %7 = vector.shape_cast %6 : vector<1x32x32x3xbf16> to vector<32x32x3xbf16>
    %c1_14 = arith.constant 1 : index
    %c1_15 = arith.constant 1 : index
    %c0_16 = arith.constant 0 : index
    %8 = vector.load %arg6[%c1_14, %c1_15, %c0_16] : memref<34x34x3xbf16, #tpu.memory_space<vmem>>, vector<32x32x3xbf16>
    tpu.vector_store %arg6[%c1_14, %c1_15, %c0_16], %7 {strides = array<i32>} : memref<34x34x3xbf16, #tpu.memory_space<vmem>>, vector<32x32x3xbf16>,
    %c0_17 = arith.constant 0 : index
    %c0_18 = arith.constant 0 : index
    %9 = vector.load %arg4[%c0_17, %c0_18] : memref<1x64xf32, #tpu.memory_space<vmem>>, vector<1x64xf32>
    %c0_19 = arith.constant 0 : index
    %c0_20 = arith.constant 0 : index
    %10 = vector.load %arg3[%c0_19, %c0_20] : memref<27x64xbf16, #tpu.memory_space<vmem>>, vector<27x64xbf16>
    %c0_i32 = arith.constant 0 : i32
    %c16_i32 = arith.constant 16 : i32
    %11 = arith.muli %c0_i32, %c16_i32 : i32
    %12 = tpu.assume_multiple %11, 16 : i32
    %13 = arith.index_cast %12 : i32 to index
    %c0_21 = arith.constant 0 : index
    %c0_22 = arith.constant 0 : index
    %14 = vector.load %arg6[%13, %c0_21, %c0_22] : memref<34x34x3xbf16, #tpu.memory_space<vmem>>, vector<18x34x3xbf16>
    %15 = vector.extract_strided_slice %14 {offsets = [0, 0, 0], sizes = [16, 32, 3], strides = [1, 1, 1]} : vector<18x34x3xbf16> to vector<16x32x3xbf16>
    %16 = vector.extract_strided_slice %14 {offsets = [0, 1, 0], sizes = [16, 32, 3], strides = [1, 1, 1]} : vector<18x34x3xbf16> to vector<16x32x3xbf16>
    %17 = vector.extract_strided_slice %14 {offsets = [0, 2, 0], sizes = [16, 32, 3], strides = [1, 1, 1]} : vector<18x34x3xbf16> to vector<16x32x3xbf16>
    %18 = vector.extract_strided_slice %14 {offsets = [1, 0, 0], sizes = [16, 32, 3], strides = [1, 1, 1]} : vector<18x34x3xbf16> to vector<16x32x3xbf16>
    %19 = vector.extract_strided_slice %14 {offsets = [1, 1, 0], sizes = [16, 32, 3], strides = [1, 1, 1]} : vector<18x34x3xbf16> to vector<16x32x3xbf16>
    %20 = vector.extract_strided_slice %14 {offsets = [1, 2, 0], sizes = [16, 32, 3], strides = [1, 1, 1]} : vector<18x34x3xbf16> to vector<16x32x3xbf16>
    %21 = vector.extract_strided_slice %14 {offsets = [2, 0, 0], sizes = [16, 32, 3], strides = [1, 1, 1]} : vector<18x34x3xbf16> to vector<16x32x3xbf16>
    %22 = vector.extract_strided_slice %14 {offsets = [2, 1, 0], sizes = [16, 32, 3], strides = [1, 1, 1]} : vector<18x34x3xbf16> to vector<16x32x3xbf16>
    %23 = vector.extract_strided_slice %14 {offsets = [2, 2, 0], sizes = [16, 32, 3], strides = [1, 1, 1]} : vector<18x34x3xbf16> to vector<16x32x3xbf16>
    %24 = tpu.concatenate %15, %16, %17, %18, %19, %20, %21, %22, %23 in 2 : vector<16x32x3xbf16>, vector<16x32x3xbf16>, vector<16x32x3xbf16>, vector<16x32x3xbf16>, vector<16x32x3xbf16>, vector<16x32x3xbf16>, vector<16x32x3xbf16>, vector<16x32x3xbf16>, vector<16x32x3xbf16> -> vector<16x32x27xbf16>
    %25 = vector.shape_cast %24 : vector<16x32x27xbf16> to vector<512x27xbf16>
    %cst_23 = arith.constant dense<0.000000e+00> : vector<512x64xf32>
    %26 = tpu.matmul %25, %10, %cst_23 {dimension_numbers = #tpu.dot_dimension_numbers<[1], [0], [0], [1], [0, 0, 1, 1], [], []>} : vector<512x27xbf16>, vector<27x64xbf16>, vector<512x64xf32> -> vector<512x64xf32>
    %27 = vector.broadcast %9 : vector<1x64xf32> to vector<512x64xf32>
    %28 = arith.addf %26, %27 : vector<512x64xf32>
    %29 = vector.shape_cast %28 : vector<512x64xf32> to vector<16x32x64xf32>
    %30 = arith.truncf %29 : vector<16x32x64xf32> to vector<16x32x64xbf16>
    %c0_24 = arith.constant 0 : index
    %31 = arith.index_cast %12 : i32 to index
    %c0_25 = arith.constant 0 : index
    %c0_26 = arith.constant 0 : index
    %32 = vector.load %arg5[%c0_24, %31, %c0_25, %c0_26] : memref<1x32x32x64xbf16, #tpu.memory_space<vmem>>, vector<1x16x32x64xbf16>
    %33 = vector.shape_cast %32 : vector<1x16x32x64xbf16> to vector<16x32x64xbf16>
    %34 = vector.shape_cast %30 : vector<16x32x64xbf16> to vector<1x16x32x64xbf16>
    tpu.vector_store %arg5[%c0_24, %31, %c0_25, %c0_26], %34 {strides = array<i32>} : memref<1x32x32x64xbf16, #tpu.memory_space<vmem>>, vector<1x16x32x64xbf16>,
    %c1_i32 = arith.constant 1 : i32
    %c16_i32_27 = arith.constant 16 : i32
    %35 = arith.muli %c1_i32, %c16_i32_27 : i32
    %36 = tpu.assume_multiple %35, 16 : i32
    %37 = arith.index_cast %36 : i32 to index
    %c0_28 = arith.constant 0 : index
    %c0_29 = arith.constant 0 : index
    %38 = vector.load %arg6[%37, %c0_28, %c0_29] : memref<34x34x3xbf16, #tpu.memory_space<vmem>>, vector<18x34x3xbf16>
    %39 = vector.extract_strided_slice %38 {offsets = [0, 0, 0], sizes = [16, 32, 3], strides = [1, 1, 1]} : vector<18x34x3xbf16> to vector<16x32x3xbf16>
    %40 = vector.extract_strided_slice %38 {offsets = [0, 1, 0], sizes = [16, 32, 3], strides = [1, 1, 1]} : vector<18x34x3xbf16> to vector<16x32x3xbf16>
    %41 = vector.extract_strided_slice %38 {offsets = [0, 2, 0], sizes = [16, 32, 3], strides = [1, 1, 1]} : vector<18x34x3xbf16> to vector<16x32x3xbf16>
    %42 = vector.extract_strided_slice %38 {offsets = [1, 0, 0], sizes = [16, 32, 3], strides = [1, 1, 1]} : vector<18x34x3xbf16> to vector<16x32x3xbf16>
    %43 = vector.extract_strided_slice %38 {offsets = [1, 1, 0], sizes = [16, 32, 3], strides = [1, 1, 1]} : vector<18x34x3xbf16> to vector<16x32x3xbf16>
    %44 = vector.extract_strided_slice %38 {offsets = [1, 2, 0], sizes = [16, 32, 3], strides = [1, 1, 1]} : vector<18x34x3xbf16> to vector<16x32x3xbf16>
    %45 = vector.extract_strided_slice %38 {offsets = [2, 0, 0], sizes = [16, 32, 3], strides = [1, 1, 1]} : vector<18x34x3xbf16> to vector<16x32x3xbf16>
    %46 = vector.extract_strided_slice %38 {offsets = [2, 1, 0], sizes = [16, 32, 3], strides = [1, 1, 1]} : vector<18x34x3xbf16> to vector<16x32x3xbf16>
    %47 = vector.extract_strided_slice %38 {offsets = [2, 2, 0], sizes = [16, 32, 3], strides = [1, 1, 1]} : vector<18x34x3xbf16> to vector<16x32x3xbf16>
    %48 = tpu.concatenate %39, %40, %41, %42, %43, %44, %45, %46, %47 in 2 : vector<16x32x3xbf16>, vector<16x32x3xbf16>, vector<16x32x3xbf16>, vector<16x32x3xbf16>, vector<16x32x3xbf16>, vector<16x32x3xbf16>, vector<16x32x3xbf16>, vector<16x32x3xbf16>, vector<16x32x3xbf16> -> vector<16x32x27xbf16>
    %49 = vector.shape_cast %48 : vector<16x32x27xbf16> to vector<512x27xbf16>
    %cst_30 = arith.constant dense<0.000000e+00> : vector<512x64xf32>
    %50 = tpu.matmul %49, %10, %cst_30 {dimension_numbers = #tpu.dot_dimension_numbers<[1], [0], [0], [1], [0, 0, 1, 1], [], []>} : vector<512x27xbf16>, vector<27x64xbf16>, vector<512x64xf32> -> vector<512x64xf32>
    %51 = vector.broadcast %9 : vector<1x64xf32> to vector<512x64xf32>
    %52 = arith.addf %50, %51 : vector<512x64xf32>
    %53 = vector.shape_cast %52 : vector<512x64xf32> to vector<16x32x64xf32>
    %54 = arith.truncf %53 : vector<16x32x64xf32> to vector<16x32x64xbf16>
    %c0_31 = arith.constant 0 : index
    %55 = arith.index_cast %36 : i32 to index
    %c0_32 = arith.constant 0 : index
    %c0_33 = arith.constant 0 : index
    %56 = vector.load %arg5[%c0_31, %55, %c0_32, %c0_33] : memref<1x32x32x64xbf16, #tpu.memory_space<vmem>>, vector<1x16x32x64xbf16>
    %57 = vector.shape_cast %56 : vector<1x16x32x64xbf16> to vector<16x32x64xbf16>
    %58 = vector.shape_cast %54 : vector<16x32x64xbf16> to vector<1x16x32x64xbf16>
    tpu.vector_store %arg5[%c0_31, %55, %c0_32, %c0_33], %58 {strides = array<i32>} : memref<1x32x32x64xbf16, #tpu.memory_space<vmem>>, vector<1x16x32x64xbf16>,
    %c2_i32 = arith.constant 2 : i32
    return
  }
  func.func @transform_0(%arg0: i32, %arg1: i32) -> (i32, i32, i32, i32) {
    %c0_i32 = arith.constant 0 : i32
    %c0_i32_0 = arith.constant 0 : i32
    %c0_i32_1 = arith.constant 0 : i32
    %c0_i32_2 = arith.constant 0 : i32
    return %arg0, %c0_i32, %c0_i32_0, %c0_i32_1 : i32, i32, i32, i32
  }
  func.func @transform_1(%arg0: i32, %arg1: i32) -> (i32, i32) {
    %c0_i32 = arith.constant 0 : i32
    %c0_i32_0 = arith.constant 0 : i32
    return %c0_i32, %arg1 : i32, i32
  }
  func.func @transform_2(%arg0: i32, %arg1: i32) -> (i32, i32) {
    %c0_i32 = arith.constant 0 : i32
    %c0_i32_0 = arith.constant 0 : i32
    return %c0_i32, %arg1 : i32, i32
  }
  func.func @transform_3(%arg0: i32, %arg1: i32) -> (i32, i32, i32, i32) {
    %c0_i32 = arith.constant 0 : i32
    %c0_i32_0 = arith.constant 0 : i32
    %c0_i32_1 = arith.constant 0 : i32
    return %arg0, %c0_i32, %c0_i32_0, %arg1 : i32, i32, i32, i32
  }
}

</mosaic_0001>

<bundles_post_ra>
// kernel: tpu_custom_call.1
= control target key start
LH: loop header
LB: loop body
LE: loop exit
PB: predicated region body
PF: predicated region fallthrough
CT: control target
= control target key end

     0   :  { %8 = vsyncpa [#allocation4], 0  ;;  %s13445_s0 = inlined_call_operand.vmem [shape: bf16[2,32,32,3], index: 0, kind: input, shape index: {}]   ;;  %s13446_s1 = inlined_call_operand.vmem [shape: bf16[27,64], index: 1, kind: input, shape index: {}]   ;;  %s13447_s2 = inlined_call_operand.vmem [shape: f32[1,64], index: 2, kind: input, shape index: {}]   ;;  %s13448_s3 = inlined_call_operand.hbm [shape: bf16[2,32,32,64], index: 3, kind: output, shape index: {}]  }
   0x1   :  { %10 = vsyncpa [#allocation4 + $0x1], 0  ;;  %s8370_s12 = smov 0   ;;  %s8372_s13 = smov 0  }
   0x2   :  { %s8374_s14 = smov 0   ;;  %s8376_s15 = smov 0  }
   0x3   :  { %s8378_s16 = smov 0   ;;  %s8380_s17 = smov 0  }
   0x4 LB: > { %s7237_s18 = sadd.s32 4294967295, %s8335_s17   ;;  %s7238_s19 = sadd.s32 4294967294, %s8335_s17   ;;  %s8335_s17 = sphi %s8380_s17, %s16_s17   ;;  %s8331_s16 = sphi %s8378_s16, %s14394_s16   ;;  %s8327_s15 = sphi %s8376_s15, %s14393_s15   ;;  %s8323_s14 = sphi %s8374_s14, %s14392_s14   ;;  %s8319_s13 = sphi %s8372_s13, %s14391_s13   ;;  %s8315_s12 = sphi %s8370_s12, %s14390_s12  }
   0x5   : > { %s28_s20 = sadd.s32 1, %s8331_s16  ;;  %s115_s21 = sadd.s32 1, %s8323_s14 }
   0x6   : > { %p30_p0 = scmp.ge.s32.totalorder %s28_s20, 2  ;;  %p125_p1 = scmp.ne.s32.totalorder %s8323_s14, %s8319_s13 }
   0x7   : > { %p126_p2 = scmp.eq.s32.totalorder %s7237_s18, 1  ;;  %p131_p3 = scmp.ne.s32.totalorder %s8319_s13, %s8315_s12 }
   0x8   : > { %s14396_s20 = smov (%p30_p0, %s28_s20), 0  ;;  %p132_p5 = scmp.eq.s32.totalorder %s7238_s19, 1 }
   0x9   : > { %p8410_p4 = por %p126_p2, %p125_p1  ;;  %s110_s23 = ssub.s32 %s8331_s16, %s14396_s20 }
   0xa   : > { %p7243_p6 = scmp.ge.s32.totalorder %s8335_s17, 1  ;;  %p113_p7 = scmp.eq.s32.totalorder %s110_s23, 0 }
   0xb   : > { %p8417_p8 = por %p132_p5, %p131_p3  ;;  %p171_p9 = scmp.lt.s32.totalorder %s8335_s17, 3 }
   0xc   : > { %s8423_s25 = scalar_select %p113_p7, %s8323_s14, %s115_s21  }
   0xd   : > { %p172_p10 = pnand %p7243_p6, %p171_p9 }
   0xf   : > { %175 = sbr.rel (%p172_p10) target bundleno = 1513 (0x5e9), region = 32 }
  0x14   : > { %vm215_vm0 = vcmask 19456   ;;  %vm220_vm1 = vcmask 16384   ;;  %v8337_v0 = vmov 0   ;;  %vm230_vm2 = vsmask.f32 256  ;;  %p202_p11 = scmp.lt.s32.totalorder %s8327_s15, 1 }
  0x15   : > { %216 = vst.msk [vmem:[#allocation2] sm:$0xf] %vm215_vm0, %v8337_v0  ;;  %217 = vst.msk [vmem:[#allocation2 + $0x4] sm:$0xf] %vm215_vm0, %v8337_v0  ;;  %vm328_vm3 = vsmask.f32 7938 }
  0x16   : > { %218 = vst.msk [vmem:[#allocation2 + $0x8] sm:$0xf] %vm215_vm0, %v8337_v0  ;;  %219 = vst.msk [vmem:[#allocation2 + $0xc] sm:$0xf] %vm215_vm0, %v8337_v0  ;;  %v13635_v1 = vmov 0  ;;  %v13638_v4 = vmov 0 }
  0x17   : > { %223 = vst.msk [vmem:[#allocation2 + $0x294] sm:$0xf] %vm215_vm0, %v8337_v0  ;;  %224 = vst.msk [vmem:[#allocation2 + $0x298] sm:$0xf] %vm215_vm0, %v8337_v0  ;;  %v235_v2 = vld [vmem:[#allocation2 + $0x28] sm:$0x1] }
  0x18   : > { %225 = vst.msk [vmem:[#allocation2 + $0x29c] sm:$0xf] %vm215_vm0, %v8337_v0  ;;  %226 = vst.msk [vmem:[#allocation2 + $0x2a0] sm:$0xf] %vm215_vm0, %v8337_v0  ;;  %v232_v3 = vld [vmem:[#allocation2 + $0x14] sm:$0x1] }
  0x19   : > { %221 = vst.msk [vmem:[#allocation2 + $0x10] sm:$0x1] %vm220_vm1, %v8337_v0  ;;  %227 = vst.msk [vmem:[#allocation2 + $0x2a4] sm:$0x1] %vm220_vm1, %v8337_v0  ;;  %s203_s26 = scalar_select %p202_p11, %s8327_s15, 1  ;;  %v13641_v30 = vmov 0 }
  0x1a   : > { %vm8438_vm4 = vmand %vm220_vm1, %vm230_vm2  ;;  %v238_v7 = vld [vmem:[#allocation2 + $0x3c] sm:$0x1]  ;;  %v330_v9 = vld [vmem:[#allocation2 + $0x24] sm:$0x1]  ;;  %vm13630_vm6 = vsmask.f32 7424 }
  0x1b   : > { %v13636_v1 = vsel %vm8438_vm4, 4294967295, %v13635_v1  ;;  %vm8444_vm5 = vmand %vm220_vm1, %vm328_vm3  ;;  %v236_v5 = vsel %vm8438_vm4, 0, %v235_v2  ;;  %v233_v6 = vsel %vm8438_vm4, 0, %v232_v3  ;;  %v239_v8 = vsel %vm8438_vm4, 0, %v238_v7  ;;  %v241_v10 = vld [vmem:[#allocation2 + $0x50] sm:$0x1] }
  0x1c   : > { %13637 = vst [vmem:[#allocation6_spill] sm:$0xff] %v13636_v1  ;;  %v13639_v4 = vsel %vm8444_vm5, 4294967295, %v13638_v4  ;;  %237 = vst [vmem:[#allocation2 + $0x28] sm:$0x1] %v236_v5  ;;  %s7619_s27 = sshll.u32 %s203_s26, 9  ;;  %v331_v11 = vsel %vm8444_vm5, 0, %v330_v9 }
  0x1d   : > { %13640 = vst [vmem:[#allocation7_spill] sm:$0xff] %v13639_v4  ;;  %234 = vst [vmem:[#allocation2 + $0x14] sm:$0x1] %v233_v6  ;;  %v242_v12 = vsel %vm8438_vm4, 0, %v241_v10  ;;  %v333_v13 = vld [vmem:[#allocation2 + $0x38] sm:$0x1]  ;;  %s8462_s30 = scalar_lea.vmem %s13445_s0, %s7619_s27 }
  0x1e   : > { %240 = vst [vmem:[#allocation2 + $0x3c] sm:$0x1] %v239_v8  ;;  %332 = vst [vmem:[#allocation2 + $0x24] sm:$0x1] %v331_v11  ;;  %v334_v14 = vsel %vm8444_vm5, 0, %v333_v13  ;;  %v8020_v18 = vld [vmem:[#allocation2] sm:$0xff]  }
  0x1f   : > { %243 = vst [vmem:[#allocation2 + $0x50] sm:$0x1] %v242_v12  ;;  %v430_v15 = vld [vmem:[%s8462_s30 + $0x10] sm:$0xf]  ;;  %v431_v16 = vld [vmem:[%s8462_s30 + $0x14] sm:$0xf]  ;;  %vm8478_vm9 = vmand %vm215_vm0, %vm328_vm3 }
  0x20   : > { %vm554_vm7 = vsmask.f32 4368  ;;  %335 = vst [vmem:[#allocation2 + $0x38] sm:$0x1] %v334_v14  ;;  %v432_v17 = vld [vmem:[%s8462_s30 + $0x18] sm:$0xf] }
  0x21   : > { %v8021_v19 = vld [vmem:[#allocation2 + $0x8] sm:$0xff]   ;;  %v592_v20 = vshrl.u32 %v430_v15, 16  ;;  %v595_v21 = vshll.u32 %v430_v15, 16  ;;  %v8022_v22 = vld [vmem:[#allocation2 + $0x10] ss:$0 sps:$4 sm:$0x11]   ;;  %vm8472_vm8 = vmor %vm230_vm2, %vm554_vm7 }
  0x22   : > { %v600_v23 = vshrl.u32 %v431_v16, 16  ;;  %v2434_v24 = vshrl.u32 %v8020_v18, 16  ;;  %v2436_v25 = vshll.u32 %v8020_v18, 16  ;;  %v2441_v26 = vshll.u32 %v8021_v19, 16  ;;  %v433_v29 = vld [vmem:[%s8462_s30 + $0x1c] sm:$0xf] }
  0x23   : > { %v2445_v27 = vshrl.u32 %v8021_v19, 16  ;;  %v2449_v28 = vshll.u32 %v8022_v22, 16  ;;  %v13642_v30 = vsel %vm8472_vm8, 4294967295, %v13641_v30  ;;  %v594_v31 = vrot.slane %v592_v20, 7  ;;  %v1847_v39 = vld [vmem:[#allocation2 + $0x28] sm:$0xf] }
  0x24   : > { %13643 = vst [vmem:[#allocation8_spill] sm:$0xff] %v13642_v30  ;;  %v602_v32 = vrot.slane %v600_v23, 7  ;;  %v603_v33 = vshll.u32 %v431_v16, 16  ;;  %v2438_v34 = vrot.slane %v2436_v25, 1  ;;  %v2443_v35 = vrot.slane %v2441_v26, 1  ;;  %s8338_s4 = smov 3  }
  0x25   : > { %v609_v36 = vshrl.u32 %v432_v17, 16  ;;  %v612_v37 = vshll.u32 %v432_v17, 16  ;;  %v13644_v38 = vmov 0  ;;  %v2451_v40 = vrot.slane %v2449_v28, 1  ;;  %v426_v48 = vld [vmem:[%s8462_s30] sm:$0xf] }
  0x26   : > { %v13645_v38 = vsel %vm8478_vm9, 4294967295, %v13644_v38  ;;  %v597_v41 = vor.u32 %v595_v21, %v594_v31  ;;  %v598_v42 = vrot.slane %v594_v31, 4  ;;  %v605_v43 = vor.u32 %v603_v33, %v602_v32  ;;  %v427_v49 = vld [vmem:[%s8462_s30 + $0x4] sm:$0xf]  ;;  %v428_v54 = vld [vmem:[%s8462_s30 + $0x8] sm:$0xf] }
  0x27   : > { %13646 = vst [vmem:[#allocation9_spill] sm:$0xff] %v13645_v38  ;;  %v2439_v44 = vor.u32 %v2438_v34, %v2434_v24  ;;  %v2447_v45 = vor.u32 %v2445_v27, %v2443_v35  ;;  %v607_v46 = vrot.slane %v602_v32, 4  ;;  %v611_v47 = vrot.slane %v609_v36, 7  ;;  %v429_v59 = vld [vmem:[%s8462_s30 + $0xc] sm:$0xf]  ;;  %s8339_s5 = smov 6  }
  0x28   : > { %v606_v50 = vsel %vm8472_vm8, %v598_v42, %v605_v43  ;;  %v618_v51 = vshrl.u32 %v433_v29, 16  ;;  %v621_v52 = vshll.u32 %v433_v29, 16  ;;  %v1848_v53 = vsel %vm8478_vm9, %v597_v41, %v1847_v39  ;;  %v434_v0 = vld [vmem:[%s8462_s30 + $0x20] sm:$0xf]  ;;  %v1838_v13 = vld [vmem:[#allocation2 + $0x14] sm:$0xf] }
  0x29   : > { %v2444_v55 = vsel %vm13630_vm6, %v2439_v44, %v2443_v35  ;;  %v2452_v56 = vsel %vm13630_vm6, %v2447_v45, %v2451_v40  ;;  %v614_v57 = vor.u32 %v612_v37, %v611_v47  ;;  %v616_v58 = vrot.slane %v611_v47, 4  ;;  %1849 = vst [vmem:[#allocation2 + $0x28] sm:$0xf] %v1848_v53  ;;  %1850 = vst.msk [vmem:[#allocation2 + $0x2c] sm:$0xf] %vm215_vm0, %v606_v50  ;;  %s8340_s6 = smov 9  }
  0x2a   : > { %2753 = vrot.lane.b32.xlu0 %v2444_v55, %s8338_s4  ;;  %v8494_v60 = vrot.slane %v618_v51, 7  ;;  %v557_v61 = vshrl.u32 %v426_v48, 16  ;;  %v560_v62 = vshll.u32 %v426_v48, 16  ;;  %v565_v63 = vshrl.u32 %v427_v49, 16  ;;  %v435_v20 = vld [vmem:[%s8462_s30 + $0x24] sm:$0xf] }
  0x2b   : > { %v615_v2 = vsel %vm8472_vm8, %v607_v46, %v614_v57  ;;  %v568_v3 = vshll.u32 %v427_v49, 16  ;;  %v574_v5 = vshrl.u32 %v428_v54, 16  ;;  %v577_v6 = vshll.u32 %v428_v54, 16  ;;  %v436_v25 = vld [vmem:[%s8462_s30 + $0x28] sm:$0xf]  ;;  %s8341_s7 = smov 12  }
  0x2c   : > { %v623_v7 = vor.u32 %v621_v52, %v8494_v60  ;;  %1851 = vst.msk [vmem:[#allocation2 + $0x30] sm:$0xf] %vm215_vm0, %v615_v2  ;;  %v559_v8 = vrot.slane %v557_v61, 7  ;;  %v567_v9 = vrot.slane %v565_v63, 7  ;;  %v583_v10 = vshrl.u32 %v429_v59, 16  ;;  %s8342_s8 = smov 15  }
  0x2d   : > { %v576_v11 = vrot.slane %v574_v5, 7  ;;  %v586_v12 = vshll.u32 %v429_v59, 16  ;;  %v627_v14 = vshrl.u32 %v434_v0, 16  ;;  %v630_v15 = vshll.u32 %v434_v0, 16  ;;  %v437_v33 = vld [vmem:[%s8462_s30 + $0x2c] sm:$0xf] }
  0x2e   : > { %2755 = vrot.lane.b32.xlu0 %v2452_v56, %s8338_s4  ;;  %v624_v16 = vsel %vm8472_vm8, %v616_v58, %v623_v7  ;;  %v562_v17 = vor.u32 %v560_v62, %v559_v8  ;;  %v563_v18 = vrot.slane %v559_v8, 4  ;;  %v570_v19 = vor.u32 %v568_v3, %v567_v9  ;;  %v1856_v36 = vld [vmem:[#allocation2 + $0x3c] sm:$0xf]  ;;  %v438_v42 = vld [vmem:[%s8462_s30 + $0x30] sm:$0xf]  ;;  %s8343_s9 = smov 18  }
  0x2f   : > { %1852 = vst.msk [vmem:[#allocation2 + $0x34] sm:$0xf] %vm215_vm0, %v624_v16  ;;  %v572_v21 = vrot.slane %v567_v9, 4  ;;  %v579_v22 = vor.u32 %v577_v6, %v576_v11  ;;  %v581_v23 = vrot.slane %v576_v11, 4  ;;  %v585_v24 = vrot.slane %v583_v10, 7  ;;  %s8344_s10 = smov 21  }
  0x30   : > { %v8023_v26 = vld [vmem:[#allocation2 + $0x28] sm:$0xff]   ;;  %v571_v27 = vsel %vm8472_vm8, %v563_v18, %v570_v19  ;;  %v1839_v28 = vsel %vm8478_vm9, %v562_v17, %v1838_v13  ;;  %v629_v29 = vrot.slane %v627_v14, 7  ;;  %v635_v34 = vshrl.u32 %v435_v20, 16  ;;  %v1844_v51 = vld [vmem:[#allocation2 + $0x24] sm:$0x1]  ;;  %s8345_s11 = smov 24  }
  0x31   : > { %v580_v31 = vsel %vm8472_vm8, %v572_v21, %v579_v22  ;;  %v588_v32 = vor.u32 %v586_v12, %v585_v24  ;;  %1840 = vst [vmem:[#allocation2 + $0x14] sm:$0xf] %v1839_v28  ;;  %1841 = vst.msk [vmem:[#allocation2 + $0x18] sm:$0xf] %vm215_vm0, %v571_v27  ;;  %v638_v35 = vshll.u32 %v435_v20, 16  ;;  %v2474_v37 = vshrl.u32 %v8023_v26, 16 }
  0x32   : > { %v2476_v39 = vshll.u32 %v8023_v26, 16  ;;  %1842 = vst.msk [vmem:[#allocation2 + $0x1c] sm:$0xf] %vm215_vm0, %v580_v31  ;;  %v632_v40 = vor.u32 %v630_v15, %v629_v29  ;;  %v633_v41 = vrot.slane %v629_v29, 4  ;;  %v637_v44 = vrot.slane %v635_v34, 7  ;;  %s199_s26 = sand.u32 1, %s8319_s13  }
  0x33   : > { %v589_v43 = vsel %vm8472_vm8, %v581_v23, %v588_v32  ;;  %v644_v45 = vshrl.u32 %v436_v25, 16  ;;  %v647_v46 = vshll.u32 %v436_v25, 16  ;;  %v653_v48 = vshrl.u32 %v437_v33, 16  ;;  %v439_v56 = vld [vmem:[%s8462_s30 + $0x34] sm:$0xf]  ;;  %s7244_s29 = sshll.u32 %s199_s26, 9 }
  0x34   : > { %v2478_v47 = vrot.slane %v2476_v39, 1  ;;  %1843 = vst.msk [vmem:[#allocation2 + $0x20] sm:$0xf] %vm215_vm0, %v589_v43  ;;  %v656_v49 = vshll.u32 %v437_v33, 16  ;;  %v1857_v50 = vsel %vm8478_vm9, %v632_v40, %v1856_v36  ;;  %v640_v52 = vor.u32 %v638_v35, %v637_v44  ;;  %v440_v3 = vld [vmem:[%s8462_s30 + $0x38] sm:$0xf] }
  0x35   : > { %v642_v53 = vrot.slane %v637_v44, 4  ;;  %v646_v54 = vrot.slane %v644_v45, 7  ;;  %1858 = vst [vmem:[#allocation2 + $0x3c] sm:$0xf] %v1857_v50  ;;  %v590_v55 = vrot.slane %v585_v24, 4  ;;  %v8525_v58 = vrot.slane %v653_v48, 7 }
  0x36   : > { %v8523_v57 = vld [vmem:[#allocation2 + $0x30] sm:$0xff]   ;;  %v662_v59 = vshrl.u32 %v438_v42, 16  ;;  %v665_v61 = vshll.u32 %v438_v42, 16  ;;  %v641_v62 = vsel %vm8472_vm8, %v633_v41, %v640_v52  ;;  %v441_v5 = vld [vmem:[%s8462_s30 + $0x3c] sm:$0xf]  ;;  %v2479_v6 = vor.u32 %v2478_v47, %v2474_v37  ;;  %s8347_s21 = smov [#allocation3]  }
  0x37   : > { %v649_v63 = vor.u32 %v647_v46, %v646_v54  ;;  %v651_v0 = vrot.slane %v646_v54, 4  ;;  %v1845_v2 = vsel %vm8438_vm4, %v590_v55, %v1844_v51  ;;  %v2481_v7 = vshll.u32 %v8523_v57, 16  ;;  %1859 = vst.msk [vmem:[#allocation2 + $0x40] sm:$0xf] %vm215_vm0, %v641_v62  ;;  %v1865_v18 = vld [vmem:[#allocation2 + $0x50] sm:$0xf] }
  0x38   : > { %v8025_v8 = vld [vmem:[#allocation2 + $0x14] sm:$0xff]   ;;  %v658_v9 = vor.u32 %v656_v49, %v8525_v58  ;;  %1846 = vst [vmem:[#allocation2 + $0x24] sm:$0x1] %v1845_v2  ;;  %v664_v11 = vrot.slane %v662_v59, 7  ;;  %v670_v12 = vshrl.u32 %v439_v56, 16  ;;  %v673_v13 = vshll.u32 %v439_v56, 16 }
  0x39   : > { %v650_v10 = vsel %vm8472_vm8, %v642_v53, %v649_v63  ;;  %v8538_v14 = vrot.slane %v2481_v7, 1  ;;  %v2454_v15 = vshrl.u32 %v8025_v8, 16  ;;  %v2456_v16 = vshll.u32 %v8025_v8, 16  ;;  %v1853_v33 = vld [vmem:[#allocation2 + $0x38] sm:$0x1]  ;;  %s8263_s23 = sshll.u32 %s8347_s21, 4  ;;  %s8264_s23 = int_to_ptr.vmem [resolvable:$false] %s8263_s23 }
  0x3a   : > { %v659_v17 = vsel %vm8472_vm8, %v651_v0, %v658_v9  ;;  %1860 = vst.msk [vmem:[#allocation2 + $0x44] sm:$0xf] %vm215_vm0, %v650_v10  ;;  %v667_v20 = vor.u32 %v665_v61, %v664_v11  ;;  %v668_v21 = vrot.slane %v664_v11, 4  ;;  %v672_v22 = vrot.slane %v670_v12, 7  ;;  %v244_v39 = vld [vmem:[#allocation2 + $0x64] sm:$0x1] }
  0x3b   : > { %v8026_v19 = vld [vmem:[#allocation2 + $0x1c] sm:$0xff]   ;;  %1861 = vst.msk [vmem:[#allocation2 + $0x48] sm:$0xf] %vm215_vm0, %v659_v17  ;;  %v679_v23 = vshrl.u32 %v440_v3, 16  ;;  %v8546_v24 = vsel %vm13630_vm6, %v2479_v6, %v8538_v14  ;;  %v2458_v25 = vrot.slane %v2456_v16, 1  ;;  %v682_v26 = vshll.u32 %v440_v3, 16 }
  0x3c   : > { %13647 = vst [vmem:[#allocation10_spill] sm:$0xff] %v8546_v24  ;;  %v688_v27 = vshrl.u32 %v441_v5, 16  ;;  %2761 = vrot.lane.b32.xlu0 %v8546_v24, %s8338_s4  ;;  %v2461_v28 = vshll.u32 %v8026_v19, 16  ;;  %v2465_v29 = vshrl.u32 %v8026_v19, 16  ;;  %v675_v31 = vor.u32 %v673_v13, %v672_v22  ;;  %v442_v40 = vld [vmem:[%s8462_s30 + $0x40] sm:$0xf] }
  0x3d   : > { %v677_v32 = vrot.slane %v672_v22, 4  ;;  %v2459_v34 = vor.u32 %v2458_v25, %v2454_v15  ;;  %v681_v35 = vrot.slane %v679_v23, 7  ;;  %v691_v37 = vshll.u32 %v441_v5, 16  ;;  %v443_v54 = vld [vmem:[%s8462_s30 + $0x44] sm:$0xf]  ;;  %s8265_s27 = scalar_lea.vmem %s8264_s23, 16384 }
  0x3e   : > { %v8550_v36 = vrot.slane %v688_v27, 7  ;;  %v2463_v41 = vrot.slane %v2461_v28, 1  ;;  %v8027_v42 = vld [vmem:[#allocation2 + $0x3c] sm:$0xff]   ;;  %v676_v43 = vsel %vm8472_vm8, %v668_v21, %v675_v31  ;;  %v1866_v44 = vsel %vm8478_vm9, %v667_v20, %v1865_v18  ;;  %v444_v0 = vld [vmem:[%s8462_s30 + $0x48] sm:$0xf] }
  0x3f   : > { %v8029_v45 = vld [vmem:[#allocation2 + $0x24] ss:$0 sps:$4 sm:$0x11]   ;;  %v684_v46 = vor.u32 %v682_v26, %v681_v35  ;;  %v686_v47 = vrot.slane %v681_v35, 4  ;;  %1867 = vst [vmem:[#allocation2 + $0x50] sm:$0xf] %v1866_v44 }
  0x40   : > { %v693_v48 = vor.u32 %v691_v37, %v8550_v36  ;;  %1868 = vst.msk [vmem:[#allocation2 + $0x54] sm:$0xf] %vm215_vm0, %v676_v43  ;;  %v625_v49 = vrot.slane %v8494_v60, 4  ;;  %v8561_v50 = vsel %vm13630_vm6, %v2459_v34, %v2463_v41  ;;  %v2494_v51 = vshrl.u32 %v8027_v42, 16  ;;  %v445_v15 = vld [vmem:[%s8462_s30 + $0x4c] sm:$0xf] }
  0x41   : > { %13648 = vst [vmem:[#allocation11_spill] sm:$0xff] %v8561_v50  ;;  %v2496_v52 = vshll.u32 %v8027_v42, 16  ;;  %v2467_v53 = vor.u32 %v2465_v29, %v2463_v41  ;;  %2757 = vrot.lane.b32.xlu1 %v8561_v50, %s8338_s4  ;;  %v2469_v56 = vshll.u32 %v8029_v45, 16  ;;  %v685_v59 = vsel %vm8472_vm8, %v677_v32, %v684_v46  ;;  %v336_v29 = vld [vmem:[#allocation2 + $0x4c] sm:$0x1] }
  0x42   : > { %v8566_v55 = vld [vmem:[#allocation2 + $0x44] sm:$0xff]   ;;  %v694_v60 = vsel %vm8472_vm8, %v686_v47, %v693_v48  ;;  %v1854_v61 = vsel %vm8438_vm4, %v625_v49, %v1853_v33  ;;  %1869 = vst.msk [vmem:[#allocation2 + $0x58] sm:$0xf] %vm215_vm0, %v685_v59  ;;  %v245_v63 = vsel %vm8438_vm4, 0, %v244_v39  ;;  %v697_v2 = vshrl.u32 %v442_v40, 16 }
  0x43   : > { %v2498_v62 = vrot.slane %v2496_v52, 1  ;;  %1870 = vst.msk [vmem:[#allocation2 + $0x5c] sm:$0xf] %vm215_vm0, %v694_v60  ;;  %1855 = vst [vmem:[#allocation2 + $0x38] sm:$0x1] %v1854_v61  ;;  %v2501_v3 = vshll.u32 %v8566_v55, 16 }
  0x44   : > { %v2471_v5 = vrot.slane %v2469_v56, 1  ;;  %246 = vst [vmem:[#allocation2 + $0x64] sm:$0x1] %v245_v63  ;;  %v700_v6 = vshll.u32 %v442_v40, 16  ;;  %v705_v7 = vshrl.u32 %v443_v54, 16  ;;  %v2485_v9 = vshrl.u32 %v8523_v57, 16 }
  0x45   : > { %v2499_v8 = vor.u32 %v2498_v62, %v2494_v51  ;;  %v699_v10 = vrot.slane %v697_v2, 7  ;;  %v708_v11 = vshll.u32 %v443_v54, 16  ;;  %v8581_v12 = vrot.slane %v2501_v3, 1  ;;  %v247_v34 = vld [vmem:[#allocation2 + $0x78] sm:$0x1] }
  0x46   : > { %v8584_v13 = vsel %vm13630_vm6, %v2467_v53, %v2471_v5  ;;  %v707_v16 = vrot.slane %v705_v7, 7  ;;  %v714_v17 = vshrl.u32 %v444_v0, 16  ;;  %v717_v27 = vshll.u32 %v444_v0, 16  ;;  %v446_v35 = vld [vmem:[%s8462_s30 + $0x50] sm:$0xf] }
  0x47   : > { %13649 = vst [vmem:[#allocation12_spill] sm:$0xff] %v8584_v13  ;;  %2759 = vrot.lane.b32.xlu1 %v8584_v13, %s8338_s4  ;;  %v8030_v18 = vld [vmem:[#allocation2 + $0x50] sm:$0xff]   ;;  %v702_v19 = vor.u32 %v700_v6, %v699_v10  ;;  %v703_v20 = vrot.slane %v699_v10, 4  ;;  %v8591_v57 = vsel %vm13630_vm6, %v2499_v8, %v8581_v12  ;;  %v723_v28 = vshrl.u32 %v445_v15, 16  ;;  %v448_v54 = vld [vmem:[%s8462_s30 + $0x58] sm:$0xf] }
  0x48   : > { %13650 = vst [vmem:[#allocation13_spill] sm:$0xff] %v8591_v57  ;;  %v710_v21 = vor.u32 %v708_v11, %v707_v16  ;;  %v712_v22 = vrot.slane %v707_v16, 4  ;;  %v716_v23 = vrot.slane %v714_v17, 7  ;;  %2765 = vrot.lane.b32.xlu0 %v8591_v57, %s8338_s4  ;;  %v2514_v25 = vshrl.u32 %v8030_v18, 16  ;;  %v447_v51 = vld [vmem:[%s8462_s30 + $0x54] sm:$0xf] }
  0x49   : > { %v2516_v26 = vshll.u32 %v8030_v18, 16  ;;  %v2487_v40 = vor.u32 %v2485_v9, %v8538_v14  ;;  %v8603_v43 = vrot.slane %v723_v28, 7  ;;  %v726_v44 = vshll.u32 %v445_v15, 16  ;;  %v449_v61 = vld [vmem:[%s8462_s30 + $0x5c] sm:$0xf] }
  0x4a   : > { %v8595_v31 = vld [vmem:[#allocation2 + $0x58] sm:$0xff]   ;;  %v711_v32 = vsel %vm8472_vm8, %v703_v20, %v710_v21  ;;  %v721_v33 = vrot.slane %v716_v23, 4  ;;  %v719_v41 = vor.u32 %v717_v27, %v716_v23  ;;  %v337_v46 = vsel %vm8444_vm5, 0, %v336_v29  ;;  %v339_v5 = vld [vmem:[#allocation2 + $0x60] sm:$0x1] }
  0x4b   : > { %v2518_v37 = vrot.slane %v2516_v26, 1  ;;  %v8032_v39 = vld [vmem:[#allocation2 + $0x38] ss:$0 sps:$4 sm:$0x11]   ;;  %1877 = vst.msk [vmem:[#allocation2 + $0x68] sm:$0xf] %vm215_vm0, %v711_v32  ;;  %v728_v53 = vor.u32 %v726_v44, %v8603_v43 }
  0x4c   : > { %v2521_v42 = vshll.u32 %v8595_v31, 16  ;;  %v1874_v45 = vld [vmem:[#allocation2 + $0x64] sm:$0xf]  ;;  %v2489_v48 = vshll.u32 %v8032_v39, 16  ;;  %v720_v49 = vsel %vm8472_vm8, %v712_v22, %v719_v41  ;;  %338 = vst [vmem:[#allocation2 + $0x4c] sm:$0x1] %v337_v46 }
  0x4d   : > { %v2519_v47 = vor.u32 %v2518_v37, %v2514_v25  ;;  %v1875_v14 = vsel %vm8478_vm9, %v702_v19, %v1874_v45  ;;  %1878 = vst.msk [vmem:[#allocation2 + $0x6c] sm:$0xf] %vm215_vm0, %v720_v49  ;;  %v660_v59 = vrot.slane %v8525_v58, 4  ;;  %v248_v60 = vsel %vm8438_vm4, 0, %v247_v34  ;;  %v250_v9 = vld [vmem:[#allocation2 + $0x8c] sm:$0x1] }
  0x4e   : > { %v8612_v52 = vrot.slane %v2521_v42, 1  ;;  %1876 = vst [vmem:[#allocation2 + $0x64] sm:$0xf] %v1875_v14  ;;  %v2491_v56 = vrot.slane %v2489_v48, 1  ;;  %v732_v62 = vshrl.u32 %v446_v35, 16  ;;  %v729_v0 = vsel %vm8472_vm8, %v721_v33, %v728_v53 }
  0x4f   : > { %249 = vst [vmem:[#allocation2 + $0x78] sm:$0x1] %v248_v60  ;;  %v735_v2 = vshll.u32 %v446_v35, 16  ;;  %v740_v3 = vshrl.u32 %v447_v51, 16  ;;  %1879 = vst.msk [vmem:[#allocation2 + $0x70] sm:$0xf] %vm215_vm0, %v729_v0 }
  0x50   : > { %v8623_v63 = vsel %vm13630_vm6, %v2519_v47, %v8612_v52  ;;  %v8630_v58 = vsel %vm13630_vm6, %v2487_v40, %v2491_v56  ;;  %v734_v6 = vrot.slane %v732_v62, 7  ;;  %v743_v7 = vshll.u32 %v447_v51, 16  ;;  %v450_v20 = vld [vmem:[%s8462_s30 + $0x60] sm:$0xf]  ;;  %v451_v27 = vld [vmem:[%s8462_s30 + $0x64] sm:$0xf] }
  0x51   : > { %13651 = vst [vmem:[#allocation14_spill] sm:$0xff] %v8623_v63  ;;  %2769 = vrot.lane.b32.xlu0 %v8623_v63, %s8338_s4  ;;  %13652 = vst [vmem:[#allocation15_spill] sm:$0xff] %v8630_v58  ;;  %v749_v8 = vshrl.u32 %v448_v54, 16  ;;  %2763 = vrot.lane.b32.xlu1 %v8630_v58, %s8338_s4  ;;  %v742_v10 = vrot.slane %v740_v3, 7  ;;  %v752_v11 = vshll.u32 %v448_v54, 16  ;;  %v758_v15 = vshrl.u32 %v449_v61, 16 }
  0x52   : > { %v761_v16 = vshll.u32 %v449_v61, 16  ;;  %v738_v17 = vrot.slane %v734_v6, 4  ;;  %v340_v19 = vsel %vm8444_vm5, 0, %v339_v5  ;;  %v737_v22 = vor.u32 %v735_v2, %v734_v6  ;;  %v452_v40 = vld [vmem:[%s8462_s30 + $0x68] sm:$0xf] }
  0x53   : > { %v751_v18 = vrot.slane %v749_v8, 7  ;;  %v1862_v21 = vld [vmem:[#allocation2 + $0x4c] sm:$0x1]  ;;  %v745_v23 = vor.u32 %v743_v7, %v742_v10  ;;  %v747_v25 = vrot.slane %v742_v10, 4  ;;  %v8638_v26 = vrot.slane %v758_v15, 7 }
  0x54   : > { %341 = vst [vmem:[#allocation2 + $0x60] sm:$0x1] %v340_v19  ;;  %v1863_v29 = vsel %vm8438_vm4, %v660_v59, %v1862_v21  ;;  %v2505_v34 = vshrl.u32 %v8566_v55, 16  ;;  %v251_v39 = vsel %vm8438_vm4, 0, %v250_v9  ;;  %v453_v41 = vld [vmem:[%s8462_s30 + $0x6c] sm:$0xf] }
  0x55   : > { %v8033_v28 = vld [vmem:[#allocation2 + $0x64] sm:$0xff]   ;;  %v754_v32 = vor.u32 %v752_v11, %v751_v18  ;;  %v756_v33 = vrot.slane %v751_v18, 4  ;;  %1864 = vst [vmem:[#allocation2 + $0x4c] sm:$0x1] %v1863_v29  ;;  %v746_v35 = vsel %vm8472_vm8, %v738_v17, %v745_v23  ;;  %v763_v37 = vor.u32 %v761_v16, %v8638_v26  ;;  %252 = vst [vmem:[#allocation2 + $0x8c] sm:$0x1] %v251_v39 }
  0x56   : > { %v2534_v42 = vshrl.u32 %v8033_v28, 16  ;;  %v2536_v44 = vshll.u32 %v8033_v28, 16  ;;  %v1883_v46 = vld [vmem:[#allocation2 + $0x78] sm:$0xf]  ;;  %1886 = vst.msk [vmem:[#allocation2 + $0x7c] sm:$0xf] %vm215_vm0, %v746_v35  ;;  %v2507_v18 = vor.u32 %v2505_v34, %v8581_v12 }
  0x57   : > { %v755_v45 = vsel %vm8472_vm8, %v747_v25, %v754_v32  ;;  %v767_v55 = vshrl.u32 %v450_v20, 16  ;;  %v8654_v47 = vld [vmem:[#allocation2 + $0x6c] sm:$0xff]   ;;  %v764_v48 = vsel %vm8472_vm8, %v756_v33, %v763_v37  ;;  %v1884_v49 = vsel %vm8478_vm9, %v737_v22, %v1883_v46  ;;  %v253_v15 = vld [vmem:[#allocation2 + $0xa0] sm:$0x1]  ;;  %v455_v46 = vld [vmem:[%s8462_s30 + $0x74] sm:$0xf] }
  0x58   : > { %1887 = vst.msk [vmem:[#allocation2 + $0x80] sm:$0xf] %vm215_vm0, %v755_v45  ;;  %v695_v14 = vrot.slane %v8550_v36, 4  ;;  %v770_v51 = vshll.u32 %v450_v20, 16  ;;  %v2538_v53 = vrot.slane %v2536_v44, 1  ;;  %v775_v56 = vshrl.u32 %v451_v27, 16 }
  0x59   : > { %1885 = vst [vmem:[#allocation2 + $0x78] sm:$0xf] %v1884_v49  ;;  %1888 = vst.msk [vmem:[#allocation2 + $0x84] sm:$0xf] %vm215_vm0, %v764_v48  ;;  %v769_v54 = vrot.slane %v767_v55, 7  ;;  %v778_v59 = vshll.u32 %v451_v27, 16 }
  0x5a   : > { %v2541_v60 = vshll.u32 %v8654_v47, 16  ;;  %v784_v61 = vshrl.u32 %v452_v40, 16  ;;  %v787_v62 = vshll.u32 %v452_v40, 16  ;;  %v793_v0 = vshrl.u32 %v453_v41, 16  ;;  %v342_v36 = vld [vmem:[#allocation2 + $0x74] sm:$0x1] }
  0x5b   : > { %v2539_v2 = vor.u32 %v2538_v53, %v2534_v42  ;;  %v1871_v3 = vld [vmem:[#allocation2 + $0x60] sm:$0x1]  ;;  %v772_v5 = vor.u32 %v770_v51, %v769_v54  ;;  %v773_v6 = vrot.slane %v769_v54, 4  ;;  %v777_v7 = vrot.slane %v775_v56, 7  ;;  %v454_v16 = vld [vmem:[%s8462_s30 + $0x70] sm:$0xf] }
  0x5c   : > { %v8664_v8 = vrot.slane %v2541_v60, 1  ;;  %v1872_v9 = vsel %vm8438_vm4, %v695_v14, %v1871_v3  ;;  %v786_v10 = vrot.slane %v784_v61, 7  ;;  %v8668_v11 = vrot.slane %v793_v0, 7  ;;  %v8035_v17 = vld [vmem:[#allocation2 + $0x4c] ss:$0 sps:$4 sm:$0x11]  }
  0x5d   : > { %1873 = vst [vmem:[#allocation2 + $0x60] sm:$0x1] %v1872_v9  ;;  %v780_v19 = vor.u32 %v778_v59, %v777_v7  ;;  %v782_v20 = vrot.slane %v777_v7, 4  ;;  %v796_v25 = vshll.u32 %v453_v41, 16  ;;  %v1892_v27 = vld [vmem:[#allocation2 + $0x8c] sm:$0xf] }
  0x5e   : > { %v8674_v21 = vsel %vm13630_vm6, %v2539_v2, %v8664_v8  ;;  %v789_v22 = vor.u32 %v787_v62, %v786_v10  ;;  %v791_v23 = vrot.slane %v786_v10, 4  ;;  %v2509_v28 = vshll.u32 %v8035_v17, 16  ;;  %v456_v49 = vld [vmem:[%s8462_s30 + $0x78] sm:$0xf]  ;;  %v457_v3 = vld [vmem:[%s8462_s30 + $0x7c] sm:$0xf] }
  0x5f   : > { %13653 = vst [vmem:[#allocation16_spill] sm:$0xff] %v8674_v21  ;;  %2773 = vrot.lane.b32.xlu0 %v8674_v21, %s8338_s4  ;;  %v781_v29 = vsel %vm8472_vm8, %v773_v6, %v780_v19  ;;  %v1893_v12 = vsel %vm8478_vm9, %v772_v5, %v1892_v27  ;;  %v343_v32 = vsel %vm8444_vm5, 0, %v342_v36  ;;  %v2525_v34 = vshrl.u32 %v8595_v31, 16  ;;  %v345_v9 = vld [vmem:[#allocation2 + $0x88] sm:$0x1] }
  0x60   : > { %v8036_v33 = vld [vmem:[#allocation2 + $0x78] sm:$0xff]   ;;  %v790_v35 = vsel %vm8472_vm8, %v782_v20, %v789_v22  ;;  %v798_v37 = vor.u32 %v796_v25, %v8668_v11  ;;  %1894 = vst [vmem:[#allocation2 + $0x8c] sm:$0xf] %v1893_v12  ;;  %1895 = vst.msk [vmem:[#allocation2 + $0x90] sm:$0xf] %vm215_vm0, %v781_v29  ;;  %v2511_v39 = vrot.slane %v2509_v28, 1 }
  0x61   : > { %344 = vst [vmem:[#allocation2 + $0x74] sm:$0x1] %v343_v32  ;;  %v8689_v40 = vld [vmem:[#allocation2 + $0x80] sm:$0xff]   ;;  %1896 = vst.msk [vmem:[#allocation2 + $0x94] sm:$0xf] %vm215_vm0, %v790_v35  ;;  %v254_v41 = vsel %vm8438_vm4, 0, %v253_v15  ;;  %v2527_v56 = vor.u32 %v2525_v34, %v8612_v52 }
  0x62   : > { %v802_v42 = vshrl.u32 %v454_v16, 16  ;;  %v2554_v31 = vshrl.u32 %v8036_v33, 16  ;;  %v2556_v44 = vshll.u32 %v8036_v33, 16  ;;  %v799_v45 = vsel %vm8472_vm8, %v791_v23, %v798_v37  ;;  %255 = vst [vmem:[#allocation2 + $0xa0] sm:$0x1] %v254_v41  ;;  %v9231_v13 = vld [vmem:[#allocation2 + $0x80] sm:$0xff]  }
  0x63   : > { %v8698_v55 = vsel %vm13630_vm6, %v2507_v18, %v2511_v39  ;;  %v2561_v48 = vshll.u32 %v8689_v40, 16  ;;  %1897 = vst.msk [vmem:[#allocation2 + $0x98] sm:$0xf] %vm215_vm0, %v799_v45  ;;  %v805_v51 = vshll.u32 %v454_v16, 16  ;;  %v730_v60 = vrot.slane %v8603_v43, 4  ;;  %13683 = vst [vmem:[#allocation44_spill] sm:$0xff] %v9231_v13 }
  0x64   : > { %13654 = vst [vmem:[#allocation17_spill] sm:$0xff] %v8698_v55  ;;  %v804_v14 = vrot.slane %v802_v42, 7  ;;  %2767 = vrot.lane.b32.xlu1 %v8698_v55, %s8338_s4  ;;  %v2558_v53 = vrot.slane %v2556_v44, 1  ;;  %v8038_v54 = vld [vmem:[#allocation2 + $0x60] ss:$0 sps:$4 sm:$0x11]  }
  0x65   : > { %v8706_v59 = vrot.slane %v2561_v48, 1  ;;  %v810_v62 = vshrl.u32 %v455_v46, 16  ;;  %v2529_v2 = vshll.u32 %v8038_v54, 16  ;;  %v813_v5 = vshll.u32 %v455_v46, 16  ;;  %v256_v23 = vld [vmem:[#allocation2 + $0xb4] sm:$0x1] }
  0x66   : > { %v808_v61 = vrot.slane %v804_v14, 4  ;;  %v2559_v0 = vor.u32 %v2558_v53, %v2554_v31  ;;  %v819_v6 = vshrl.u32 %v456_v49, 16  ;;  %v807_v16 = vor.u32 %v805_v51, %v804_v14  ;;  %v458_v35 = vld [vmem:[%s8462_s30 + $0x80] sm:$0xf]  ;;  %v459_v31 = vld [vmem:[%s8462_s30 + $0x84] sm:$0xf] }
  0x67   : > { %v8039_v7 = vld [vmem:[#allocation2 + $0x8c] sm:$0xff]   ;;  %v812_v36 = vrot.slane %v810_v62, 7  ;;  %v2531_v15 = vrot.slane %v2529_v2, 1  ;;  %v822_v29 = vshll.u32 %v456_v49, 16  ;;  %v828_v33 = vshrl.u32 %v457_v3, 16 }
  0x68   : > { %v8712_v10 = vsel %vm13630_vm6, %v2559_v0, %v8706_v59  ;;  %v1880_v52 = vld [vmem:[#allocation2 + $0x74] sm:$0x1]  ;;  %v821_v17 = vrot.slane %v819_v6, 7  ;;  %v2574_v43 = vshrl.u32 %v8039_v7, 16  ;;  %v2576_v18 = vshll.u32 %v8039_v7, 16 }
  0x69   : > { %13655 = vst [vmem:[#allocation18_spill] sm:$0xff] %v8712_v10  ;;  %2777 = vrot.lane.b32.xlu0 %v8712_v10, %s8338_s4  ;;  %v1881_v19 = vsel %vm8438_vm4, %v730_v60, %v1880_v52  ;;  %v815_v20 = vor.u32 %v813_v5, %v812_v36  ;;  %v1901_v22 = vld [vmem:[#allocation2 + $0xa0] sm:$0xf]  ;;  %v8719_v25 = vsel %vm13630_vm6, %v2527_v56, %v2531_v15  ;;  %v817_v28 = vrot.slane %v812_v36, 4  ;;  %v460_v49 = vld [vmem:[%s8462_s30 + $0x88] sm:$0xf] }
  0x6a   : > { %13656 = vst [vmem:[#allocation19_spill] sm:$0xff] %v8719_v25  ;;  %v8721_v27 = vld [vmem:[#allocation2 + $0x94] sm:$0xff]   ;;  %1882 = vst [vmem:[#allocation2 + $0x74] sm:$0x1] %v1881_v19  ;;  %2771 = vrot.lane.b32.xlu1 %v8719_v25, %s8338_s4  ;;  %v2578_v12 = vrot.slane %v2576_v18, 1  ;;  %v831_v34 = vshll.u32 %v457_v3, 16  ;;  %v824_v39 = vor.u32 %v822_v29, %v821_v17  ;;  %v1902_v41 = vsel %vm8478_vm9, %v807_v16, %v1901_v22 }
  0x6b   : > { %v816_v32 = vsel %vm8472_vm8, %v808_v61, %v815_v20  ;;  %v2581_v37 = vshll.u32 %v8721_v27, 16  ;;  %v346_v42 = vsel %vm8444_vm5, 0, %v345_v9  ;;  %v2545_v45 = vshrl.u32 %v8654_v47, 16  ;;  %1903 = vst [vmem:[#allocation2 + $0xa0] sm:$0xf] %v1902_v41 }
  0x6c   : > { %1904 = vst.msk [vmem:[#allocation2 + $0xa4] sm:$0xf] %vm215_vm0, %v816_v32  ;;  %v2579_v44 = vor.u32 %v2578_v12, %v2574_v43  ;;  %v826_v46 = vrot.slane %v821_v17, 4  ;;  %v8736_v48 = vrot.slane %v828_v33, 7  ;;  %347 = vst [vmem:[#allocation2 + $0x88] sm:$0x1] %v346_v42  ;;  %v825_v51 = vsel %vm8472_vm8, %v817_v28, %v824_v39 }
  0x6d   : > { %v8739_v14 = vrot.slane %v2581_v37, 1  ;;  %v257_v53 = vsel %vm8438_vm4, 0, %v256_v23  ;;  %v837_v54 = vshrl.u32 %v458_v35, 16  ;;  %1905 = vst.msk [vmem:[#allocation2 + $0xa8] sm:$0xf] %vm215_vm0, %v825_v51  ;;  %v765_v47 = vrot.slane %v8638_v26, 4 }
  0x6e   : > { %v833_v56 = vor.u32 %v831_v34, %v8736_v48  ;;  %258 = vst [vmem:[#allocation2 + $0xb4] sm:$0x1] %v257_v53  ;;  %v840_v60 = vshll.u32 %v458_v35, 16  ;;  %v845_v61 = vshrl.u32 %v459_v31, 16  ;;  %v461_v0 = vld [vmem:[%s8462_s30 + $0x8c] sm:$0xf]  ;;  %v2547_v26 = vor.u32 %v2545_v45, %v8664_v8 }
  0x6f   : > { %v8750_v62 = vsel %vm13630_vm6, %v2579_v44, %v8739_v14  ;;  %v839_v2 = vrot.slane %v837_v54, 7  ;;  %v848_v3 = vshll.u32 %v459_v31, 16  ;;  %v854_v5 = vshrl.u32 %v460_v49, 16  ;;  %v348_v16 = vld [vmem:[#allocation2 + $0x9c] sm:$0x1] }
  0x70   : > { %13657 = vst [vmem:[#allocation20_spill] sm:$0xff] %v8750_v62  ;;  %2781 = vrot.lane.b32.xlu0 %v8750_v62, %s8338_s4  ;;  %v834_v7 = vsel %vm8472_vm8, %v826_v46, %v833_v56  ;;  %v847_v36 = vrot.slane %v845_v61, 7  ;;  %v857_v52 = vshll.u32 %v460_v49, 16  ;;  %v863_v19 = vshrl.u32 %v461_v0, 16  ;;  %v259_v20 = vld [vmem:[#allocation2 + $0xc8] sm:$0x1] }
  0x71   : > { %v8041_v6 = vld [vmem:[#allocation2 + $0x74] ss:$0 sps:$4 sm:$0x11]   ;;  %1906 = vst.msk [vmem:[#allocation2 + $0xac] sm:$0xf] %vm215_vm0, %v834_v7  ;;  %v843_v9 = vrot.slane %v839_v2, 4  ;;  %v842_v28 = vor.u32 %v840_v60, %v839_v2 }
  0x72   : > { %v856_v15 = vrot.slane %v854_v5, 7  ;;  %v2549_v17 = vshll.u32 %v8041_v6, 16  ;;  %v850_v43 = vor.u32 %v848_v3, %v847_v36  ;;  %v852_v18 = vrot.slane %v847_v36, 4  ;;  %v462_v8 = vld [vmem:[%s8462_s30 + $0x90] sm:$0xf]  ;;  %v9219_v62 = vld [vmem:[#allocation2 + $0x78] sm:$0xff]  }
  0x73   : > { %v8042_v22 = vld [vmem:[#allocation2 + $0xa0] sm:$0xff]   ;;  %v1889_v23 = vld [vmem:[#allocation2 + $0x88] sm:$0x1]  ;;  %v8764_v35 = vrot.slane %v863_v19, 7  ;;  %v463_v37 = vld [vmem:[%s8462_s30 + $0x94] sm:$0xf] }
  0x74   : > { %v859_v29 = vor.u32 %v857_v52, %v856_v15  ;;  %v861_v12 = vrot.slane %v856_v15, 4  ;;  %v2551_v32 = vrot.slane %v2549_v17, 1  ;;  %v1890_v33 = vsel %vm8438_vm4, %v765_v47, %v1889_v23  ;;  %v464_v39 = vld [vmem:[%s8462_s30 + $0x98] sm:$0xf]  ;;  %v465_v60 = vld [vmem:[%s8462_s30 + $0x9c] sm:$0xf] }
  0x75   : > { %v851_v34 = vsel %vm8472_vm8, %v843_v9, %v850_v43  ;;  %v2594_v41 = vshrl.u32 %v8042_v22, 16  ;;  %v2596_v42 = vshll.u32 %v8042_v22, 16  ;;  %1891 = vst [vmem:[#allocation2 + $0x88] sm:$0x1] %v1890_v33  ;;  %v866_v44 = vshll.u32 %v461_v0, 16 }
  0x76   : > { %v860_v31 = vsel %vm8472_vm8, %v852_v18, %v859_v29  ;;  %1913 = vst.msk [vmem:[#allocation2 + $0xb8] sm:$0xf] %vm215_vm0, %v851_v34  ;;  %v8772_v45 = vsel %vm13630_vm6, %v2547_v26, %v2551_v32  ;;  %v2565_v46 = vshrl.u32 %v8689_v40, 16  ;;  %v1910_v49 = vld [vmem:[#allocation2 + $0xb4] sm:$0xf]  ;;  %v349_v51 = vsel %vm8444_vm5, 0, %v348_v16 }
  0x77   : > { %13658 = vst [vmem:[#allocation21_spill] sm:$0xff] %v8772_v45  ;;  %1914 = vst.msk [vmem:[#allocation2 + $0xbc] sm:$0xf] %vm215_vm0, %v860_v31  ;;  %v800_v53 = vrot.slane %v8668_v11, 4  ;;  %2775 = vrot.lane.b32.xlu1 %v8772_v45, %s8338_s4  ;;  %v2598_v54 = vrot.slane %v2596_v42, 1  ;;  %v868_v56 = vor.u32 %v866_v44, %v8764_v35  ;;  %v1911_v47 = vsel %vm8478_vm9, %v842_v28, %v1910_v49  ;;  %v9201_v45 = vld [vmem:[#allocation2 + $0x6c] sm:$0xff]  }
  0x78   : > { %350 = vst [vmem:[#allocation2 + $0x9c] sm:$0x1] %v349_v51  ;;  %v260_v40 = vsel %vm8438_vm4, 0, %v259_v20  ;;  %v351_v61 = vld [vmem:[#allocation2 + $0xb0] sm:$0x1]  ;;  %v8787_v0 = vld [vmem:[#allocation2 + $0xa8] sm:$0xff]   ;;  %v2567_v29 = vor.u32 %v2565_v46, %v8706_v59 }
  0x79   : > { %1912 = vst [vmem:[#allocation2 + $0xb4] sm:$0xf] %v1911_v47  ;;  %261 = vst [vmem:[#allocation2 + $0xc8] sm:$0x1] %v260_v40  ;;  %v872_v11 = vshrl.u32 %v462_v8, 16  ;;  %v875_v2 = vshll.u32 %v462_v8, 16  ;;  %v2599_v5 = vor.u32 %v2598_v54, %v2594_v41  ;;  %v869_v6 = vsel %vm8472_vm8, %v861_v12, %v868_v56 }
  0x7a   : > { %v880_v3 = vshrl.u32 %v463_v37, 16  ;;  %v883_v7 = vshll.u32 %v463_v37, 16  ;;  %v889_v36 = vshrl.u32 %v464_v39, 16  ;;  %v2601_v26 = vshll.u32 %v8787_v0, 16  ;;  %1915 = vst.msk [vmem:[#allocation2 + $0xc0] sm:$0xf] %vm215_vm0, %v869_v6 }
  0x7b   : > { %v874_v9 = vrot.slane %v872_v11, 7  ;;  %v892_v52 = vshll.u32 %v464_v39, 16  ;;  %v898_v17 = vshrl.u32 %v465_v60, 16  ;;  %v901_v43 = vshll.u32 %v465_v60, 16  ;;  %v262_v28 = vld [vmem:[#allocation2 + $0xdc] sm:$0x1] }
  0x7c   : > { %v882_v15 = vrot.slane %v880_v3, 7  ;;  %v891_v16 = vrot.slane %v889_v36, 7  ;;  %v352_v18 = vsel %vm8444_vm5, 0, %v351_v61  ;;  %v8795_v19 = vrot.slane %v2601_v26, 1  ;;  %v466_v33 = vld [vmem:[%s8462_s30 + $0xa0] sm:$0xf] }
  0x7d   : > { %v8044_v20 = vld [vmem:[#allocation2 + $0x88] ss:$0 sps:$4 sm:$0x11]   ;;  %v877_v22 = vor.u32 %v875_v2, %v874_v9  ;;  %353 = vst [vmem:[#allocation2 + $0xb0] sm:$0x1] %v352_v18  ;;  %v878_v12 = vrot.slane %v874_v9, 4 }
  0x7e   : > { %v885_v23 = vor.u32 %v883_v7, %v882_v15  ;;  %v887_v8 = vrot.slane %v882_v15, 4  ;;  %v894_v32 = vor.u32 %v892_v52, %v891_v16  ;;  %v8801_v34 = vsel %vm13630_vm6, %v2599_v5, %v8795_v19  ;;  %v468_v40 = vld [vmem:[%s8462_s30 + $0xa8] sm:$0xf]  ;;  %v469_v6 = vld [vmem:[%s8462_s30 + $0xac] sm:$0xf] }
  0x7f   : > { %13659 = vst [vmem:[#allocation22_spill] sm:$0xff] %v8801_v34  ;;  %v2569_v37 = vshll.u32 %v8044_v20, 16  ;;  %v1898_v39 = vld [vmem:[#allocation2 + $0x9c] sm:$0x1]  ;;  %v896_v41 = vrot.slane %v891_v16, 4  ;;  %v8803_v42 = vrot.slane %v898_v17, 7  ;;  %2785 = vrot.lane.b32.xlu0 %v8801_v34, %s8338_s4 }
  0x80   : > { %v8807_v31 = vld [vmem:[#allocation2 + $0xb4] sm:$0xff]   ;;  %v1899_v59 = vsel %vm8438_vm4, %v800_v53, %v1898_v39  ;;  %v2585_v44 = vshrl.u32 %v8721_v27, 16  ;;  %v886_v46 = vsel %vm8472_vm8, %v878_v12, %v885_v23  ;;  %v895_v49 = vsel %vm8472_vm8, %v887_v8, %v894_v32  ;;  %v1919_v51 = vld [vmem:[#allocation2 + $0xc8] sm:$0xf]  ;;  %v467_v53 = vld [vmem:[%s8462_s30 + $0xa4] sm:$0xf] }
  0x81   : > { %v2571_v54 = vrot.slane %v2569_v37, 1  ;;  %1900 = vst [vmem:[#allocation2 + $0x9c] sm:$0x1] %v1899_v59  ;;  %v903_v56 = vor.u32 %v901_v43, %v8803_v42  ;;  %v1920_v47 = vsel %vm8478_vm9, %v877_v22, %v1919_v51  ;;  %1922 = vst.msk [vmem:[#allocation2 + $0xcc] sm:$0xf] %vm215_vm0, %v886_v46  ;;  %v835_v27 = vrot.slane %v8736_v48, 4 }
  0x82   : > { %1923 = vst.msk [vmem:[#allocation2 + $0xd0] sm:$0xf] %vm215_vm0, %v895_v49  ;;  %v8824_v60 = vld [vmem:[#allocation2 + $0xbc] sm:$0xff]   ;;  %v2614_v61 = vshrl.u32 %v8807_v31, 16  ;;  %v2616_v11 = vshll.u32 %v8807_v31, 16  ;;  %v263_v2 = vsel %vm8438_vm4, 0, %v262_v28  ;;  %v2587_v59 = vor.u32 %v2585_v44, %v8739_v14 }
  0x83   : > { %1921 = vst [vmem:[#allocation2 + $0xc8] sm:$0xf] %v1920_v47  ;;  %v8831_v3 = vsel %vm13630_vm6, %v2567_v29, %v2571_v54  ;;  %v904_v5 = vsel %vm8472_vm8, %v896_v41, %v903_v56  ;;  %v2605_v48 = vshrl.u32 %v8787_v0, 16  ;;  %264 = vst [vmem:[#allocation2 + $0xdc] sm:$0x1] %v263_v2  ;;  %v907_v7 = vshrl.u32 %v466_v33, 16 }
  0x84   : > { %13660 = vst [vmem:[#allocation23_spill] sm:$0xff] %v8831_v3  ;;  %2779 = vrot.lane.b32.xlu1 %v8831_v3, %s8338_s4  ;;  %v2618_v36 = vrot.slane %v2616_v11, 1  ;;  %v2621_v26 = vshll.u32 %v8824_v60, 16  ;;  %1924 = vst.msk [vmem:[#allocation2 + $0xd4] sm:$0xf] %vm215_vm0, %v904_v5  ;;  %v910_v15 = vshll.u32 %v466_v33, 16 }
  0x85   : > { %v1907_v9 = vld [vmem:[#allocation2 + $0xb0] sm:$0x1]  ;;  %v915_v52 = vshrl.u32 %v467_v53, 16  ;;  %v909_v17 = vrot.slane %v907_v7, 7  ;;  %v918_v43 = vshll.u32 %v467_v53, 16  ;;  %v924_v0 = vshrl.u32 %v468_v40, 16 }
  0x86   : > { %v1908_v16 = vsel %vm8438_vm4, %v835_v27, %v1907_v9  ;;  %v2619_v18 = vor.u32 %v2618_v36, %v2614_v61  ;;  %v8843_v20 = vrot.slane %v2621_v26, 1  ;;  %v927_v23 = vshll.u32 %v468_v40, 16  ;;  %v354_v32 = vld [vmem:[#allocation2 + $0xc4] sm:$0x1]  ;;  %v265_v49 = vld [vmem:[#allocation2 + $0xf0] sm:$0x1] }
  0x87   : > { %1909 = vst [vmem:[#allocation2 + $0xb0] sm:$0x1] %v1908_v16  ;;  %v917_v22 = vrot.slane %v915_v52, 7  ;;  %v912_v28 = vor.u32 %v910_v15, %v909_v17  ;;  %v913_v29 = vrot.slane %v909_v17, 4  ;;  %v926_v12 = vrot.slane %v924_v0, 7  ;;  %v9171_v3 = vld [vmem:[#allocation2 + $0x44] sm:$0xff]  }
  0x88   : > { %v933_v8 = vshrl.u32 %v469_v6, 16  ;;  %v8847_v33 = vsel %vm13630_vm6, %v2619_v18, %v8843_v20  ;;  %v8849_v37 = vld [vmem:[#allocation2 + $0x9c] ss:$0 sps:$4 sm:$0x11]   ;;  %v470_v40 = vld [vmem:[%s8462_s30 + $0xb0] sm:$0xf]  ;;  %v2607_v52 = vor.u32 %v2605_v48, %v8795_v19 }
  0x89   : > { %13661 = vst [vmem:[#allocation24_spill] sm:$0xff] %v8847_v33  ;;  %v920_v39 = vor.u32 %v918_v43, %v917_v22  ;;  %v922_v41 = vrot.slane %v917_v22, 4  ;;  %2789 = vrot.lane.b32.xlu0 %v8847_v33, %s8338_s4  ;;  %v929_v46 = vor.u32 %v927_v23, %v926_v12  ;;  %v2589_v51 = vshll.u32 %v8849_v37, 16  ;;  %v471_v5 = vld [vmem:[%s8462_s30 + $0xb4] sm:$0xf] }
  0x8a   : > { %v8855_v54 = vld [vmem:[#allocation2 + $0xc8] sm:$0xff]   ;;  %v931_v47 = vrot.slane %v926_v12, 4  ;;  %v8859_v27 = vrot.slane %v933_v8, 7  ;;  %v1928_v53 = vld [vmem:[#allocation2 + $0xdc] sm:$0xf]  ;;  %v936_v44 = vshll.u32 %v469_v6, 16 }
  0x8b   : > { %v921_v56 = vsel %vm8472_vm8, %v913_v29, %v920_v39  ;;  %v8862_v61 = vld [vmem:[#allocation2 + $0xd0] sm:$0xff]   ;;  %v930_v14 = vsel %vm8472_vm8, %v922_v41, %v929_v46  ;;  %v1929_v11 = vsel %vm8478_vm9, %v912_v28, %v1928_v53  ;;  %v355_v2 = vsel %vm8444_vm5, 0, %v354_v32  ;;  %v472_v6 = vld [vmem:[%s8462_s30 + $0xb8] sm:$0xf]  ;;  %v473_v17 = vld [vmem:[%s8462_s30 + $0xbc] sm:$0xf] }
  0x8c   : > { %1931 = vst.msk [vmem:[#allocation2 + $0xe0] sm:$0xf] %vm215_vm0, %v921_v56  ;;  %v2591_v7 = vrot.slane %v2589_v51, 1  ;;  %v2634_v36 = vshrl.u32 %v8855_v54, 16  ;;  %v2636_v26 = vshll.u32 %v8855_v54, 16  ;;  %v2641_v9 = vshll.u32 %v8862_v61, 16 }
  0x8d   : > { %1930 = vst [vmem:[#allocation2 + $0xdc] sm:$0xf] %v1929_v11  ;;  %1932 = vst.msk [vmem:[#allocation2 + $0xe4] sm:$0xf] %vm215_vm0, %v930_v14  ;;  %v938_v16 = vor.u32 %v936_v44, %v8859_v27  ;;  %v870_v18 = vrot.slane %v8764_v35, 4  ;;  %v266_v22 = vsel %vm8438_vm4, 0, %v265_v49 }
  0x8e   : > { %356 = vst [vmem:[#allocation2 + $0xc4] sm:$0x1] %v355_v2  ;;  %v8877_v15 = vld [vmem:[#allocation2 + $0xb0] ss:$0 sps:$4 sm:$0x11]   ;;  %v8883_v43 = vsel %vm13630_vm6, %v2587_v59, %v2591_v7  ;;  %v2638_v0 = vrot.slane %v2636_v26, 1 }
  0x8f   : > { %13662 = vst [vmem:[#allocation25_spill] sm:$0xff] %v8883_v43  ;;  %2783 = vrot.lane.b32.xlu1 %v8883_v43, %s8338_s4  ;;  %v8890_v23 = vrot.slane %v2641_v9, 1  ;;  %v2609_v28 = vshll.u32 %v8877_v15, 16  ;;  %v939_v19 = vsel %vm8472_vm8, %v931_v47, %v938_v16  ;;  %267 = vst [vmem:[#allocation2 + $0xf0] sm:$0x1] %v266_v22  ;;  %v942_v48 = vshrl.u32 %v470_v40, 16 }
  0x90   : > { %v2639_v29 = vor.u32 %v2638_v0, %v2634_v36  ;;  %1933 = vst.msk [vmem:[#allocation2 + $0xe8] sm:$0xf] %vm215_vm0, %v939_v19  ;;  %v945_v12 = vshll.u32 %v470_v40, 16  ;;  %v950_v35 = vshrl.u32 %v471_v5, 16  ;;  %v953_v39 = vshll.u32 %v471_v5, 16 }
  0x91   : > { %v2611_v8 = vrot.slane %v2609_v28, 1  ;;  %v944_v32 = vrot.slane %v942_v48, 7  ;;  %v959_v41 = vshrl.u32 %v472_v6, 16  ;;  %v357_v59 = vld [vmem:[#allocation2 + $0xd8] sm:$0x1]  ;;  %v962_v51 = vshll.u32 %v472_v6, 16 }
  0x92   : > { %v8898_v46 = vsel %vm13630_vm6, %v2639_v29, %v8890_v23  ;;  %v952_v49 = vrot.slane %v950_v35, 7  ;;  %v968_v56 = vshrl.u32 %v473_v17, 16  ;;  %v268_v44 = vld [vmem:[#allocation2 + $0x104] sm:$0x1]  ;;  %v474_v11 = vld [vmem:[%s8462_s30 + $0xc0] sm:$0xf] }
  0x93   : > { %13663 = vst [vmem:[#allocation26_spill] sm:$0xff] %v8898_v46  ;;  %2793 = vrot.lane.b32.xlu0 %v8898_v46, %s8338_s4  ;;  %v8903_v47 = vsel %vm13630_vm6, %v2607_v52, %v2611_v8  ;;  %v947_v40 = vor.u32 %v945_v12, %v944_v32  ;;  %v948_v14 = vrot.slane %v944_v32, 4  ;;  %v961_v36 = vrot.slane %v959_v41, 7  ;;  %v475_v0 = vld [vmem:[%s8462_s30 + $0xc4] sm:$0xf] }
  0x94   : > { %13664 = vst [vmem:[#allocation27_spill] sm:$0xff] %v8903_v47  ;;  %v8905_v53 = vld [vmem:[#allocation2 + $0xdc] sm:$0xff]   ;;  %2787 = vrot.lane.b32.xlu1 %v8903_v47, %s8338_s4  ;;  %v955_v5 = vor.u32 %v953_v39, %v952_v49  ;;  %v957_v7 = vrot.slane %v952_v49, 4  ;;  %v8910_v26 = vrot.slane %v968_v56, 7  ;;  %v971_v16 = vshll.u32 %v473_v17, 16 }
  0x95   : > { %v1916_v2 = vld [vmem:[#allocation2 + $0xc4] sm:$0x1]  ;;  %v2654_v6 = vshrl.u32 %v8905_v53, 16  ;;  %v2656_v9 = vshll.u32 %v8905_v53, 16  ;;  %v964_v28 = vor.u32 %v962_v51, %v961_v36  ;;  %v966_v19 = vrot.slane %v961_v36, 4 }
  0x96   : > { %v1917_v52 = vsel %vm8438_vm4, %v870_v18, %v1916_v2  ;;  %v956_v22 = vsel %vm8472_vm8, %v948_v14, %v955_v5  ;;  %v1937_v48 = vld [vmem:[#allocation2 + $0xf0] sm:$0xf]  ;;  %v358_v29 = vsel %vm8444_vm5, 0, %v357_v59  ;;  %v476_v12 = vld [vmem:[%s8462_s30 + $0xc8] sm:$0xf]  ;;  %v973_v32 = vor.u32 %v971_v16, %v8910_v26 }
  0x97   : > { %1918 = vst [vmem:[#allocation2 + $0xc4] sm:$0x1] %v1917_v52  ;;  %v8922_v35 = vld [vmem:[#allocation2 + $0xe4] sm:$0xff]   ;;  %v2658_v8 = vrot.slane %v2656_v9, 1  ;;  %v1938_v17 = vsel %vm8478_vm9, %v947_v40, %v1937_v48  ;;  %1940 = vst.msk [vmem:[#allocation2 + $0xf4] sm:$0xf] %vm215_vm0, %v956_v22  ;;  %v965_v41 = vsel %vm8472_vm8, %v957_v7, %v964_v28 }
  0x98   : > { %359 = vst [vmem:[#allocation2 + $0xd8] sm:$0x1] %v358_v29  ;;  %v477_v18 = vld [vmem:[%s8462_s30 + $0xcc] sm:$0xf]  ;;  %v2625_v39 = vshrl.u32 %v8824_v60, 16  ;;  %v269_v59 = vsel %vm8438_vm4, 0, %v268_v44  ;;  %v974_v40 = vsel %vm8472_vm8, %v966_v19, %v973_v32 }
  0x99   : > { %1939 = vst [vmem:[#allocation2 + $0xf0] sm:$0xf] %v1938_v17  ;;  %v977_v49 = vshrl.u32 %v474_v11, 16  ;;  %v2659_v51 = vor.u32 %v2658_v8, %v2654_v6  ;;  %v2661_v56 = vshll.u32 %v8922_v35, 16  ;;  %1941 = vst.msk [vmem:[#allocation2 + $0xf8] sm:$0xf] %vm215_vm0, %v965_v41 }
  0x9a   : > { %v905_v14 = vrot.slane %v8803_v42, 4  ;;  %270 = vst [vmem:[#allocation2 + $0x104] sm:$0x1] %v269_v59  ;;  %1942 = vst.msk [vmem:[#allocation2 + $0xfc] sm:$0xf] %vm215_vm0, %v974_v40  ;;  %v980_v5 = vshll.u32 %v474_v11, 16  ;;  %v2627_v11 = vor.u32 %v2625_v39, %v8843_v20 }
  0x9b   : > { %v979_v2 = vrot.slane %v977_v49, 7  ;;  %v985_v7 = vshrl.u32 %v475_v0, 16  ;;  %v988_v36 = vshll.u32 %v475_v0, 16  ;;  %v8940_v9 = vrot.slane %v2661_v56, 1  ;;  %v360_v19 = vld [vmem:[#allocation2 + $0xec] sm:$0x1] }
  0x9c   : > { %v994_v44 = vshrl.u32 %v476_v12, 16  ;;  %v997_v6 = vshll.u32 %v476_v12, 16  ;;  %v1003_v52 = vshrl.u32 %v477_v18, 16  ;;  %v1006_v28 = vshll.u32 %v477_v18, 16  ;;  %v271_v29 = vld [vmem:[#allocation2 + $0x118] sm:$0x1] }
  0x9d   : > { %v983_v16 = vrot.slane %v979_v2, 4  ;;  %v987_v22 = vrot.slane %v985_v7, 7  ;;  %v8944_v42 = vsel %vm13630_vm6, %v2659_v51, %v8940_v9  ;;  %v982_v8 = vor.u32 %v980_v5, %v979_v2  ;;  %v478_v41 = vld [vmem:[%s8462_s30 + $0xd0] sm:$0xf]  ;;  %v479_v56 = vld [vmem:[%s8462_s30 + $0xd4] sm:$0xf] }
  0x9e   : > { %13665 = vst [vmem:[#allocation28_spill] sm:$0xff] %v8944_v42  ;;  %v8946_v48 = vld [vmem:[#allocation2 + $0xc4] ss:$0 sps:$4 sm:$0x11]   ;;  %v996_v0 = vrot.slane %v994_v44, 7  ;;  %2797 = vrot.lane.b32.xlu0 %v8944_v42, %s8338_s4  ;;  %v8951_v18 = vrot.slane %v1003_v52, 7 }
  0x9f   : > { %v1925_v12 = vld [vmem:[#allocation2 + $0xd8] sm:$0x1]  ;;  %v990_v32 = vor.u32 %v988_v36, %v987_v22  ;;  %v992_v17 = vrot.slane %v987_v22, 4  ;;  %v2629_v59 = vshll.u32 %v8946_v48, 16  ;;  %v361_v7 = vsel %vm8444_vm5, 0, %v360_v19 }
  0xa0   : > { %v8955_v49 = vld [vmem:[#allocation2 + $0xf0] sm:$0xff]   ;;  %v1926_v51 = vsel %vm8438_vm4, %v905_v14, %v1925_v12  ;;  %v999_v20 = vor.u32 %v997_v6, %v996_v0  ;;  %v1001_v39 = vrot.slane %v996_v0, 4  ;;  %v1008_v2 = vor.u32 %v1006_v28, %v8951_v18  ;;  %362 = vst [vmem:[#allocation2 + $0xec] sm:$0x1] %v361_v7  ;;  %v480_v0 = vld [vmem:[%s8462_s30 + $0xd8] sm:$0xf] }
  0xa1   : > { %1927 = vst [vmem:[#allocation2 + $0xd8] sm:$0x1] %v1926_v51  ;;  %v991_v40 = vsel %vm8472_vm8, %v983_v16, %v990_v32  ;;  %v1946_v5 = vld [vmem:[#allocation2 + $0x104] sm:$0xf]  ;;  %v2631_v36 = vrot.slane %v2629_v59, 1  ;;  %v8965_v44 = vld [vmem:[#allocation2 + $0xf8] sm:$0xff]  }
  0xa2   : > { %v2674_v52 = vshrl.u32 %v8955_v49, 16  ;;  %v2676_v14 = vshll.u32 %v8955_v49, 16  ;;  %v1000_v6 = vsel %vm8472_vm8, %v992_v17, %v999_v20  ;;  %1949 = vst.msk [vmem:[#allocation2 + $0x108] sm:$0xf] %vm215_vm0, %v991_v40  ;;  %v2645_v16 = vshrl.u32 %v8862_v61, 16 }
  0xa3   : > { %v1009_v22 = vsel %vm8472_vm8, %v1001_v39, %v1008_v2  ;;  %v1947_v28 = vsel %vm8478_vm9, %v982_v8, %v1946_v5  ;;  %1950 = vst.msk [vmem:[#allocation2 + $0x10c] sm:$0xf] %vm215_vm0, %v1000_v6  ;;  %v272_v19 = vsel %vm8438_vm4, 0, %v271_v29  ;;  %v8982_v12 = vsel %vm13630_vm6, %v2627_v11, %v2631_v36  ;;  %v481_v59 = vld [vmem:[%s8462_s30 + $0xdc] sm:$0xf] }
  0xa4   : > { %13666 = vst [vmem:[#allocation29_spill] sm:$0xff] %v8982_v12  ;;  %v2678_v32 = vrot.slane %v2676_v14, 1  ;;  %v2681_v17 = vshll.u32 %v8965_v44, 16  ;;  %1948 = vst [vmem:[#allocation2 + $0x104] sm:$0xf] %v1947_v28  ;;  %v1012_v51 = vshrl.u32 %v478_v41, 16  ;;  %2791 = vrot.lane.b32.xlu1 %v8982_v12, %s8338_s4 }
  0xa5   : > { %1951 = vst.msk [vmem:[#allocation2 + $0x110] sm:$0xf] %vm215_vm0, %v1009_v22  ;;  %273 = vst [vmem:[#allocation2 + $0x118] sm:$0x1] %v272_v19  ;;  %v940_v8 = vrot.slane %v8859_v27, 4  ;;  %v1015_v20 = vshll.u32 %v478_v41, 16  ;;  %v2647_v27 = vor.u32 %v2645_v16, %v8890_v23 }
  0xa6   : > { %v1020_v29 = vshrl.u32 %v479_v56, 16  ;;  %v1023_v39 = vshll.u32 %v479_v56, 16  ;;  %v2679_v40 = vor.u32 %v2678_v32, %v2674_v52  ;;  %v8990_v11 = vrot.slane %v2681_v17, 1  ;;  %v363_v22 = vld [vmem:[#allocation2 + $0x100] sm:$0x1] }
  0xa7   : > { %v1014_v2 = vrot.slane %v1012_v51, 7  ;;  %v1029_v5 = vshrl.u32 %v480_v0, 16  ;;  %v1032_v36 = vshll.u32 %v480_v0, 16  ;;  %v1038_v14 = vshrl.u32 %v481_v59, 16  ;;  %v1934_v56 = vld [vmem:[#allocation2 + $0xec] sm:$0x1] }
  0xa8   : > { %v1022_v7 = vrot.slane %v1020_v29, 7  ;;  %v1041_v6 = vshll.u32 %v481_v59, 16  ;;  %v8994_v28 = vsel %vm13630_vm6, %v2679_v40, %v8990_v11  ;;  %v8996_v19 = vld [vmem:[#allocation2 + $0xd8] ss:$0 sps:$4 sm:$0x11]   ;;  %v1935_v51 = vsel %vm8438_vm4, %v940_v8, %v1934_v56 }
  0xa9   : > { %13667 = vst [vmem:[#allocation30_spill] sm:$0xff] %v8994_v28  ;;  %v1018_v41 = vrot.slane %v1014_v2, 4  ;;  %2801 = vrot.lane.b32.xlu0 %v8994_v28, %s8338_s4  ;;  %v1017_v52 = vor.u32 %v1015_v20, %v1014_v2  ;;  %v1031_v17 = vrot.slane %v1029_v5, 7  ;;  %v2649_v59 = vshll.u32 %v8996_v19, 16  ;;  %v274_v23 = vld [vmem:[#allocation2 + $0x12c] sm:$0x1] }
  0xaa   : > { %v1025_v32 = vor.u32 %v1023_v39, %v1022_v7  ;;  %v1027_v0 = vrot.slane %v1022_v7, 4  ;;  %v9004_v29 = vrot.slane %v1038_v14, 7  ;;  %v364_v40 = vsel %vm8444_vm5, 0, %v363_v22  ;;  %v482_v16 = vld [vmem:[%s8462_s30 + $0xe0] sm:$0xf] }
  0xab   : > { %v9009_v12 = vld [vmem:[#allocation2 + $0x104] sm:$0xff]   ;;  %1936 = vst [vmem:[#allocation2 + $0xec] sm:$0x1] %v1935_v51  ;;  %v1034_v39 = vor.u32 %v1032_v36, %v1031_v17  ;;  %v1036_v2 = vrot.slane %v1031_v17, 4  ;;  %365 = vst [vmem:[#allocation2 + $0x100] sm:$0x1] %v364_v40 }
  0xac   : > { %v1026_v20 = vsel %vm8472_vm8, %v1018_v41, %v1025_v32  ;;  %v2651_v5 = vrot.slane %v2649_v59, 1  ;;  %v9013_v8 = vld [vmem:[#allocation2 + $0x10c] sm:$0xff]   ;;  %v2665_v7 = vshrl.u32 %v8922_v35, 16  ;;  %v1043_v14 = vor.u32 %v1041_v6, %v9004_v29  ;;  %v1955_v22 = vld [vmem:[#allocation2 + $0x118] sm:$0xf] }
  0xad   : > { %1958 = vst.msk [vmem:[#allocation2 + $0x11c] sm:$0xf] %vm215_vm0, %v1026_v20  ;;  %v2694_v56 = vshrl.u32 %v9009_v12, 16  ;;  %v2696_v51 = vshll.u32 %v9009_v12, 16  ;;  %v1035_v36 = vsel %vm8472_vm8, %v1027_v0, %v1034_v39  ;;  %v1956_v41 = vsel %vm8478_vm9, %v1017_v52, %v1955_v22  ;;  %v483_v32 = vld [vmem:[%s8462_s30 + $0xe4] sm:$0xf] }
  0xae   : > { %v484_v17 = vld [vmem:[%s8462_s30 + $0xe8] sm:$0xf]  ;;  %v9027_v59 = vsel %vm13630_vm6, %v2647_v27, %v2651_v5  ;;  %v2701_v6 = vshll.u32 %v9013_v8, 16  ;;  %v1044_v40 = vsel %vm8472_vm8, %v1036_v2, %v1043_v14  ;;  %1957 = vst [vmem:[#allocation2 + $0x118] sm:$0xf] %v1956_v41  ;;  %v975_v20 = vrot.slane %v8910_v26, 4 }
  0xaf   : > { %13668 = vst [vmem:[#allocation31_spill] sm:$0xff] %v9027_v59  ;;  %1959 = vst.msk [vmem:[#allocation2 + $0x120] sm:$0xf] %vm215_vm0, %v1035_v36  ;;  %v485_v28 = vld [vmem:[%s8462_s30 + $0xec] sm:$0xf]  ;;  %2795 = vrot.lane.b32.xlu1 %v9027_v59, %s8338_s4  ;;  %v2698_v52 = vrot.slane %v2696_v51, 1  ;;  %v2667_v51 = vor.u32 %v2665_v7, %v8940_v9 }
  0xb0   : > { %1960 = vst.msk [vmem:[#allocation2 + $0x124] sm:$0xf] %vm215_vm0, %v1044_v40  ;;  %v275_v27 = vsel %vm8438_vm4, 0, %v274_v23  ;;  %v1047_v0 = vshrl.u32 %v482_v16, 16  ;;  %v1050_v39 = vshll.u32 %v482_v16, 16  ;;  %v9040_v5 = vrot.slane %v2701_v6, 1 }
  0xb1   : > { %276 = vst [vmem:[#allocation2 + $0x12c] sm:$0x1] %v275_v27  ;;  %v1055_v2 = vshrl.u32 %v483_v32, 16  ;;  %v1058_v14 = vshll.u32 %v483_v32, 16  ;;  %v1064_v22 = vshrl.u32 %v484_v17, 16  ;;  %v2699_v36 = vor.u32 %v2698_v52, %v2694_v56 }
  0xb2   : > { %v1049_v26 = vrot.slane %v1047_v0, 7  ;;  %v1067_v41 = vshll.u32 %v484_v17, 16  ;;  %v1073_v47 = vshrl.u32 %v485_v28, 16  ;;  %v9042_v42 = vld [vmem:[#allocation2 + $0xec] ss:$0 sps:$4 sm:$0x11]  }
  0xb3   : > { %v1057_v40 = vrot.slane %v1055_v2, 7  ;;  %v9047_v23 = vsel %vm13630_vm6, %v2699_v36, %v9040_v5  ;;  %v1943_v16 = vld [vmem:[#allocation2 + $0x100] sm:$0x1]  ;;  %v1066_v27 = vrot.slane %v1064_v22, 7  ;;  %v2669_v56 = vshll.u32 %v9042_v42, 16 }
  0xb4   : > { %13669 = vst [vmem:[#allocation32_spill] sm:$0xff] %v9047_v23  ;;  %v1052_v6 = vor.u32 %v1050_v39, %v1049_v26  ;;  %v1053_v59 = vrot.slane %v1049_v26, 4  ;;  %2805 = vrot.lane.b32.xlu0 %v9047_v23, %s8338_s4  ;;  %v1944_v32 = vsel %vm8438_vm4, %v975_v20, %v1943_v16  ;;  %v366_v9 = vld [vmem:[#allocation2 + $0x114] sm:$0x1]  ;;  %v1075_v26 = vrot.slane %v1073_v47, 7 }
  0xb5   : > { %v1060_v17 = vor.u32 %v1058_v14, %v1057_v40  ;;  %v1062_v52 = vrot.slane %v1057_v40, 4  ;;  %v9054_v7 = vld [vmem:[#allocation2 + $0x118] sm:$0xff]   ;;  %1945 = vst [vmem:[#allocation2 + $0x100] sm:$0x1] %v1944_v32  ;;  %v1069_v0 = vor.u32 %v1067_v41, %v1066_v27  ;;  %v1071_v2 = vrot.slane %v1066_v27, 4 }
  0xb6   : > { %v2671_v36 = vrot.slane %v2669_v56, 1  ;;  %v1076_v23 = vshll.u32 %v485_v28, 16  ;;  %v2714_v43 = vshrl.u32 %v9054_v7, 16  ;;  %v2716_v20 = vshll.u32 %v9054_v7, 16  ;;  %v369_v27 = vld [vmem:[#allocation2 + $0x128] sm:$0x1] }
  0xb7   : > { %v9056_v39 = vld [vmem:[#allocation2 + $0x120] sm:$0xff]   ;;  %v1061_v22 = vsel %vm8472_vm8, %v1053_v59, %v1060_v17  ;;  %v1070_v14 = vsel %vm8472_vm8, %v1062_v52, %v1069_v0  ;;  %v367_v41 = vsel %vm8444_vm5, 0, %v366_v9  ;;  %v1010_v0 = vrot.slane %v8951_v18, 4  ;;  %v487_v34 = vld [vmem:[%s8462_s30 + $0xf4] sm:$0xf] }
  0xb8   : > { %v1964_v40 = vld [vmem:[#allocation2 + $0x12c] sm:$0xf]  ;;  %1967 = vst.msk [vmem:[#allocation2 + $0x130] sm:$0xf] %vm215_vm0, %v1061_v22  ;;  %v9068_v16 = vsel %vm13630_vm6, %v2667_v51, %v2671_v36  ;;  %v2721_v59 = vshll.u32 %v9056_v39, 16  ;;  %v1078_v47 = vor.u32 %v1076_v23, %v1075_v26  ;;  %v2718_v56 = vrot.slane %v2716_v20, 1 }
  0xb9   : > { %13670 = vst [vmem:[#allocation33_spill] sm:$0xff] %v9068_v16  ;;  %v1965_v28 = vsel %vm8478_vm9, %v1052_v6, %v1964_v40  ;;  %1968 = vst.msk [vmem:[#allocation2 + $0x134] sm:$0xf] %vm215_vm0, %v1070_v14  ;;  %2799 = vrot.lane.b32.xlu1 %v9068_v16, %s8338_s4  ;;  %v2685_v51 = vshrl.u32 %v8965_v44, 16  ;;  %v372_v23 = vld [vmem:[#allocation2 + $0x13c] sm:$0x1] }
  0xba   : > { %368 = vst [vmem:[#allocation2 + $0x114] sm:$0x1] %v367_v41  ;;  %1966 = vst [vmem:[#allocation2 + $0x12c] sm:$0xf] %v1965_v28  ;;  %v9076_v32 = vrot.slane %v2721_v59, 1  ;;  %v1079_v17 = vsel %vm8472_vm8, %v1071_v2, %v1078_v47  ;;  %v2719_v52 = vor.u32 %v2718_v56, %v2714_v43  ;;  %v370_v6 = vsel %vm8444_vm5, 0, %v369_v27 }
  0xbb   : > { %1969 = vst.msk [vmem:[#allocation2 + $0x138] sm:$0xf] %vm215_vm0, %v1079_v17  ;;  %371 = vst [vmem:[#allocation2 + $0x128] sm:$0x1] %v370_v6  ;;  %v373_v22 = vsel %vm8444_vm5, 0, %v372_v23  ;;  %v2687_v43 = vor.u32 %v2685_v51, %v8990_v11  ;;  %v1045_v41 = vrot.slane %v9004_v29, 4 }
  0xbc   : > { %v9084_v9 = vld [vmem:[#allocation2 + $0x100] ss:$0 sps:$4 sm:$0x11]   ;;  %v9089_v36 = vsel %vm13630_vm6, %v2719_v52, %v9076_v32  ;;  %374 = vst [vmem:[#allocation2 + $0x13c] sm:$0x1] %v373_v22  ;;  %v1080_v27 = vrot.slane %v1075_v26, 4 }
  0xbd   : > { %13671 = vst [vmem:[#allocation34_spill] sm:$0xff] %v9089_v36  ;;  %2809 = vrot.lane.b32.xlu0 %v9089_v36, %s8338_s4  ;;  %v2689_v2 = vshll.u32 %v9084_v9, 16  ;;  %v2705_v23 = vshrl.u32 %v9013_v8, 16  ;;  %v8130_v52 = vld [vmem:[#allocation2] sm:$0xff]   ;;  %vm2817_vm10 = vcmask 1046528   ;;  %v1090_v10 = vshrl.u32 %v487_v34, 16 }
  0xbe   : > { %v2818_v6 = vrot.slane %v8130_v52, 1  ;;  %v488_v25 = vld [vmem:[%s8462_s30 + $0xf8] sm:$0xf]  ;;  %v1093_v58 = vshll.u32 %v487_v34, 16  ;;  %vm3422_vm11 = vcmask 23552   ;;  %vm4024_vm12 = vcmask 1044480  }
  0xbf   : > { %v2691_v14 = vrot.slane %v2689_v2, 1  ;;  %v8147_v34 = vld [vmem:[#allocation2 + $0x4c] ss:$0 sps:$4 sm:$0x11]   ;;  %vm4025_vm13 = vcmask 1045504   ;;  %vm3487_vm14 = vcmask 48128  }
  0xc0   : > { %vm3552_vm15 = vcmask 72704   ;;  %vm3617_vm1 = vcmask 97280   ;;  %vm3682_vm2 = vcmask 121856   ;;  %vm3747_vm3 = vcmask 146432  }
  0xc1   : > { %v1952_v20 = vld [vmem:[#allocation2 + $0x114] sm:$0x1]  ;;  %v9097_v40 = vld [vmem:[#allocation2 + $0x12c] sm:$0xff]   ;;  %v9103_v59 = vsel %vm13630_vm6, %v2687_v43, %v2691_v14  ;;  %vm3812_vm7 = vcmask 171008  }
  0xc2   : > { %v1953_v18 = vsel %vm8438_vm4, %v1010_v0, %v1952_v20  ;;  %13672 = vst [vmem:[#allocation35_spill] sm:$0xff] %v9103_v59  ;;  %v9105_v47 = vld [vmem:[#allocation2 + $0x134] sm:$0xff]   ;;  %v2734_v11 = vshrl.u32 %v9097_v40, 16  ;;  %v2736_v28 = vshll.u32 %v9097_v40, 16  ;;  %2803 = vrot.lane.b32.xlu1 %v9103_v59, %s8338_s4  ;;  %v1961_v56 = vld [vmem:[#allocation2 + $0x128] sm:$0x1] }
  0xc3   : > { %1954 = vst [vmem:[#allocation2 + $0x114] sm:$0x1] %v1953_v18  ;;  %v2741_v17 = vshll.u32 %v9105_v47, 16  ;;  %v1962_v29 = vsel %vm8438_vm4, %v1045_v41, %v1961_v56  ;;  %v9115_v0 = vld [vmem:[#allocation2 + $0x8] sm:$0xff]   ;;  %v1970_v26 = vld [vmem:[#allocation2 + $0x13c] sm:$0x1]  ;;  %v2707_v41 = vor.u32 %v2705_v23, %v9040_v5 }
  0xc4   : > { %v2738_v51 = vrot.slane %v2736_v28, 1  ;;  %v2819_v22 = vrot.slane %v9115_v0, 1  ;;  %1963 = vst [vmem:[#allocation2 + $0x128] sm:$0x1] %v1962_v29  ;;  %v1971_v20 = vsel %vm8438_vm4, %v1080_v27, %v1970_v26  ;;  %v2725_v56 = vshrl.u32 %v9056_v39, 16  ;;  %v9141_v5 = vld [vmem:[#allocation2 + $0x28] sm:$0xff]  }
  0xc5   : > { %v2743_v2 = vrot.slane %v2741_v17, 1  ;;  %1972 = vst [vmem:[#allocation2 + $0x13c] sm:$0x1] %v1971_v20  ;;  %v9134_v17 = vld [vmem:[#allocation2 + $0x1c] sm:$0xff]   ;;  %v2745_v52 = vshrl.u32 %v9105_v47, 16  ;;  %v2828_v23 = vrot.slane %v9141_v5, 1 }
  0xc6   : > { %v2739_v43 = vor.u32 %v2738_v51, %v2734_v11  ;;  %v2820_v28 = vsel %vm2817_vm10, %v2818_v6, %v2819_v22  ;;  %v9131_v51 = vld [vmem:[#allocation2 + $0x14] sm:$0xff]   ;;  %v2824_v29 = vrot.slane %v9134_v17, 1  ;;  %v2727_v59 = vor.u32 %v2725_v56, %v9076_v32 }
  0xc7   : > { %v2823_v27 = vrot.slane %v9131_v51, 1  ;;  %v9144_v6 = vld [vmem:[#allocation2 + $0x30] sm:$0xff]   ;;  %v2747_v36 = vor.u32 %v2745_v52, %v2743_v2 }
  0xc8   : > { %v9121_v14 = vsel %vm13630_vm6, %v2739_v43, %v2743_v2  ;;  %v2829_v43 = vrot.slane %v9144_v6, 1  ;;  %v13480_v2 = vrot.slane %v9171_v3, 1 }
  0xc9   : > { %13673 = vst [vmem:[#allocation36_spill] sm:$0xff] %v9121_v14  ;;  %2813 = vrot.lane.b32.xlu0 %v9121_v14, %s8338_s4  ;;  %v9153_v14 = vsel %vm2817_vm10, %v2823_v27, %v2824_v29 }
  0xca   : > { %v9123_v18 = vld [vmem:[#allocation2 + $0x114] ss:$0 sps:$4 sm:$0x11]   ;;  %13675 = vst [vmem:[#allocation38_spill] sm:$0xff] %v9153_v14 }
  0xcb   : > { %v2709_v11 = vshll.u32 %v9123_v18, 16  ;;  %v9138_v26 = vld [vmem:[#allocation2 + $0x128] ss:$0 sps:$4 sm:$0x11]  }
  0xcc   : > { %v9155_v16 = vld [vmem:[#allocation2 + $0x13c] ss:$0 sps:$4 sm:$0x11]  }
  0xcd   : > { %v2711_v0 = vrot.slane %v2709_v11, 1  ;;  %2898 = vrot.lane.b32.xlu0 %v2820_v28, %s8339_s5  ;;  %v2729_v11 = vshll.u32 %v9138_v26, 16  ;;  %v2749_v46 = vshll.u32 %v9155_v16, 16 }
  0xcf   : > { %v9148_v20 = vsel %vm13630_vm6, %v2707_v41, %v2711_v0  ;;  %v2731_v28 = vrot.slane %v2729_v11, 1  ;;  %v9162_v41 = vld [vmem:[#allocation2 + $0x3c] sm:$0xff]   ;;  %v2751_v27 = vrot.slane %v2749_v46, 1  ;;  %v9169_v0 = vsel %vm2817_vm10, %v2828_v23, %v2829_v43  ;;  %v8138_v11 = vld [vmem:[#allocation2 + $0x10] ss:$0 sps:$4 sm:$0x11]  }
  0xd0   : > { %13674 = vst [vmem:[#allocation37_spill] sm:$0xff] %v9148_v20  ;;  %2807 = vrot.lane.b32.xlu1 %v9148_v20, %s8338_s4  ;;  %v2833_v32 = vrot.slane %v9162_v41, 1  ;;  %13677 = vst [vmem:[#allocation40_spill] sm:$0xff] %v9169_v0  ;;  %v9198_v20 = vld [vmem:[#allocation2 + $0x64] sm:$0xff]  }
  0xd1   : > { %2902 = vrot.lane.b32.xlu0 %v9153_v14, %s8339_s5  ;;  %v9166_v56 = vsel %vm13630_vm6, %v2727_v59, %v2731_v28  ;;  %v9177_v52 = vsel %vm13630_vm6, %v2747_v36, %v2751_v27  ;;  %v2821_v14 = vrot.slane %v8138_v11, 1  ;;  %v8139_v59 = vld [vmem:[#allocation2 + $0x24] ss:$0 sps:$4 sm:$0x11]   ;;  %v9186_v28 = vld [vmem:[#allocation2 + $0x50] sm:$0xff]   ;;  %v9189_v27 = vld [vmem:[#allocation2 + $0x58] sm:$0xff]  }
  0xd2   : > { %13676 = vst [vmem:[#allocation39_spill] sm:$0xff] %v9166_v56  ;;  %13678 = vst [vmem:[#allocation41_spill] sm:$0xff] %v9177_v52  ;;  %v9184_v46 = vsel %vm2817_vm10, %v2833_v32, %v13480_v2  ;;  %v2826_v23 = vrot.slane %v8139_v59, 1  ;;  %v2838_v36 = vrot.slane %v9186_v28, 1  ;;  %v277_v2 = vld [vmem:[#allocation2 + $0x140] sm:$0x1] }
  0xd3   : > { %13679 = vst [vmem:[#allocation42_spill] sm:$0xff] %v9184_v46  ;;  %v2822_v32 = vsel %vm2817_vm10, %v2819_v22, %v2821_v14  ;;  %v486_v59 = vld [vmem:[%s8462_s30 + $0xf0] sm:$0xf]  ;;  %v2843_v33 = vrot.slane %v9198_v20, 1  ;;  %v13680_v22 = vrot.slane %v9189_v27, 1  ;;  %v2848_v11 = vrot.slane %v9219_v62, 1 }
  0xd4   : > { %2811 = vrot.lane.b32.xlu1 %v9166_v56, %s8338_s4  ;;  %v278_v55 = vsel %vm8438_vm4, 0, %v277_v2  ;;  %v2849_v2 = vrot.slane %v9231_v13, 1  ;;  %v9240_v13 = vld [vmem:[#allocation2 + $0x8c] sm:$0xff]  }
  0xd5   : > { %2906 = vrot.lane.b32.xlu0 %v9169_v0, %s8339_s5  ;;  %v8142_v0 = vld [vmem:[#allocation2 + $0x38] ss:$0 sps:$4 sm:$0x11]   ;;  %v9212_v14 = vsel %vm2817_vm10, %v2838_v36, %v13680_v22  ;;  %279 = vst [vmem:[#allocation2 + $0x140] sm:$0x1] %v278_v55  ;;  %v1099_v36 = vshrl.u32 %v488_v25, 16 }
  0xd6   : > { %v2831_v56 = vrot.slane %v8142_v0, 1  ;;  %13681 = vst [vmem:[#allocation43_spill] sm:$0xff] %v9212_v14  ;;  %v489_v0 = vld [vmem:[%s8462_s30 + $0xfc] sm:$0xf]  ;;  %v1102_v22 = vshll.u32 %v488_v25, 16  ;;  %v1092_v55 = vrot.slane %v1090_v10, 7 }
  0xd7   : > { %v1108_v21 = vshrl.u32 %v489_v0, 16  ;;  %v1111_v63 = vshll.u32 %v489_v0, 16  ;;  %v2853_v10 = vrot.slane %v9240_v13, 1  ;;  %v9243_v0 = vpop.permute.xlu0 %2753 }
  0xd8   : > { %2815 = vrot.lane.b32.xlu1 %v9177_v52, %s8338_s4  ;;  %v9207_v52 = vsel %vm2817_vm10, %v2824_v29, %v2826_v23  ;;  %v1082_v29 = vshrl.u32 %v486_v59, 16  ;;  %v1085_v23 = vshll.u32 %v486_v59, 16  ;;  %v1101_v59 = vrot.slane %v1099_v36, 7  ;;  %13684 = vst [vmem:[#allocation45_spill] sm:$0xff] %v9243_v0 }
  0xd9   : > { %2910 = vrot.lane.b32.xlu0 %v9184_v46, %s8339_s5  ;;  %v9217_v46 = vsel %vm2817_vm10, %v2829_v43, %v2831_v56  ;;  %v9236_v50 = vrot.slane %v1108_v21, 7  ;;  %v9249_v21 = vld [vmem:[#allocation2 + $0x94] sm:$0xff]   ;;  %v2879_v0 = vrot.slane %v8965_v44, 1 }
  0xda   : > { %v1084_v56 = vrot.slane %v1082_v29, 7  ;;  %v1097_v29 = vrot.slane %v1092_v55, 4  ;;  %v1104_v25 = vor.u32 %v1102_v22, %v1101_v59 }
  0xdb   : > { %v1113_v36 = vor.u32 %v1111_v63, %v9236_v50 }
  0xdc   : > { %2900 = vrot.lane.b32.xlu1 %v2822_v32, %s8339_s5  ;;  %v13682_v32 = vrot.slane %v9201_v45, 1  ;;  %v1087_v57 = vor.u32 %v1085_v23, %v1084_v56  ;;  %v1088_v24 = vrot.slane %v1084_v56, 4  ;;  %v9247_v23 = vsel %vm2817_vm10, %v2848_v11, %v2849_v2 }
  0xdd   : > { %2914 = vrot.lane.b32.xlu0 %v9212_v14, %s8339_s5  ;;  %v2836_v14 = vrot.slane %v8147_v34, 1  ;;  %v1105_v22 = vsel %vm8472_vm8, %v1097_v29, %v1104_v25  ;;  %v13685_v11 = vrot.slane %v9171_v3, 1  ;;  %v9275_v25 = vld [vmem:[#allocation2 + $0xa0] sm:$0xff]  }
  0xde   : > { %v9229_v43 = vsel %vm2817_vm10, %v2843_v33, %v13682_v32  ;;  %v1095_v33 = vor.u32 %v1093_v58, %v1092_v55  ;;  %v1106_v32 = vrot.slane %v1101_v59, 4  ;;  %v2854_v58 = vrot.slane %v9249_v21, 1  ;;  %v1973_v55 = vld [vmem:[#allocation2 + $0x140] sm:$0xf]  ;;  %1977 = vst.msk [vmem:[#allocation2 + $0x148] sm:$0xf] %vm215_vm0, %v1105_v22 }
  0xdf   : > { %v9265_v59 = vsel %vm2817_vm10, %v13685_v11, %v2836_v14  ;;  %v9278_v14 = vld [vmem:[#allocation2 + $0xa8] sm:$0xff]   ;;  %v2864_v11 = vrot.slane %v8824_v60, 1  ;;  %v2868_v60 = vrot.slane %v8855_v54, 1  ;;  %v2874_v54 = vrot.slane %v8922_v35, 1 }
  0xe0   : > { %2904 = vrot.lane.b32.xlu1 %v9207_v52, %s8339_s5  ;;  %v1096_v56 = vsel %vm8472_vm8, %v1088_v24, %v1095_v33  ;;  %v1114_v63 = vsel %vm8472_vm8, %v1106_v32, %v1113_v36  ;;  %v8150_v24 = vld [vmem:[#allocation2 + $0x60] ss:$0 sps:$4 sm:$0x11]   ;;  %v1974_v33 = vsel %vm8478_vm9, %v1087_v57, %v1973_v55  ;;  %v9273_v29 = vsel %vm2817_vm10, %v2853_v10, %v2854_v58  ;;  %v9283_v57 = vpop.permute.xlu0 %2755  ;;  %v8153_v10 = vld [vmem:[#allocation2 + $0x74] ss:$0 sps:$4 sm:$0x11]  }
  0xe1   : > { %2918 = vrot.lane.b32.xlu0 %v9229_v43, %s8339_s5  ;;  %1976 = vst.msk [vmem:[#allocation2 + $0x144] sm:$0xf] %vm215_vm0, %v1096_v56  ;;  %v2841_v34 = vrot.slane %v8150_v24, 1  ;;  %1978 = vst.msk [vmem:[#allocation2 + $0x14c] sm:$0xf] %vm215_vm0, %v1114_v63  ;;  %v2858_v32 = vrot.slane %v9275_v25, 1 }
  0xe2   : > { %1975 = vst [vmem:[#allocation2 + $0x140] sm:$0xf] %v1974_v33  ;;  %13686 = vst [vmem:[#allocation46_spill] sm:$0xff] %v9278_v14  ;;  %v2859_v36 = vrot.slane %v9278_v14, 1  ;;  %v13688_v56 = vrot.slane %v9189_v27, 1  ;;  %v2846_v55 = vrot.slane %v8153_v10, 1 }
  0xe3   : > { %13687 = vst [vmem:[#allocation47_spill] sm:$0xff] %v9283_v57  ;;  %v2863_v63 = vrot.slane %v8807_v31, 1  ;;  %v13689_v33 = vrot.slane %v9201_v45, 1 }
  0xe4   : > { %2908 = vrot.lane.b32.xlu1 %v9217_v46, %s8339_s5  ;;  %v9288_v22 = vsel %vm2817_vm10, %v13688_v56, %v2841_v34  ;;  %v9295_v24 = vsel %vm2817_vm10, %v2858_v32, %v2859_v36  ;;  %v8154_v56 = vld [vmem:[#allocation2 + $0x88] ss:$0 sps:$4 sm:$0x11]   ;;  %v9306_v57 = vpop.permute.xlu0 %2761  ;;  %v2869_v32 = vrot.slane %v8862_v61, 1  ;;  %v9328_v61 = vpop.permute.xlu1 %2757 }
  0xe5   : > { %2922 = vrot.lane.b32.xlu0 %v9247_v23, %s8339_s5  ;;  %v9302_v34 = vsel %vm2817_vm10, %v13689_v33, %v2846_v55  ;;  %v2851_v10 = vrot.slane %v8154_v56, 1  ;;  %13690 = vst [vmem:[#allocation48_spill] sm:$0xff] %v9306_v57  ;;  %v9309_v31 = vsel %vm2817_vm10, %v2863_v63, %v2864_v11  ;;  %v2856_v33 = vrot.slane %v8849_v37, 1  ;;  %13692 = vst [vmem:[#allocation50_spill] sm:$0xff] %v9328_v61 }
  0xe6   : > { %v9322_v56 = vsel %vm2817_vm10, %v2868_v60, %v2869_v32  ;;  %v2873_v63 = vrot.slane %v8905_v53, 1  ;;  %v2861_v37 = vrot.slane %v8877_v15, 1  ;;  %v2878_v60 = vrot.slane %v8955_v49, 1 }
  0xe7   : > { %v9316_v55 = vsel %vm2817_vm10, %v2849_v2, %v2851_v10  ;;  %13691 = vst [vmem:[#allocation49_spill] sm:$0xff] %v9322_v56  ;;  %v9333_v2 = vsel %vm2817_vm10, %v2854_v58, %v2856_v33  ;;  %v2866_v58 = vrot.slane %v8946_v48, 1  ;;  %v2883_v61 = vrot.slane %v9009_v12, 1 }
  0xe8   : > { %2912 = vrot.lane.b32.xlu1 %v9265_v59, %s8339_s5  ;;  %v9330_v57 = vpop.permute.xlu0 %2765  ;;  %v9339_v10 = vsel %vm2817_vm10, %v2873_v63, %v2874_v54  ;;  %v9351_v15 = vpop.permute.xlu1 %2759  ;;  %v9356_v63 = vsel %vm2817_vm10, %v2878_v60, %v2879_v0  ;;  %v2871_v48 = vrot.slane %v8996_v19, 1  ;;  %v2888_v60 = vrot.slane %v9054_v7, 1  ;;  %v11152_v1 = vld [vmem:[#allocation2 + $0x148] sm:$0xff]  }
  0xe9   : > { %2926 = vrot.lane.b32.xlu0 %v9273_v29, %s8339_s5  ;;  %13693 = vst [vmem:[#allocation51_spill] sm:$0xff] %v9330_v57  ;;  %v9346_v57 = vsel %vm2817_vm10, %v2859_v36, %v2861_v37  ;;  %13695 = vst [vmem:[#allocation53_spill] sm:$0xff] %v9351_v15  ;;  %v9363_v36 = vsel %vm2817_vm10, %v2864_v11, %v2866_v58  ;;  %v375_v15 = vld [vmem:[#allocation2 + $0x150] sm:$0x1] }
  0xea   : > { %13694 = vst [vmem:[#allocation52_spill] sm:$0xff] %v9346_v57  ;;  %13697 = vst [vmem:[#allocation55_spill] sm:$0xff] %v9356_v63  ;;  %v376_v19 = vsel %vm8444_vm5, 0, %v375_v15  ;;  %v9382_v58 = vsel %vm2817_vm10, %v2869_v32, %v2871_v48  ;;  %v2881_v32 = vrot.slane %v9084_v9, 1  ;;  %v2886_v9 = vrot.slane %v9123_v18, 1 }
  0xeb   : > { %13698 = vst [vmem:[#allocation56_spill] sm:$0xff] %v9363_v36  ;;  %377 = vst [vmem:[#allocation2 + $0x150] sm:$0x1] %v376_v19  ;;  %v1115_v19 = vrot.slane %v9236_v50, 4 }
  0xec   : > { %2916 = vrot.lane.b32.xlu1 %v9288_v22, %s8339_s5  ;;  %v9353_v33 = vpop.permute.xlu0 %2769 }
  0xed   : > { %2930 = vrot.lane.b32.xlu0 %v9295_v24, %s8339_s5  ;;  %13696 = vst [vmem:[#allocation54_spill] sm:$0xff] %v9353_v33  ;;  %v2889_v33 = vrot.slane %v9056_v39, 1 }
  0xf0   : > { %2920 = vrot.lane.b32.xlu1 %v9302_v34, %s8339_s5  ;;  %v9377_v11 = vpop.permute.xlu0 %2773 }
  0xf1   : > { %2934 = vrot.lane.b32.xlu0 %v9309_v31, %s8339_s5  ;;  %13700 = vst [vmem:[#allocation58_spill] sm:$0xff] %v9377_v11 }
  0xf2   : > { %v1979_v11 = vld [vmem:[#allocation2 + $0x150] sm:$0x1] }
  0xf4   : > { %2924 = vrot.lane.b32.xlu1 %v9316_v55, %s8339_s5  ;;  %v9402_v48 = vpop.permute.xlu0 %2777 }
  0xf5   : > { %2938 = vrot.lane.b32.xlu0 %v9322_v56, %s8339_s5  ;;  %v2884_v56 = vrot.slane %v9013_v8, 1  ;;  %13703 = vst [vmem:[#allocation61_spill] sm:$0xff] %v9402_v48 }
  0xf7   : > { %v9369_v37 = vsel %vm2817_vm10, %v2883_v61, %v2884_v56  ;;  %v2876_v61 = vrot.slane %v9042_v42, 1  ;;  %v9425_v48 = vsel %vm2817_vm10, %v2884_v56, %v2886_v9 }
  0xf8   : > { %2928 = vrot.lane.b32.xlu1 %v9333_v2, %s8339_s5 }
  0xf9   : > { %2942 = vrot.lane.b32.xlu0 %v9339_v10, %s8339_s5  ;;  %v9395_v15 = vsel %vm2817_vm10, %v2874_v54, %v2876_v61  ;;  %v9411_v54 = vsel %vm2817_vm10, %v2879_v0, %v2881_v32  ;;  %v1980_v61 = vsel %vm8438_vm4, %v1115_v19, %v1979_v11  ;;  %v2891_v0 = vrot.slane %v9138_v26, 1 }
  0xfa   : > { %13701 = vst [vmem:[#allocation59_spill] sm:$0xff] %v9395_v15  ;;  %1981 = vst [vmem:[#allocation2 + $0x150] sm:$0x1] %v1980_v61  ;;  %v2896_v11 = vrot.slane %v9155_v16, 1 }
  0xfb   : > { %v9433_v18 = vsel %vm2817_vm10, %v2889_v33, %v2891_v0  ;;  %v9487_v0 = vld [vmem:[#allocation2 + $0xb4] sm:$0xff]  }
  0xfc   : > { %2932 = vrot.lane.b32.xlu1 %v9346_v57, %s8339_s5  ;;  %v9375_v57 = vpop.permute.xlu1 %2763 }
  0xfd   : > { %2946 = vrot.lane.b32.xlu0 %v9356_v63, %s8339_s5  ;;  %13699 = vst [vmem:[#allocation57_spill] sm:$0xff] %v9375_v57  ;;  %v9388_v63 = vsel %vm2817_vm10, %v2888_v60, %v2889_v33  ;;  %v2894_v57 = vrot.slane %v9105_v47, 1 }
 0x100   : > { %2936 = vrot.lane.b32.xlu1 %v9363_v36, %s8339_s5  ;;  %v2893_v36 = vrot.slane %v9097_v40, 1  ;;  %v9400_v42 = vpop.permute.xlu1 %2767 }
 0x101   : > { %2950 = vrot.lane.b32.xlu0 %v9369_v37, %s8339_s5  ;;  %13702 = vst [vmem:[#allocation60_spill] sm:$0xff] %v9400_v42 }
 0x102   : > { %v9405_v60 = vsel %vm2817_vm10, %v2893_v36, %v2894_v57  ;;  %v9422_v36 = vpop.permute.xlu0 %2781 }
 0x103   : > { %13705 = vst [vmem:[#allocation63_spill] sm:$0xff] %v9422_v36  ;;  %v13742_v36 = vld [vmem:[#allocation14_spill] sm:$0xff] }
 0x104   : > { %2940 = vrot.lane.b32.xlu1 %v9382_v58, %s8339_s5  ;;  %v9420_v50 = vpop.permute.xlu1 %2771 }
 0x105   : > { %2954 = vrot.lane.b32.xlu0 %v9388_v63, %s8339_s5  ;;  %13704 = vst [vmem:[#allocation62_spill] sm:$0xff] %v9420_v50  ;;  %v13746_v50 = vld [vmem:[#allocation16_spill] sm:$0xff] }
 0x106   : > { %v9440_v56 = vpop.permute.xlu0 %2785 }
 0x107   : > { %13707 = vst [vmem:[#allocation65_spill] sm:$0xff] %v9440_v56 }
 0x108   : > { %2944 = vrot.lane.b32.xlu1 %v9395_v15, %s8339_s5  ;;  %v9438_v32 = vpop.permute.xlu1 %2775 }
 0x109   : > { %2958 = vrot.lane.b32.xlu0 %v9405_v60, %s8339_s5  ;;  %13706 = vst [vmem:[#allocation64_spill] sm:$0xff] %v9438_v32 }
 0x10a   : > { %v9453_v26 = vpop.permute.xlu0 %2789 }
 0x10b   : > { %13709 = vst [vmem:[#allocation67_spill] sm:$0xff] %v9453_v26  ;;  %v9497_v26 = vld [vmem:[#allocation2 + $0xc8] sm:$0xff]  }
 0x10c   : > { %2948 = vrot.lane.b32.xlu1 %v9411_v54, %s8339_s5  ;;  %v9451_v16 = vpop.permute.xlu1 %2779 }
 0x10d   : > { %2972 = vrot.lane.b32.xlu0 %v9131_v51, %s8340_s6  ;;  %v9445_v51 = vsel %vm2817_vm10, %v2894_v57, %v2896_v11  ;;  %13708 = vst [vmem:[#allocation66_spill] sm:$0xff] %v9451_v16  ;;  %v13716_v11 = vld [vmem:[#allocation44_spill] sm:$0xff] }
 0x10e   : > { %v9463_v33 = vpop.permute.xlu0 %2793 }
 0x10f   : > { %13711 = vst [vmem:[#allocation69_spill] sm:$0xff] %v9463_v33 }
 0x110   : > { %2952 = vrot.lane.b32.xlu1 %v9425_v48, %s8339_s5  ;;  %v9461_v57 = vpop.permute.xlu1 %2783 }
 0x111   : > { %2976 = vrot.lane.b32.xlu0 %v9141_v5, %s8340_s6  ;;  %13710 = vst [vmem:[#allocation68_spill] sm:$0xff] %v9461_v57 }
 0x112   : > { %v9473_v9 = vpop.permute.xlu0 %2797 }
 0x113   : > { %13713 = vst [vmem:[#allocation71_spill] sm:$0xff] %v9473_v9 }
 0x114   : > { %2956 = vrot.lane.b32.xlu1 %v9433_v18, %s8339_s5  ;;  %v9471_v19 = vpop.permute.xlu1 %2787 }
 0x115   : > { %2980 = vrot.lane.b32.xlu0 %v9162_v41, %s8340_s6  ;;  %13712 = vst [vmem:[#allocation70_spill] sm:$0xff] %v9471_v19 }
 0x118   : > { %2960 = vrot.lane.b32.xlu1 %v9445_v51, %s8339_s5 }
 0x119   : > { %2984 = vrot.lane.b32.xlu0 %v9186_v28, %s8340_s6 }
 0x11b   : > { %v9483_v61 = vpop.permute.xlu0 %2801 }
 0x11c   : > { %2974 = vrot.lane.b32.xlu1 %v9134_v17, %s8340_s6  ;;  %v9481_v17 = vpop.permute.xlu1 %2791  ;;  %13715 = vst [vmem:[#allocation73_spill] sm:$0xff] %v9483_v61 }
 0x11d   : > { %2988 = vrot.lane.b32.xlu0 %v9198_v20, %s8340_s6  ;;  %13714 = vst [vmem:[#allocation72_spill] sm:$0xff] %v9481_v17 }
 0x120   : > { %2978 = vrot.lane.b32.xlu1 %v9144_v6, %s8340_s6 }
 0x121   : > { %2992 = vrot.lane.b32.xlu0 %v9219_v62, %s8340_s6  ;;  %v9493_v9 = vpop.permute.xlu1 %2795 }
 0x122   : > { %13717 = vst [vmem:[#allocation44_spill] sm:$0xff] %v9493_v9 }
 0x124   : > { %2982 = vrot.lane.b32.xlu1 %v9171_v3, %s8340_s6 }
 0x125   : > { %2996 = vrot.lane.b32.xlu0 %v9240_v13, %s8340_s6 }
 0x126   : > { %v9495_v33 = vpop.permute.xlu0 %2805 }
 0x127   : > { %13718 = vst [vmem:[#allocation74_spill] sm:$0xff] %v9495_v33  ;;  %v9513_v33 = vld [vmem:[#allocation2 + $0xbc] sm:$0xff]  }
 0x128   : > { %2986 = vrot.lane.b32.xlu1 %v9189_v27, %s8340_s6  ;;  %13721 = vst [vmem:[#allocation77_spill] sm:$0xff] %v9513_v33 }
 0x129   : > { %3000 = vrot.lane.b32.xlu0 %v9275_v25, %s8340_s6 }
 0x12b   : > { %v9503_v61 = vpop.permute.xlu1 %2799 }
 0x12c   : > { %2990 = vrot.lane.b32.xlu1 %v9201_v45, %s8340_s6  ;;  %13719 = vst [vmem:[#allocation75_spill] sm:$0xff] %v9503_v61 }
 0x12d   : > { %3004 = vrot.lane.b32.xlu0 %v9487_v0, %s8340_s6 }
 0x12f   : > { %v9507_v17 = vpop.permute.xlu0 %2809 }
 0x130   : > { %2994 = vrot.lane.b32.xlu1 %v13716_v11, %s8340_s6  ;;  %13720 = vst [vmem:[#allocation76_spill] sm:$0xff] %v9507_v17 }
 0x131   : > { %3008 = vrot.lane.b32.xlu0 %v9497_v26, %s8340_s6 }
 0x134   : > { %2998 = vrot.lane.b32.xlu1 %v9249_v21, %s8340_s6  ;;  %v9517_v9 = vpop.permute.xlu1 %2803 }
 0x135   : > { %3012 = vrot.lane.b32.xlu0 %v8905_v53, %s8340_s6  ;;  %13722 = vst [vmem:[#allocation78_spill] sm:$0xff] %v9517_v9  ;;  %v9523_v53 = vld [vmem:[#allocation2 + $0xd0] sm:$0xff]  }
 0x136   : > { %13724 = vst [vmem:[#allocation80_spill] sm:$0xff] %v9523_v53 }
 0x138   : > { %3002 = vrot.lane.b32.xlu1 %v9278_v14, %s8340_s6 }
 0x139   : > { %3016 = vrot.lane.b32.xlu0 %v8955_v49, %s8340_s6 }
 0x13b   : > { %v9519_v19 = vpop.permute.xlu0 %2813 }
 0x13c   : > { %3006 = vrot.lane.b32.xlu1 %v9513_v33, %s8340_s6  ;;  %13723 = vst [vmem:[#allocation79_spill] sm:$0xff] %v9519_v19 }
 0x13d   : > { %3020 = vrot.lane.b32.xlu0 %v9009_v12, %s8340_s6  ;;  %v9541_v12 = vld [vmem:[#allocation2 + $0x140] sm:$0xff]  }
 0x13f   : > { %v9527_v17 = vpop.permute.xlu0 %2898 }
 0x140   : > { %3010 = vrot.lane.b32.xlu1 %v9523_v53, %s8340_s6  ;;  %13725 = vst [vmem:[#allocation81_spill] sm:$0xff] %v9527_v17 }
 0x141   : > { %3024 = vrot.lane.b32.xlu0 %v9054_v7, %s8340_s6 }
 0x142   : > { %v9529_v49 = vpop.permute.xlu1 %2807 }
 0x143   : > { %13726 = vst [vmem:[#allocation82_spill] sm:$0xff] %v9529_v49  ;;  %v9535_v9 = vpop.permute.xlu0 %2902 }
 0x144   : > { %3014 = vrot.lane.b32.xlu1 %v8922_v35, %s8340_s6  ;;  %13727 = vst [vmem:[#allocation83_spill] sm:$0xff] %v9535_v9  ;;  %v13763_v9 = vld [vmem:[#allocation23_spill] sm:$0xff] }
 0x145   : > { %3028 = vrot.lane.b32.xlu0 %v9097_v40, %s8340_s6  ;;  %v13733_v40 = vld [vmem:[#allocation11_spill] sm:$0xff] }
 0x146   : > { %v9537_v19 = vpop.permute.xlu1 %2811 }
 0x147   : > { %13728 = vst [vmem:[#allocation84_spill] sm:$0xff] %v9537_v19  ;;  %v9545_v61 = vpop.permute.xlu0 %2906  ;;  %v13736_v19 = vld [vmem:[#allocation10_spill] sm:$0xff] }
 0x148   : > { %3018 = vrot.lane.b32.xlu1 %v8965_v44, %s8340_s6  ;;  %13729 = vst [vmem:[#allocation85_spill] sm:$0xff] %v9545_v61  ;;  %v13759_v61 = vld [vmem:[#allocation21_spill] sm:$0xff] }
 0x149   : > { %3032 = vrot.lane.b32.xlu0 %v9541_v12, %s8340_s6 }
 0x14a   : > { %v9547_v49 = vpop.permute.xlu1 %2815 }
 0x14b   : > { %13730 = vst [vmem:[#allocation86_spill] sm:$0xff] %v9547_v49  ;;  %v9553_v35 = vpop.permute.xlu0 %2910 }
 0x14c   : > { %3022 = vrot.lane.b32.xlu1 %v9013_v8, %s8340_s6  ;;  %13731 = vst [vmem:[#allocation87_spill] sm:$0xff] %v9553_v35  ;;  %v9569_v8 = vld [vmem:[#allocation2 + $0x148] sm:$0xff]   ;;  %v13755_v35 = vld [vmem:[#allocation19_spill] sm:$0xff] }
 0x14d   : > { %3059 = vrot.lane.b32.xlu0 %v13733_v40, %s8341_s7  ;;  %v13739_v40 = vld [vmem:[#allocation13_spill] sm:$0xff] }
 0x14e   : > { %v9555_v7 = vpop.permute.xlu1 %2900 }
 0x14f   : > { %13732 = vst [vmem:[#allocation88_spill] sm:$0xff] %v9555_v7  ;;  %v9561_v44 = vpop.permute.xlu0 %2914 }
 0x150   : > { %3026 = vrot.lane.b32.xlu1 %v9056_v39, %s8340_s6  ;;  %13734 = vst [vmem:[#allocation11_spill] sm:$0xff] %v9561_v44  ;;  %v13747_v44 = vld [vmem:[#allocation15_spill] sm:$0xff] }
 0x151   : > { %3063 = vrot.lane.b32.xlu0 %v13736_v19, %s8341_s7  ;;  %v13783_v19 = vld [vmem:[#allocation33_spill] sm:$0xff] }
 0x152   : > { %v9563_v49 = vpop.permute.xlu1 %2904 }
 0x153   : > { %13735 = vst [vmem:[#allocation89_spill] sm:$0xff] %v9563_v49  ;;  %v9571_v56 = vpop.permute.xlu0 %2918 }
 0x154   : > { %3030 = vrot.lane.b32.xlu1 %v9105_v47, %s8340_s6  ;;  %13737 = vst [vmem:[#allocation90_spill] sm:$0xff] %v9571_v56  ;;  %v13743_v47 = vld [vmem:[#allocation12_spill] sm:$0xff] }
 0x155   : > { %3067 = vrot.lane.b32.xlu0 %v13739_v40, %s8341_s7 }
 0x156   : > { %v9573_v57 = vpop.permute.xlu1 %2908 }
 0x157   : > { %13738 = vst [vmem:[#allocation91_spill] sm:$0xff] %v9573_v57  ;;  %v9579_v39 = vpop.permute.xlu0 %2922  ;;  %v13751_v57 = vld [vmem:[#allocation17_spill] sm:$0xff] }
 0x158   : > { %3034 = vrot.lane.b32.xlu1 %v9569_v8, %s8340_s6  ;;  %13740 = vst [vmem:[#allocation92_spill] sm:$0xff] %v9579_v39 }
 0x159   : > { %3071 = vrot.lane.b32.xlu0 %v13742_v36, %s8341_s7 }
 0x15a   : > { %v9581_v16 = vpop.permute.xlu1 %2912 }
 0x15b   : > { %13741 = vst [vmem:[#allocation93_spill] sm:$0xff] %v9581_v16  ;;  %v9587_v32 = vpop.permute.xlu0 %2926  ;;  %v13750_v16 = vld [vmem:[#allocation18_spill] sm:$0xff] }
 0x15c   : > { %3061 = vrot.lane.b32.xlu1 %v13743_v47, %s8341_s7  ;;  %13744 = vst [vmem:[#allocation12_spill] sm:$0xff] %v9587_v32 }
 0x15d   : > { %3075 = vrot.lane.b32.xlu0 %v13746_v50, %s8341_s7 }
 0x15e   : > { %v9589_v56 = vpop.permute.xlu1 %2916 }
 0x15f   : > { %13745 = vst [vmem:[#allocation94_spill] sm:$0xff] %v9589_v56  ;;  %v9595_v42 = vpop.permute.xlu0 %2930  ;;  %v13754_v56 = vld [vmem:[#allocation20_spill] sm:$0xff] }
 0x160   : > { %3065 = vrot.lane.b32.xlu1 %v13747_v44, %s8341_s7  ;;  %13748 = vst [vmem:[#allocation95_spill] sm:$0xff] %v9595_v42 }
 0x161   : > { %3079 = vrot.lane.b32.xlu0 %v13750_v16, %s8341_s7 }
 0x162   : > { %v9597_v39 = vpop.permute.xlu1 %2920 }
 0x163   : > { %13749 = vst [vmem:[#allocation96_spill] sm:$0xff] %v9597_v39  ;;  %v9603_v47 = vpop.permute.xlu0 %2934  ;;  %v13758_v39 = vld [vmem:[#allocation22_spill] sm:$0xff] }
 0x164   : > { %3069 = vrot.lane.b32.xlu1 %v13751_v57, %s8341_s7  ;;  %13752 = vst [vmem:[#allocation97_spill] sm:$0xff] %v9603_v47  ;;  %v491_v57 = vld [vmem:[%s8462_s30 + $0x104] sm:$0xf] }
 0x165   : > { %3083 = vrot.lane.b32.xlu0 %v13754_v56, %s8341_s7  ;;  %v490_v56 = vld [vmem:[%s8462_s30 + $0x100] sm:$0xf] }
 0x166   : > { %v9605_v32 = vpop.permute.xlu1 %2924  ;;  %v1117_v16 = vshrl.u32 %v490_v56, 16  ;;  %v1120_v50 = vshll.u32 %v490_v56, 16 }
 0x167   : > { %13753 = vst [vmem:[#allocation98_spill] sm:$0xff] %v9605_v32  ;;  %v9611_v49 = vpop.permute.xlu0 %2938  ;;  %v13762_v32 = vld [vmem:[#allocation24_spill] sm:$0xff] }
 0x168   : > { %3073 = vrot.lane.b32.xlu1 %v13755_v35, %s8341_s7  ;;  %13756 = vst [vmem:[#allocation99_spill] sm:$0xff] %v9611_v49  ;;  %v3047_v35 = vshll.u32 %v9569_v8, 16 }
 0x169   : > { %3087 = vrot.lane.b32.xlu0 %v13758_v39, %s8341_s7  ;;  %v13767_v39 = vld [vmem:[#allocation25_spill] sm:$0xff] }
 0x16a   : > { %v9613_v42 = vpop.permute.xlu1 %2928  ;;  %v3049_v40 = vrot.slane %v3047_v35, 1 }
 0x16b   : > { %13757 = vst [vmem:[#allocation100_spill] sm:$0xff] %v9613_v42  ;;  %v9619_v7 = vpop.permute.xlu0 %2942  ;;  %v13766_v42 = vld [vmem:[#allocation26_spill] sm:$0xff] }
 0x16c   : > { %3077 = vrot.lane.b32.xlu1 %v13759_v61, %s8341_s7  ;;  %13760 = vst [vmem:[#allocation101_spill] sm:$0xff] %v9619_v7 }
 0x16d   : > { %3091 = vrot.lane.b32.xlu0 %v13762_v32, %s8341_s7  ;;  %v13771_v32 = vld [vmem:[#allocation27_spill] sm:$0xff] }
 0x16e   : > { %v9621_v47 = vpop.permute.xlu1 %2932 }
 0x16f   : > { %13761 = vst [vmem:[#allocation102_spill] sm:$0xff] %v9621_v47  ;;  %v9627_v17 = vpop.permute.xlu0 %2946  ;;  %v13770_v47 = vld [vmem:[#allocation28_spill] sm:$0xff] }
 0x170   : > { %3081 = vrot.lane.b32.xlu1 %v13763_v9, %s8341_s7  ;;  %13764 = vst [vmem:[#allocation103_spill] sm:$0xff] %v9627_v17 }
 0x171   : > { %3095 = vrot.lane.b32.xlu0 %v13766_v42, %s8341_s7  ;;  %v13774_v42 = vld [vmem:[#allocation30_spill] sm:$0xff] }
 0x172   : > { %v9629_v49 = vpop.permute.xlu1 %2936 }
 0x173   : > { %13765 = vst [vmem:[#allocation104_spill] sm:$0xff] %v9629_v49  ;;  %v9635_v61 = vpop.permute.xlu0 %2950 }
 0x174   : > { %3085 = vrot.lane.b32.xlu1 %v13767_v39, %s8341_s7  ;;  %13768 = vst [vmem:[#allocation105_spill] sm:$0xff] %v9635_v61  ;;  %v3042_v39 = vshll.u32 %v9541_v12, 16  ;;  %v13775_v61 = vld [vmem:[#allocation29_spill] sm:$0xff] }
 0x175   : > { %3099 = vrot.lane.b32.xlu0 %v13770_v47, %s8341_s7  ;;  %v280_v47 = vld [vmem:[#allocation2 + $0x154] sm:$0x1] }
 0x176   : > { %v9637_v7 = vpop.permute.xlu1 %2940  ;;  %v281_v9 = vsel %vm8438_vm4, 0, %v280_v47  ;;  %v1125_v47 = vshrl.u32 %v491_v57, 16 }
 0x177   : > { %13769 = vst [vmem:[#allocation106_spill] sm:$0xff] %v9637_v7  ;;  %v9643_v17 = vpop.permute.xlu0 %2954  ;;  %282 = vst [vmem:[#allocation2 + $0x154] sm:$0x1] %v281_v9 }
 0x178   : > { %3089 = vrot.lane.b32.xlu1 %v13771_v32, %s8341_s7  ;;  %13772 = vst [vmem:[#allocation107_spill] sm:$0xff] %v9643_v17  ;;  %v13778_v17 = vld [vmem:[#allocation32_spill] sm:$0xff]  ;;  %v1127_v9 = vrot.slane %v1125_v47, 7 }
 0x179   : > { %3103 = vrot.lane.b32.xlu0 %v13774_v42, %s8341_s7  ;;  %v3044_v42 = vrot.slane %v3042_v39, 1  ;;  %v1128_v39 = vshll.u32 %v491_v57, 16 }
 0x17a   : > { %v9645_v49 = vpop.permute.xlu1 %2944 }
 0x17b   : > { %13773 = vst [vmem:[#allocation108_spill] sm:$0xff] %v9645_v49  ;;  %v9652_v7 = vpop.permute.xlu0 %2958  ;;  %v3040_v49 = vshrl.u32 %v9541_v12, 16  ;;  %v1130_v33 = vor.u32 %v1128_v39, %v1127_v9 }
 0x17c   : > { %3093 = vrot.lane.b32.xlu1 %v13775_v61, %s8341_s7  ;;  %13776 = vst [vmem:[#allocation109_spill] sm:$0xff] %v9652_v7  ;;  %v13779_v61 = vld [vmem:[#allocation31_spill] sm:$0xff] }
 0x17d   : > { %3107 = vrot.lane.b32.xlu0 %v13778_v17, %s8341_s7  ;;  %v1119_v17 = vrot.slane %v1117_v16, 7  ;;  %v3045_v36 = vor.u32 %v3044_v42, %v3040_v49  ;;  %v13786_v16 = vld [vmem:[#allocation36_spill] sm:$0xff]  ;;  %v13788_v49 = vld [vmem:[#allocation35_spill] sm:$0xff] }
 0x17e   : > { %v9656_v32 = vpop.permute.xlu1 %2948 }
 0x17f   : > { %13777 = vst [vmem:[#allocation110_spill] sm:$0xff] %v9656_v32  ;;  %v9666_v7 = vpop.permute.xlu0 %2972  ;;  %v13782_v32 = vld [vmem:[#allocation34_spill] sm:$0xff]  ;;  %v1123_v53 = vrot.slane %v1119_v17, 4  ;;  %v9685_v57 = vsel %vm13630_vm6, %v3045_v36, %v3049_v40 }
 0x180   : > { %3097 = vrot.lane.b32.xlu1 %v13779_v61, %s8341_s7  ;;  %13780 = vst [vmem:[#allocation111_spill] sm:$0xff] %v9666_v7  ;;  %v1122_v7 = vor.u32 %v1120_v50, %v1119_v17  ;;  %13787 = vst [vmem:[#allocation114_spill] sm:$0xff] %v9685_v57  ;;  %v492_v50 = vld [vmem:[%s8462_s30 + $0x108] sm:$0xf]  ;;  %v493_v17 = vld [vmem:[%s8462_s30 + $0x10c] sm:$0xf] }
 0x181   : > { %3111 = vrot.lane.b32.xlu0 %v13782_v32, %s8341_s7  ;;  %v1131_v56 = vsel %vm8472_vm8, %v1123_v53, %v1130_v33  ;;  %v1134_v47 = vshrl.u32 %v492_v50, 16  ;;  %v1143_v39 = vshrl.u32 %v493_v17, 16  ;;  %v1137_v53 = vshll.u32 %v492_v50, 16  ;;  %v13794_v50 = vld [vmem:[#allocation38_spill] sm:$0xff] }
 0x182   : > { %v9668_v44 = vpop.permute.xlu1 %2952  ;;  %1985 = vst.msk [vmem:[#allocation2 + $0x158] sm:$0xf] %vm215_vm0, %v1131_v56  ;;  %v13791_v56 = vld [vmem:[#allocation37_spill] sm:$0xff] }
 0x183   : > { %13781 = vst [vmem:[#allocation112_spill] sm:$0xff] %v9668_v44  ;;  %v9674_v61 = vpop.permute.xlu0 %2976  ;;  %v1982_v44 = vld [vmem:[#allocation2 + $0x154] sm:$0xf]  ;;  %v1136_v36 = vrot.slane %v1134_v47, 7 }
 0x184   : > { %3101 = vrot.lane.b32.xlu1 %v13783_v19, %s8341_s7  ;;  %13784 = vst [vmem:[#allocation34_spill] sm:$0xff] %v9674_v61  ;;  %v1983_v42 = vsel %vm8478_vm9, %v1122_v7, %v1982_v44  ;;  %v9700_v7 = vrot.slane %v1143_v39, 7  ;;  %v1146_v44 = vshll.u32 %v493_v17, 16  ;;  %v13795_v47 = vld [vmem:[#allocation39_spill] sm:$0xff] }
 0x185   : > { %3115 = vrot.lane.b32.xlu0 %v13786_v16, %s8341_s7  ;;  %1984 = vst [vmem:[#allocation2 + $0x154] sm:$0xf] %v1983_v42  ;;  %v1139_v61 = vor.u32 %v1137_v53, %v1136_v36 }
 0x186   : > { %v9676_v14 = vpop.permute.xlu1 %2956  ;;  %v1148_v16 = vor.u32 %v1146_v44, %v9700_v7 }
 0x187   : > { %13785 = vst [vmem:[#allocation113_spill] sm:$0xff] %v9676_v14  ;;  %v9692_v35 = vpop.permute.xlu0 %2980  ;;  %v9694_v14 = vld [vmem:[#allocation2 + $0x150] ss:$0 sps:$4 sm:$0x11]  }
 0x188   : > { %3105 = vrot.lane.b32.xlu1 %v13788_v49, %s8341_s7  ;;  %13789 = vst [vmem:[#allocation115_spill] sm:$0xff] %v9692_v35  ;;  %v1132_v35 = vrot.slane %v1127_v9, 4  ;;  %v1141_v49 = vrot.slane %v1136_v36, 4  ;;  %v3055_v19 = vshll.u32 %v9694_v14, 16 }
 0x189   : > { %3119 = vrot.lane.b32.xlu0 %v9685_v57, %s8341_s7 }
 0x18a   : > { %v9696_v33 = vpop.permute.xlu1 %2960  ;;  %v1140_v17 = vsel %vm8472_vm8, %v1132_v35, %v1139_v61  ;;  %v1149_v9 = vsel %vm8472_vm8, %v1141_v49, %v1148_v16  ;;  %v3057_v53 = vrot.slane %v3055_v19, 1  ;;  %v13799_v61 = vld [vmem:[#allocation41_spill] sm:$0xff] }
 0x18b   : > { %13790 = vst [vmem:[#allocation116_spill] sm:$0xff] %v9696_v33  ;;  %v9704_v42 = vpop.permute.xlu0 %2984  ;;  %v3051_v33 = vshrl.u32 %v9569_v8, 16  ;;  %1986 = vst.msk [vmem:[#allocation2 + $0x15c] sm:$0xf] %vm215_vm0, %v1140_v17  ;;  %v13802_v17 = vld [vmem:[#allocation42_spill] sm:$0xff] }
 0x18c   : > { %3109 = vrot.lane.b32.xlu1 %v13791_v56, %s8341_s7  ;;  %13792 = vst [vmem:[#allocation37_spill] sm:$0xff] %v9704_v42  ;;  %1987 = vst.msk [vmem:[#allocation2 + $0x160] sm:$0xf] %vm215_vm0, %v1149_v9 }
 0x18d   : > { %3128 = vrot.lane.b32.xlu0 %v13794_v50, %s8342_s8  ;;  %v3053_v36 = vor.u32 %v3051_v33, %v3049_v40  ;;  %v13798_v50 = vld [vmem:[#allocation40_spill] sm:$0xff]  ;;  %v13805_v33 = vld [vmem:[#allocation43_spill] sm:$0xff] }
 0x18e   : > { %v9709_v57 = vpop.permute.xlu1 %2974 }
 0x18f   : > { %13793 = vst [vmem:[#allocation117_spill] sm:$0xff] %v9709_v57  ;;  %v9721_v39 = vpop.permute.xlu0 %2988  ;;  %v9732_v49 = vsel %vm13630_vm6, %v3053_v36, %v3057_v53  ;;  %v1150_v57 = vrot.slane %v9700_v7, 4 }
 0x190   : > { %3113 = vrot.lane.b32.xlu1 %v13795_v47, %s8341_s7  ;;  %13796 = vst [vmem:[#allocation38_spill] sm:$0xff] %v9721_v39  ;;  %v13825_v39 = vld [vmem:[#allocation56_spill] sm:$0xff] }
 0x191   : > { %3132 = vrot.lane.b32.xlu0 %v13798_v50, %s8342_s8 }
 0x192   : > { %v9723_v44 = vpop.permute.xlu1 %2978 }
 0x193   : > { %13797 = vst [vmem:[#allocation39_spill] sm:$0xff] %v9723_v44  ;;  %v9729_v16 = vpop.permute.xlu0 %2992 }
 0x194   : > { %3117 = vrot.lane.b32.xlu1 %v13799_v61, %s8341_s7  ;;  %13800 = vst [vmem:[#allocation40_spill] sm:$0xff] %v9729_v16 }
 0x195   : > { %3136 = vrot.lane.b32.xlu0 %v13802_v17, %s8342_s8 }
 0x196   : > { %v9734_v35 = vpop.permute.xlu1 %2982 }
 0x197   : > { %13801 = vst [vmem:[#allocation41_spill] sm:$0xff] %v9734_v35  ;;  %v9740_v19 = vpop.permute.xlu0 %2996 }
 0x198   : > { %3121 = vrot.lane.b32.xlu1 %v9732_v49, %s8341_s7  ;;  %13803 = vst [vmem:[#allocation42_spill] sm:$0xff] %v9740_v19 }
 0x199   : > { %3140 = vrot.lane.b32.xlu0 %v13805_v33, %s8342_s8 }
 0x19a   : > { %v9742_v40 = vpop.permute.xlu1 %2986 }
 0x19b   : > { %13804 = vst [vmem:[#allocation118_spill] sm:$0xff] %v9742_v40  ;;  %v9748_v9 = vpop.permute.xlu0 %3000 }
 0x19c   : > { %3130 = vrot.lane.b32.xlu1 %v9207_v52, %s8342_s8  ;;  %13806 = vst [vmem:[#allocation43_spill] sm:$0xff] %v9748_v9 }
 0x19d   : > { %3144 = vrot.lane.b32.xlu0 %v9229_v43, %s8342_s8 }
 0x19e   : > { %v9750_v36 = vpop.permute.xlu1 %2990 }
 0x19f   : > { %13807 = vst [vmem:[#allocation119_spill] sm:$0xff] %v9750_v36  ;;  %v9756_v53 = vpop.permute.xlu0 %3004 }
 0x1a0   : > { %3134 = vrot.lane.b32.xlu1 %v9217_v46, %s8342_s8  ;;  %13808 = vst [vmem:[#allocation120_spill] sm:$0xff] %v9756_v53 }
 0x1a1   : > { %3148 = vrot.lane.b32.xlu0 %v9247_v23, %s8342_s8 }
 0x1a2   : > { %v9758_v19 = vpop.permute.xlu1 %2994 }
 0x1a3   : > { %13809 = vst [vmem:[#allocation121_spill] sm:$0xff] %v9758_v19  ;;  %v9764_v52 = vpop.permute.xlu0 %3008 }
 0x1a4   : > { %3138 = vrot.lane.b32.xlu1 %v9265_v59, %s8342_s8  ;;  %13810 = vst [vmem:[#allocation122_spill] sm:$0xff] %v9764_v52 }
 0x1a5   : > { %3152 = vrot.lane.b32.xlu0 %v9273_v29, %s8342_s8 }
 0x1a6   : > { %v9766_v9 = vpop.permute.xlu1 %2998 }
 0x1a7   : > { %13811 = vst [vmem:[#allocation123_spill] sm:$0xff] %v9766_v9  ;;  %v9772_v36 = vpop.permute.xlu0 %3012 }
 0x1a8   : > { %3142 = vrot.lane.b32.xlu1 %v9288_v22, %s8342_s8  ;;  %13812 = vst [vmem:[#allocation124_spill] sm:$0xff] %v9772_v36 }
 0x1a9   : > { %3156 = vrot.lane.b32.xlu0 %v9295_v24, %s8342_s8 }
 0x1aa   : > { %v9774_v53 = vpop.permute.xlu1 %3002 }
 0x1ab   : > { %13813 = vst [vmem:[#allocation125_spill] sm:$0xff] %v9774_v53  ;;  %v9780_v19 = vpop.permute.xlu0 %3016  ;;  %v13818_v53 = vld [vmem:[#allocation49_spill] sm:$0xff] }
 0x1ac   : > { %3146 = vrot.lane.b32.xlu1 %v9302_v34, %s8342_s8  ;;  %13814 = vst [vmem:[#allocation126_spill] sm:$0xff] %v9780_v19 }
 0x1ad   : > { %3160 = vrot.lane.b32.xlu0 %v9309_v31, %s8342_s8 }
 0x1ae   : > { %v9782_v52 = vpop.permute.xlu1 %3006 }
 0x1af   : > { %13815 = vst [vmem:[#allocation127_spill] sm:$0xff] %v9782_v52  ;;  %v9788_v9 = vpop.permute.xlu0 %3020  ;;  %v13821_v52 = vld [vmem:[#allocation52_spill] sm:$0xff] }
 0x1b0   : > { %3150 = vrot.lane.b32.xlu1 %v9316_v55, %s8342_s8  ;;  %13816 = vst [vmem:[#allocation128_spill] sm:$0xff] %v9788_v9 }
 0x1b1   : > { %3164 = vrot.lane.b32.xlu0 %v13818_v53, %s8342_s8 }
 0x1b2   : > { %v9790_v36 = vpop.permute.xlu1 %3010 }
 0x1b3   : > { %13817 = vst [vmem:[#allocation129_spill] sm:$0xff] %v9790_v36  ;;  %v9796_v16 = vpop.permute.xlu0 %3024  ;;  %v13824_v36 = vld [vmem:[#allocation55_spill] sm:$0xff] }
 0x1b4   : > { %3154 = vrot.lane.b32.xlu1 %v9333_v2, %s8342_s8  ;;  %13819 = vst [vmem:[#allocation49_spill] sm:$0xff] %v9796_v16 }
 0x1b5   : > { %3168 = vrot.lane.b32.xlu0 %v9339_v10, %s8342_s8 }
 0x1b6   : > { %v9798_v19 = vpop.permute.xlu1 %3014 }
 0x1b7   : > { %13820 = vst [vmem:[#allocation130_spill] sm:$0xff] %v9798_v19  ;;  %v9804_v40 = vpop.permute.xlu0 %3028  ;;  %v378_v19 = vld [vmem:[#allocation2 + $0x164] sm:$0x1] }
 0x1b8   : > { %3158 = vrot.lane.b32.xlu1 %v13821_v52, %s8342_s8  ;;  %13822 = vst [vmem:[#allocation52_spill] sm:$0xff] %v9804_v40 }
 0x1b9   : > { %3172 = vrot.lane.b32.xlu0 %v13824_v36, %s8342_s8 }
 0x1ba   : > { %v9806_v9 = vpop.permute.xlu1 %3018 }
 0x1bb   : > { %13823 = vst [vmem:[#allocation131_spill] sm:$0xff] %v9806_v9  ;;  %v9812_v35 = vpop.permute.xlu0 %3032  ;;  %v379_v9 = vsel %vm8444_vm5, 0, %v378_v19 }
 0x1bc   : > { %3162 = vrot.lane.b32.xlu1 %v13825_v39, %s8342_s8  ;;  %13826 = vst [vmem:[#allocation55_spill] sm:$0xff] %v9812_v35  ;;  %380 = vst [vmem:[#allocation2 + $0x164] sm:$0x1] %v379_v9  ;;  %v3123_v35 = vrot.slane %v9541_v12, 1 }
 0x1bd   : > { %3176 = vrot.lane.b32.xlu0 %v9369_v37, %s8342_s8 }
 0x1be   : > { %v9814_v16 = vpop.permute.xlu1 %3022 }
 0x1bf   : > { %13827 = vst [vmem:[#allocation56_spill] sm:$0xff] %v9814_v16  ;;  %v9820_v40 = vpop.permute.xlu0 %3059  ;;  %v3124_v16 = vrot.slane %v9569_v8, 1 }
 0x1c0   : > { %3166 = vrot.lane.b32.xlu1 %v9382_v58, %s8342_s8  ;;  %13828 = vst [vmem:[#allocation132_spill] sm:$0xff] %v9820_v40 }
 0x1c1   : > { %3180 = vrot.lane.b32.xlu0 %v9388_v63, %s8342_s8  ;;  %v9840_v19 = vsel %vm2817_vm10, %v3123_v35, %v3124_v16 }
 0x1c2   : > { %v9824_v42 = vpop.permute.xlu1 %3026 }
 0x1c3   : > { %13829 = vst [vmem:[#allocation133_spill] sm:$0xff] %v9824_v42  ;;  %v9832_v44 = vpop.permute.xlu0 %3063  ;;  %v1988_v42 = vld [vmem:[#allocation2 + $0x164] sm:$0x1] }
 0x1c4   : > { %3170 = vrot.lane.b32.xlu1 %v9395_v15, %s8342_s8  ;;  %13830 = vst [vmem:[#allocation134_spill] sm:$0xff] %v9832_v44  ;;  %v1989_v15 = vsel %vm8438_vm4, %v1150_v57, %v1988_v42  ;;  %v3126_v42 = vrot.slane %v9694_v14, 1 }
 0x1c5   : > { %3184 = vrot.lane.b32.xlu0 %v9405_v60, %s8342_s8  ;;  %1990 = vst [vmem:[#allocation2 + $0x164] sm:$0x1] %v1989_v15 }
 0x1c6   : > { %v9835_v40 = vpop.permute.xlu1 %3030 }
 0x1c7   : > { %13831 = vst [vmem:[#allocation135_spill] sm:$0xff] %v9835_v40  ;;  %v9844_v9 = vpop.permute.xlu0 %3067  ;;  %v9874_v40 = vsel %vm2817_vm10, %v3124_v16, %v3126_v42 }
 0x1c8   : > { %3174 = vrot.lane.b32.xlu1 %v9411_v54, %s8342_s8  ;;  %13832 = vst [vmem:[#allocation136_spill] sm:$0xff] %v9844_v9  ;;  %13839 = vst [vmem:[#allocation143_spill] sm:$0xff] %v9874_v40 }
 0x1c9   : > { %3188 = vrot.lane.b32.xlu0 %v9840_v19, %s8342_s8 }
 0x1ca   : > { %v9848_v44 = vpop.permute.xlu1 %3034 }
 0x1cb   : > { %13833 = vst [vmem:[#allocation137_spill] sm:$0xff] %v9848_v44  ;;  %v9854_v7 = vpop.permute.xlu0 %3071 }
 0x1cc   : > { %3178 = vrot.lane.b32.xlu1 %v9425_v48, %s8342_s8  ;;  %13834 = vst [vmem:[#allocation138_spill] sm:$0xff] %v9854_v7 }
 0x1cd   : > { %3202 = vrot.lane.b32.xlu0 %v9141_v5, %s8343_s9 }
 0x1ce   : > { %v9856_v35 = vpop.permute.xlu1 %3061 }
 0x1cf   : > { %13835 = vst [vmem:[#allocation139_spill] sm:$0xff] %v9856_v35  ;;  %v9862_v57 = vpop.permute.xlu0 %3075 }
 0x1d0   : > { %3182 = vrot.lane.b32.xlu1 %v9433_v18, %s8342_s8  ;;  %13836 = vst [vmem:[#allocation140_spill] sm:$0xff] %v9862_v57 }
 0x1d1   : > { %3206 = vrot.lane.b32.xlu0 %v9162_v41, %s8343_s9 }
 0x1d2   : > { %v9865_v44 = vpop.permute.xlu1 %3065 }
 0x1d3   : > { %13837 = vst [vmem:[#allocation141_spill] sm:$0xff] %v9865_v44  ;;  %v9871_v15 = vpop.permute.xlu0 %3079 }
 0x1d4   : > { %3186 = vrot.lane.b32.xlu1 %v9445_v51, %s8342_s8  ;;  %13838 = vst [vmem:[#allocation142_spill] sm:$0xff] %v9871_v15 }
 0x1d5   : > { %3210 = vrot.lane.b32.xlu0 %v9186_v28, %s8343_s9 }
 0x1d6   : > { %v9876_v5 = vpop.permute.xlu1 %3069 }
 0x1d7   : > { %13840 = vst [vmem:[#allocation144_spill] sm:$0xff] %v9876_v5  ;;  %v9882_v14 = vpop.permute.xlu0 %3083 }
 0x1d8   : > { %3190 = vrot.lane.b32.xlu1 %v9874_v40, %s8342_s8  ;;  %13841 = vst [vmem:[#allocation145_spill] sm:$0xff] %v9882_v14  ;;  %v8166_v14 = vld [vmem:[#allocation2 + $0x10c] sm:$0xff]  }
 0x1d9   : > { %3214 = vrot.lane.b32.xlu0 %v9198_v20, %s8343_s9 }
 0x1da   : > { %v9884_v57 = vpop.permute.xlu1 %3073 }
 0x1db   : > { %13842 = vst [vmem:[#allocation146_spill] sm:$0xff] %v9884_v57  ;;  %v9890_v41 = vpop.permute.xlu0 %3087 }
 0x1dc   : > { %3204 = vrot.lane.b32.xlu1 %v9144_v6, %s8343_s9  ;;  %13843 = vst [vmem:[#allocation147_spill] sm:$0xff] %v9890_v41 }
 0x1dd   : > { %3218 = vrot.lane.b32.xlu0 %v9219_v62, %s8343_s9 }
 0x1de   : > { %v9892_v16 = vpop.permute.xlu1 %3077 }
 0x1df   : > { %13844 = vst [vmem:[#allocation148_spill] sm:$0xff] %v9892_v16  ;;  %v9898_v28 = vpop.permute.xlu0 %3091 }
 0x1e0   : > { %3208 = vrot.lane.b32.xlu1 %v9171_v3, %s8343_s9  ;;  %13845 = vst [vmem:[#allocation149_spill] sm:$0xff] %v9898_v28 }
 0x1e1   : > { %3222 = vrot.lane.b32.xlu0 %v9240_v13, %s8343_s9 }
 0x1e2   : > { %v9900_v42 = vpop.permute.xlu1 %3081 }
 0x1e3   : > { %13846 = vst [vmem:[#allocation150_spill] sm:$0xff] %v9900_v42  ;;  %v9906_v6 = vpop.permute.xlu0 %3095 }
 0x1e4   : > { %3212 = vrot.lane.b32.xlu1 %v9189_v27, %s8343_s9  ;;  %13847 = vst [vmem:[#allocation151_spill] sm:$0xff] %v9906_v6  ;;  %v8160_v6 = vld [vmem:[#allocation2 + $0xf0] sm:$0xff]  }
 0x1e5   : > { %3226 = vrot.lane.b32.xlu0 %v9275_v25, %s8343_s9 }
 0x1e6   : > { %v9908_v20 = vpop.permute.xlu1 %3085 }
 0x1e7   : > { %13848 = vst [vmem:[#allocation152_spill] sm:$0xff] %v9908_v20  ;;  %v9914_v62 = vpop.permute.xlu0 %3099  ;;  %v496_v20 = vld [vmem:[%s8462_s30 + $0x118] sm:$0xf] }
 0x1e8   : > { %3216 = vrot.lane.b32.xlu1 %v9201_v45, %s8343_s9  ;;  %13849 = vst [vmem:[#allocation153_spill] sm:$0xff] %v9914_v62  ;;  %v8159_v62 = vld [vmem:[#allocation2 + $0xdc] sm:$0xff]   ;;  %v1169_v15 = vshrl.u32 %v496_v20, 16  ;;  %v1172_v7 = vshll.u32 %v496_v20, 16 }
 0x1e9   : > { %3230 = vrot.lane.b32.xlu0 %v9487_v0, %s8343_s9  ;;  %v13855_v0 = vld [vmem:[#allocation46_spill] sm:$0xff] }
 0x1ea   : > { %v9916_v3 = vpop.permute.xlu1 %3089 }
 0x1eb   : > { %13850 = vst [vmem:[#allocation154_spill] sm:$0xff] %v9916_v3  ;;  %v9922_v13 = vpop.permute.xlu0 %3103  ;;  %v286_v3 = vld [vmem:[#allocation2 + $0x17c] sm:$0x1] }
 0x1ec   : > { %3220 = vrot.lane.b32.xlu1 %v13716_v11, %s8343_s9  ;;  %13851 = vst [vmem:[#allocation155_spill] sm:$0xff] %v9922_v13 }
 0x1ed   : > { %3234 = vrot.lane.b32.xlu0 %v9497_v26, %s8343_s9  ;;  %v13858_v26 = vld [vmem:[#allocation77_spill] sm:$0xff] }
 0x1ee   : > { %v9924_v27 = vpop.permute.xlu1 %3093 }
 0x1ef   : > { %13852 = vst [vmem:[#allocation156_spill] sm:$0xff] %v9924_v27  ;;  %v9930_v45 = vpop.permute.xlu0 %3107 }
 0x1f0   : > { %3224 = vrot.lane.b32.xlu1 %v9249_v21, %s8343_s9  ;;  %13853 = vst [vmem:[#allocation157_spill] sm:$0xff] %v9930_v45 }
 0x1f1   : > { %3238 = vrot.lane.b32.xlu0 %v8159_v62, %s8343_s9  ;;  %v13861_v62 = vld [vmem:[#allocation80_spill] sm:$0xff] }
 0x1f2   : > { %v9932_v25 = vpop.permute.xlu1 %3097 }
 0x1f3   : > { %13854 = vst [vmem:[#allocation158_spill] sm:$0xff] %v9932_v25  ;;  %v9937_v11 = vpop.permute.xlu0 %3111  ;;  %v8161_v25 = vld [vmem:[#allocation2 + $0x104] sm:$0xff]  }
 0x1f4   : > { %3228 = vrot.lane.b32.xlu1 %v13855_v0, %s8343_s9  ;;  %13856 = vst [vmem:[#allocation46_spill] sm:$0xff] %v9937_v11 }
 0x1f5   : > { %3242 = vrot.lane.b32.xlu0 %v8160_v6, %s8343_s9  ;;  %v8162_v6 = vld [vmem:[#allocation2 + $0x118] sm:$0xff]  }
 0x1f6   : > { %v9939_v13 = vpop.permute.xlu1 %3101 }
 0x1f7   : > { %13857 = vst [vmem:[#allocation159_spill] sm:$0xff] %v9939_v13  ;;  %v9944_v21 = vpop.permute.xlu0 %3115 }
 0x1f8   : > { %3232 = vrot.lane.b32.xlu1 %v13858_v26, %s8343_s9  ;;  %13859 = vst [vmem:[#allocation77_spill] sm:$0xff] %v9944_v21  ;;  %v8163_v26 = vld [vmem:[#allocation2 + $0xe4] sm:$0xff]  }
 0x1f9   : > { %3246 = vrot.lane.b32.xlu0 %v8161_v25, %s8343_s9  ;;  %v8164_v25 = vld [vmem:[#allocation2 + $0x12c] sm:$0xff]  }
 0x1fa   : > { %v9946_v45 = vpop.permute.xlu1 %3105 }
 0x1fb   : > { %13860 = vst [vmem:[#allocation160_spill] sm:$0xff] %v9946_v45  ;;  %v9951_v0 = vpop.permute.xlu0 %3119  ;;  %v283_v45 = vld [vmem:[#allocation2 + $0x168] sm:$0x1] }
 0x1fc   : > { %3236 = vrot.lane.b32.xlu1 %v13861_v62, %s8343_s9  ;;  %13862 = vst [vmem:[#allocation80_spill] sm:$0xff] %v9951_v0  ;;  %v284_v62 = vsel %vm8438_vm4, 0, %v283_v45  ;;  %v8165_v0 = vld [vmem:[#allocation2 + $0xf8] sm:$0xff]  }
 0x1fd   : > { %3250 = vrot.lane.b32.xlu0 %v8162_v6, %s8343_s9  ;;  %285 = vst [vmem:[#allocation2 + $0x168] sm:$0x1] %v284_v62  ;;  %v497_v45 = vld [vmem:[%s8462_s30 + $0x11c] sm:$0xf]  ;;  %v287_v62 = vsel %vm8438_vm4, 0, %v286_v3 }
 0x1fe   : > { %v9953_v11 = vpop.permute.xlu1 %3109  ;;  %288 = vst [vmem:[#allocation2 + $0x17c] sm:$0x1] %v287_v62 }
 0x1ff   : > { %13863 = vst [vmem:[#allocation161_spill] sm:$0xff] %v9953_v11  ;;  %v9957_v21 = vpop.permute.xlu0 %3128  ;;  %v495_v11 = vld [vmem:[%s8462_s30 + $0x114] sm:$0xf] }
 0x200   : > { %3240 = vrot.lane.b32.xlu1 %v8163_v26, %s8343_s9  ;;  %13864 = vst [vmem:[#allocation162_spill] sm:$0xff] %v9957_v21  ;;  %v494_v26 = vld [vmem:[%s8462_s30 + $0x110] sm:$0xf]  ;;  %v1160_v28 = vshrl.u32 %v495_v11, 16  ;;  %v506_v21 = vld [vmem:[%s8462_s30 + $0x140] sm:$0xf] }
 0x201   : > { %3254 = vrot.lane.b32.xlu0 %v8164_v25, %s8343_s9  ;;  %v1152_v27 = vshrl.u32 %v494_v26, 16  ;;  %v9973_v25 = vld [vmem:[#allocation2 + $0x154] sm:$0xff]   ;;  %v1155_v41 = vshll.u32 %v494_v26, 16 }
 0x202   : > { %v9959_v13 = vpop.permute.xlu1 %3113  ;;  %v1162_v42 = vrot.slane %v1160_v28, 7  ;;  %v1171_v28 = vrot.slane %v1169_v15, 7 }
 0x203   : > { %13865 = vst [vmem:[#allocation163_spill] sm:$0xff] %v9959_v13  ;;  %v9965_v6 = vpop.permute.xlu0 %3132 }
 0x204   : > { %3244 = vrot.lane.b32.xlu1 %v8165_v0, %s8343_s9  ;;  %13866 = vst [vmem:[#allocation164_spill] sm:$0xff] %v9965_v6  ;;  %v1154_v0 = vrot.slane %v1152_v27, 7  ;;  %v1991_v26 = vld [vmem:[#allocation2 + $0x168] sm:$0xf]  ;;  %v1167_v62 = vrot.slane %v1162_v42, 4  ;;  %v1176_v15 = vrot.slane %v1171_v28, 4 }
 0x205   : > { %3258 = vrot.lane.b32.xlu0 %v9541_v12, %s8343_s9  ;;  %v1178_v12 = vshrl.u32 %v497_v45, 16  ;;  %v292_v6 = vld [vmem:[#allocation2 + $0x1a4] sm:$0x1] }
 0x206   : > { %v9969_v13 = vpop.permute.xlu1 %3117  ;;  %v1157_v57 = vor.u32 %v1155_v41, %v1154_v0  ;;  %v1158_v5 = vrot.slane %v1154_v0, 4  ;;  %v8167_v41 = vld [vmem:[#allocation2 + $0x120] sm:$0xff]  }
 0x207   : > { %13867 = vst [vmem:[#allocation165_spill] sm:$0xff] %v9969_v13  ;;  %v9980_v16 = vpop.permute.xlu0 %3136  ;;  %v1163_v13 = vshll.u32 %v495_v11, 16  ;;  %v9986_v27 = vrot.slane %v1178_v12, 7 }
 0x208   : > { %3248 = vrot.lane.b32.xlu1 %v8166_v14, %s8343_s9  ;;  %13868 = vst [vmem:[#allocation166_spill] sm:$0xff] %v9980_v16  ;;  %v1181_v14 = vshll.u32 %v497_v45, 16  ;;  %v1992_v11 = vsel %vm8478_vm9, %v1157_v57, %v1991_v26  ;;  %v498_v16 = vld [vmem:[%s8462_s30 + $0x120] sm:$0xf]  ;;  %v13872_v57 = vld [vmem:[#allocation10_spill] sm:$0xff] }
 0x209   : > { %3262 = vrot.lane.b32.xlu0 %v9973_v25, %s8343_s9  ;;  %v1165_v3 = vor.u32 %v1163_v13, %v1162_v42  ;;  %v1174_v13 = vor.u32 %v1172_v7, %v1171_v28  ;;  %1993 = vst [vmem:[#allocation2 + $0x168] sm:$0xf] %v1992_v11  ;;  %v499_v42 = vld [vmem:[%s8462_s30 + $0x124] sm:$0xf]  ;;  %v8168_v28 = vld [vmem:[#allocation2 + $0x134] sm:$0xff]  }
 0x20a   : > { %v9982_v44 = vpop.permute.xlu1 %3121  ;;  %v1183_v12 = vor.u32 %v1181_v14, %v9986_v27  ;;  %v500_v11 = vld [vmem:[%s8462_s30 + $0x128] sm:$0xf] }
 0x20b   : > { %13869 = vst [vmem:[#allocation167_spill] sm:$0xff] %v9982_v44  ;;  %v9992_v20 = vpop.permute.xlu0 %3140  ;;  %v1166_v0 = vsel %vm8472_vm8, %v1158_v5, %v1165_v3  ;;  %v1175_v26 = vsel %vm8472_vm8, %v1167_v62, %v1174_v13  ;;  %v1187_v5 = vshrl.u32 %v498_v16, 16  ;;  %v1190_v3 = vshll.u32 %v498_v16, 16  ;;  %v13875_v13 = vld [vmem:[#allocation13_spill] sm:$0xff] }
 0x20c   : > { %3252 = vrot.lane.b32.xlu1 %v8167_v41, %s8343_s9  ;;  %13870 = vst [vmem:[#allocation168_spill] sm:$0xff] %v9992_v20  ;;  %1994 = vst.msk [vmem:[#allocation2 + $0x16c] sm:$0xf] %vm215_vm0, %v1166_v0  ;;  %v1184_v7 = vsel %vm8472_vm8, %v1176_v15, %v1183_v12  ;;  %v1195_v0 = vshrl.u32 %v499_v42, 16  ;;  %v501_v20 = vld [vmem:[%s8462_s30 + $0x12c] sm:$0xf] }
 0x20d   : > { %3289 = vrot.lane.b32.xlu0 %v13872_v57, %s8344_s10  ;;  %1995 = vst.msk [vmem:[#allocation2 + $0x170] sm:$0xf] %vm215_vm0, %v1175_v26  ;;  %1996 = vst.msk [vmem:[#allocation2 + $0x174] sm:$0xf] %vm215_vm0, %v1184_v7  ;;  %v1189_v41 = vrot.slane %v1187_v5, 7  ;;  %v1198_v57 = vshll.u32 %v499_v42, 16 }
 0x20e   : > { %v9999_v45 = vpop.permute.xlu1 %3130  ;;  %v1197_v12 = vrot.slane %v1195_v0, 7  ;;  %v1204_v26 = vshrl.u32 %v500_v11, 16  ;;  %v2000_v7 = vld [vmem:[#allocation2 + $0x17c] sm:$0xf]  ;;  %v13878_v42 = vld [vmem:[#allocation14_spill] sm:$0xff] }
 0x20f   : > { %13871 = vst [vmem:[#allocation169_spill] sm:$0xff] %v9999_v45  ;;  %v10010_v14 = vpop.permute.xlu0 %3144  ;;  %v1192_v16 = vor.u32 %v1190_v3, %v1189_v41  ;;  %v1193_v15 = vrot.slane %v1189_v41, 4 }
 0x210   : > { %3256 = vrot.lane.b32.xlu1 %v8168_v28, %s8343_s9  ;;  %13873 = vst [vmem:[#allocation10_spill] sm:$0xff] %v10010_v14  ;;  %v10019_v28 = vld [vmem:[#allocation2 + $0x15c] sm:$0xff]   ;;  %v1200_v5 = vor.u32 %v1198_v57, %v1197_v12  ;;  %v1206_v0 = vrot.slane %v1204_v26, 7  ;;  %v1202_v57 = vrot.slane %v1197_v12, 4 }
 0x211   : > { %3293 = vrot.lane.b32.xlu0 %v13875_v13, %s8344_s10  ;;  %v2001_v41 = vsel %vm8478_vm9, %v1192_v16, %v2000_v7  ;;  %v1207_v13 = vshll.u32 %v500_v11, 16  ;;  %v289_v16 = vld [vmem:[#allocation2 + $0x190] sm:$0x1] }
 0x212   : > { %v10013_v62 = vpop.permute.xlu1 %3134  ;;  %v1201_v3 = vsel %vm8472_vm8, %v1193_v15, %v1200_v5  ;;  %2002 = vst [vmem:[#allocation2 + $0x17c] sm:$0xf] %v2001_v41  ;;  %v13881_v15 = vld [vmem:[#allocation16_spill] sm:$0xff]  ;;  %v1211_v7 = vrot.slane %v1206_v0, 4  ;;  %v13882_v41 = vld [vmem:[#allocation15_spill] sm:$0xff] }
 0x213   : > { %13874 = vst [vmem:[#allocation170_spill] sm:$0xff] %v10013_v62  ;;  %v10021_v44 = vpop.permute.xlu0 %3148  ;;  %2003 = vst.msk [vmem:[#allocation2 + $0x180] sm:$0xf] %vm215_vm0, %v1201_v3  ;;  %v1209_v26 = vor.u32 %v1207_v13, %v1206_v0  ;;  %v1216_v3 = vshll.u32 %v501_v20, 16  ;;  %v502_v11 = vld [vmem:[%s8462_s30 + $0x130] sm:$0xf] }
 0x214   : > { %3260 = vrot.lane.b32.xlu1 %v9569_v8, %s8343_s9  ;;  %13876 = vst [vmem:[#allocation13_spill] sm:$0xff] %v10021_v44  ;;  %v503_v13 = vld [vmem:[%s8462_s30 + $0x134] sm:$0xf] }
 0x215   : > { %3297 = vrot.lane.b32.xlu0 %v13878_v42, %s8344_s10  ;;  %v1213_v42 = vshrl.u32 %v501_v20, 16  ;;  %v504_v20 = vld [vmem:[%s8462_s30 + $0x138] sm:$0xf] }
 0x216   : > { %v10023_v14 = vpop.permute.xlu1 %3138  ;;  %v1239_v62 = vshrl.u32 %v504_v20, 16 }
 0x217   : > { %13877 = vst [vmem:[#allocation171_spill] sm:$0xff] %v10023_v14  ;;  %v10035_v8 = vpop.permute.xlu0 %3152  ;;  %v10041_v5 = vrot.slane %v1213_v42, 7  ;;  %v13885_v42 = vld [vmem:[#allocation18_spill] sm:$0xff] }
 0x218   : > { %3264 = vrot.lane.b32.xlu1 %v10019_v28, %s8343_s9  ;;  %13879 = vst [vmem:[#allocation14_spill] sm:$0xff] %v10035_v8  ;;  %v1210_v8 = vsel %vm8472_vm8, %v1202_v57, %v1209_v26  ;;  %v1222_v57 = vshrl.u32 %v502_v11, 16  ;;  %v1225_v26 = vshll.u32 %v502_v11, 16  ;;  %v1241_v45 = vrot.slane %v1239_v62, 7  ;;  %v13893_v62 = vld [vmem:[#allocation22_spill] sm:$0xff] }
 0x219   : > { %3301 = vrot.lane.b32.xlu0 %v13881_v15, %s8344_s10  ;;  %v290_v15 = vsel %vm8438_vm4, 0, %v289_v16  ;;  %2004 = vst.msk [vmem:[#allocation2 + $0x184] sm:$0xf] %vm215_vm0, %v1210_v8 }
 0x21a   : > { %v10037_v44 = vpop.permute.xlu1 %3142  ;;  %291 = vst [vmem:[#allocation2 + $0x190] sm:$0x1] %v290_v15  ;;  %v1224_v14 = vrot.slane %v1222_v57, 7  ;;  %v13889_v15 = vld [vmem:[#allocation20_spill] sm:$0xff] }
 0x21b   : > { %13880 = vst [vmem:[#allocation172_spill] sm:$0xff] %v10037_v44  ;;  %v10045_v12 = vpop.permute.xlu0 %3156  ;;  %v1218_v44 = vor.u32 %v1216_v3, %v10041_v5  ;;  %v13886_v3 = vld [vmem:[#allocation17_spill] sm:$0xff] }
 0x21c   : > { %3291 = vrot.lane.b32.xlu1 %v13882_v41, %s8344_s10  ;;  %13883 = vst [vmem:[#allocation16_spill] sm:$0xff] %v10045_v12  ;;  %v505_v12 = vld [vmem:[%s8462_s30 + $0x13c] sm:$0xf]  ;;  %v1227_v9 = vor.u32 %v1225_v26, %v1224_v14 }
 0x21d   : > { %3305 = vrot.lane.b32.xlu0 %v13885_v42, %s8344_s10  ;;  %v1219_v41 = vsel %vm8472_vm8, %v1211_v7, %v1218_v44  ;;  %v1233_v42 = vshll.u32 %v503_v13, 16  ;;  %v1242_v7 = vshll.u32 %v504_v20, 16  ;;  %v1248_v11 = vshrl.u32 %v505_v12, 16 }
 0x21e   : > { %v10054_v0 = vpop.permute.xlu1 %3146  ;;  %2005 = vst.msk [vmem:[#allocation2 + $0x188] sm:$0xf] %vm215_vm0, %v1219_v41  ;;  %v13890_v41 = vld [vmem:[#allocation19_spill] sm:$0xff]  ;;  %v1246_v20 = vrot.slane %v1241_v45, 4  ;;  %v1251_v40 = vshll.u32 %v505_v12, 16 }
 0x21f   : > { %13884 = vst [vmem:[#allocation15_spill] sm:$0xff] %v10054_v0  ;;  %v10065_v16 = vpop.permute.xlu0 %3160  ;;  %v1230_v0 = vshrl.u32 %v503_v13, 16 }
 0x220   : > { %3295 = vrot.lane.b32.xlu1 %v13886_v3, %s8344_s10  ;;  %13887 = vst [vmem:[#allocation18_spill] sm:$0xff] %v10065_v16  ;;  %v1228_v3 = vrot.slane %v1224_v14, 4  ;;  %v381_v16 = vld [vmem:[#allocation2 + $0x178] sm:$0x1] }
 0x221   : > { %3309 = vrot.lane.b32.xlu0 %v13889_v15, %s8344_s10  ;;  %v1232_v44 = vrot.slane %v1230_v0, 7  ;;  %v507_v15 = vld [vmem:[%s8462_s30 + $0x144] sm:$0xf]  ;;  %v1244_v0 = vor.u32 %v1242_v7, %v1241_v45  ;;  %v2009_v26 = vld [vmem:[#allocation2 + $0x190] sm:$0xf] }
 0x222   : > { %v10068_v8 = vpop.permute.xlu1 %3150  ;;  %v508_v7 = vld [vmem:[%s8462_s30 + $0x148] sm:$0xf] }
 0x223   : > { %13888 = vst [vmem:[#allocation17_spill] sm:$0xff] %v10068_v8  ;;  %v10074_v13 = vpop.permute.xlu0 %3164  ;;  %v1235_v57 = vor.u32 %v1233_v42, %v1232_v44  ;;  %v1237_v35 = vrot.slane %v1232_v44, 4  ;;  %v10076_v8 = vrot.slane %v1248_v11, 7  ;;  %v2010_v42 = vsel %vm8478_vm9, %v1227_v9, %v2009_v26  ;;  %v13894_v11 = vld [vmem:[#allocation21_spill] sm:$0xff] }
 0x224   : > { %3299 = vrot.lane.b32.xlu1 %v13890_v41, %s8344_s10  ;;  %13891 = vst [vmem:[#allocation20_spill] sm:$0xff] %v10074_v13  ;;  %v382_v44 = vsel %vm8444_vm5, 0, %v381_v16  ;;  %2011 = vst [vmem:[#allocation2 + $0x190] sm:$0xf] %v2010_v42  ;;  %v293_v9 = vsel %vm8438_vm4, 0, %v292_v6  ;;  %v1277_v6 = vshll.u32 %v508_v7, 16 }
 0x225   : > { %3313 = vrot.lane.b32.xlu0 %v13893_v62, %s8344_s10  ;;  %v1236_v41 = vsel %vm8472_vm8, %v1228_v3, %v1235_v57  ;;  %v1245_v45 = vsel %vm8472_vm8, %v1237_v35, %v1244_v0  ;;  %v1253_v12 = vor.u32 %v1251_v40, %v10076_v8  ;;  %383 = vst [vmem:[#allocation2 + $0x178] sm:$0x1] %v382_v44  ;;  %v509_v16 = vld [vmem:[%s8462_s30 + $0x14c] sm:$0xf]  ;;  %v1257_v57 = vshrl.u32 %v506_v21, 16  ;;  %v13897_v62 = vld [vmem:[#allocation24_spill] sm:$0xff] }
 0x226   : > { %v10080_v14 = vpop.permute.xlu1 %3154  ;;  %2012 = vst.msk [vmem:[#allocation2 + $0x194] sm:$0xf] %vm215_vm0, %v1236_v41  ;;  %2013 = vst.msk [vmem:[#allocation2 + $0x198] sm:$0xf] %vm215_vm0, %v1245_v45  ;;  %v1265_v35 = vshrl.u32 %v507_v15, 16  ;;  %v1260_v0 = vshll.u32 %v506_v21, 16 }
 0x227   : > { %13892 = vst [vmem:[#allocation19_spill] sm:$0xff] %v10080_v14  ;;  %v10097_v3 = vpop.permute.xlu0 %3168  ;;  %v1254_v40 = vsel %vm8472_vm8, %v1246_v20, %v1253_v12  ;;  %294 = vst [vmem:[#allocation2 + $0x1a4] sm:$0x1] %v293_v9  ;;  %v1259_v41 = vrot.slane %v1257_v57, 7  ;;  %v1268_v44 = vshll.u32 %v507_v15, 16  ;;  %v1274_v45 = vshrl.u32 %v508_v7, 16 }
 0x228   : > { %3303 = vrot.lane.b32.xlu1 %v13894_v11, %s8344_s10  ;;  %13895 = vst [vmem:[#allocation22_spill] sm:$0xff] %v10097_v3  ;;  %2014 = vst.msk [vmem:[#allocation2 + $0x19c] sm:$0xf] %vm215_vm0, %v1254_v40  ;;  %v1267_v42 = vrot.slane %v1265_v35, 7  ;;  %v1283_v11 = vshrl.u32 %v509_v16, 16  ;;  %v13898_v3 = vld [vmem:[#allocation23_spill] sm:$0xff] }
 0x229   : > { %3317 = vrot.lane.b32.xlu0 %v13897_v62, %s8344_s10  ;;  %v1185_v21 = vrot.slane %v9986_v27, 4  ;;  %v1263_v20 = vrot.slane %v1259_v41, 4  ;;  %v384_v9 = vld [vmem:[#allocation2 + $0x18c] sm:$0x1]  ;;  %v1276_v14 = vrot.slane %v1274_v45, 7  ;;  %v1286_v35 = vshll.u32 %v509_v16, 16 }
 0x22a   : > { %v10105_v26 = vpop.permute.xlu1 %3158  ;;  %v1270_v12 = vor.u32 %v1268_v44, %v1267_v42  ;;  %v1272_v62 = vrot.slane %v1267_v42, 4  ;;  %v10115_v40 = vrot.slane %v1283_v11, 7  ;;  %v295_v57 = vld [vmem:[#allocation2 + $0x1b8] sm:$0x1]  ;;  %v13901_v7 = vld [vmem:[#allocation26_spill] sm:$0xff] }
 0x22b   : > { %13896 = vst [vmem:[#allocation21_spill] sm:$0xff] %v10105_v26  ;;  %v10112_v13 = vpop.permute.xlu0 %3172  ;;  %v1262_v26 = vor.u32 %v1260_v0, %v1259_v41  ;;  %v1279_v44 = vor.u32 %v1277_v6, %v1276_v14  ;;  %v385_v0 = vsel %vm8444_vm5, 0, %v384_v9  ;;  %v13902_v41 = vld [vmem:[#allocation25_spill] sm:$0xff] }
 0x22c   : > { %3307 = vrot.lane.b32.xlu1 %v13898_v3, %s8344_s10  ;;  %13899 = vst [vmem:[#allocation24_spill] sm:$0xff] %v10112_v13  ;;  %v1271_v3 = vsel %vm8472_vm8, %v1263_v20, %v1270_v12  ;;  %v1997_v27 = vld [vmem:[#allocation2 + $0x178] sm:$0x1]  ;;  %v1281_v13 = vrot.slane %v1276_v14, 4  ;;  %v1288_v16 = vor.u32 %v1286_v35, %v10115_v40  ;;  %386 = vst [vmem:[#allocation2 + $0x18c] sm:$0x1] %v385_v0 }
 0x22d   : > { %3321 = vrot.lane.b32.xlu0 %v13901_v7, %s8344_s10  ;;  %2021 = vst.msk [vmem:[#allocation2 + $0x1a8] sm:$0xf] %vm215_vm0, %v1271_v3  ;;  %v1998_v45 = vsel %vm8438_vm4, %v1185_v21, %v1997_v27  ;;  %v510_v14 = vld [vmem:[%s8462_s30 + $0x150] sm:$0xf]  ;;  %v1280_v6 = vsel %vm8472_vm8, %v1272_v62, %v1279_v44  ;;  %v511_v12 = vld [vmem:[%s8462_s30 + $0x154] sm:$0xf] }
 0x22e   : > { %v10117_v15 = vpop.permute.xlu1 %3162  ;;  %v2018_v11 = vld [vmem:[#allocation2 + $0x1a4] sm:$0xf]  ;;  %1999 = vst [vmem:[#allocation2 + $0x178] sm:$0x1] %v1998_v45  ;;  %v13905_v7 = vld [vmem:[#allocation28_spill] sm:$0xff]  ;;  %v1289_v21 = vsel %vm8472_vm8, %v1281_v13, %v1288_v16  ;;  %v296_v3 = vsel %vm8438_vm4, 0, %v295_v57 }
 0x22f   : > { %13900 = vst [vmem:[#allocation23_spill] sm:$0xff] %v10117_v15  ;;  %v10128_v42 = vpop.permute.xlu0 %3176  ;;  %v2019_v20 = vsel %vm8478_vm9, %v1262_v26, %v2018_v11  ;;  %2022 = vst.msk [vmem:[#allocation2 + $0x1ac] sm:$0xf] %vm215_vm0, %v1280_v6  ;;  %v512_v35 = vld [vmem:[%s8462_s30 + $0x158] sm:$0xf]  ;;  %v1292_v62 = vshrl.u32 %v510_v14, 16 }
 0x230   : > { %3311 = vrot.lane.b32.xlu1 %v13902_v41, %s8344_s10  ;;  %13903 = vst [vmem:[#allocation26_spill] sm:$0xff] %v10128_v42  ;;  %2020 = vst [vmem:[#allocation2 + $0x1a4] sm:$0xf] %v2019_v20  ;;  %v513_v26 = vld [vmem:[%s8462_s30 + $0x15c] sm:$0xf]  ;;  %v13906_v27 = vld [vmem:[#allocation27_spill] sm:$0xff] }
 0x231   : > { %3325 = vrot.lane.b32.xlu0 %v13905_v7, %s8344_s10  ;;  %2023 = vst.msk [vmem:[#allocation2 + $0x1b0] sm:$0xf] %vm215_vm0, %v1289_v21  ;;  %297 = vst [vmem:[#allocation2 + $0x1b8] sm:$0x1] %v296_v3  ;;  %v1220_v0 = vrot.slane %v10041_v5, 4  ;;  %v1300_v13 = vshrl.u32 %v511_v12, 16 }
 0x232   : > { %v10139_v9 = vpop.permute.xlu1 %3166  ;;  %v1303_v41 = vshll.u32 %v511_v12, 16  ;;  %v1294_v45 = vrot.slane %v1292_v62, 7  ;;  %v1295_v16 = vshll.u32 %v510_v14, 16  ;;  %v1309_v11 = vshrl.u32 %v512_v35, 16  ;;  %v13909_v57 = vld [vmem:[#allocation30_spill] sm:$0xff]  ;;  %v13913_v15 = vld [vmem:[#allocation32_spill] sm:$0xff] }
 0x233   : > { %13904 = vst [vmem:[#allocation25_spill] sm:$0xff] %v10139_v9  ;;  %v10153_v44 = vpop.permute.xlu0 %3180  ;;  %v1302_v20 = vrot.slane %v1300_v13, 7  ;;  %v1318_v7 = vshrl.u32 %v513_v26, 16  ;;  %v2006_v21 = vld [vmem:[#allocation2 + $0x18c] sm:$0x1]  ;;  %v1312_v42 = vshll.u32 %v512_v35, 16 }
 0x234   : > { %3315 = vrot.lane.b32.xlu1 %v13906_v27, %s8344_s10  ;;  %13907 = vst [vmem:[#allocation28_spill] sm:$0xff] %v10153_v44  ;;  %v1298_v3 = vrot.slane %v1294_v45, 4  ;;  %v387_v27 = vld [vmem:[#allocation2 + $0x1a0] sm:$0x1]  ;;  %v2007_v14 = vsel %vm8438_vm4, %v1220_v0, %v2006_v21  ;;  %v1321_v62 = vshll.u32 %v513_v26, 16  ;;  %v3272_v35 = vshll.u32 %v9973_v25, 16 }
 0x235   : > { %3329 = vrot.lane.b32.xlu0 %v13909_v57, %s8344_s10  ;;  %v13910_v44 = vld [vmem:[#allocation29_spill] sm:$0xff]  ;;  %v1305_v12 = vor.u32 %v1303_v41, %v1302_v20  ;;  %2008 = vst [vmem:[#allocation2 + $0x18c] sm:$0x1] %v2007_v14  ;;  %v1307_v9 = vrot.slane %v1302_v20, 4  ;;  %v1311_v57 = vrot.slane %v1309_v11, 7  ;;  %v388_v26 = vsel %vm8444_vm5, 0, %v387_v27 }
 0x236   : > { %v10156_v6 = vpop.permute.xlu1 %3170  ;;  %389 = vst [vmem:[#allocation2 + $0x1a0] sm:$0x1] %v388_v26  ;;  %v298_v20 = vld [vmem:[#allocation2 + $0x1cc] sm:$0x1]  ;;  %v3270_v27 = vshrl.u32 %v9973_v25, 16  ;;  %v3274_v14 = vrot.slane %v3272_v35, 1 }
 0x237   : > { %13908 = vst [vmem:[#allocation27_spill] sm:$0xff] %v10156_v6  ;;  %v10162_v5 = vpop.permute.xlu0 %3184  ;;  %v1297_v6 = vor.u32 %v1295_v16, %v1294_v45  ;;  %v1314_v0 = vor.u32 %v1312_v42, %v1311_v57  ;;  %v13914_v45 = vld [vmem:[#allocation31_spill] sm:$0xff]  ;;  %v1316_v16 = vrot.slane %v1311_v57, 4  ;;  %v514_v42 = vld [vmem:[%s8462_s30 + $0x160] sm:$0xf] }
 0x238   : > { %3319 = vrot.lane.b32.xlu1 %v13910_v44, %s8344_s10  ;;  %13911 = vst [vmem:[#allocation30_spill] sm:$0xff] %v10162_v5  ;;  %v1306_v44 = vsel %vm8472_vm8, %v1298_v3, %v1305_v12  ;;  %v10173_v5 = vrot.slane %v1318_v7, 7  ;;  %v2027_v41 = vld [vmem:[#allocation2 + $0x1b8] sm:$0xf]  ;;  %v515_v35 = vld [vmem:[%s8462_s30 + $0x164] sm:$0xf] }
 0x239   : > { %3333 = vrot.lane.b32.xlu0 %v13913_v15, %s8344_s10  ;;  %2030 = vst.msk [vmem:[#allocation2 + $0x1bc] sm:$0xf] %vm215_vm0, %v1306_v44  ;;  %v1315_v7 = vsel %vm8472_vm8, %v1307_v9, %v1314_v0  ;;  %v2028_v21 = vsel %vm8478_vm9, %v1297_v6, %v2027_v41  ;;  %v3277_v9 = vshll.u32 %v10019_v28, 16  ;;  %v1255_v6 = vrot.slane %v10076_v8, 4  ;;  %v516_v26 = vld [vmem:[%s8462_s30 + $0x168] sm:$0xf] }
 0x23a   : > { %v10166_v13 = vpop.permute.xlu1 %3174  ;;  %v1323_v11 = vor.u32 %v1321_v62, %v10173_v5  ;;  %2029 = vst [vmem:[#allocation2 + $0x1b8] sm:$0xf] %v2028_v21  ;;  %2031 = vst.msk [vmem:[#allocation2 + $0x1c0] sm:$0xf] %vm215_vm0, %v1315_v7  ;;  %v299_v62 = vsel %vm8438_vm4, 0, %v298_v20  ;;  %v1327_v44 = vshrl.u32 %v514_v42, 16 }
 0x23b   : > { %13912 = vst [vmem:[#allocation29_spill] sm:$0xff] %v10166_v13  ;;  %v10180_v15 = vpop.permute.xlu0 %3188  ;;  %300 = vst [vmem:[#allocation2 + $0x1cc] sm:$0x1] %v299_v62  ;;  %v13919_v41 = vld [vmem:[#allocation36_spill] sm:$0xff]  ;;  %v10211_v7 = vrot.slane %v3277_v9, 1  ;;  %v1338_v62 = vshll.u32 %v515_v35, 16 }
 0x23c   : > { %3323 = vrot.lane.b32.xlu1 %v13914_v45, %s8344_s10  ;;  %13915 = vst [vmem:[#allocation32_spill] sm:$0xff] %v10180_v15  ;;  %v1324_v12 = vsel %vm8472_vm8, %v1316_v16, %v1323_v11  ;;  %v3275_v45 = vor.u32 %v3274_v14, %v3270_v27  ;;  %v1329_v16 = vrot.slane %v1327_v44, 7  ;;  %v1330_v11 = vshll.u32 %v514_v42, 16  ;;  %v517_v21 = vld [vmem:[%s8462_s30 + $0x16c] sm:$0xf] }
 0x23d   : > { %3337 = vrot.lane.b32.xlu0 %v13782_v32, %s8344_s10  ;;  %2032 = vst.msk [vmem:[#allocation2 + $0x1c4] sm:$0xf] %vm215_vm0, %v1324_v12  ;;  %v13917_v32 = vld [vmem:[#allocation33_spill] sm:$0xff]  ;;  %v1335_v12 = vshrl.u32 %v515_v35, 16  ;;  %v13922_v42 = vld [vmem:[#allocation114_spill] sm:$0xff] }
 0x23e   : > { %v10188_v3 = vpop.permute.xlu1 %3178  ;;  %v2015_v8 = vld [vmem:[#allocation2 + $0x1a0] sm:$0x1]  ;;  %v1332_v9 = vor.u32 %v1330_v11, %v1329_v16  ;;  %v3280_v35 = vsel %vm13630_vm6, %v3275_v45, %v10211_v7  ;;  %v390_v13 = vld [vmem:[#allocation2 + $0x1b4] sm:$0x1] }
 0x23f   : > { %13916 = vst [vmem:[#allocation31_spill] sm:$0xff] %v10188_v3  ;;  %v10203_v57 = vpop.permute.xlu0 %3202  ;;  %v2016_v20 = vsel %vm8438_vm4, %v1255_v6, %v2015_v8  ;;  %v1337_v27 = vrot.slane %v1335_v12, 7  ;;  %v1347_v6 = vshll.u32 %v516_v26, 16  ;;  %v1353_v8 = vshrl.u32 %v517_v21, 16  ;;  %v301_v45 = vld [vmem:[#allocation2 + $0x1e0] sm:$0x1] }
 0x240   : > { %3327 = vrot.lane.b32.xlu1 %v13917_v32, %s8344_s10  ;;  %v13920_v32 = vld [vmem:[#allocation35_spill] sm:$0xff]  ;;  %2017 = vst [vmem:[#allocation2 + $0x1a0] sm:$0x1] %v2016_v20 }
 0x241   : > { %3341 = vrot.lane.b32.xlu0 %v13919_v41, %s8344_s10  ;;  %v1333_v41 = vrot.slane %v1329_v16, 4  ;;  %v1340_v3 = vor.u32 %v1338_v62, %v1337_v27  ;;  %v1342_v12 = vrot.slane %v1337_v27, 4  ;;  %v1356_v62 = vshll.u32 %v517_v21, 16 }
 0x242   : > { %v10207_v0 = vpop.permute.xlu1 %3182  ;;  %v3281_v21 = vshrl.u32 %v10019_v28, 16 }
 0x243   : > { %13918 = vst [vmem:[#allocation33_spill] sm:$0xff] %v10207_v0  ;;  %v10218_v15 = vpop.permute.xlu0 %3206  ;;  %v1344_v0 = vshrl.u32 %v516_v26, 16  ;;  %v1341_v26 = vsel %vm8472_vm8, %v1333_v41, %v1340_v3  ;;  %v518_v3 = vld [vmem:[%s8462_s30 + $0x170] sm:$0xf]  ;;  %v391_v41 = vsel %vm8444_vm5, 0, %v390_v13 }
 0x244   : > { %3331 = vrot.lane.b32.xlu1 %v13920_v32, %s8344_s10  ;;  %v2036_v32 = vld [vmem:[#allocation2 + $0x1cc] sm:$0xf]  ;;  %2039 = vst.msk [vmem:[#allocation2 + $0x1d0] sm:$0xf] %vm215_vm0, %v1341_v26  ;;  %392 = vst [vmem:[#allocation2 + $0x1b4] sm:$0x1] %v391_v41 }
 0x245   : > { %3345 = vrot.lane.b32.xlu0 %v13922_v42, %s8344_s10  ;;  %v1346_v44 = vrot.slane %v1344_v0, 7  ;;  %v10230_v42 = vld [vmem:[#allocation2 + $0x164] ss:$0 sps:$4 sm:$0x11]   ;;  %v10234_v0 = vrot.slane %v1353_v8, 7  ;;  %v2037_v27 = vsel %vm8478_vm9, %v1332_v9, %v2036_v32  ;;  %v1362_v13 = vshrl.u32 %v518_v3, 16 }
 0x246   : > { %v10220_v14 = vpop.permute.xlu1 %3186  ;;  %2038 = vst [vmem:[#allocation2 + $0x1cc] sm:$0xf] %v2037_v27  ;;  %v3285_v8 = vshll.u32 %v10230_v42, 16  ;;  %v521_v32 = vld [vmem:[%s8462_s30 + $0x17c] sm:$0xf]  ;;  %v1365_v26 = vshll.u32 %v518_v3, 16 }
 0x247   : > { %13921 = vst [vmem:[#allocation36_spill] sm:$0xff] %v10220_v14  ;;  %v10228_v20 = vpop.permute.xlu0 %3210  ;;  %v1349_v14 = vor.u32 %v1347_v6, %v1346_v44  ;;  %v1351_v11 = vrot.slane %v1346_v44, 4  ;;  %v519_v6 = vld [vmem:[%s8462_s30 + $0x174] sm:$0xf]  ;;  %v1358_v9 = vor.u32 %v1356_v62, %v10234_v0  ;;  %v302_v44 = vsel %vm8438_vm4, 0, %v301_v45 }
 0x248   : > { %3335 = vrot.lane.b32.xlu1 %v13791_v56, %s8344_s10  ;;  %13923 = vst [vmem:[#allocation35_spill] sm:$0xff] %v10228_v20  ;;  %303 = vst [vmem:[#allocation2 + $0x1e0] sm:$0x1] %v302_v44  ;;  %v1364_v45 = vrot.slane %v1362_v13, 7  ;;  %v1373_v62 = vshll.u32 %v519_v6, 16  ;;  %v1290_v41 = vrot.slane %v10115_v40, 4 }
 0x249   : > { %3349 = vrot.lane.b32.xlu0 %v3280_v35, %s8344_s10  ;;  %v1350_v56 = vsel %vm8472_vm8, %v1342_v12, %v1349_v14  ;;  %v520_v35 = vld [vmem:[%s8462_s30 + $0x178] sm:$0xf]  ;;  %v3287_v20 = vrot.slane %v3285_v8, 1 }
 0x24a   : > { %v10236_v16 = vpop.permute.xlu1 %3190  ;;  %2040 = vst.msk [vmem:[#allocation2 + $0x1d4] sm:$0xf] %vm215_vm0, %v1350_v56  ;;  %v1370_v56 = vshrl.u32 %v519_v6, 16  ;;  %v1382_v3 = vshll.u32 %v520_v35, 16  ;;  %v1367_v6 = vor.u32 %v1365_v26, %v1364_v45  ;;  %v522_v26 = vld [vmem:[%s8462_s30 + $0x180] sm:$0xf] }
 0x24b   : > { %13924 = vst [vmem:[#allocation114_spill] sm:$0xff] %v10236_v16  ;;  %v10251_v14 = vpop.permute.xlu0 %3214  ;;  %v1379_v16 = vshrl.u32 %v520_v35, 16 }
 0x24c   : > { %3339 = vrot.lane.b32.xlu1 %v13795_v47, %s8344_s10  ;;  %13925 = vst [vmem:[#allocation173_spill] sm:$0xff] %v10251_v14  ;;  %v1359_v47 = vsel %vm8472_vm8, %v1351_v11, %v1358_v9  ;;  %v1372_v44 = vrot.slane %v1370_v56, 7  ;;  %v1388_v14 = vshrl.u32 %v521_v32, 16  ;;  %v1368_v11 = vrot.slane %v1364_v45, 4 }
 0x24d   : > { %3358 = vrot.lane.b32.xlu0 %v13798_v50, %s8345_s11  ;;  %2041 = vst.msk [vmem:[#allocation2 + $0x1d8] sm:$0xf] %vm215_vm0, %v1359_v47  ;;  %v3283_v50 = vor.u32 %v3281_v21, %v10211_v7  ;;  %v2024_v47 = vld [vmem:[#allocation2 + $0x1b4] sm:$0x1]  ;;  %v1381_v40 = vrot.slane %v1379_v16, 7 }
 0x24e   : > { %v10260_v12 = vpop.permute.xlu1 %3204  ;;  %v1375_v13 = vor.u32 %v1373_v62, %v1372_v44  ;;  %v10277_v56 = vrot.slane %v1388_v14, 7  ;;  %v2025_v21 = vsel %vm8438_vm4, %v1290_v41, %v2024_v47  ;;  %v523_v41 = vld [vmem:[%s8462_s30 + $0x184] sm:$0xf]  ;;  %v1400_v47 = vshll.u32 %v522_v26, 16 }
 0x24f   : > { %13926 = vst [vmem:[#allocation174_spill] sm:$0xff] %v10260_v12  ;;  %v10269_v27 = vpop.permute.xlu0 %3218  ;;  %v1391_v12 = vshll.u32 %v521_v32, 16  ;;  %v2045_v8 = vld [vmem:[#allocation2 + $0x1e0] sm:$0xf]  ;;  %v3288_v35 = vsel %vm13630_vm6, %v3283_v50, %v3287_v20  ;;  %2026 = vst [vmem:[#allocation2 + $0x1b4] sm:$0x1] %v2025_v21  ;;  %v1384_v16 = vor.u32 %v1382_v3, %v1381_v40 }
 0x250   : > { %3343 = vrot.lane.b32.xlu1 %v13799_v61, %s8344_s10  ;;  %13927 = vst [vmem:[#allocation175_spill] sm:$0xff] %v10269_v27  ;;  %v393_v61 = vld [vmem:[#allocation2 + $0x1c8] sm:$0x1]  ;;  %v1377_v27 = vrot.slane %v1372_v44, 4  ;;  %v1386_v14 = vrot.slane %v1381_v40, 4  ;;  %v2046_v62 = vsel %vm8478_vm9, %v1367_v6, %v2045_v8  ;;  %v1397_v3 = vshrl.u32 %v522_v26, 16 }
 0x251   : > { %3362 = vrot.lane.b32.xlu0 %v13802_v17, %s8345_s11  ;;  %v1376_v17 = vsel %vm8472_vm8, %v1368_v11, %v1375_v13  ;;  %v1393_v32 = vor.u32 %v1391_v12, %v10277_v56  ;;  %v394_v20 = vsel %vm8444_vm5, 0, %v393_v61  ;;  %2047 = vst [vmem:[#allocation2 + $0x1e0] sm:$0xf] %v2046_v62  ;;  %v524_v50 = vld [vmem:[%s8462_s30 + $0x188] sm:$0xf]  ;;  %v1408_v40 = vshll.u32 %v523_v41, 16 }
 0x252   : > { %v10273_v9 = vpop.permute.xlu1 %3208  ;;  %2048 = vst.msk [vmem:[#allocation2 + $0x1e4] sm:$0xf] %vm215_vm0, %v1376_v17  ;;  %v1385_v12 = vsel %vm8472_vm8, %v1377_v27, %v1384_v16  ;;  %395 = vst [vmem:[#allocation2 + $0x1c8] sm:$0x1] %v394_v20  ;;  %v1405_v27 = vshrl.u32 %v523_v41, 16  ;;  %v1399_v61 = vrot.slane %v1397_v3, 7 }
 0x253   : > { %v10281_v7 = vpop.permute.xlu0 %3222  ;;  %v1394_v44 = vsel %vm8472_vm8, %v1386_v14, %v1393_v32  ;;  %2049 = vst.msk [vmem:[#allocation2 + $0x1e8] sm:$0xf] %vm215_vm0, %v1385_v12  ;;  %v525_v13 = vld [vmem:[%s8462_s30 + $0x18c] sm:$0xf]  ;;  %v1414_v21 = vshrl.u32 %v524_v50, 16  ;;  %v1325_v17 = vrot.slane %v10173_v5, 4 }
 0x254   : > { %3347 = vrot.lane.b32.xlu1 %v9732_v49, %s8344_s10  ;;  %13928 = vst [vmem:[#allocation176_spill] sm:$0xff] %v10281_v7  ;;  %v304_v49 = vld [vmem:[#allocation2 + $0x1f4] sm:$0x1]  ;;  %2050 = vst.msk [vmem:[#allocation2 + $0x1ec] sm:$0xf] %vm215_vm0, %v1394_v44  ;;  %v1407_v8 = vrot.slane %v1405_v27, 7  ;;  %v1402_v41 = vor.u32 %v1400_v47, %v1399_v61 }
 0x255   : > { %3366 = vrot.lane.b32.xlu0 %v13805_v33, %s8345_s11  ;;  %v305_v11 = vsel %vm8438_vm4, 0, %v304_v49  ;;  %v1403_v14 = vrot.slane %v1399_v61, 4  ;;  %v1416_v62 = vrot.slane %v1414_v21, 7  ;;  %v1423_v20 = vshrl.u32 %v525_v13, 16  ;;  %v307_v61 = vld [vmem:[#allocation2 + $0x208] sm:$0x1] }
 0x256   : > { %v10291_v45 = vpop.permute.xlu1 %3212  ;;  %306 = vst [vmem:[#allocation2 + $0x1f4] sm:$0x1] %v305_v11  ;;  %v1410_v32 = vor.u32 %v1408_v40, %v1407_v8  ;;  %v1412_v49 = vrot.slane %v1407_v8, 4  ;;  %v10335_v11 = vld [vmem:[#allocation2 + $0x140] sm:$0xff]   ;;  %v1426_v40 = vshll.u32 %v525_v13, 16  ;;  %v10357_v13 = vld [vmem:[#allocation2 + $0x148] sm:$0xff]  }
 0x257   : > { %v10306_v33 = vpop.permute.xlu0 %3226  ;;  %v10339_v27 = vrot.slane %v1423_v20, 7  ;;  %v527_v8 = vld [vmem:[%s8462_s30 + $0x194] sm:$0xf]  ;;  %v528_v20 = vld [vmem:[%s8462_s30 + $0x198] sm:$0xf] }
 0x258   : > { %3351 = vrot.lane.b32.xlu1 %v3288_v35, %s8344_s10  ;;  %13929 = vst [vmem:[#allocation177_spill] sm:$0xff] %v10306_v33  ;;  %v1417_v35 = vshll.u32 %v524_v50, 16 }
 0x259   : > { %3370 = vrot.lane.b32.xlu0 %v9229_v43, %s8345_s11  ;;  %v2033_v26 = vld [vmem:[#allocation2 + $0x1c8] sm:$0x1] }
 0x25a   : > { %v10312_v6 = vpop.permute.xlu1 %3216  ;;  %v2034_v5 = vsel %vm8438_vm4, %v1325_v17, %v2033_v26  ;;  %v1419_v12 = vor.u32 %v1417_v35, %v1416_v62  ;;  %v526_v17 = vld [vmem:[%s8462_s30 + $0x190] sm:$0xf]  ;;  %v529_v26 = vld [vmem:[%s8462_s30 + $0x19c] sm:$0xf] }
 0x25b   : > { %v10320_v16 = vpop.permute.xlu0 %3230  ;;  %2035 = vst [vmem:[#allocation2 + $0x1c8] sm:$0x1] %v2034_v5  ;;  %v1440_v5 = vshrl.u32 %v527_v8, 16 }
 0x25c   : > { %3360 = vrot.lane.b32.xlu1 %v9217_v46, %s8345_s11  ;;  %13930 = vst [vmem:[#allocation178_spill] sm:$0xff] %v10320_v16  ;;  %v1411_v46 = vsel %vm8472_vm8, %v1403_v14, %v1410_v32  ;;  %v1420_v3 = vsel %vm8472_vm8, %v1412_v49, %v1419_v12  ;;  %v10359_v32 = vld [vmem:[#allocation2 + $0x154] sm:$0xff]   ;;  %v1428_v49 = vor.u32 %v1426_v40, %v10339_v27  ;;  %v399_v40 = vld [vmem:[#allocation2 + $0x1f0] sm:$0x1] }
 0x25d   : > { %3374 = vrot.lane.b32.xlu0 %v9247_v23, %s8345_s11  ;;  %v2054_v50 = vld [vmem:[#allocation2 + $0x1f4] sm:$0xf]  ;;  %2057 = vst.msk [vmem:[#allocation2 + $0x1f8] sm:$0xf] %vm215_vm0, %v1411_v46  ;;  %v396_v23 = vld [vmem:[#allocation2 + $0x1dc] sm:$0x1] }
 0x25e   : > { %v10322_v43 = vpop.permute.xlu1 %3220  ;;  %v2055_v21 = vsel %vm8478_vm9, %v1402_v41, %v2054_v50  ;;  %2058 = vst.msk [vmem:[#allocation2 + $0x1fc] sm:$0xf] %vm215_vm0, %v1420_v3  ;;  %v397_v35 = vsel %vm8444_vm5, 0, %v396_v23  ;;  %v1432_v41 = vshrl.u32 %v526_v17, 16  ;;  %v4948_v46 = vshll.u32 %v10335_v11, 16  ;;  %v10373_v3 = vld [vmem:[#allocation2 + $0x15c] sm:$0xff]  }
 0x25f   : > { %13931 = vst [vmem:[#allocation179_spill] sm:$0xff] %v10322_v43  ;;  %v10332_v44 = vpop.permute.xlu0 %3234  ;;  %2056 = vst [vmem:[#allocation2 + $0x1f4] sm:$0xf] %v2055_v21  ;;  %v1435_v50 = vshll.u32 %v526_v17, 16  ;;  %v1443_v23 = vshll.u32 %v527_v8, 16  ;;  %v4968_v17 = vshll.u32 %v10359_v32, 16 }
 0x260   : > { %3364 = vrot.lane.b32.xlu1 %v9265_v59, %s8345_s11  ;;  %13932 = vst [vmem:[#allocation180_spill] sm:$0xff] %v10332_v44  ;;  %v1421_v59 = vrot.slane %v1416_v62, 4  ;;  %398 = vst [vmem:[#allocation2 + $0x1dc] sm:$0x1] %v397_v35  ;;  %v308_v62 = vsel %vm8438_vm4, 0, %v307_v61  ;;  %v1434_v61 = vrot.slane %v1432_v41, 7 }
 0x261   : > { %3378 = vrot.lane.b32.xlu0 %v9273_v29, %s8345_s11  ;;  %309 = vst [vmem:[#allocation2 + $0x208] sm:$0x1] %v308_v62  ;;  %v1442_v35 = vrot.slane %v1440_v5, 7  ;;  %v1449_v62 = vshrl.u32 %v528_v20, 16  ;;  %v1458_v29 = vshrl.u32 %v529_v26, 16  ;;  %v400_v16 = vsel %vm8444_vm5, 0, %v399_v40 }
 0x262   : > { %v10341_v47 = vpop.permute.xlu1 %3224  ;;  %v1429_v12 = vsel %vm8472_vm8, %v1421_v59, %v1428_v49  ;;  %v4953_v59 = vshll.u32 %v10357_v13, 16  ;;  %v1438_v8 = vrot.slane %v1434_v61, 4  ;;  %v1452_v49 = vshll.u32 %v528_v20, 16  ;;  %401 = vst [vmem:[#allocation2 + $0x1f0] sm:$0x1] %v400_v16  ;;  %v8169_v16 = vld [vmem:[#allocation2] sm:$0xff]  }
 0x263   : > { %13933 = vst [vmem:[#allocation181_spill] sm:$0xff] %v10341_v47  ;;  %v10354_v14 = vpop.permute.xlu0 %3238  ;;  %2059 = vst.msk [vmem:[#allocation2 + $0x200] sm:$0xf] %vm215_vm0, %v1429_v12  ;;  %v1437_v41 = vor.u32 %v1435_v50, %v1434_v61  ;;  %v1451_v12 = vrot.slane %v1449_v62, 7  ;;  %v1447_v44 = vrot.slane %v1442_v35, 4  ;;  %v4973_v50 = vshll.u32 %v10373_v3, 16 }
 0x264   : > { %3368 = vrot.lane.b32.xlu1 %v9288_v22, %s8345_s11  ;;  %13934 = vst [vmem:[#allocation182_spill] sm:$0xff] %v10354_v14  ;;  %v310_v61 = vld [vmem:[#allocation2 + $0x21c] sm:$0x1]  ;;  %v10402_v40 = vrot.slane %v4948_v46, 1  ;;  %v10415_v46 = vrot.slane %v4968_v17, 1 }
 0x265   : > { %3382 = vrot.lane.b32.xlu0 %v9295_v24, %s8345_s11  ;;  %v1360_v24 = vrot.slane %v10234_v0, 4  ;;  %v1454_v62 = vor.u32 %v1452_v49, %v1451_v12  ;;  %v531_v49 = vld [vmem:[%s8462_s30 + $0x1a4] sm:$0xf] }
 0x266   : > { %v10366_v22 = vpop.permute.xlu1 %3228  ;;  %v13941_v0 = vld [vmem:[#allocation45_spill] sm:$0xff] }
 0x267   : > { %13935 = vst [vmem:[#allocation183_spill] sm:$0xff] %v10366_v22  ;;  %v10378_v21 = vpop.permute.xlu0 %3242  ;;  %v2042_v5 = vld [vmem:[#allocation2 + $0x1dc] sm:$0x1]  ;;  %v1461_v22 = vshll.u32 %v529_v26, 16 }
 0x268   : > { %3372 = vrot.lane.b32.xlu1 %v9302_v34, %s8345_s11  ;;  %13936 = vst [vmem:[#allocation184_spill] sm:$0xff] %v10378_v21  ;;  %v1445_v34 = vor.u32 %v1443_v23, %v1442_v35  ;;  %v10387_v21 = vrot.slane %v1458_v29, 7  ;;  %v2043_v29 = vsel %vm8438_vm4, %v1360_v24, %v2042_v5  ;;  %v2063_v26 = vld [vmem:[#allocation2 + $0x208] sm:$0xf]  ;;  %v530_v24 = vld [vmem:[%s8462_s30 + $0x1a0] sm:$0xf] }
 0x269   : > { %3386 = vrot.lane.b32.xlu0 %v9309_v31, %s8345_s11  ;;  %v10406_v35 = vld [vmem:[#allocation2 + $0x168] sm:$0xff]   ;;  %2044 = vst [vmem:[#allocation2 + $0x1dc] sm:$0x1] %v2043_v29  ;;  %v1456_v31 = vrot.slane %v1451_v12, 4  ;;  %v1455_v12 = vsel %vm8472_vm8, %v1447_v44, %v1454_v62  ;;  %v1395_v44 = vrot.slane %v10277_v56, 4 }
 0x26a   : > { %v10383_v14 = vpop.permute.xlu1 %3232  ;;  %v1446_v23 = vsel %vm8472_vm8, %v1438_v8, %v1445_v34  ;;  %v2064_v8 = vsel %vm8478_vm9, %v1437_v41, %v2063_v26  ;;  %v10421_v34 = vld [vmem:[#allocation2 + $0x150] ss:$0 sps:$4 sm:$0x11]   ;;  %v532_v29 = vld [vmem:[%s8462_s30 + $0x1a8] sm:$0xf] }
 0x26b   : > { %13937 = vst [vmem:[#allocation185_spill] sm:$0xff] %v10383_v14  ;;  %v10394_v20 = vpop.permute.xlu0 %3246  ;;  %2066 = vst.msk [vmem:[#allocation2 + $0x20c] sm:$0xf] %vm215_vm0, %v1446_v23  ;;  %v10434_v23 = vld [vmem:[#allocation2 + $0x170] sm:$0xff]   ;;  %v533_v26 = vld [vmem:[%s8462_s30 + $0x1ac] sm:$0xf] }
 0x26c   : > { %3376 = vrot.lane.b32.xlu1 %v9316_v55, %s8345_s11  ;;  %13938 = vst [vmem:[#allocation186_spill] sm:$0xff] %v10394_v20  ;;  %v10404_v55 = vrot.slane %v4953_v59, 1  ;;  %v1463_v59 = vor.u32 %v1461_v22, %v10387_v21  ;;  %2065 = vst [vmem:[#allocation2 + $0x208] sm:$0xf] %v2064_v8  ;;  %v10432_v22 = vrot.slane %v4973_v50, 1  ;;  %v1470_v50 = vshll.u32 %v530_v24, 16 }
 0x26d   : > { %3390 = vrot.lane.b32.xlu0 %v13818_v53, %s8345_s11  ;;  %v311_v53 = vsel %vm8438_vm4, 0, %v310_v61  ;;  %2067 = vst.msk [vmem:[#allocation2 + $0x210] sm:$0xf] %vm215_vm0, %v1455_v12  ;;  %v1467_v61 = vshrl.u32 %v530_v24, 16  ;;  %v1475_v8 = vshrl.u32 %v531_v49, 16  ;;  %v1478_v12 = vshll.u32 %v531_v49, 16 }
 0x26e   : > { %v10410_v5 = vpop.permute.xlu1 %3236  ;;  %v1464_v41 = vsel %vm8472_vm8, %v1456_v31, %v1463_v59  ;;  %312 = vst [vmem:[#allocation2 + $0x21c] sm:$0x1] %v311_v53  ;;  %v8083_v56 = vld [vmem:[#allocation2 + $0x164] ss:$0 sps:$4 sm:$0x11]   ;;  %v1484_v53 = vshrl.u32 %v532_v29, 16 }
 0x26f   : > { %13939 = vst [vmem:[#allocation187_spill] sm:$0xff] %v10410_v5  ;;  %v10430_v17 = vpop.permute.xlu0 %3250  ;;  %2068 = vst.msk [vmem:[#allocation2 + $0x214] sm:$0xf] %vm215_vm0, %v1464_v41  ;;  %v1469_v59 = vrot.slane %v1467_v61, 7  ;;  %v2051_v20 = vld [vmem:[#allocation2 + $0x1f0] sm:$0x1] }
 0x270   : > { %3380 = vrot.lane.b32.xlu1 %v9333_v2, %s8345_s11  ;;  %13940 = vst [vmem:[#allocation188_spill] sm:$0xff] %v10430_v17  ;;  %v4988_v2 = vshll.u32 %v10406_v35, 16  ;;  %v10446_v17 = vsel %vm3422_vm11, %v8169_v16, %v13941_v0  ;;  %v1477_v41 = vrot.slane %v1475_v8, 7  ;;  %v1487_v24 = vshll.u32 %v532_v29, 16  ;;  %v10463_v62 = vld [vmem:[#allocation2 + $0x184] sm:$0xff]  }
 0x271   : > { %3394 = vrot.lane.b32.xlu0 %v9339_v10, %s8345_s11  ;;  %v1493_v5 = vshrl.u32 %v533_v26, 16  ;;  %v4993_v16 = vshll.u32 %v10434_v23, 16  ;;  %v10459_v10 = vld [vmem:[#allocation2 + $0x17c] sm:$0xff]   ;;  %v2052_v49 = vsel %vm8438_vm4, %v1395_v44, %v2051_v20  ;;  %v1473_v61 = vrot.slane %v1469_v59, 4 }
 0x272   : > { %v10448_v31 = vpop.permute.xlu1 %3240  ;;  %2053 = vst [vmem:[#allocation2 + $0x1f0] sm:$0x1] %v2052_v49  ;;  %v1472_v29 = vor.u32 %v1470_v50, %v1469_v59  ;;  %v1480_v8 = vor.u32 %v1478_v12, %v1477_v41  ;;  %v1482_v14 = vrot.slane %v1477_v41, 4  ;;  %v1486_v47 = vrot.slane %v1484_v53, 7  ;;  %v402_v12 = vld [vmem:[#allocation2 + $0x204] sm:$0x1] }
 0x273   : > { %13942 = vst [vmem:[#allocation45_spill] sm:$0xff] %v10448_v31  ;;  %v10455_v0 = vpop.permute.xlu0 %3254  ;;  %v4961_v31 = vshll.u32 %v10421_v34, 16  ;;  %v13945_v34 = vrot.slane %v10019_v28, 1  ;;  %v13947_v20 = vshrl.u32 %v10335_v11, 16  ;;  %v10479_v50 = vrot.slane %v1493_v5, 7 }
 0x274   : > { %3384 = vrot.lane.b32.xlu1 %v13821_v52, %s8345_s11  ;;  %13943 = vst [vmem:[#allocation189_spill] sm:$0xff] %v10455_v0  ;;  %v13946_v0 = vrot.slane %v9973_v25, 1  ;;  %v1496_v59 = vshll.u32 %v533_v26, 16  ;;  %v4981_v53 = vshll.u32 %v8083_v56, 16  ;;  %v1481_v41 = vsel %vm8472_vm8, %v1473_v61, %v1480_v8 }
 0x275   : > { %3398 = vrot.lane.b32.xlu0 %v13824_v36, %s8345_s11  ;;  %v4951_v44 = vor.u32 %v10402_v40, %v13947_v20  ;;  %v1489_v36 = vor.u32 %v1487_v24, %v1486_v47  ;;  %v1491_v49 = vrot.slane %v1486_v47, 4  ;;  %v13949_v11 = vshrl.u32 %v10359_v32, 16  ;;  %2075 = vst.msk [vmem:[#allocation2 + $0x220] sm:$0xf] %vm215_vm0, %v1481_v41  ;;  %v313_v24 = vld [vmem:[#allocation2 + $0x230] sm:$0x1] }
 0x276   : > { %v10465_v52 = vpop.permute.xlu1 %3244  ;;  %v10474_v33 = vsel %vm2817_vm10, %v13946_v0, %v13945_v34  ;;  %v4990_v5 = vrot.slane %v4988_v2, 1  ;;  %v5008_v26 = vshll.u32 %v10459_v10, 16  ;;  %v1498_v56 = vor.u32 %v1496_v59, %v10479_v50  ;;  %v535_v34 = vld [vmem:[%s8462_s30 + $0x1b4] sm:$0xf] }
 0x277   : > { %13944 = vst [vmem:[#allocation190_spill] sm:$0xff] %v10465_v52  ;;  %v2072_v52 = vld [vmem:[#allocation2 + $0x21c] sm:$0xf]  ;;  %v10485_v25 = vpop.permute.xlu0 %3258  ;;  %v4971_v40 = vor.u32 %v10415_v46, %v13949_v11  ;;  %v4957_v47 = vshrl.u32 %v10357_v13, 16  ;;  %v403_v32 = vsel %vm8444_vm5, 0, %v402_v12  ;;  %v10504_v2 = vrot.slane %v4993_v16, 1 }
 0x278   : > { %3388 = vrot.lane.b32.xlu1 %v13825_v39, %s8345_s11  ;;  %13948 = vst [vmem:[#allocation191_spill] sm:$0xff] %v10485_v25  ;;  %v1490_v39 = vsel %vm8472_vm8, %v1482_v14, %v1489_v36  ;;  %v2073_v0 = vsel %vm8478_vm9, %v1472_v29, %v2072_v52  ;;  %v4963_v61 = vrot.slane %v4961_v31, 1  ;;  %v5013_v13 = vshll.u32 %v10463_v62, 16  ;;  %404 = vst [vmem:[#allocation2 + $0x204] sm:$0x1] %v403_v32  ;;  %v10518_v31 = vld [vmem:[#allocation2 + $0x190] sm:$0xff]  }
 0x279   : > { %3402 = vrot.lane.b32.xlu0 %v9369_v37, %s8345_s11  ;;  %v1499_v14 = vsel %vm8472_vm8, %v1491_v49, %v1498_v56  ;;  %2074 = vst [vmem:[#allocation2 + $0x21c] sm:$0xf] %v2073_v0  ;;  %2076 = vst.msk [vmem:[#allocation2 + $0x224] sm:$0xf] %vm215_vm0, %v1490_v39  ;;  %v534_v29 = vld [vmem:[%s8462_s30 + $0x1b0] sm:$0xf]  ;;  %v10513_v8 = vsel %vm13630_vm6, %v4951_v44, %v10404_v55 }
 0x27a   : > { %v10500_v46 = vpop.permute.xlu1 %3248  ;;  %v4977_v52 = vshrl.u32 %v10373_v3, 16  ;;  %v10516_v37 = vrot.slane %v4981_v53, 1  ;;  %2077 = vst.msk [vmem:[#allocation2 + $0x228] sm:$0xf] %vm215_vm0, %v1499_v14  ;;  %v314_v16 = vsel %vm8438_vm4, 0, %v313_v24  ;;  %v10530_v3 = vsel %vm13630_vm6, %v4971_v40, %v10432_v22  ;;  %v10535_v12 = vld [vmem:[#allocation2 + $0x198] sm:$0xff]  }
 0x27b   : > { %13950 = vst [vmem:[#allocation192_spill] sm:$0xff] %v10500_v46  ;;  %v10526_v20 = vpop.permute.xlu0 %3262  ;;  %13952 = vst [vmem:[#allocation194_spill] sm:$0xff] %v10530_v3  ;;  %v10533_v59 = vrot.slane %v5008_v26, 1  ;;  %v13953_v41 = vshrl.u32 %v10406_v35, 16  ;;  %v536_v49 = vld [vmem:[%s8462_s30 + $0x1b8] sm:$0xf] }
 0x27c   : > { %3392 = vrot.lane.b32.xlu1 %v9382_v58, %s8345_s11  ;;  %13951 = vst [vmem:[#allocation193_spill] sm:$0xff] %v10526_v20  ;;  %315 = vst [vmem:[#allocation2 + $0x230] sm:$0x1] %v314_v16  ;;  %v4959_v58 = vor.u32 %v4957_v47, %v10404_v55  ;;  %v537_v11 = vld [vmem:[%s8462_s30 + $0x1bc] sm:$0xf]  ;;  %v1502_v56 = vshrl.u32 %v534_v29, 16 }
 0x27d   : > { %v4991_v36 = vor.u32 %v4990_v5, %v13953_v41  ;;  %v1505_v24 = vshll.u32 %v534_v29, 16  ;;  %3406 = vrot.lane.b32.xlu0 %v9388_v63, %s8345_s11  ;;  %v10547_v26 = vrot.slane %v5013_v13, 1  ;;  %v1510_v0 = vshrl.u32 %v535_v34, 16  ;;  %v8086_v14 = vld [vmem:[#allocation2 + $0x178] ss:$0 sps:$4 sm:$0x11]  }
 0x27e   : > { %v10543_v40 = vpop.permute.xlu1 %3252  ;;  %v1513_v32 = vshll.u32 %v535_v34, 16  ;;  %v13955_v35 = vrot.slane %v10230_v42, 1  ;;  %v13956_v5 = vrot.slane %v10019_v28, 1  ;;  %v5028_v47 = vshll.u32 %v10518_v31, 16  ;;  %v10558_v29 = vld [vmem:[#allocation2 + $0x1a4] sm:$0xff]   ;;  %v13957_v16 = vld [vmem:[#allocation59_spill] sm:$0xff] }
 0x27f   : > { %13954 = vst [vmem:[#allocation195_spill] sm:$0xff] %v10543_v40  ;;  %v1430_v63 = vrot.slane %v10339_v27, 4  ;;  %v1504_v13 = vrot.slane %v1502_v56, 7  ;;  %v10563_v41 = vpop.permute.xlu0 %3289  ;;  %v5033_v42 = vshll.u32 %v10535_v12, 16  ;;  %v1512_v34 = vrot.slane %v1510_v0, 7  ;;  %v10573_v27 = vld [vmem:[#allocation2 + $0x1ac] sm:$0xff]  }
 0x280   : > { %v10555_v55 = vsel %vm2817_vm10, %v13956_v5, %v13955_v35  ;;  %3396 = vrot.lane.b32.xlu1 %v13957_v16, %s8345_s11  ;;  %v1519_v28 = vshrl.u32 %v536_v49, 16  ;;  %v1528_v39 = vshrl.u32 %v537_v11, 16  ;;  %v405_v35 = vld [vmem:[#allocation2 + $0x218] sm:$0x1]  ;;  %v10568_v5 = vsel %vm13630_vm6, %v4991_v36, %v10504_v2  ;;  %v2060_v20 = vld [vmem:[#allocation2 + $0x204] sm:$0x1] }
 0x281   : > { %13958 = vst [vmem:[#allocation59_spill] sm:$0xff] %v10568_v5  ;;  %v10571_v53 = vsel %vm13630_vm6, %v4959_v58, %v4963_v61  ;;  %v1507_v56 = vor.u32 %v1505_v24, %v1504_v13  ;;  %v1508_v44 = vrot.slane %v1504_v13, 4  ;;  %3410 = vrot.lane.b32.xlu0 %v9405_v60, %s8345_s11  ;;  %v10580_v0 = vor.u32 %v4977_v52, %v10432_v22 }
 0x282   : > { %v10575_v16 = vpop.permute.xlu1 %3256  ;;  %v1515_v25 = vor.u32 %v1513_v32, %v1512_v34  ;;  %v1522_v40 = vshll.u32 %v536_v49, 16  ;;  %v1531_v36 = vshll.u32 %v537_v11, 16  ;;  %v5030_v46 = vrot.slane %v5028_v47, 1 }
 0x283   : > { %13959 = vst [vmem:[#allocation196_spill] sm:$0xff] %v10575_v16  ;;  %v5048_v61 = vshll.u32 %v10558_v29, 16  ;;  %v5017_v58 = vshrl.u32 %v10463_v62, 16  ;;  %v2061_v24 = vsel %vm8438_vm4, %v1430_v63, %v2060_v20  ;;  %v2081_v13 = vld [vmem:[#allocation2 + $0x230] sm:$0xf]  ;;  %v10588_v60 = vpop.permute.xlu0 %3293  ;;  %v1517_v52 = vrot.slane %v1512_v34, 4 }
 0x284   : > { %3400 = vrot.lane.b32.xlu1 %v9411_v54, %s8345_s11  ;;  %2062 = vst [vmem:[#allocation2 + $0x204] sm:$0x1] %v2061_v24  ;;  %v1516_v22 = vsel %vm8472_vm8, %v1508_v44, %v1515_v25  ;;  %v1521_v49 = vrot.slane %v1519_v28, 7  ;;  %v10592_v11 = vrot.slane %v1528_v39, 7  ;;  %v5001_v32 = vshll.u32 %v8086_v14, 16 }
 0x285   : > { %v5053_v47 = vshll.u32 %v10573_v27, 16  ;;  %v2082_v20 = vsel %vm8478_vm9, %v1507_v56, %v2081_v13  ;;  %2084 = vst.msk [vmem:[#allocation2 + $0x234] sm:$0xf] %vm215_vm0, %v1516_v22  ;;  %v406_v54 = vsel %vm8444_vm5, 0, %v405_v35  ;;  %3414 = vrot.lane.b32.xlu0 %v9840_v19, %s8345_s11  ;;  %v10604_v25 = vrot.slane %v5033_v42, 1 }
 0x286   : > { %v10600_v63 = vpop.permute.xlu1 %3260  ;;  %v1524_v44 = vor.u32 %v1522_v40, %v1521_v49  ;;  %v1526_v39 = vrot.slane %v1521_v49, 4  ;;  %v1533_v14 = vor.u32 %v1531_v36, %v10592_v11  ;;  %2083 = vst [vmem:[#allocation2 + $0x230] sm:$0xf] %v2082_v20  ;;  %407 = vst [vmem:[#allocation2 + $0x218] sm:$0x1] %v406_v54  ;;  %v13961_v34 = vshrl.u32 %v10459_v10, 16 }
 0x287   : > { %13960 = vst [vmem:[#allocation197_spill] sm:$0xff] %v10600_v63  ;;  %v13962_v35 = vshrl.u32 %v10434_v23, 16  ;;  %v5046_v24 = vshrl.u32 %v10558_v29, 16  ;;  %v5050_v13 = vrot.slane %v5048_v61, 1  ;;  %v316_v19 = vld [vmem:[#allocation2 + $0x244] sm:$0x1]  ;;  %v10619_v40 = vpop.permute.xlu0 %3297 }
 0x288   : > { %v5011_v28 = vor.u32 %v10533_v59, %v13961_v34  ;;  %v10615_v42 = vld [vmem:[%s8462_s30 + $0x1c0] sm:$0xf]  ;;  %3404 = vrot.lane.b32.xlu1 %v9425_v48, %s8345_s11  ;;  %v1525_v10 = vsel %vm8472_vm8, %v1517_v52, %v1524_v44  ;;  %v1534_v59 = vsel %vm8472_vm8, %v1526_v39, %v1533_v14  ;;  %v8111_v23 = vld [vmem:[%s13446_s1 + $0x8] sm:$0x3f]   ;;  %v5003_v36 = vrot.slane %v5001_v32, 1  ;;  %v10632_v48 = vld [vmem:[#allocation2 + $0x1b8] sm:$0xff]  }
 0x289   : > { %v4999_v56 = vor.u32 %v13962_v35, %v10504_v2  ;;  %v13963_v2 = vshrl.u32 %v10518_v31, 16  ;;  %v10630_v61 = vrot.slane %v5053_v47, 1  ;;  %2085 = vst.msk [vmem:[#allocation2 + $0x238] sm:$0xf] %vm215_vm0, %v1525_v10  ;;  %2086 = vst.msk [vmem:[#allocation2 + $0x23c] sm:$0xf] %vm215_vm0, %v1534_v59  ;;  %3418 = vrot.lane.b32.xlu0 %v10474_v33, %s8345_s11  ;;  %v5051_v54 = vor.u32 %v5050_v13, %v5046_v24 }
 0x28a   : > { %v539_v22 = vld [vmem:[%s8462_s30 + $0x1c4] sm:$0xf]  ;;  %v10637_v52 = vpop.permute.xlu1 %3264  ;;  %v10641_v49 = vld [vmem:[#allocation2 + $0x18c] ss:$0 sps:$4 sm:$0x11]   ;;  %v1465_v31 = vrot.slane %v10387_v21, 4 }
 0x28b   : > { %v5031_v29 = vor.u32 %v5030_v46, %v13963_v2  ;;  %13964 = vst [vmem:[#allocation198_spill] sm:$0xff] %v10637_v52  ;;  %v8346_v46 = vmov 65535   ;;  %v317_v47 = vsel %vm8438_vm4, 0, %v316_v19  ;;  %v1537_v20 = vshrl.u32 %v10615_v42, 16  ;;  %v10647_v44 = vld [vmem:[#allocation2 + $0x1c0] sm:$0xff]   ;;  %v10656_v21 = vpop.permute.xlu0 %3301 }
 0x28c   : > { %v4026_v32 = vsel %vm4024_vm12, 4294967295, %v8346_v46  ;;  %v10649_v39 = vld [vmem:[#allocation2 + $0x1a0] ss:$0 sps:$4 sm:$0x11]   ;;  %v5037_v14 = vshrl.u32 %v10535_v12, 16  ;;  %v1540_v34 = vshll.u32 %v10615_v42, 16  ;;  %3408 = vrot.lane.b32.xlu1 %v9433_v18, %s8345_s11  ;;  %v10665_v12 = vsel %vm13630_vm6, %v5011_v28, %v10547_v26 }
 0x28d   : > { %v4027_v33 = vsel %vm4025_vm13, %v4026_v32, 0  ;;  %318 = vst [vmem:[#allocation2 + $0x244] sm:$0x1] %v317_v47  ;;  %v1539_v19 = vrot.slane %v1537_v20, 7  ;;  %v1545_v24 = vshrl.u32 %v539_v22, 16  ;;  %v1548_v13 = vshll.u32 %v539_v22, 16  ;;  %5265 = vrot.lane.b32.xlu0 %v10513_v8, %s8338_s4 }
 0x28e   : > { %v4029_v35 = vand.u32 %v8111_v23, %v4027_v33  ;;  %v10661_v10 = vld [vmem:[%s13446_s1] sm:$0xff]   ;;  %13965 = vst [vmem:[#allocation199_spill] sm:$0xff] %v10665_v12  ;;  %v10670_v18 = vsel %vm13630_vm6, %v10580_v0, %v10516_v37  ;;  %v10675_v42 = vor.u32 %v5017_v58, %v10547_v26  ;;  %v5068_v59 = vshll.u32 %v10632_v48, 16  ;;  %v2069_v23 = vld [vmem:[#allocation2 + $0x218] sm:$0x1]  ;;  %v10678_v2 = vpop.permute.xlu1 %3291  ;;  %v10686_v37 = vld [vmem:[#allocation2 + $0x1cc] sm:$0xff]  }
 0x28f   : > { %13966 = vst [vmem:[#allocation200_spill] sm:$0xff] %v10670_v18  ;;  %v10684_v28 = vsel %vm13630_vm6, %v5031_v29, %v10604_v25  ;;  %v2070_v62 = vsel %vm8438_vm4, %v1465_v31, %v2069_v23  ;;  %v540_v26 = vld [vmem:[%s8462_s30 + $0x1c8] sm:$0xf]  ;;  %v1543_v0 = vrot.slane %v1539_v19, 4  ;;  %v10691_v58 = vrot.slane %v1545_v24, 7  ;;  %v10703_v46 = vld [vmem:[#allocation2 + $0x1d4] sm:$0xff]   ;;  %v10708_v31 = vpop.permute.xlu0 %3305 }
 0x290   : > { %13967 = vst [vmem:[#allocation201_spill] sm:$0xff] %v10684_v28  ;;  %7817 = vmatprep.subr.bf16.mxu0 %v4029_v35  ;;  %v10694_v22 = vsel %vm13630_vm6, %v4999_v56, %v5003_v36  ;;  %v10698_v8 = vsel %vm13630_vm6, %v5051_v54, %v10630_v61  ;;  %v10701_v29 = vor.u32 %v5037_v14, %v10604_v25  ;;  %2071 = vst [vmem:[#allocation2 + $0x218] sm:$0x1] %v2070_v62  ;;  %v541_v32 = vld [vmem:[%s8462_s30 + $0x1cc] sm:$0xf]  ;;  %vm3877_vm12 = vcmask 195584  }
 0x291   : > { %13968 = vst [vmem:[#allocation202_spill] sm:$0xff] %v10694_v22  ;;  %13969 = vst [vmem:[#allocation203_spill] sm:$0xff] %v10698_v8  ;;  %7818 = vmatpush3.bf16.msra.mxu0 %v4029_v35  ;;  %7885 = vmatprep.subr.bf16.mxu1 %v4029_v35  ;;  %v5021_v56 = vshll.u32 %v10641_v49, 16  ;;  %v5073_v36 = vshll.u32 %v10647_v44, 16  ;;  %v1542_v47 = vor.u32 %v1540_v34, %v1539_v19  ;;  %v5066_v25 = vshrl.u32 %v10632_v48, 16 }
 0x292   : > { %3412 = vrot.lane.b32.xlu1 %v9445_v51, %s8345_s11  ;;  %13970 = vst [vmem:[#allocation204_spill] sm:$0xff] %v10708_v31  ;;  %v1550_v20 = vor.u32 %v1548_v13, %v10691_v58  ;;  %7819 = vmatprep.subr.bf16.mxu0 %v10661_v10  ;;  %v5070_v54 = vrot.slane %v5068_v59, 1  ;;  %v5041_v14 = vshll.u32 %v10649_v39, 16  ;;  %v1554_v33 = vshrl.u32 %v540_v26, 16  ;;  %v408_v24 = vld [vmem:[#allocation2 + $0x22c] sm:$0x1]  ;;  %v10716_v51 = vpop.permute.xlu1 %3295 }
 0x293   : > { %7886 = vmatpush3.bf16.msra.mxu1 %v4029_v35  ;;  %5269 = vrot.lane.b32.xlu0 %v10530_v3, %s8338_s4  ;;  %v5088_v49 = vshll.u32 %v10686_v37, 16  ;;  %v1557_v19 = vshll.u32 %v540_v26, 16  ;;  %v1563_v13 = vshrl.u32 %v541_v32, 16  ;;  %v5093_v39 = vshll.u32 %v10703_v46, 16  ;;  %v319_v62 = vld [vmem:[#allocation2 + $0x258] sm:$0x1] }
 0x294   : > { %v1551_v34 = vsel %vm8472_vm8, %v1543_v0, %v1550_v20  ;;  %v2090_v48 = vld [vmem:[#allocation2 + $0x244] sm:$0xf]  ;;  %7887 = vmatprep.subr.bf16.mxu1 %v10661_v10  ;;  %v1552_v59 = vrot.slane %v10691_v58, 4  ;;  %v1556_v35 = vrot.slane %v1554_v33, 7  ;;  %v1566_v23 = vshll.u32 %v541_v32, 16  ;;  %v13971_v26 = vld [vmem:[#allocation143_spill] sm:$0xff]  ;;  %v10733_v0 = vpop.permute.xlu0 %3309 }
 0x295   : > { %2093 = vst.msk [vmem:[#allocation2 + $0x248] sm:$0xf] %vm215_vm0, %v1551_v34  ;;  %v10728_v52 = vld [vmem:[%s8462_s30 + $0x1d0] sm:$0xf]  ;;  %7820 = vmatpush3.bf16.msra.mxu0 %v10661_v10  ;;  %13972 = vst [vmem:[#allocation143_spill] sm:$0xff] %v10733_v0  ;;  %v5023_v20 = vrot.slane %v5021_v56, 1  ;;  %v2091_v32 = vsel %vm8478_vm9, %v1542_v47, %v2090_v48  ;;  %v5071_v33 = vor.u32 %v5070_v54, %v5066_v25 }
 0x296   : > { %3416 = vrot.lane.b32.xlu1 %v13971_v26, %s8345_s11  ;;  %v10735_v63 = vrot.slane %v5073_v36, 1  ;;  %v10737_v16 = vld [vmem:[#allocation2 + $0x1b4] ss:$0 sps:$4 sm:$0x11]   ;;  %v10739_v58 = vrot.slane %v1563_v13, 7  ;;  %v5057_v34 = vshrl.u32 %v10573_v27, 16  ;;  %v1559_v43 = vor.u32 %v1557_v19, %v1556_v35  ;;  %v10748_v56 = vpop.permute.xlu1 %3299 }
 0x297   : > { %13973 = vst [vmem:[#allocation205_spill] sm:$0xff] %v10737_v16  ;;  %v10744_v3 = vld [vmem:[#allocation2 + $0x1e0] sm:$0xff]   ;;  %v1561_v7 = vrot.slane %v1556_v35, 4  ;;  %2092 = vst [vmem:[#allocation2 + $0x244] sm:$0xf] %v2091_v32  ;;  %7888 = vmatpush3.bf16.msra.mxu1 %v10661_v10  ;;  %5273 = vrot.lane.b32.xlu0 %v10568_v5, %s8338_s4  ;;  %v5043_v36 = vrot.slane %v5041_v14, 1 }
 0x298   : > { %13974 = vst [vmem:[#allocation206_spill] sm:$0xff] %v10744_v3  ;;  %v543_v26 = vld [vmem:[%s8462_s30 + $0x1d4] sm:$0xf]  ;;  %v10753_v25 = vld [vmem:[#allocation2 + $0x1e8] sm:$0xff]   ;;  %v1568_v27 = vor.u32 %v1566_v23, %v10739_v58  ;;  %v409_v54 = vsel %vm8444_vm5, 0, %v408_v24  ;;  %v5090_v19 = vrot.slane %v5088_v49, 1  ;;  %v1560_v48 = vsel %vm8472_vm8, %v1552_v59, %v1559_v43  ;;  %v10766_v35 = vpop.permute.xlu0 %3313 }
 0x299   : > { %v10758_v13 = vrot.slane %v5093_v39, 1  ;;  %410 = vst [vmem:[#allocation2 + $0x22c] sm:$0x1] %v409_v54  ;;  %v544_v14 = vld [vmem:[%s8462_s30 + $0x1d8] sm:$0xf]  ;;  %13975 = vst [vmem:[#allocation207_spill] sm:$0xff] %v10766_v35 }
 0x29a   : > { %3420 = vrot.lane.b32.xlu1 %v10555_v55, %s8345_s11  ;;  %v5061_v23 = vshll.u32 %v10737_v16, 16  ;;  %v1569_v24 = vsel %vm8472_vm8, %v1561_v7, %v1568_v27  ;;  %2094 = vst.msk [vmem:[#allocation2 + $0x24c] sm:$0xf] %vm215_vm0, %v1560_v48  ;;  %v320_v49 = vsel %vm8438_vm4, 0, %v319_v62  ;;  %v545_v39 = vld [vmem:[%s8462_s30 + $0x1dc] sm:$0xf]  ;;  %v10780_v10 = vpop.permute.xlu1 %3303 }
 0x29b   : > { %v1572_v43 = vshrl.u32 %v10728_v52, 16  ;;  %v5106_v59 = vshrl.u32 %v10744_v3, 16  ;;  %v5108_v32 = vshll.u32 %v10744_v3, 16  ;;  %2095 = vst.msk [vmem:[#allocation2 + $0x250] sm:$0xf] %vm215_vm0, %v1569_v24  ;;  %v1575_v55 = vshll.u32 %v10728_v52, 16  ;;  %5277 = vrot.lane.b32.xlu0 %v10665_v12, %s8338_s4 }
 0x29c   : > { %321 = vst [vmem:[#allocation2 + $0x258] sm:$0x1] %v320_v49  ;;  %v1580_v54 = vshrl.u32 %v543_v26, 16  ;;  %13976 = vst [vmem:[#allocation208_spill] sm:$0xff] %v10780_v10  ;;  %v5113_v7 = vshll.u32 %v10753_v25, 16  ;;  %v1583_v27 = vshll.u32 %v543_v26, 16  ;;  %v10788_v52 = vpop.permute.xlu0 %3317  ;;  %v10792_v24 = vsel %vm13630_vm6, %v10675_v42, %v5023_v20 }
 0x29d   : > { %v1574_v62 = vrot.slane %v1572_v43, 7  ;;  %v1589_v48 = vshrl.u32 %v544_v14, 16  ;;  %v1500_v47 = vrot.slane %v10479_v50, 4  ;;  %v1592_v35 = vshll.u32 %v544_v14, 16  ;;  %13977 = vst [vmem:[#allocation209_spill] sm:$0xff] %v10788_v52  ;;  %13978 = vst [vmem:[#allocation210_spill] sm:$0xff] %v10792_v24 }
 0x29e   : > { %v1582_v5 = vrot.slane %v1580_v54, 7  ;;  %v1598_v0 = vshrl.u32 %v545_v39, 16  ;;  %5267 = vrot.lane.b32.xlu1 %v10571_v53, %s8338_s4  ;;  %v10796_v49 = vsel %vm13630_vm6, %v5071_v33, %v10735_v63  ;;  %v10798_v26 = vld [vmem:[#allocation2 + $0x1f4] sm:$0xff]   ;;  %v10800_v43 = vld [vmem:[#allocation2 + $0x1fc] sm:$0xff]   ;;  %v10806_v42 = vpop.permute.xlu1 %3307  ;;  %v10812_v20 = vsel %vm13630_vm6, %v10701_v29, %v5043_v36 }
 0x29f   : > { %13979 = vst [vmem:[#allocation211_spill] sm:$0xff] %v10796_v49  ;;  %v1578_v50 = vrot.slane %v1574_v62, 4  ;;  %v1591_v14 = vrot.slane %v1589_v48, 7  ;;  %v411_v54 = vld [vmem:[#allocation2 + $0x240] sm:$0x1]  ;;  %v1577_v53 = vor.u32 %v1575_v55, %v1574_v62  ;;  %13980 = vst [vmem:[#allocation212_spill] sm:$0xff] %v10806_v42  ;;  %5281 = vrot.lane.b32.xlu0 %v10684_v28, %s8338_s4  ;;  %v10815_v33 = vor.u32 %v5057_v34, %v10630_v61 }
 0x2a0   : > { %v10802_v12 = vld [vmem:[#allocation2 + $0x1c8] ss:$0 sps:$4 sm:$0x11]   ;;  %v1585_v16 = vor.u32 %v1583_v27, %v1582_v5  ;;  %v1587_v52 = vrot.slane %v1582_v5, 4  ;;  %v10804_v3 = vrot.slane %v1598_v0, 7  ;;  %13981 = vst [vmem:[#allocation213_spill] sm:$0xff] %v10812_v20  ;;  %v10828_v61 = vpop.permute.xlu0 %3321 }
 0x2a1   : > { %v5110_v48 = vrot.slane %v5108_v32, 1  ;;  %v10817_v10 = vld [vmem:[#allocation2 + $0x1dc] ss:$0 sps:$4 sm:$0x11]   ;;  %v2078_v55 = vld [vmem:[#allocation2 + $0x22c] sm:$0x1]  ;;  %v1594_v62 = vor.u32 %v1592_v35, %v1591_v14 }
 0x2a2   : > { %v322_v5 = vld [vmem:[#allocation2 + $0x26c] sm:$0x1]  ;;  %v2079_v0 = vsel %vm8438_vm4, %v1500_v47, %v2078_v55  ;;  %v1586_v27 = vsel %vm8472_vm8, %v1578_v50, %v1585_v16  ;;  %v1596_v28 = vrot.slane %v1591_v14, 4  ;;  %v1601_v42 = vshll.u32 %v545_v39, 16  ;;  %v10824_v31 = vld [vmem:[%s8462_s30 + $0x1e0] sm:$0xf]  ;;  %5271 = vrot.lane.b32.xlu1 %v10670_v18, %s8338_s4  ;;  %v10846_v55 = vpop.permute.xlu1 %3311 }
 0x2a3   : > { %13982 = vst [vmem:[#allocation214_spill] sm:$0xff] %v10828_v61  ;;  %v13983_v29 = vshrl.u32 %v10686_v37, 16  ;;  %v5128_v36 = vshll.u32 %v10798_v26, 16  ;;  %v5133_v47 = vshll.u32 %v10800_v43, 16  ;;  %2080 = vst [vmem:[#allocation2 + $0x22c] sm:$0x1] %v2079_v0  ;;  %v1595_v16 = vsel %vm8472_vm8, %v1587_v52, %v1594_v62  ;;  %5285 = vrot.lane.b32.xlu0 %v10698_v8, %s8338_s4 }
 0x2a4   : > { %v2099_v35 = vld [vmem:[#allocation2 + $0x258] sm:$0xf]  ;;  %2102 = vst.msk [vmem:[#allocation2 + $0x25c] sm:$0xf] %vm215_vm0, %v1586_v27  ;;  %v5063_v39 = vrot.slane %v5061_v23, 1  ;;  %v10837_v32 = vld [vmem:[#allocation2 + $0x208] sm:$0xff]   ;;  %v1603_v50 = vor.u32 %v1601_v42, %v10804_v3  ;;  %v5111_v52 = vor.u32 %v5110_v48, %v5106_v59 }
 0x2a5   : > { %v5091_v34 = vor.u32 %v5090_v19, %v13983_v29  ;;  %v2100_v37 = vsel %vm8478_vm9, %v1577_v53, %v2099_v35  ;;  %2103 = vst.msk [vmem:[#allocation2 + $0x260] sm:$0xf] %vm215_vm0, %v1595_v16  ;;  %v412_v19 = vsel %vm8444_vm5, 0, %v411_v54  ;;  %v547_v14 = vld [vmem:[%s8462_s30 + $0x1e4] sm:$0xf]  ;;  %13984 = vst [vmem:[#allocation215_spill] sm:$0xff] %v10846_v55 }
 0x2a6   : > { %v10850_v23 = vrot.slane %v5113_v7, 1  ;;  %2101 = vst [vmem:[#allocation2 + $0x258] sm:$0xf] %v2100_v37  ;;  %413 = vst [vmem:[#allocation2 + $0x240] sm:$0x1] %v412_v19  ;;  %v5126_v0 = vshrl.u32 %v10798_v26, 16  ;;  %v1604_v54 = vsel %vm8472_vm8, %v1596_v28, %v1603_v50  ;;  %5275 = vrot.lane.b32.xlu1 %v10694_v22, %s8338_s4  ;;  %v10863_v7 = vpop.permute.xlu0 %3325  ;;  %v10873_v42 = vpop.permute.xlu1 %3315 }
 0x2a7   : > { %v548_v53 = vld [vmem:[%s8462_s30 + $0x1e8] sm:$0xf]  ;;  %v323_v27 = vsel %vm8438_vm4, 0, %v322_v5  ;;  %v1607_v59 = vshrl.u32 %v10824_v31, 16  ;;  %13985 = vst [vmem:[#allocation216_spill] sm:$0xff] %v10863_v7  ;;  %v5130_v48 = vrot.slane %v5128_v36, 1  ;;  %5289 = vrot.lane.b32.xlu0 %v10796_v49, %s8338_s4  ;;  %v10883_v62 = vsel %vm13630_vm6, %v5091_v34, %v10758_v13 }
 0x2a8   : > { %v10865_v29 = vrot.slane %v5133_v47, 1  ;;  %2104 = vst.msk [vmem:[#allocation2 + $0x264] sm:$0xf] %vm215_vm0, %v1604_v54  ;;  %324 = vst [vmem:[#allocation2 + $0x26c] sm:$0x1] %v323_v27  ;;  %v1615_v28 = vshrl.u32 %v547_v14, 16  ;;  %v10901_v34 = vsel %vm13630_vm6, %v10815_v33, %v5063_v39 }
 0x2a9   : > { %v10870_v35 = vld [vmem:[%s8462_s30 + $0x1ec] sm:$0xf]  ;;  %v5148_v5 = vshll.u32 %v10837_v32, 16  ;;  %v1609_v50 = vrot.slane %v1607_v59, 7  ;;  %v1618_v37 = vshll.u32 %v547_v14, 16  ;;  %v1624_v19 = vshrl.u32 %v548_v53, 16 }
 0x2aa   : > { %13986 = vst [vmem:[#allocation217_spill] sm:$0xff] %v10873_v42  ;;  %v10877_v36 = vld [vmem:[#allocation2 + $0x210] sm:$0xff]   ;;  %v1535_v47 = vrot.slane %v10592_v11, 4  ;;  %v1610_v54 = vshll.u32 %v10824_v31, 16  ;;  %v1617_v27 = vrot.slane %v1615_v28, 7  ;;  %v1627_v16 = vshll.u32 %v548_v53, 16  ;;  %5279 = vrot.lane.b32.xlu1 %v10792_v24, %s8338_s4  ;;  %v10897_v53 = vpop.permute.xlu0 %3329  ;;  %v10908_v55 = vpop.permute.xlu1 %3319 }
 0x2ab   : > { %13987 = vst [vmem:[#allocation218_spill] sm:$0xff] %v10883_v62  ;;  %v13988_v14 = vshrl.u32 %v10647_v44, 16  ;;  %v10890_v8 = vld [vmem:[#allocation2 + $0x21c] sm:$0xff]   ;;  %v10892_v49 = vld [vmem:[#allocation2 + $0x224] sm:$0xff]   ;;  %v1613_v22 = vrot.slane %v1609_v50, 4  ;;  %v1633_v11 = vshrl.u32 %v10870_v35, 16  ;;  %v5131_v18 = vor.u32 %v5130_v48, %v5126_v0  ;;  %5293 = vrot.lane.b32.xlu0 %v10883_v62, %s8338_s4 }
 0x2ac   : > { %v414_v31 = vld [vmem:[#allocation2 + $0x254] sm:$0x1]  ;;  %13989 = vst [vmem:[#allocation219_spill] sm:$0xff] %v10897_v53  ;;  %13990 = vst [vmem:[#allocation220_spill] sm:$0xff] %v10901_v34  ;;  %v1622_v44 = vrot.slane %v1617_v27, 4  ;;  %v1626_v28 = vrot.slane %v1624_v19, 7 }
 0x2ad   : > { %v10888_v59 = vor.u32 %v13988_v14, %v10735_v63  ;;  %v1620_v63 = vor.u32 %v1618_v37, %v1617_v27  ;;  %v10905_v14 = vsel %vm13630_vm6, %v5111_v52, %v10850_v23  ;;  %v5146_v7 = vshrl.u32 %v10837_v32, 16  ;;  %v2087_v42 = vld [vmem:[#allocation2 + $0x240] sm:$0x1]  ;;  %v10912_v24 = vld [vmem:[#allocation2 + $0x1f0] ss:$0 sps:$4 sm:$0x11]  }
 0x2ae   : > { %13991 = vst [vmem:[#allocation221_spill] sm:$0xff] %v10905_v14  ;;  %v5150_v61 = vrot.slane %v5148_v5, 1  ;;  %v10914_v33 = vld [vmem:[#allocation2 + $0x230] sm:$0xff]   ;;  %v2088_v39 = vsel %vm8438_vm4, %v1535_v47, %v2087_v42  ;;  %v1612_v37 = vor.u32 %v1610_v54, %v1609_v50  ;;  %v1629_v0 = vor.u32 %v1627_v16, %v1626_v28  ;;  %5283 = vrot.lane.b32.xlu1 %v10812_v20, %s8338_s4  ;;  %v10926_v42 = vpop.permute.xlu0 %3333  ;;  %v10994_v38 = vld [vmem:[#allocation2 + $0x258] sm:$0xff]  }
 0x2af   : > { %v1621_v52 = vsel %vm8472_vm8, %v1613_v22, %v1620_v63  ;;  %v5153_v48 = vshll.u32 %v10877_v36, 16  ;;  %v5168_v5 = vshll.u32 %v10890_v8, 16  ;;  %v5173_v19 = vshll.u32 %v10892_v49, 16  ;;  %2089 = vst [vmem:[#allocation2 + $0x240] sm:$0x1] %v2088_v39  ;;  %13992 = vst [vmem:[#allocation222_spill] sm:$0xff] %v10926_v42  ;;  %5297 = vrot.lane.b32.xlu0 %v10905_v14, %s8338_s4 }
 0x2b0   : > { %v1631_v27 = vrot.slane %v1626_v28, 4  ;;  %2111 = vst.msk [vmem:[#allocation2 + $0x270] sm:$0xf] %vm215_vm0, %v1621_v52  ;;  %v1630_v22 = vsel %vm8472_vm8, %v1622_v44, %v1629_v0  ;;  %v10930_v16 = vrot.slane %v1633_v11, 7  ;;  %v1636_v50 = vshll.u32 %v10870_v35, 16  ;;  %v10945_v44 = vld [vmem:[#allocation2 + $0x244] sm:$0xff]  }
 0x2b1   : > { %v2108_v47 = vld [vmem:[#allocation2 + $0x26c] sm:$0xf]  ;;  %v415_v54 = vsel %vm8444_vm5, 0, %v414_v31  ;;  %v13993_v63 = vshll.u32 %v10802_v12, 16  ;;  %v10939_v39 = vsel %vm13630_vm6, %v5131_v18, %v10865_v29  ;;  %v13995_v52 = vshrl.u32 %v10703_v46, 16  ;;  %v10948_v31 = vpop.permute.xlu1 %3323 }
 0x2b2   : > { %13994 = vst [vmem:[#allocation223_spill] sm:$0xff] %v10939_v39  ;;  %v5117_v11 = vshrl.u32 %v10753_v25, 16  ;;  %2112 = vst.msk [vmem:[#allocation2 + $0x274] sm:$0xf] %vm215_vm0, %v1630_v22  ;;  %v417_v35 = vld [vmem:[#allocation2 + $0x268] sm:$0x1]  ;;  %v2109_v20 = vsel %vm8478_vm9, %v1612_v37, %v2108_v47  ;;  %v5151_v22 = vor.u32 %v5150_v61, %v5146_v7  ;;  %5287 = vrot.lane.b32.xlu1 %v10901_v34, %s8338_s4 }
 0x2b3   : > { %v5083_v28 = vrot.slane %v13993_v63, 1  ;;  %v5099_v62 = vor.u32 %v13995_v52, %v10758_v13  ;;  %416 = vst [vmem:[#allocation2 + $0x254] sm:$0x1] %v415_v54  ;;  %13996 = vst [vmem:[#allocation224_spill] sm:$0xff] %v10948_v31  ;;  %v13997_v18 = vshll.u32 %v10817_v10, 16  ;;  %v10954_v63 = vld [vmem:[#allocation2 + $0x238] sm:$0xff]   ;;  %v1638_v52 = vor.u32 %v1636_v50, %v10930_v16  ;;  %5301 = vrot.lane.b32.xlu0 %v10939_v39, %s8338_s4 }
 0x2b4   : > { %v5188_v13 = vshll.u32 %v10914_v33, 16  ;;  %v10960_v54 = vrot.slane %v5153_v48, 1  ;;  %v5166_v42 = vshrl.u32 %v10890_v8, 16  ;;  %v5170_v53 = vrot.slane %v5168_v5, 1  ;;  %2110 = vst [vmem:[#allocation2 + $0x26c] sm:$0xf] %v2109_v20 }
 0x2b5   : > { %v5103_v0 = vrot.slane %v13997_v18, 1  ;;  %v10965_v18 = vpop.permute.xlu0 %3337  ;;  %v5121_v14 = vshll.u32 %v10912_v24, 16  ;;  %v10968_v31 = vrot.slane %v5173_v19, 1  ;;  %v1639_v50 = vsel %vm8472_vm8, %v1631_v27, %v1638_v52  ;;  %v420_v7 = vld [vmem:[#allocation2 + $0x27c] sm:$0x1]  ;;  %v14000_v27 = vld [vmem:[#allocation81_spill] sm:$0xff] }
 0x2b6   : > { %13998 = vst [vmem:[#allocation225_spill] sm:$0xff] %v10965_v18  ;;  %v418_v61 = vsel %vm8444_vm5, 0, %v417_v35  ;;  %v10976_v37 = vsel %vm13630_vm6, %v10888_v59, %v5083_v28  ;;  %v10978_v20 = vld [vmem:[#allocation2 + $0x204] ss:$0 sps:$4 sm:$0x11]   ;;  %v5186_v48 = vshrl.u32 %v10914_v33, 16  ;;  %v3489_v47 = vsel %vm3487_vm14, %v10446_v17, %v14000_v27  ;;  %v10987_v35 = vpop.permute.xlu1 %3327 }
 0x2b7   : > { %13999 = vst [vmem:[#allocation226_spill] sm:$0xff] %v10976_v37  ;;  %v5208_v5 = vshll.u32 %v10945_v44, 16  ;;  %2113 = vst.msk [vmem:[#allocation2 + $0x278] sm:$0xf] %vm215_vm0, %v1639_v50  ;;  %v1570_v19 = vrot.slane %v10739_v58, 4  ;;  %v5190_v59 = vrot.slane %v5188_v13, 1  ;;  %v5171_v17 = vor.u32 %v5170_v53, %v5166_v42  ;;  %5291 = vrot.lane.b32.xlu1 %v10976_v37, %s8338_s4 }
 0x2b8   : > { %419 = vst [vmem:[#allocation2 + $0x268] sm:$0x1] %v418_v61  ;;  %v5193_v28 = vshll.u32 %v10954_v63, 16  ;;  %v10992_v52 = vld [vmem:[#allocation2 + $0x24c] sm:$0xff]   ;;  %v11000_v61 = vsel %vm13630_vm6, %v5151_v22, %v10960_v54  ;;  %v421_v30 = vsel %vm8444_vm5, 0, %v420_v7  ;;  %v11009_v13 = vsel %vm13630_vm6, %v5099_v62, %v5103_v0  ;;  %v11034_v37 = vld [vmem:[#allocation2 + $0x260] sm:$0xff]  }
 0x2b9   : > { %v14001_v50 = vld [vmem:[#allocation111_spill] sm:$0xff]  ;;  %14002 = vst [vmem:[#allocation81_spill] sm:$0xff] %v11000_v61  ;;  %v11002_v27 = vld [vmem:[#allocation2 + $0x218] ss:$0 sps:$4 sm:$0x11]   ;;  %v11011_v39 = vpop.permute.xlu0 %3341  ;;  %v5137_v22 = vshrl.u32 %v10800_v43, 16  ;;  %5305 = vrot.lane.b32.xlu0 %v11000_v61, %s8338_s4 }
 0x2ba   : > { %v3554_v58 = vsel %vm3552_vm15, %v3489_v47, %v14001_v50  ;;  %14003 = vst [vmem:[#allocation111_spill] sm:$0xff] %v11009_v13  ;;  %14004 = vst [vmem:[#allocation227_spill] sm:$0xff] %v11011_v39  ;;  %v5119_v47 = vor.u32 %v5117_v11, %v10850_v23  ;;  %v5123_v50 = vrot.slane %v5121_v14, 1  ;;  %v2096_v34 = vld [vmem:[#allocation2 + $0x254] sm:$0x1]  ;;  %v5141_v53 = vshll.u32 %v10978_v20, 16  ;;  %v11019_v62 = vpop.permute.xlu1 %3331 }
 0x2bb   : > { %422 = vst [vmem:[#allocation2 + $0x27c] sm:$0x1] %v421_v30  ;;  %v5206_v42 = vshrl.u32 %v10945_v44, 16  ;;  %v5210_v7 = vrot.slane %v5208_v5, 1  ;;  %v2097_v4 = vsel %vm8438_vm4, %v1570_v19, %v2096_v34  ;;  %14005 = vst [vmem:[#allocation228_spill] sm:$0xff] %v11019_v62  ;;  %v5213_v23 = vshll.u32 %v10992_v52, 16  ;;  %5295 = vrot.lane.b32.xlu1 %v11009_v13, %s8338_s4 }
 0x2bc   : > { %v5228_v14 = vshll.u32 %v10994_v38, 16  ;;  %2098 = vst [vmem:[#allocation2 + $0x254] sm:$0x1] %v2097_v4  ;;  %v1605_v30 = vrot.slane %v10804_v3, 4  ;;  %v14006_v11 = vld [vmem:[#allocation132_spill] sm:$0xff]  ;;  %v11030_v5 = vsel %vm13630_vm6, %v5171_v17, %v10968_v31  ;;  %v5191_v34 = vor.u32 %v5190_v59, %v5186_v48  ;;  %v11036_v61 = vld [vmem:[#allocation2 + $0x26c] sm:$0xff]  }
 0x2bd   : > { %v3619_v0 = vsel %vm3617_vm1, %v3554_v58, %v14006_v11  ;;  %14007 = vst [vmem:[#allocation132_spill] sm:$0xff] %v11030_v5  ;;  %v11032_v19 = vrot.slane %v5193_v28, 1  ;;  %v11040_v4 = vpop.permute.xlu0 %3345  ;;  %v5157_v3 = vshrl.u32 %v10877_v36, 16  ;;  %v5161_v58 = vshll.u32 %v11002_v27, 16  ;;  %5309 = vrot.lane.b32.xlu0 %v11030_v5, %s8338_s4 }
 0x2be   : > { %14008 = vst [vmem:[#allocation229_spill] sm:$0xff] %v11040_v4  ;;  %v1640_v17 = vrot.slane %v10930_v16, 4  ;;  %v11046_v48 = vsel %vm13630_vm6, %v5119_v47, %v5123_v50  ;;  %v5139_v59 = vor.u32 %v5137_v22, %v10865_v29  ;;  %v5143_v28 = vrot.slane %v5141_v53, 1  ;;  %v11049_v39 = vld [vmem:[#allocation2 + $0x22c] ss:$0 sps:$4 sm:$0x11]   ;;  %v11051_v62 = vpop.permute.xlu1 %3335 }
 0x2bf   : > { %14009 = vst [vmem:[#allocation230_spill] sm:$0xff] %v11046_v48  ;;  %v5211_v11 = vor.u32 %v5210_v7, %v5206_v42  ;;  %v2105_v18 = vld [vmem:[#allocation2 + $0x268] sm:$0x1]  ;;  %14010 = vst [vmem:[#allocation231_spill] sm:$0xff] %v11051_v62  ;;  %v11055_v13 = vrot.slane %v5213_v23, 1  ;;  %v5226_v4 = vshrl.u32 %v10994_v38, 16  ;;  %v11064_v22 = vsel %vm13630_vm6, %v5191_v34, %v11032_v19  ;;  %5299 = vrot.lane.b32.xlu1 %v11046_v48, %s8338_s4 }
 0x2c0   : > { %v5230_v16 = vrot.slane %v5228_v14, 1  ;;  %v2106_v47 = vsel %vm8438_vm4, %v1605_v30, %v2105_v18  ;;  %v14011_v50 = vld [vmem:[#allocation162_spill] sm:$0xff]  ;;  %v5233_v53 = vshll.u32 %v11034_v37, 16  ;;  %v11067_v42 = vld [vmem:[#allocation2 + $0x274] sm:$0xff]   ;;  %v5248_v7 = vshll.u32 %v11036_v61, 16 }
 0x2c1   : > { %v3684_v29 = vsel %vm3682_vm2, %v3619_v0, %v14011_v50  ;;  %14012 = vst [vmem:[#allocation162_spill] sm:$0xff] %v11064_v22  ;;  %2107 = vst [vmem:[#allocation2 + $0x268] sm:$0x1] %v2106_v47  ;;  %v11072_v18 = vpop.permute.xlu0 %3349  ;;  %v5163_v14 = vrot.slane %v5161_v58, 1  ;;  %v5177_v30 = vshrl.u32 %v10892_v49, 16  ;;  %v11080_v50 = vsel %vm13630_vm6, %v5139_v59, %v5143_v28  ;;  %5313 = vrot.lane.b32.xlu0 %v11064_v22, %s8338_s4 }
 0x2c2   : > { %v2114_v23 = vld [vmem:[#allocation2 + $0x27c] sm:$0x1]  ;;  %14013 = vst [vmem:[#allocation232_spill] sm:$0xff] %v11072_v18  ;;  %v3749_v34 = vsel %vm3747_vm3, %v3684_v29, %v10203_v57  ;;  %14014 = vst [vmem:[#allocation233_spill] sm:$0xff] %v11080_v50  ;;  %v5159_v47 = vor.u32 %v5157_v3, %v10960_v54  ;;  %v5181_v5 = vshll.u32 %v11049_v39, 16  ;;  %v11086_v48 = vpop.permute.xlu1 %3339  ;;  %v11092_v58 = vsel %vm13630_vm6, %v5211_v11, %v11055_v13 }
 0x2c3   : > { %v2115_v0 = vsel %vm8438_vm4, %v1640_v17, %v2114_v23  ;;  %v11084_v62 = vld [vmem:[#allocation2 + $0x240] ss:$0 sps:$4 sm:$0x11]   ;;  %14015 = vst [vmem:[#allocation234_spill] sm:$0xff] %v11086_v48  ;;  %14016 = vst [vmem:[#allocation235_spill] sm:$0xff] %v11092_v58  ;;  %vm3959_vm13 = vcmask 220160   ;;  %v5231_v57 = vor.u32 %v5230_v16, %v5226_v4  ;;  %v3814_v28 = vsel %vm3812_vm7, %v3749_v34, %v10563_v41  ;;  %5303 = vrot.lane.b32.xlu1 %v11080_v50, %s8338_s4 }
 0x2c4   : > { %2116 = vst [vmem:[#allocation2 + $0x27c] sm:$0x1] %v2115_v0  ;;  %v11094_v17 = vrot.slane %v5233_v53, 1  ;;  %v5246_v54 = vshrl.u32 %v11036_v61, 16  ;;  %v5250_v3 = vrot.slane %v5248_v7, 1  ;;  %v5253_v59 = vshll.u32 %v11067_v42, 16 }
 0x2c5   : > { %v3359_v29 = vpop.permute.xlu0 %3358  ;;  %v5179_v11 = vor.u32 %v5177_v30, %v10968_v31  ;;  %v5197_v23 = vshrl.u32 %v10954_v63, 16  ;;  %v11105_v4 = vsel %vm13630_vm6, %v5159_v47, %v5163_v14  ;;  %v5183_v61 = vrot.slane %v5181_v5, 1  ;;  %v11109_v7 = vld [vmem:[#allocation2 + $0x254] ss:$0 sps:$4 sm:$0x11]   ;;  %5317 = vrot.lane.b32.xlu0 %v11092_v58, %s8338_s4  ;;  %v8170_v30 = vld [vmem:[#allocation2 + $0x8] sm:$0xff]  }
 0x2c6   : > { %14017 = vst [vmem:[#allocation236_spill] sm:$0xff] %v11105_v4  ;;  %v3879_v16 = vsel %vm3877_vm12, %v3814_v28, %v3359_v29  ;;  %v5201_v53 = vshll.u32 %v11084_v62, 16  ;;  %v11111_v0 = vpop.permute.xlu1 %3343  ;;  %v11118_v41 = vsel %vm13630_vm6, %v5231_v57, %v11094_v17  ;;  %v5251_v31 = vor.u32 %v5250_v3, %v5246_v54  ;;  %v14020_v5 = vld [vmem:[#allocation47_spill] sm:$0xff]  ;;  %v14021_v28 = vld [vmem:[#allocation50_spill] sm:$0xff]  ;;  %v14038_v48 = vld [vmem:[#allocation48_spill] sm:$0xff] }
 0x2c7   : > { %14018 = vst [vmem:[#allocation237_spill] sm:$0xff] %v11111_v0  ;;  %7821 = vmatprep.mubr.msk.bf16.mxu0 %vm3959_vm13, %v3879_v16  ;;  %14019 = vst [vmem:[#allocation238_spill] sm:$0xff] %v11118_v41  ;;  %v11120_v14 = vrot.slane %v5253_v59, 1  ;;  %v3426_v34 = vsel %vm3422_vm11, %v8170_v30, %v14020_v5  ;;  %v8171_v47 = vld [vmem:[#allocation2 + $0x14] sm:$0xff]   ;;  %5307 = vrot.lane.b32.xlu1 %v11105_v4, %s8338_s4  ;;  %v5199_v16 = vor.u32 %v5197_v23, %v11032_v19  ;;  %v14026_v19 = vld [vmem:[#allocation34_spill] sm:$0xff] }
 0x2c8   : > { %v3428_v29 = vsel %vm3422_vm11, %v8171_v47, %v14021_v28  ;;  %v11132_v57 = vsel %vm13630_vm6, %v5179_v11, %v5183_v61  ;;  %v5203_v54 = vrot.slane %v5201_v53, 1  ;;  %v5217_v3 = vshrl.u32 %v10992_v52, 16  ;;  %v11136_v30 = vld [vmem:[#allocation2 + $0x268] ss:$0 sps:$4 sm:$0x11]   ;;  %v14023_v5 = vld [vmem:[#allocation83_spill] sm:$0xff] }
 0x2c9   : > { %v11128_v58 = vpop.permute.xlu0 %3362  ;;  %14022 = vst [vmem:[#allocation47_spill] sm:$0xff] %v11132_v57  ;;  %v5221_v59 = vshll.u32 %v11109_v7, 16  ;;  %v3493_v47 = vsel %vm3487_vm14, %v3428_v29, %v14023_v5  ;;  %v14024_v28 = vld [vmem:[#allocation88_spill] sm:$0xff]  ;;  %5321 = vrot.lane.b32.xlu0 %v11118_v41, %s8338_s4  ;;  %v11150_v23 = vsel %vm13630_vm6, %v5251_v31, %v11120_v14  ;;  %v8172_v61 = vld [vmem:[#allocation2 + $0x140] sm:$0xff]   ;;  %v5237_v31 = vshrl.u32 %v11034_v37, 16  ;;  %v8176_v0 = vld [vmem:[#allocation2 + $0x28] sm:$0xff]  }
 0x2ca   : > { %v3491_v22 = vsel %vm3487_vm14, %v3426_v34, %v14024_v28  ;;  %v11142_v4 = vpop.permute.xlu1 %3347  ;;  %v3558_v11 = vsel %vm3552_vm15, %v3493_v47, %v14026_v19  ;;  %14027 = vst [vmem:[#allocation83_spill] sm:$0xff] %v11150_v23  ;;  %v5329_v53 = vrot.slane %v8172_v61, 1  ;;  %v14028_v5 = vld [vmem:[#allocation117_spill] sm:$0xff]  ;;  %v14029_v28 = vld [vmem:[#allocation134_spill] sm:$0xff]  ;;  %v11165_v19 = vsel %vm13630_vm6, %v5199_v16, %v5203_v54 }
 0x2cb   : > { %14025 = vst [vmem:[#allocation50_spill] sm:$0xff] %v11142_v4  ;;  %v3556_v34 = vsel %vm3552_vm15, %v3491_v22, %v14028_v5  ;;  %v3623_v50 = vsel %vm3617_vm1, %v3558_v11, %v14029_v28  ;;  %5311 = vrot.lane.b32.xlu1 %v11132_v57, %s8338_s4  ;;  %14030 = vst [vmem:[#allocation88_spill] sm:$0xff] %v11165_v19  ;;  %v5219_v61 = vor.u32 %v5217_v3, %v11055_v13  ;;  %v8123_v18 = vld [vmem:[#allocation2 + $0x27c] ss:$0 sps:$4 sm:$0x11]   ;;  %v14031_v22 = vld [vmem:[#allocation139_spill] sm:$0xff] }
 0x2cc   : > { %v5223_v41 = vrot.slane %v5221_v59, 1  ;;  %v5241_v29 = vshll.u32 %v11136_v30, 16  ;;  %v3621_v5 = vsel %vm3617_vm1, %v3556_v34, %v14031_v22  ;;  %v14032_v11 = vld [vmem:[#allocation164_spill] sm:$0xff]  ;;  %v14034_v4 = vld [vmem:[#allocation169_spill] sm:$0xff]  ;;  %v14035_v13 = vrot.slane %v11152_v1, 1 }
 0x2cd   : > { %v11161_v47 = vpop.permute.xlu0 %3366  ;;  %v3688_v28 = vsel %vm3682_vm2, %v3623_v50, %v14032_v11  ;;  %5325 = vrot.lane.b32.xlu0 %v11150_v23, %s8338_s4  ;;  %v3686_v16 = vsel %vm3682_vm2, %v3621_v5, %v14034_v4  ;;  %v11182_v3 = vld [vmem:[#allocation2 + $0x154] sm:$0xff]   ;;  %v11185_v34 = vld [vmem:[#allocation2 + $0x15c] sm:$0xff]   ;;  %v14036_v11 = vld [vmem:[#allocation174_spill] sm:$0xff]  ;;  %v5261_v50 = vshll.u32 %v8123_v18, 16 }
 0x2ce   : > { %v11173_v57 = vpop.permute.xlu1 %3351  ;;  %v5331_v54 = vsel %vm2817_vm10, %v5329_v53, %v14035_v13  ;;  %v5334_v59 = vrot.slane %v11182_v3, 1  ;;  %v3753_v22 = vsel %vm3747_vm3, %v3688_v28, %v10218_v15  ;;  %v3751_v23 = vsel %vm3747_vm3, %v3686_v16, %v14036_v11  ;;  %v8177_v28 = vld [vmem:[#allocation2 + $0x1c] sm:$0xff]  }
 0x2cf   : > { %14033 = vst [vmem:[#allocation34_spill] sm:$0xff] %v11173_v57  ;;  %5315 = vrot.lane.b32.xlu1 %v11165_v19, %s8338_s4  ;;  %v5239_v53 = vor.u32 %v5237_v31, %v11094_v17  ;;  %v11198_v5 = vsel %vm13630_vm6, %v5219_v61, %v5223_v41  ;;  %v5243_v13 = vrot.slane %v5241_v29, 1  ;;  %v5257_v57 = vshrl.u32 %v11067_v42, 16  ;;  %v14039_v16 = vld [vmem:[#allocation53_spill] sm:$0xff]  ;;  %v11219_v31 = vld [vmem:[#allocation2 + $0x170] sm:$0xff]  }
 0x2d0   : > { %14037 = vst [vmem:[#allocation117_spill] sm:$0xff] %v11198_v5  ;;  %v3432_v15 = vsel %vm3422_vm11, %v8176_v0, %v14038_v48  ;;  %v3430_v11 = vsel %vm3422_vm11, %v8177_v28, %v14039_v16  ;;  %v3818_v19 = vsel %vm3812_vm7, %v3753_v22, %v10588_v60  ;;  %v3816_v17 = vsel %vm3812_vm7, %v3751_v23, %v10678_v2  ;;  %v11216_v48 = vld [vmem:[#allocation2 + $0x168] sm:$0xff]   ;;  %v14041_v61 = vld [vmem:[#allocation85_spill] sm:$0xff]  ;;  %v14043_v28 = vld [vmem:[#allocation115_spill] sm:$0xff] }
 0x2d1   : > { %v11194_v4 = vpop.permute.xlu0 %3370  ;;  %5409 = vrot.lane.b32.xlu0 %v5331_v54, %s8339_s5  ;;  %v14040_v18 = vrot.slane %v11185_v34, 1  ;;  %v5339_v0 = vrot.slane %v11216_v48, 1  ;;  %v13591_v60 = vrot.slane %v11219_v31, 1  ;;  %v3497_v2 = vsel %vm3487_vm14, %v3432_v15, %v14041_v61  ;;  %v14042_v23 = vld [vmem:[#allocation89_spill] sm:$0xff] }
 0x2d2   : > { %v3361_v41 = vpop.permute.xlu1 %3360  ;;  %v3495_v54 = vsel %vm3487_vm14, %v3430_v11, %v14042_v23  ;;  %v3883_v22 = vsel %vm3877_vm12, %v3818_v19, %v11128_v58  ;;  %v3562_v16 = vsel %vm3552_vm15, %v3497_v2, %v14043_v28  ;;  %v11237_v15 = vsel %vm13630_vm6, %v5239_v53, %v5243_v13  ;;  %v14046_v19 = vld [vmem:[#allocation136_spill] sm:$0xff]  ;;  %v14047_v61 = vld [vmem:[#allocation141_spill] sm:$0xff]  ;;  %v14049_v23 = vld [vmem:[#allocation166_spill] sm:$0xff] }
 0x2d3   : > { %v3881_v42 = vsel %vm3877_vm12, %v3816_v17, %v3361_v41  ;;  %v11214_v29 = vsel %vm2817_vm10, %v5334_v59, %v14040_v18  ;;  %5319 = vrot.lane.b32.xlu1 %v11198_v5, %s8338_s4  ;;  %14044 = vst [vmem:[#allocation134_spill] sm:$0xff] %v11237_v15  ;;  %v5259_v11 = vor.u32 %v5257_v57, %v11120_v14  ;;  %v5263_v17 = vrot.slane %v5261_v50, 1  ;;  %v14045_v41 = vld [vmem:[#allocation39_spill] sm:$0xff]  ;;  %v11253_v14 = vld [vmem:[#allocation2 + $0x17c] sm:$0xff]   ;;  %v11256_v50 = vld [vmem:[#allocation2 + $0x184] sm:$0xff]  }
 0x2d4   : > { %7822 = vmatmul.mubr.msk.bf16.vlgmr.msra.gmra.mxu0 %vm3959_vm13, %v3881_v42  ;;  %v3560_v58 = vsel %vm3552_vm15, %v3495_v54, %v14045_v41  ;;  %v3627_v18 = vsel %vm3617_vm1, %v3562_v16, %v14046_v19  ;;  %v11251_v53 = vsel %vm2817_vm10, %v5339_v0, %v13591_v60  ;;  %14048 = vst [vmem:[#allocation139_spill] sm:$0xff] %v11253_v14  ;;  %v5344_v57 = vrot.slane %v11253_v14, 1  ;;  %v14051_v0 = vld [vmem:[#allocation35_spill] sm:$0xff] }
 0x2d5   : > { %v11231_v59 = vpop.permute.xlu0 %3374  ;;  %7825 = vmatprep.mubr.msk.bf16.mxu0 %vm3959_vm13, %v3883_v22  ;;  %5413 = vrot.lane.b32.xlu0 %v11214_v29, %s8339_s5  ;;  %v3625_v2 = vsel %vm3617_vm1, %v3560_v58, %v14047_v61  ;;  %v3692_v54 = vsel %vm3682_vm2, %v3627_v18, %v14049_v23  ;;  %v14050_v22 = vld [vmem:[#allocation170_spill] sm:$0xff]  ;;  %v11272_v19 = vsel %vm13630_vm6, %v5259_v11, %v5263_v17  ;;  %v8182_v61 = vld [vmem:[#allocation2 + $0x150] ss:$0 sps:$4 sm:$0x11]   ;;  %v8183_v18 = vld [vmem:[#allocation2 + $0x3c] sm:$0xff]   ;;  %v14054_v11 = vrot.slane %v11256_v50, 1 }
 0x2d6   : > { %v3365_v42 = vpop.permute.xlu1 %3364  ;;  %v3690_v28 = vsel %vm3682_vm2, %v3625_v2, %v14050_v22  ;;  %v3757_v41 = vsel %vm3747_vm3, %v3692_v54, %v14051_v0  ;;  %14052 = vst [vmem:[#allocation164_spill] sm:$0xff] %v11272_v19  ;;  %v5332_v60 = vrot.slane %v8182_v61, 1  ;;  %v14053_v23 = vld [vmem:[#allocation51_spill] sm:$0xff]  ;;  %v11291_v0 = vld [vmem:[#allocation2 + $0x198] sm:$0xff]   ;;  %vm4579_vm6 = vcmask 519168  }
 0x2d7   : > { %5323 = vrot.lane.b32.xlu1 %v11237_v15, %s8338_s4  ;;  %v3755_v58 = vsel %vm3747_vm3, %v3690_v28, %v10273_v9  ;;  %v3436_v2 = vsel %vm3422_vm11, %v8183_v18, %v14053_v23  ;;  %v3822_v22 = vsel %vm3812_vm7, %v3757_v41, %v10619_v40  ;;  %v11286_v17 = vsel %vm2817_vm10, %v5344_v57, %v14054_v11  ;;  %v11288_v54 = vld [vmem:[#allocation2 + $0x190] sm:$0xff]   ;;  %v14057_v41 = vld [vmem:[#allocation57_spill] sm:$0xff] }
 0x2d8   : > { %v3820_v13 = vsel %vm3812_vm7, %v3755_v58, %v10716_v51  ;;  %14055 = vst [vmem:[#allocation169_spill] sm:$0xff] %v11286_v17  ;;  %14056 = vst [vmem:[#allocation174_spill] sm:$0xff] %v11288_v54  ;;  %v5349_v28 = vrot.slane %v11288_v54, 1  ;;  %v8186_v51 = vld [vmem:[#allocation2 + $0x30] sm:$0xff]   ;;  %v14060_v11 = vld [vmem:[#allocation37_spill] sm:$0xff] }
 0x2d9   : > { %v11265_v16 = vpop.permute.xlu0 %3378  ;;  %5417 = vrot.lane.b32.xlu0 %v11251_v53, %s8339_s5  ;;  %v3885_v9 = vsel %vm3877_vm12, %v3820_v13, %v3365_v42  ;;  %v3434_v58 = vsel %vm3422_vm11, %v8186_v51, %v14057_v41  ;;  %v14058_v61 = vld [vmem:[#allocation87_spill] sm:$0xff]  ;;  %v3887_v13 = vsel %vm3877_vm12, %v3822_v22, %v11161_v47  ;;  %v8187_v47 = vld [vmem:[#allocation2 + $0x164] ss:$0 sps:$4 sm:$0x11]   ;;  %v14072_v54 = vld [vmem:[#allocation54_spill] sm:$0xff] }
 0x2da   : > { %v3369_v15 = vpop.permute.xlu1 %3368  ;;  %v3501_v42 = vsel %vm3487_vm14, %v3436_v2, %v14058_v61  ;;  %v14059_v18 = vld [vmem:[#allocation91_spill] sm:$0xff]  ;;  %v14061_v2 = vrot.slane %v11152_v1, 1  ;;  %v5337_v22 = vrot.slane %v8187_v47, 1  ;;  %v14062_v41 = vld [vmem:[#allocation41_spill] sm:$0xff]  ;;  %v14065_v1 = vrot.slane %v11291_v0, 1 }
 0x2db   : > { %5327 = vrot.lane.b32.xlu1 %v11272_v19, %s8338_s4  ;;  %v3499_v23 = vsel %vm3487_vm14, %v3434_v58, %v14059_v18  ;;  %v3566_v40 = vsel %vm3552_vm15, %v3501_v42, %v14060_v11  ;;  %v14064_v58 = vld [vmem:[#allocation144_spill] sm:$0xff]  ;;  %v14069_v47 = vld [vmem:[#allocation171_spill] sm:$0xff]  ;;  %s12302_s4 = scalar_lea.vmem [#allocation3], %s7244_s29 }
 0x2dc   : > { %7826 = vmatmul.mubr.msk.bf16.gmra.mxu0 %vm3959_vm13, %v3885_v9  ;;  %v5333_v51 = vsel %vm2817_vm10, %v14061_v2, %v5332_v60  ;;  %v3564_v61 = vsel %vm3552_vm15, %v3499_v23, %v14062_v41  ;;  %v14063_v9 = vld [vmem:[#allocation138_spill] sm:$0xff]  ;;  %v11326_v60 = vsel %vm2817_vm10, %v5349_v28, %v14065_v1  ;;  %v14068_v11 = vld [vmem:[#allocation168_spill] sm:$0xff]  ;;  %v14070_v28 = vld [vmem:[#allocation173_spill] sm:$0xff]  ;;  %v14071_v1 = vrot.slane %v11185_v34, 1 }
 0x2dd   : > { %v11303_v57 = vpop.permute.xlu0 %3382  ;;  %7829 = vmatprep.mubr.msk.bf16.mxu0 %vm3959_vm13, %v3887_v13  ;;  %v3631_v19 = vsel %vm3617_vm1, %v3566_v40, %v14063_v9  ;;  %5421 = vrot.lane.b32.xlu0 %v11286_v17, %s8339_s5  ;;  %v3629_v42 = vsel %vm3617_vm1, %v3564_v61, %v14064_v58  ;;  %14066 = vst [vmem:[#allocation48_spill] sm:$0xff] %v11326_v60  ;;  %v11328_v13 = vld [vmem:[#allocation2 + $0x1a4] sm:$0xff]   ;;  %v11331_v23 = vld [vmem:[#allocation2 + $0x1ac] sm:$0xff]  }
 0x2de   : > { %v11317_v5 = vpop.permute.xlu1 %3372  ;;  %14067 = vst [vmem:[#allocation53_spill] sm:$0xff] %v11328_v13  ;;  %v5354_v18 = vrot.slane %v11328_v13, 1  ;;  %v3696_v2 = vsel %vm3682_vm2, %v3631_v19, %v14068_v11  ;;  %v3694_v41 = vsel %vm3682_vm2, %v3629_v42, %v14069_v47  ;;  %v11348_v40 = vsel %vm2817_vm10, %v14071_v1, %v5337_v22  ;;  %v8190_v13 = vld [vmem:[#allocation2 + $0x178] ss:$0 sps:$4 sm:$0x11]   ;;  %v8191_v11 = vld [vmem:[#allocation2 + $0x50] sm:$0xff]  }
 0x2df   : > { %5411 = vrot.lane.b32.xlu1 %v5333_v51, %s8339_s5  ;;  %v3761_v9 = vsel %vm3747_vm3, %v3696_v2, %v14070_v28  ;;  %v3759_v58 = vsel %vm3747_vm3, %v3694_v41, %v10291_v45  ;;  %v5342_v19 = vrot.slane %v8190_v13, 1  ;;  %v3440_v42 = vsel %vm3422_vm11, %v8191_v11, %v14072_v54  ;;  %v11366_v41 = vld [vmem:[#allocation2 + $0x1b8] sm:$0xff]   ;;  %v8194_v28 = vld [vmem:[#allocation2 + $0x44] sm:$0xff]   ;;  %v14077_v1 = vld [vmem:[#allocation11_spill] sm:$0xff] }
 0x2e0   : > { %v3826_v51 = vsel %vm3812_vm7, %v3761_v9, %v10656_v21  ;;  %v3824_v2 = vsel %vm3812_vm7, %v3759_v58, %v10748_v56  ;;  %v14073_v22 = vrot.slane %v11331_v23, 1  ;;  %14075 = vst [vmem:[#allocation89_spill] sm:$0xff] %v11366_v41  ;;  %v5359_v54 = vrot.slane %v11366_v41, 1  ;;  %v11369_v21 = vld [vmem:[#allocation2 + $0x1c0] sm:$0xff]   ;;  %v14076_v9 = vld [vmem:[#allocation60_spill] sm:$0xff]  ;;  %v14079_v56 = vld [vmem:[#allocation38_spill] sm:$0xff] }
 0x2e1   : > { %v11339_v61 = vpop.permute.xlu0 %3386  ;;  %5425 = vrot.lane.b32.xlu0 %v11326_v60, %s8339_s5  ;;  %v3889_v45 = vsel %vm3877_vm12, %v3824_v2, %v3369_v15  ;;  %v3438_v58 = vsel %vm3422_vm11, %v8194_v28, %v14076_v9  ;;  %v3505_v15 = vsel %vm3487_vm14, %v3440_v42, %v14077_v1  ;;  %v3891_v11 = vsel %vm3877_vm12, %v3826_v51, %v11194_v4  ;;  %v14078_v2 = vld [vmem:[#allocation93_spill] sm:$0xff]  ;;  %v8195_v4 = vld [vmem:[#allocation2 + $0x18c] ss:$0 sps:$4 sm:$0x11]   ;;  %v14083_v1 = vld [vmem:[#allocation140_spill] sm:$0xff] }
 0x2e2   : > { %v11356_v47 = vpop.permute.xlu1 %3376  ;;  %v11364_v13 = vsel %vm2817_vm10, %v5354_v18, %v14073_v22  ;;  %v3503_v22 = vsel %vm3487_vm14, %v3438_v58, %v14078_v2  ;;  %v3570_v41 = vsel %vm3552_vm15, %v3505_v15, %v14079_v56  ;;  %v14080_v42 = vrot.slane %v11219_v31, 1  ;;  %v14082_v9 = vld [vmem:[#allocation118_spill] sm:$0xff] }
 0x2e3   : > { %14074 = vst [vmem:[#allocation85_spill] sm:$0xff] %v11364_v13  ;;  %5415 = vrot.lane.b32.xlu1 %v11348_v40, %s8339_s5  ;;  %v5347_v51 = vrot.slane %v8195_v4, 1  ;;  %v3635_v60 = vsel %vm3617_vm1, %v3570_v41, %v14083_v1  ;;  %v14084_v56 = vld [vmem:[#allocation146_spill] sm:$0xff]  ;;  %v14085_v15 = vrot.slane %v11369_v21, 1  ;;  %v14089_v4 = vld [vmem:[#allocation172_spill] sm:$0xff]  ;;  %v14090_v1 = vld [vmem:[#allocation175_spill] sm:$0xff] }
 0x2e4   : > { %7830 = vmatmul.mubr.msk.bf16.gmra.mxu0 %vm3959_vm13, %v3889_v45  ;;  %v11391_v28 = vsel %vm2817_vm10, %v14080_v42, %v5342_v19  ;;  %v3568_v45 = vsel %vm3552_vm15, %v3503_v22, %v14082_v9  ;;  %v14088_v41 = vld [vmem:[#allocation10_spill] sm:$0xff] }
 0x2e5   : > { %v11381_v18 = vpop.permute.xlu0 %3390  ;;  %7833 = vmatprep.mubr.msk.bf16.mxu0 %vm3959_vm13, %v3891_v11  ;;  %14081 = vst [vmem:[#allocation115_spill] sm:$0xff] %v11391_v28  ;;  %5429 = vrot.lane.b32.xlu0 %v11364_v13, %s8339_s5  ;;  %v3633_v58 = vsel %vm3617_vm1, %v3568_v45, %v14084_v56  ;;  %v11406_v19 = vsel %vm2817_vm10, %v5359_v54, %v14085_v15  ;;  %v11408_v11 = vld [vmem:[#allocation2 + $0x1cc] sm:$0xff]   ;;  %v14091_v15 = vrot.slane %v11256_v50, 1  ;;  %v14094_v13 = vld [vmem:[#allocation204_spill] sm:$0xff] }
 0x2e6   : > { %v11397_v17 = vpop.permute.xlu1 %3380  ;;  %14086 = vst [vmem:[#allocation39_spill] sm:$0xff] %v11406_v19  ;;  %14087 = vst [vmem:[#allocation136_spill] sm:$0xff] %v11408_v11  ;;  %v5364_v2 = vrot.slane %v11408_v11, 1  ;;  %v3700_v42 = vsel %vm3682_vm2, %v3635_v60, %v14088_v41  ;;  %v3698_v9 = vsel %vm3682_vm2, %v3633_v58, %v14089_v4  ;;  %v8197_v60 = vld [vmem:[#allocation2 + $0x1a0] ss:$0 sps:$4 sm:$0x11]  }
 0x2e7   : > { %5419 = vrot.lane.b32.xlu1 %v11391_v28, %s8339_s5  ;;  %v3765_v54 = vsel %vm3747_vm3, %v3700_v42, %v14090_v1  ;;  %v3763_v56 = vsel %vm3747_vm3, %v3698_v9, %v10312_v6  ;;  %v11427_v22 = vsel %vm2817_vm10, %v14091_v15, %v5347_v51  ;;  %v5352_v41 = vrot.slane %v8197_v60, 1  ;;  %v8198_v11 = vld [vmem:[#allocation2 + $0x64] sm:$0xff]   ;;  %v14095_v28 = vld [vmem:[#allocation208_spill] sm:$0xff] }
 0x2e8   : > { %14092 = vst [vmem:[#allocation141_spill] sm:$0xff] %v11427_v22  ;;  %v14093_v58 = vld [vmem:[#allocation58_spill] sm:$0xff]  ;;  %v3830_v14 = vsel %vm3812_vm7, %v3765_v54, %v14094_v13  ;;  %v3828_v42 = vsel %vm3812_vm7, %v3763_v56, %v14095_v28  ;;  %v14096_v51 = vrot.slane %v10703_v46, 1  ;;  %v8199_v54 = vld [vmem:[#allocation2 + $0x58] sm:$0xff]  }
 0x2e9   : > { %v11418_v45 = vpop.permute.xlu0 %3394  ;;  %v3444_v4 = vsel %vm3422_vm11, %v8198_v11, %v14093_v58  ;;  %5433 = vrot.lane.b32.xlu0 %v11406_v19, %s8339_s5  ;;  %v3893_v6 = vsel %vm3877_vm12, %v3828_v42, %v11317_v5  ;;  %v14098_v11 = vld [vmem:[#allocation206_spill] sm:$0xff]  ;;  %v3895_v19 = vsel %vm3877_vm12, %v3830_v14, %v11231_v59  ;;  %v14105_v59 = vld [vmem:[#allocation205_spill] sm:$0xff] }
 0x2ea   : > { %v11435_v1 = vpop.permute.xlu1 %3384  ;;  %v11444_v9 = vsel %vm2817_vm10, %v5364_v2, %v14096_v51  ;;  %v5369_v15 = vrot.slane %v14098_v11, 1  ;;  %v14099_v60 = vld [vmem:[#allocation62_spill] sm:$0xff]  ;;  %v14102_v51 = vld [vmem:[#allocation40_spill] sm:$0xff]  ;;  %v5357_v14 = vrot.slane %v14105_v59, 1 }
 0x2eb   : > { %14097 = vst [vmem:[#allocation166_spill] sm:$0xff] %v11444_v9  ;;  %v3442_v28 = vsel %vm3422_vm11, %v8199_v54, %v14099_v60  ;;  %v14100_v56 = vld [vmem:[#allocation90_spill] sm:$0xff]  ;;  %5423 = vrot.lane.b32.xlu1 %v11427_v22, %s8339_s5  ;;  %v14106_v60 = vld [vmem:[#allocation119_spill] sm:$0xff] }
 0x2ec   : > { %v3509_v58 = vsel %vm3487_vm14, %v3444_v4, %v14100_v56  ;;  %7834 = vmatmul.mubr.msk.bf16.gmra.mxu0 %vm3959_vm13, %v3893_v6  ;;  %v14101_v2 = vld [vmem:[#allocation94_spill] sm:$0xff]  ;;  %v14103_v4 = vrot.slane %v11291_v0, 1 }
 0x2ed   : > { %v11457_v5 = vpop.permute.xlu0 %3398  ;;  %v3507_v42 = vsel %vm3487_vm14, %v3442_v28, %v14101_v2  ;;  %v3574_v11 = vsel %vm3552_vm15, %v3509_v58, %v14102_v51  ;;  %7837 = vmatprep.mubr.msk.bf16.mxu0 %vm3959_vm13, %v3895_v19  ;;  %v14107_v56 = vld [vmem:[#allocation142_spill] sm:$0xff]  ;;  %5437 = vrot.lane.b32.xlu0 %v11444_v9, %s8339_s5  ;;  %v14108_v28 = vld [vmem:[#allocation148_spill] sm:$0xff]  ;;  %v14109_v58 = vrot.slane %v10753_v25, 1  ;;  %v5374_v2 = vrot.slane %v10798_v26, 1  ;;  %v14111_v51 = vld [vmem:[#allocation13_spill] sm:$0xff] }
 0x2ee   : > { %v11467_v54 = vsel %vm2817_vm10, %v14103_v4, %v5352_v41  ;;  %v3572_v6 = vsel %vm3552_vm15, %v3507_v42, %v14106_v60  ;;  %v3639_v13 = vsel %vm3617_vm1, %v3574_v11, %v14107_v56  ;;  %v11474_v22 = vpop.permute.xlu1 %3388  ;;  %v14112_v4 = vld [vmem:[#allocation15_spill] sm:$0xff]  ;;  %v14115_v26 = vrot.slane %v11331_v23, 1 }
 0x2ef   : > { %14104 = vst [vmem:[#allocation170_spill] sm:$0xff] %v11467_v54  ;;  %v3637_v19 = vsel %vm3617_vm1, %v3572_v6, %v14108_v28  ;;  %v11483_v41 = vsel %vm2817_vm10, %v5369_v15, %v14109_v58  ;;  %v3704_v11 = vsel %vm3682_vm2, %v3639_v13, %v14111_v51  ;;  %5427 = vrot.lane.b32.xlu1 %v11467_v54, %s8339_s5  ;;  %v14113_v6 = vld [vmem:[#allocation176_spill] sm:$0xff]  ;;  %v14114_v15 = vld [vmem:[#allocation179_spill] sm:$0xff]  ;;  %v5362_v13 = vrot.slane %v10802_v12, 1 }
 0x2f0   : > { %14110 = vst [vmem:[#allocation35_spill] sm:$0xff] %v11483_v41  ;;  %v3702_v59 = vsel %vm3682_vm2, %v3637_v19, %v14112_v4  ;;  %v3769_v56 = vsel %vm3747_vm3, %v3704_v11, %v14113_v6  ;;  %v11502_v58 = vsel %vm2817_vm10, %v14115_v26, %v5357_v14  ;;  %v8200_v51 = vld [vmem:[#allocation2 + $0x78] sm:$0xff]   ;;  %v14116_v19 = vld [vmem:[#allocation61_spill] sm:$0xff]  ;;  %v14117_v42 = vld [vmem:[#allocation143_spill] sm:$0xff]  ;;  %v14119_v12 = vrot.slane %v10800_v43, 1 }
 0x2f1   : > { %v11493_v60 = vpop.permute.xlu0 %3402  ;;  %v3767_v28 = vsel %vm3747_vm3, %v3702_v59, %v14114_v15  ;;  %v3448_v4 = vsel %vm3422_vm11, %v8200_v51, %v14116_v19  ;;  %v3834_v9 = vsel %vm3812_vm7, %v3769_v56, %v14117_v42  ;;  %v14118_v54 = vld [vmem:[#allocation212_spill] sm:$0xff]  ;;  %5441 = vrot.lane.b32.xlu0 %v11483_v41, %s8339_s5  ;;  %v5379_v15 = vrot.slane %v10837_v32, 1  ;;  %v8201_v56 = vld [vmem:[#allocation2 + $0x6c] sm:$0xff]  }
 0x2f2   : > { %v3832_v11 = vsel %vm3812_vm7, %v3767_v28, %v14118_v54  ;;  %v11511_v6 = vpop.permute.xlu1 %3392  ;;  %v11520_v59 = vsel %vm2817_vm10, %v5374_v2, %v14119_v12  ;;  %v14121_v26 = vld [vmem:[#allocation64_spill] sm:$0xff]  ;;  %v3899_v19 = vsel %vm3877_vm12, %v3834_v9, %v11265_v16  ;;  %v5367_v16 = vrot.slane %v10817_v10, 1  ;;  %v14126_v9 = vld [vmem:[#allocation121_spill] sm:$0xff]  ;;  %v14137_v41 = vld [vmem:[#allocation215_spill] sm:$0xff] }
 0x2f3   : > { %v3897_v14 = vsel %vm3877_vm12, %v3832_v11, %v11356_v47  ;;  %14120 = vst [vmem:[#allocation51_spill] sm:$0xff] %v11520_v59  ;;  %v3446_v54 = vsel %vm3422_vm11, %v8201_v56, %v14121_v26  ;;  %v14122_v28 = vld [vmem:[#allocation92_spill] sm:$0xff]  ;;  %5431 = vrot.lane.b32.xlu1 %v11502_v58, %s8339_s5  ;;  %v14124_v11 = vld [vmem:[#allocation42_spill] sm:$0xff]  ;;  %v14127_v26 = vld [vmem:[#allocation145_spill] sm:$0xff]  ;;  %v5384_v10 = vrot.slane %v10890_v8, 1  ;;  %v14134_v8 = vrot.slane %v10703_v46, 1 }
 0x2f4   : > { %v3513_v51 = vsel %vm3487_vm14, %v3448_v4, %v14122_v28  ;;  %7838 = vmatmul.mubr.msk.bf16.gmra.mxu0 %vm3959_vm13, %v3897_v14  ;;  %v14123_v32 = vld [vmem:[#allocation96_spill] sm:$0xff]  ;;  %v14125_v4 = vrot.slane %v11369_v21, 1 }
 0x2f5   : > { %v11533_v47 = vpop.permute.xlu0 %3406  ;;  %v3511_v2 = vsel %vm3487_vm14, %v3446_v54, %v14123_v32  ;;  %v3578_v12 = vsel %vm3552_vm15, %v3513_v51, %v14124_v11  ;;  %7841 = vmatprep.mubr.msk.bf16.mxu0 %vm3959_vm13, %v3899_v19  ;;  %5445 = vrot.lane.b32.xlu0 %v11520_v59, %s8339_s5  ;;  %v14128_v54 = vld [vmem:[#allocation150_spill] sm:$0xff]  ;;  %v14129_v19 = vrot.slane %v10877_v36, 1  ;;  %v14136_v32 = vld [vmem:[#allocation207_spill] sm:$0xff] }
 0x2f6   : > { %v11543_v56 = vsel %vm2817_vm10, %v14125_v4, %v5362_v13  ;;  %v3576_v14 = vsel %vm3552_vm15, %v3511_v2, %v14126_v9  ;;  %v3643_v28 = vsel %vm3617_vm1, %v3578_v12, %v14127_v26  ;;  %v11550_v42 = vpop.permute.xlu1 %3396  ;;  %v14130_v2 = vld [vmem:[#allocation14_spill] sm:$0xff]  ;;  %v14131_v12 = vld [vmem:[#allocation17_spill] sm:$0xff] }
 0x2f7   : > { %v3641_v51 = vsel %vm3617_vm1, %v3576_v14, %v14128_v54  ;;  %v11559_v13 = vsel %vm2817_vm10, %v5379_v15, %v14129_v19  ;;  %v3708_v11 = vsel %vm3682_vm2, %v3643_v28, %v14130_v2  ;;  %5435 = vrot.lane.b32.xlu1 %v11543_v56, %s8339_s5  ;;  %v14132_v14 = vld [vmem:[#allocation177_spill] sm:$0xff]  ;;  %v11578_v19 = vsel %vm2817_vm10, %v14134_v8, %v5367_v16  ;;  %v8202_v2 = vld [vmem:[#allocation2 + $0x8c] sm:$0xff]  }
 0x2f8   : > { %v3706_v4 = vsel %vm3682_vm2, %v3641_v51, %v14131_v12  ;;  %v3773_v26 = vsel %vm3747_vm3, %v3708_v11, %v14132_v14  ;;  %v14133_v15 = vld [vmem:[#allocation181_spill] sm:$0xff]  ;;  %v5372_v28 = vrot.slane %v10912_v24, 1  ;;  %v14135_v51 = vld [vmem:[#allocation63_spill] sm:$0xff]  ;;  %v14138_v24 = vrot.slane %v10892_v49, 1 }
 0x2f9   : > { %v11569_v9 = vpop.permute.xlu0 %3410  ;;  %v3771_v54 = vsel %vm3747_vm3, %v3706_v4, %v14133_v15  ;;  %v3452_v12 = vsel %vm3422_vm11, %v8202_v2, %v14135_v51  ;;  %v3838_v59 = vsel %vm3812_vm7, %v3773_v26, %v14136_v32  ;;  %5449 = vrot.lane.b32.xlu0 %v11559_v13, %s8339_s5  ;;  %v5389_v4 = vrot.slane %v10914_v33, 1  ;;  %v8203_v26 = vld [vmem:[#allocation2 + $0x80] sm:$0xff]   ;;  %v14139_v15 = vld [vmem:[#allocation66_spill] sm:$0xff]  ;;  %v14142_v51 = vld [vmem:[#allocation43_spill] sm:$0xff] }
 0x2fa   : > { %v3836_v11 = vsel %vm3812_vm7, %v3771_v54, %v14137_v41  ;;  %v11587_v14 = vpop.permute.xlu1 %3400  ;;  %v11596_v16 = vsel %vm2817_vm10, %v5384_v10, %v14138_v24  ;;  %v13628_v32 = vrot.slane %v10954_v63, 1  ;;  %v3450_v41 = vsel %vm3422_vm11, %v8203_v26, %v14139_v15  ;;  %v14140_v54 = vld [vmem:[#allocation12_spill] sm:$0xff]  ;;  %v14141_v33 = vld [vmem:[#allocation98_spill] sm:$0xff]  ;;  %v14145_v26 = vld [vmem:[#allocation147_spill] sm:$0xff] }
 0x2fb   : > { %v3901_v46 = vsel %vm3877_vm12, %v3836_v11, %v11397_v17  ;;  %v3517_v8 = vsel %vm3487_vm14, %v3452_v12, %v14140_v54  ;;  %v3903_v2 = vsel %vm3877_vm12, %v3838_v59, %v11303_v57  ;;  %5439 = vrot.lane.b32.xlu1 %v11578_v19, %s8339_s5  ;;  %v3515_v10 = vsel %vm3487_vm14, %v3450_v41, %v14141_v33  ;;  %v14144_v59 = vld [vmem:[#allocation123_spill] sm:$0xff]  ;;  %v14146_v41 = vld [vmem:[#allocation152_spill] sm:$0xff] }
 0x2fc   : > { %7842 = vmatmul.mubr.msk.bf16.gmra.mxu0 %vm3959_vm13, %v3901_v46  ;;  %v3582_v11 = vsel %vm3552_vm15, %v3517_v8, %v14142_v51  ;;  %v14143_v12 = vrot.slane %v10753_v25, 1  ;;  %v5377_v57 = vrot.slane %v10978_v20, 1  ;;  %v3580_v46 = vsel %vm3552_vm15, %v3515_v10, %v14144_v59  ;;  %v14148_v10 = vld [vmem:[#allocation19_spill] sm:$0xff] }
 0x2fd   : > { %v11609_v17 = vpop.permute.xlu0 %3414  ;;  %7845 = vmatprep.mubr.msk.bf16.mxu0 %vm3959_vm13, %v3903_v2  ;;  %v3647_v15 = vsel %vm3617_vm1, %v3582_v11, %v14145_v26  ;;  %5453 = vrot.lane.b32.xlu0 %v11596_v16, %s8339_s5  ;;  %v3645_v8 = vsel %vm3617_vm1, %v3580_v46, %v14146_v41  ;;  %v11635_v25 = vsel %vm2817_vm10, %v5389_v4, %v13628_v32  ;;  %v5394_v20 = vrot.slane %v10945_v44, 1  ;;  %v14147_v2 = vld [vmem:[#allocation16_spill] sm:$0xff]  ;;  %v14150_v4 = vld [vmem:[#allocation183_spill] sm:$0xff]  ;;  %v14152_v41 = vld [vmem:[#allocation209_spill] sm:$0xff] }
 0x2fe   : > { %v11619_v24 = vsel %vm2817_vm10, %v14143_v12, %v5372_v28  ;;  %v11626_v54 = vpop.permute.xlu1 %3404  ;;  %v13629_v28 = vrot.slane %v10992_v52, 1  ;;  %v3712_v33 = vsel %vm3682_vm2, %v3647_v15, %v14147_v2  ;;  %v3710_v51 = vsel %vm3682_vm2, %v3645_v8, %v14148_v10  ;;  %v14149_v12 = vld [vmem:[#allocation178_spill] sm:$0xff]  ;;  %v14153_v2 = vld [vmem:[#allocation217_spill] sm:$0xff] }
 0x2ff   : > { %5443 = vrot.lane.b32.xlu1 %v11619_v24, %s8339_s5  ;;  %v3777_v59 = vsel %vm3747_vm3, %v3712_v33, %v14149_v12  ;;  %v3775_v46 = vsel %vm3747_vm3, %v3710_v51, %v14150_v4  ;;  %v14151_v44 = vrot.slane %v10800_v43, 1  ;;  %v5382_v15 = vrot.slane %v11002_v27, 1  ;;  %v8204_v51 = vld [vmem:[#allocation2 + $0x94] sm:$0xff]  }
 0x300   : > { %v3842_v8 = vsel %vm3812_vm7, %v3777_v59, %v14152_v41  ;;  %v3840_v10 = vsel %vm3812_vm7, %v3775_v46, %v14153_v2  ;;  %v11670_v43 = vsel %vm2817_vm10, %v5394_v20, %v13629_v28  ;;  %v5399_v27 = vrot.slane %v10994_v38, 1  ;;  %v14154_v12 = vld [vmem:[#allocation68_spill] sm:$0xff]  ;;  %v8205_v20 = vld [vmem:[#allocation2 + $0xa0] sm:$0xff]  }
 0x301   : > { %v11645_v11 = vpop.permute.xlu0 %3418  ;;  %v11654_v26 = vsel %vm2817_vm10, %v14151_v44, %v5377_v57  ;;  %5457 = vrot.lane.b32.xlu0 %v11635_v25, %s8339_s5  ;;  %v3905_v33 = vsel %vm3877_vm12, %v3840_v10, %v11435_v1  ;;  %v5400_v57 = vrot.slane %v11034_v37, 1  ;;  %v3454_v59 = vsel %vm3422_vm11, %v8204_v51, %v14154_v12  ;;  %v14155_v46 = vld [vmem:[#allocation65_spill] sm:$0xff]  ;;  %v14156_v44 = vld [vmem:[#allocation100_spill] sm:$0xff]  ;;  %v14158_v10 = vld [vmem:[#allocation95_spill] sm:$0xff] }
 0x302   : > { %v11661_v32 = vpop.permute.xlu1 %3408  ;;  %v3907_v4 = vsel %vm3877_vm12, %v3842_v8, %v11339_v61  ;;  %v3456_v38 = vsel %vm3422_vm11, %v8205_v20, %v14155_v46  ;;  %v3519_v41 = vsel %vm3487_vm14, %v3454_v59, %v14156_v44  ;;  %v14157_v2 = vrot.slane %v10877_v36, 1  ;;  %v14159_v51 = vld [vmem:[#allocation125_spill] sm:$0xff]  ;;  %v14160_v59 = vld [vmem:[#allocation120_spill] sm:$0xff]  ;;  %v14161_v36 = vld [vmem:[#allocation154_spill] sm:$0xff] }
 0x303   : > { %5447 = vrot.lane.b32.xlu1 %v11654_v26, %s8339_s5  ;;  %v5387_v8 = vrot.slane %v11049_v39, 1  ;;  %v3584_v12 = vsel %vm3552_vm15, %v3519_v41, %v14159_v51  ;;  %v11709_v39 = vsel %vm2817_vm10, %v5399_v27, %v5400_v57  ;;  %v14162_v20 = vld [vmem:[#allocation149_spill] sm:$0xff]  ;;  %v14166_v27 = vrot.slane %v10892_v49, 1 }
 0x304   : > { %7846 = vmatmul.mubr.msk.bf16.gmra.mxu0 %vm3959_vm13, %v3905_v33  ;;  %v11691_v61 = vsel %vm2817_vm10, %v14157_v2, %v5382_v15  ;;  %v3521_v33 = vsel %vm3487_vm14, %v3456_v38, %v14158_v10  ;;  %v3649_v15 = vsel %vm3617_vm1, %v3584_v12, %v14161_v36  ;;  %v14163_v38 = vld [vmem:[#allocation21_spill] sm:$0xff]  ;;  %v14164_v2 = vld [vmem:[#allocation18_spill] sm:$0xff] }
 0x305   : > { %v11681_v1 = vpop.permute.xlu0 %5265  ;;  %7849 = vmatprep.mubr.msk.bf16.mxu0 %vm3959_vm13, %v3907_v4  ;;  %5461 = vrot.lane.b32.xlu0 %v11670_v43, %s8339_s5  ;;  %v3586_v4 = vsel %vm3552_vm15, %v3521_v33, %v14160_v59  ;;  %v3714_v44 = vsel %vm3682_vm2, %v3649_v15, %v14163_v38  ;;  %v14165_v33 = vld [vmem:[#allocation185_spill] sm:$0xff]  ;;  %v11726_v12 = vsel %vm2817_vm10, %v14166_v27, %v5387_v8  ;;  %v5392_v59 = vrot.slane %v11084_v62, 1  ;;  %v8206_v8 = vld [vmem:[#allocation2 + $0xa8] sm:$0xff]  }
 0x306   : > { %v11698_v28 = vpop.permute.xlu1 %3412  ;;  %v3651_v46 = vsel %vm3617_vm1, %v3586_v4, %v14162_v20  ;;  %v3779_v51 = vsel %vm3747_vm3, %v3714_v44, %v14165_v33  ;;  %v14167_v4 = vld [vmem:[#allocation180_spill] sm:$0xff]  ;;  %v14169_v44 = vld [vmem:[#allocation70_spill] sm:$0xff]  ;;  %v14170_v33 = vld [vmem:[#allocation67_spill] sm:$0xff] }
 0x307   : > { %5451 = vrot.lane.b32.xlu1 %v11691_v61, %s8339_s5  ;;  %v3716_v10 = vsel %vm3682_vm2, %v3651_v46, %v14164_v2  ;;  %v3844_v15 = vsel %vm3812_vm7, %v3779_v51, %v10908_v55  ;;  %v14168_v46 = vld [vmem:[#allocation214_spill] sm:$0xff]  ;;  %v3458_v62 = vsel %vm3422_vm11, %v8206_v8, %v14169_v44 }
 0x308   : > { %v3781_v36 = vsel %vm3747_vm3, %v3716_v10, %v14167_v4  ;;  %v3909_v49 = vsel %vm3877_vm12, %v3844_v15, %v11474_v22  ;;  %v8207_v10 = vld [vmem:[#allocation2 + $0xb4] sm:$0xff]   ;;  %v14171_v27 = vld [vmem:[#allocation102_spill] sm:$0xff]  ;;  %v14172_v4 = vrot.slane %v10954_v63, 1  ;;  %v14173_v15 = vld [vmem:[#allocation97_spill] sm:$0xff] }
 0x309   : > { %v11717_v41 = vpop.permute.xlu0 %5269  ;;  %5465 = vrot.lane.b32.xlu0 %v11709_v39, %s8339_s5  ;;  %v3846_v38 = vsel %vm3812_vm7, %v3781_v36, %v14168_v46  ;;  %v3460_v51 = vsel %vm3422_vm11, %v8207_v10, %v14170_v33  ;;  %v3523_v22 = vsel %vm3487_vm14, %v3458_v62, %v14171_v27  ;;  %v5397_v36 = vrot.slane %v11109_v7, 1  ;;  %v14175_v44 = vld [vmem:[#allocation122_spill] sm:$0xff]  ;;  %v14176_v63 = vld [vmem:[#allocation156_spill] sm:$0xff]  ;;  %v14178_v10 = vld [vmem:[#allocation23_spill] sm:$0xff] }
 0x30a   : > { %v11733_v20 = vpop.permute.xlu1 %3416  ;;  %v3911_v2 = vsel %vm3877_vm12, %v3846_v38, %v11381_v18  ;;  %v11758_v18 = vsel %vm2817_vm10, %v14172_v4, %v5392_v59  ;;  %v3525_v46 = vsel %vm3487_vm14, %v3460_v51, %v14173_v15  ;;  %v14174_v38 = vld [vmem:[#allocation127_spill] sm:$0xff]  ;;  %v14179_v27 = vld [vmem:[#allocation20_spill] sm:$0xff]  ;;  %v14181_v15 = vrot.slane %v10992_v52, 1 }
 0x30b   : > { %5455 = vrot.lane.b32.xlu1 %v11726_v12, %s8339_s5  ;;  %v3590_v62 = vsel %vm3552_vm15, %v3525_v46, %v14175_v44 }
 0x30c   : > { %7850 = vmatmul.mubr.msk.bf16.gmra.mxu0 %vm3959_vm13, %v3909_v49  ;;  %v3588_v49 = vsel %vm3552_vm15, %v3523_v22, %v14174_v38  ;;  %v14180_v22 = vld [vmem:[#allocation187_spill] sm:$0xff]  ;;  %v11788_v46 = vsel %vm2817_vm10, %v14181_v15, %v5397_v36  ;;  %v5402_v38 = vrot.slane %v11136_v30, 1  ;;  %v8208_v36 = vld [vmem:[#allocation2 + $0xbc] sm:$0xff]  }
 0x30d   : > { %v11748_v55 = vpop.permute.xlu0 %5273  ;;  %7853 = vmatprep.mubr.msk.bf16.mxu0 %vm3959_vm13, %v3911_v2  ;;  %5483 = vrot.lane.b32.xlu0 %v11182_v3, %s8340_s6  ;;  %v3653_v59 = vsel %vm3617_vm1, %v3588_v49, %v14176_v63  ;;  %v14177_v2 = vld [vmem:[#allocation151_spill] sm:$0xff]  ;;  %v14182_v49 = vld [vmem:[#allocation182_spill] sm:$0xff] }
 0x30e   : > { %v11765_v8 = vpop.permute.xlu1 %3420  ;;  %v3655_v7 = vsel %vm3617_vm1, %v3590_v62, %v14177_v2  ;;  %v3718_v33 = vsel %vm3682_vm2, %v3653_v59, %v14178_v10  ;;  %v14183_v62 = vld [vmem:[#allocation224_spill] sm:$0xff]  ;;  %v14184_v2 = vld [vmem:[#allocation194_spill] sm:$0xff] }
 0x30f   : > { %5459 = vrot.lane.b32.xlu1 %v11758_v18, %s8339_s5  ;;  %v3720_v3 = vsel %vm3682_vm2, %v3655_v7, %v14179_v27  ;;  %v3783_v4 = vsel %vm3747_vm3, %v3718_v33, %v14180_v22  ;;  %v14185_v7 = vld [vmem:[#allocation216_spill] sm:$0xff]  ;;  %v8209_v22 = vld [vmem:[#allocation2 + $0xc8] sm:$0xff]  }
 0x310   : > { %v3785_v44 = vsel %vm3747_vm3, %v3720_v3, %v14182_v49  ;;  %v3848_v63 = vsel %vm3812_vm7, %v3783_v4, %v14183_v62  ;;  %v14186_v33 = vld [vmem:[#allocation72_spill] sm:$0xff]  ;;  %v14187_v4 = vld [vmem:[#allocation69_spill] sm:$0xff] }
 0x311   : > { %v11779_v51 = vpop.permute.xlu0 %5277  ;;  %5570 = vrot.lane.b32.xlu0 %v14184_v2, %s8341_s7  ;;  %v3850_v10 = vsel %vm3812_vm7, %v3785_v44, %v14185_v7  ;;  %v3913_v52 = vsel %vm3877_vm12, %v3848_v63, %v11511_v6  ;;  %v3462_v30 = vsel %vm3422_vm11, %v8208_v36, %v14186_v33  ;;  %v3464_v15 = vsel %vm3422_vm11, %v8209_v22, %v14187_v4  ;;  %v14188_v49 = vld [vmem:[#allocation104_spill] sm:$0xff]  ;;  %v14190_v44 = vld [vmem:[#allocation99_spill] sm:$0xff]  ;;  %v14191_v63 = vld [vmem:[#allocation129_spill] sm:$0xff] }
 0x312   : > { %v11795_v59 = vpop.permute.xlu1 %5267  ;;  %v3915_v27 = vsel %vm3877_vm12, %v3850_v10, %v11418_v45  ;;  %v3527_v6 = vsel %vm3487_vm14, %v3462_v30, %v14188_v49  ;;  %v11820_v45 = vsel %vm2817_vm10, %v5400_v57, %v5402_v38  ;;  %v3529_v62 = vsel %vm3487_vm14, %v3464_v15, %v14190_v44  ;;  %v14192_v10 = vld [vmem:[#allocation124_spill] sm:$0xff]  ;;  %v14193_v36 = vld [vmem:[#allocation158_spill] sm:$0xff]  ;;  %v14194_v33 = vld [vmem:[#allocation153_spill] sm:$0xff] }
 0x313   : > { %5463 = vrot.lane.b32.xlu1 %v11788_v46, %s8339_s5  ;;  %14189 = vst [vmem:[#allocation57_spill] sm:$0xff] %v11820_v45  ;;  %v3592_v2 = vsel %vm3552_vm15, %v3527_v6, %v14191_v63  ;;  %v14195_v38 = vld [vmem:[#allocation25_spill] sm:$0xff]  ;;  %v14196_v22 = vld [vmem:[#allocation22_spill] sm:$0xff]  ;;  %v14198_v49 = vld [vmem:[#allocation184_spill] sm:$0xff] }
 0x314   : > { %7854 = vmatmul.mubr.msk.bf16.gmra.mxu0 %vm3959_vm13, %v3913_v52  ;;  %v3594_v52 = vsel %vm3552_vm15, %v3529_v62, %v14192_v10  ;;  %v3657_v37 = vsel %vm3617_vm1, %v3592_v2, %v14193_v36  ;;  %v14197_v4 = vld [vmem:[#allocation45_spill] sm:$0xff]  ;;  %v14199_v63 = vld [vmem:[#allocation219_spill] sm:$0xff]  ;;  %v14200_v36 = vld [vmem:[#allocation44_spill] sm:$0xff] }
 0x315   : > { %v11810_v3 = vpop.permute.xlu0 %5281  ;;  %7857 = vmatprep.mubr.msk.bf16.mxu0 %vm3959_vm13, %v3915_v27  ;;  %5639 = vrot.lane.b32.xlu0 %v11214_v29, %s8342_s8  ;;  %v3659_v57 = vsel %vm3617_vm1, %v3594_v52, %v14194_v33  ;;  %v3722_v30 = vsel %vm3682_vm2, %v3657_v37, %v14195_v38  ;;  %v8210_v52 = vld [vmem:[#allocation2 + $0xd0] sm:$0xff]  }
 0x316   : > { %v11826_v7 = vpop.permute.xlu1 %5271  ;;  %v3724_v29 = vsel %vm3682_vm2, %v3659_v57, %v14196_v22  ;;  %v3787_v15 = vsel %vm3747_vm3, %v3722_v30, %v14197_v4  ;;  %v3466_v37 = vsel %vm3422_vm11, %v8210_v52, %v14200_v36  ;;  %v8211_v57 = vld [vmem:[#allocation2 + $0xdc] sm:$0xff]   ;;  %v14201_v38 = vld [vmem:[#allocation71_spill] sm:$0xff]  ;;  %v14202_v22 = vld [vmem:[#allocation106_spill] sm:$0xff] }
 0x317   : > { %5467 = vrot.lane.b32.xlu1 %v11820_v45, %s8339_s5  ;;  %v3789_v6 = vsel %vm3747_vm3, %v3724_v29, %v14198_v49  ;;  %v3852_v44 = vsel %vm3812_vm7, %v3787_v15, %v10987_v35  ;;  %v3468_v30 = vsel %vm3422_vm11, %v8211_v57, %v14201_v38  ;;  %v14203_v29 = vld [vmem:[#allocation101_spill] sm:$0xff]  ;;  %v14205_v49 = vld [vmem:[#allocation59_spill] sm:$0xff]  ;;  %v14211_v38 = vld [vmem:[#allocation24_spill] sm:$0xff] }
 0x318   : > { %v3854_v2 = vsel %vm3812_vm7, %v3789_v6, %v14199_v63  ;;  %v3917_v10 = vsel %vm3877_vm12, %v3852_v44, %v11550_v42  ;;  %v3531_v42 = vsel %vm3487_vm14, %v3466_v37, %v14202_v22  ;;  %v3533_v4 = vsel %vm3487_vm14, %v3468_v30, %v14203_v29  ;;  %v14206_v6 = vld [vmem:[#allocation126_spill] sm:$0xff]  ;;  %v14207_v63 = vld [vmem:[#allocation159_spill] sm:$0xff] }
 0x319   : > { %v11840_v27 = vpop.permute.xlu0 %5285  ;;  %5713 = vrot.lane.b32.xlu0 %v11216_v48, %s8343_s9  ;;  %v3919_v33 = vsel %vm3877_vm12, %v3854_v2, %v11457_v5  ;;  %v14204_v5 = vld [vmem:[#allocation130_spill] sm:$0xff]  ;;  %v3598_v44 = vsel %vm3552_vm15, %v3533_v4, %v14206_v6  ;;  %v14209_v36 = vld [vmem:[#allocation27_spill] sm:$0xff] }
 0x31a   : > { %v11850_v62 = vpop.permute.xlu1 %5275  ;;  %v3596_v15 = vsel %vm3552_vm15, %v3531_v42, %v14204_v5  ;;  %v14212_v22 = vld [vmem:[#allocation190_spill] sm:$0xff]  ;;  %v14214_v5 = vld [vmem:[#allocation228_spill] sm:$0xff] }
 0x31b   : > { %5485 = vrot.lane.b32.xlu1 %v11185_v34, %s8340_s6  ;;  %v3661_v2 = vsel %vm3617_vm1, %v3596_v15, %v14207_v63  ;;  %v14213_v29 = vld [vmem:[#allocation186_spill] sm:$0xff] }
 0x31c   : > { %7858 = vmatmul.mubr.msk.bf16.gmra.mxu0 %vm3959_vm13, %v3917_v10  ;;  %v14208_v10 = vld [vmem:[#allocation155_spill] sm:$0xff]  ;;  %v3726_v37 = vsel %vm3682_vm2, %v3661_v2, %v14209_v36 }
 0x31d   : > { %v11865_v35 = vpop.permute.xlu0 %5289  ;;  %7861 = vmatprep.mubr.msk.bf16.mxu0 %vm3959_vm13, %v3919_v33  ;;  %5800 = vrot.lane.b32.xlu0 %v14205_v49, %s8344_s10  ;;  %v3663_v52 = vsel %vm3617_vm1, %v3598_v44, %v14208_v10  ;;  %v14210_v33 = vld [vmem:[#allocation200_spill] sm:$0xff]  ;;  %v3791_v42 = vsel %vm3747_vm3, %v3726_v37, %v14212_v22  ;;  %v14215_v44 = vld [vmem:[#allocation222_spill] sm:$0xff] }
 0x31e   : > { %v11876_v34 = vpop.permute.xlu1 %5279  ;;  %v3728_v30 = vsel %vm3682_vm2, %v3663_v52, %v14211_v38  ;;  %v3856_v15 = vsel %vm3812_vm7, %v3791_v42, %v14214_v5  ;;  %v8212_v10 = vld [vmem:[#allocation2 + $0xe4] sm:$0xff]   ;;  %v14216_v52 = vld [vmem:[#allocation75_spill] sm:$0xff]  ;;  %v14219_v42 = vld [vmem:[#allocation108_spill] sm:$0xff] }
 0x31f   : > { %5572 = vrot.lane.b32.xlu1 %v14210_v33, %s8341_s7  ;;  %v3793_v4 = vsel %vm3747_vm3, %v3728_v30, %v14213_v29  ;;  %v3921_v2 = vsel %vm3877_vm12, %v3856_v15, %v11587_v14  ;;  %v3470_v36 = vsel %vm3422_vm11, %v8212_v10, %v14216_v52  ;;  %v8213_v38 = vld [vmem:[#allocation2 + $0xf0] sm:$0xff]   ;;  %v14218_v30 = vld [vmem:[#allocation73_spill] sm:$0xff]  ;;  %v14222_v15 = vld [vmem:[#allocation128_spill] sm:$0xff] }
 0x320   : > { %v3858_v63 = vsel %vm3812_vm7, %v3793_v4, %v14215_v44  ;;  %v3472_v22 = vsel %vm3422_vm11, %v8213_v38, %v14218_v30  ;;  %v3535_v14 = vsel %vm3487_vm14, %v3470_v36, %v14219_v42  ;;  %v14220_v29 = vld [vmem:[#allocation103_spill] sm:$0xff]  ;;  %v14224_v10 = vld [vmem:[#allocation157_spill] sm:$0xff]  ;;  %v14227_v30 = vld [vmem:[#allocation26_spill] sm:$0xff] }
 0x321   : > { %v11890_v57 = vpop.permute.xlu0 %5293  ;;  %5869 = vrot.lane.b32.xlu0 %v11251_v53, %s8345_s11  ;;  %v3923_v37 = vsel %vm3877_vm12, %v3858_v63, %v11493_v60  ;;  %v3537_v4 = vsel %vm3487_vm14, %v3472_v22, %v14220_v29  ;;  %v14221_v60 = vld [vmem:[#allocation131_spill] sm:$0xff]  ;;  %v14223_v63 = vld [vmem:[#allocation160_spill] sm:$0xff]  ;;  %v14225_v36 = vld [vmem:[#allocation29_spill] sm:$0xff] }
 0x322   : > { %v11900_v6 = vpop.permute.xlu1 %5283  ;;  %v3600_v5 = vsel %vm3552_vm15, %v3535_v14, %v14221_v60  ;;  %v3602_v44 = vsel %vm3552_vm15, %v3537_v4, %v14222_v15  ;;  %v14228_v22 = vld [vmem:[#allocation192_spill] sm:$0xff]  ;;  %v14230_v4 = vld [vmem:[#allocation231_spill] sm:$0xff]  ;;  %v14231_v15 = vld [vmem:[#allocation225_spill] sm:$0xff] }
 0x323   : > { %5641 = vrot.lane.b32.xlu1 %v11348_v40, %s8342_s8  ;;  %v3667_v52 = vsel %vm3617_vm1, %v3602_v44, %v14224_v10  ;;  %v14229_v14 = vld [vmem:[#allocation188_spill] sm:$0xff]  ;;  %v14232_v10 = vld [vmem:[#allocation78_spill] sm:$0xff] }
 0x324   : > { %7862 = vmatmul.mubr.msk.bf16.gmra.mxu0 %vm3959_vm13, %v3921_v2  ;;  %v3665_v2 = vsel %vm3617_vm1, %v3600_v5, %v14223_v63 }
 0x325   : > { %v11915_v33 = vpop.permute.xlu0 %5297  ;;  %7865 = vmatprep.mubr.msk.bf16.mxu0 %vm3959_vm13, %v3923_v37  ;;  %5487 = vrot.lane.b32.xlu0 %v11216_v48, %s8340_s6  ;;  %v3730_v37 = vsel %vm3682_vm2, %v3665_v2, %v14225_v36  ;;  %v3732_v48 = vsel %vm3682_vm2, %v3667_v52, %v14227_v30  ;;  %v8214_v2 = vld [vmem:[#allocation2 + $0xf8] sm:$0xff]  }
 0x326   : > { %14217 = vst [vmem:[#allocation87_spill] sm:$0xff] %v11915_v33  ;;  %v11926_v40 = vpop.permute.xlu1 %5287  ;;  %v3795_v42 = vsel %vm3747_vm3, %v3730_v37, %v14228_v22  ;;  %v3797_v29 = vsel %vm3747_vm3, %v3732_v48, %v14229_v14  ;;  %v3474_v52 = vsel %vm3422_vm11, %v8214_v2, %v14232_v10  ;;  %v14233_v37 = vld [vmem:[#allocation202_spill] sm:$0xff]  ;;  %v14237_v14 = vld [vmem:[#allocation105_spill] sm:$0xff] }
 0x327   : > { %5715 = vrot.lane.b32.xlu1 %v11219_v31, %s8343_s9  ;;  %v3860_v60 = vsel %vm3812_vm7, %v3795_v42, %v14230_v4  ;;  %v3862_v44 = vsel %vm3812_vm7, %v3797_v29, %v14231_v15  ;;  %v14235_v48 = vld [vmem:[#allocation74_spill] sm:$0xff]  ;;  %v14239_v15 = vld [vmem:[#allocation49_spill] sm:$0xff] }
 0x328   : > { %v3925_v63 = vsel %vm3877_vm12, %v3860_v60, %v11626_v54  ;;  %v3927_v36 = vsel %vm3877_vm12, %v3862_v44, %v11533_v47  ;;  %v14236_v42 = vld [vmem:[#allocation110_spill] sm:$0xff]  ;;  %v14238_v47 = vld [vmem:[#allocation56_spill] sm:$0xff] }
 0x329   : > { %v11940_v38 = vpop.permute.xlu0 %5301  ;;  %5574 = vrot.lane.b32.xlu0 %v14205_v49, %s8341_s7  ;;  %v8215_v49 = vld [vmem:[#allocation2 + $0x104] sm:$0xff]   ;;  %v3539_v54 = vsel %vm3487_vm14, %v3474_v52, %v14236_v42  ;;  %v14245_v42 = vld [vmem:[#allocation28_spill] sm:$0xff] }
 0x32a   : > { %14226 = vst [vmem:[#allocation91_spill] sm:$0xff] %v11940_v38  ;;  %v11950_v5 = vpop.permute.xlu1 %5291  ;;  %v3476_v22 = vsel %vm3422_vm11, %v8215_v49, %v14235_v48  ;;  %v3604_v4 = vsel %vm3552_vm15, %v3539_v54, %v14238_v47  ;;  %v14241_v10 = vld [vmem:[#allocation46_spill] sm:$0xff]  ;;  %v14243_v48 = vld [vmem:[#allocation115_spill] sm:$0xff] }
 0x32b   : > { %5802 = vrot.lane.b32.xlu1 %v14233_v37, %s8344_s10  ;;  %v3541_v29 = vsel %vm3487_vm14, %v3476_v22, %v14237_v14  ;;  %v14246_v54 = vld [vmem:[#allocation195_spill] sm:$0xff] }
 0x32c   : > { %7866 = vmatmul.mubr.msk.bf16.gmra.mxu0 %vm3959_vm13, %v3925_v63  ;;  %v3606_v44 = vsel %vm3552_vm15, %v3541_v29, %v14239_v15  ;;  %v14240_v63 = vld [vmem:[#allocation161_spill] sm:$0xff] }
 0x32d   : > { %v11965_v30 = vpop.permute.xlu0 %5305  ;;  %7869 = vmatprep.mubr.msk.bf16.mxu0 %vm3959_vm13, %v3927_v36  ;;  %5643 = vrot.lane.b32.xlu0 %v11251_v53, %s8342_s8  ;;  %v3669_v2 = vsel %vm3617_vm1, %v3604_v4, %v14240_v63  ;;  %v3671_v52 = vsel %vm3617_vm1, %v3606_v44, %v14241_v10  ;;  %v14242_v36 = vld [vmem:[#allocation31_spill] sm:$0xff]  ;;  %v14247_v29 = vld [vmem:[#allocation189_spill] sm:$0xff]  ;;  %v14248_v4 = vld [vmem:[#allocation234_spill] sm:$0xff] }
 0x32e   : > { %14234 = vst [vmem:[#allocation37_spill] sm:$0xff] %v11965_v30  ;;  %v11976_v60 = vpop.permute.xlu1 %5295  ;;  %v3734_v49 = vsel %vm3682_vm2, %v3669_v2, %v14242_v36  ;;  %v3736_v53 = vsel %vm3682_vm2, %v3671_v52, %v14245_v42  ;;  %v14250_v63 = vld [vmem:[#allocation139_spill] sm:$0xff]  ;;  %v14252_v42 = vld [vmem:[#allocation82_spill] sm:$0xff]  ;;  %v14320_v30 = vld [vmem:[#allocation89_spill] sm:$0xff] }
 0x32f   : > { %5871 = vrot.lane.b32.xlu1 %v14243_v48, %s8345_s11  ;;  %v3799_v14 = vsel %vm3747_vm3, %v3734_v49, %v14246_v54  ;;  %v3801_v47 = vsel %vm3747_vm3, %v3736_v53, %v14247_v29  ;;  %v14251_v2 = vld [vmem:[#allocation227_spill] sm:$0xff]  ;;  %v14254_v29 = vld [vmem:[#allocation76_spill] sm:$0xff] }
 0x330   : > { %v3864_v15 = vsel %vm3812_vm7, %v3799_v14, %v14248_v4  ;;  %v3866_v10 = vsel %vm3812_vm7, %v3801_v47, %v14251_v2  ;;  %v8216_v36 = vld [vmem:[#allocation2 + $0x10c] sm:$0xff]   ;;  %v8217_v14 = vld [vmem:[#allocation2 + $0x118] sm:$0xff]  }
 0x331   : > { %v11990_v22 = vpop.permute.xlu0 %5309  ;;  %5717 = vrot.lane.b32.xlu0 %v14250_v63, %s8343_s9  ;;  %v3929_v52 = vsel %vm3877_vm12, %v3864_v15, %v11661_v32  ;;  %v3478_v49 = vsel %vm3422_vm11, %v8216_v36, %v14252_v42  ;;  %v3931_v53 = vsel %vm3877_vm12, %v3866_v10, %v11569_v9  ;;  %v3480_v47 = vsel %vm3422_vm11, %v8217_v14, %v14254_v29  ;;  %v14255_v4 = vld [vmem:[#allocation112_spill] sm:$0xff]  ;;  %v14256_v15 = vld [vmem:[#allocation107_spill] sm:$0xff]  ;;  %v14257_v9 = vld [vmem:[#allocation133_spill] sm:$0xff] }
 0x332   : > { %14244 = vst [vmem:[#allocation41_spill] sm:$0xff] %v11990_v22  ;;  %v12000_v44 = vpop.permute.xlu1 %5299  ;;  %v3543_v32 = vsel %vm3487_vm14, %v3478_v49, %v14255_v4  ;;  %v3545_v2 = vsel %vm3487_vm14, %v3480_v47, %v14256_v15  ;;  %v14260_v36 = vld [vmem:[#allocation52_spill] sm:$0xff]  ;;  %v14261_v14 = vld [vmem:[#allocation163_spill] sm:$0xff]  ;;  %v14262_v49 = vld [vmem:[#allocation77_spill] sm:$0xff] }
 0x333   : > { %14249 = vst [vmem:[#allocation138_spill] sm:$0xff] %v12000_v44  ;;  %5489 = vrot.lane.b32.xlu1 %v11219_v31, %s8340_s6  ;;  %v3608_v10 = vsel %vm3552_vm15, %v3543_v32, %v14257_v9  ;;  %v3610_v42 = vsel %vm3552_vm15, %v3545_v2, %v14260_v36  ;;  %v14263_v4 = vld [vmem:[#allocation33_spill] sm:$0xff]  ;;  %v14265_v15 = vld [vmem:[#allocation30_spill] sm:$0xff]  ;;  %v14267_v36 = vld [vmem:[#allocation191_spill] sm:$0xff] }
 0x334   : > { %7870 = vmatmul.mubr.msk.bf16.gmra.mxu0 %vm3959_vm13, %v3929_v52  ;;  %v14259_v52 = vld [vmem:[#allocation199_spill] sm:$0xff]  ;;  %v3673_v29 = vsel %vm3617_vm1, %v3608_v10, %v14261_v14  ;;  %v14268_v14 = vld [vmem:[#allocation237_spill] sm:$0xff] }
 0x335   : > { %v12015_v54 = vpop.permute.xlu0 %5313  ;;  %7873 = vmatprep.mubr.msk.bf16.mxu0 %vm3959_vm13, %v3931_v53  ;;  %5804 = vrot.lane.b32.xlu0 %v14259_v52, %s8344_s10  ;;  %v3675_v53 = vsel %vm3617_vm1, %v3610_v42, %v14262_v49  ;;  %v3738_v47 = vsel %vm3682_vm2, %v3673_v29, %v14263_v4  ;;  %v14270_v29 = vld [vmem:[#allocation169_spill] sm:$0xff] }
 0x336   : > { %14253 = vst [vmem:[#allocation144_spill] sm:$0xff] %v12015_v54  ;;  %v12026_v31 = vpop.permute.xlu1 %5303  ;;  %v3740_v9 = vsel %vm3682_vm2, %v3675_v53, %v14265_v15  ;;  %v14266_v54 = vld [vmem:[#allocation196_spill] sm:$0xff]  ;;  %v8218_v15 = vld [vmem:[#allocation2 + $0x120] sm:$0xff]  }
 0x337   : > { %14258 = vst [vmem:[#allocation168_spill] sm:$0xff] %v12026_v31  ;;  %5576 = vrot.lane.b32.xlu1 %v14233_v37, %s8341_s7  ;;  %v3803_v2 = vsel %vm3747_vm3, %v3738_v47, %v14266_v54  ;;  %v3805_v10 = vsel %vm3747_vm3, %v3740_v9, %v14267_v36  ;;  %v14271_v37 = vld [vmem:[#allocation229_spill] sm:$0xff]  ;;  %v14274_v36 = vld [vmem:[#allocation79_spill] sm:$0xff] }
 0x338   : > { %v3868_v42 = vsel %vm3812_vm7, %v3803_v2, %v14268_v14  ;;  %v3870_v4 = vsel %vm3812_vm7, %v3805_v10, %v14271_v37  ;;  %v8219_v2 = vld [vmem:[#allocation2 + $0x12c] sm:$0xff]   ;;  %v14275_v14 = vld [vmem:[#allocation113_spill] sm:$0xff] }
 0x339   : > { %v12040_v32 = vpop.permute.xlu0 %5317  ;;  %5873 = vrot.lane.b32.xlu0 %v14270_v29, %s8345_s11  ;;  %v3933_v53 = vsel %vm3877_vm12, %v3868_v42, %v11698_v28  ;;  %v3935_v47 = vsel %vm3877_vm12, %v3870_v4, %v11609_v17  ;;  %v3484_v10 = vsel %vm3422_vm11, %v8219_v2, %v14274_v36  ;;  %v14277_v17 = vld [vmem:[#allocation135_spill] sm:$0xff]  ;;  %v14282_v36 = vld [vmem:[#allocation36_spill] sm:$0xff]  ;;  %v8221_v31 = vld [vmem:[#allocation2 + $0x140] sm:$0xff]  }
 0x33a   : > { %14264 = vst [vmem:[#allocation171_spill] sm:$0xff] %v12040_v32  ;;  %v12050_v49 = vpop.permute.xlu1 %5307  ;;  %v14272_v32 = vld [vmem:[#allocation84_spill] sm:$0xff]  ;;  %v14279_v4 = vld [vmem:[#allocation55_spill] sm:$0xff] }
 0x33b   : > { %14269 = vst [vmem:[#allocation173_spill] sm:$0xff] %v12050_v49  ;;  %v3482_v54 = vsel %vm3422_vm11, %v8218_v15, %v14272_v32  ;;  %5645 = vrot.lane.b32.xlu1 %v14243_v48, %s8342_s8  ;;  %v14276_v32 = vld [vmem:[#allocation109_spill] sm:$0xff]  ;;  %v14315_v49 = vld [vmem:[#allocation220_spill] sm:$0xff] }
 0x33c   : > { %7874 = vmatmul.mubr.msk.bf16.gmra.mxu0 %vm3959_vm13, %v3933_v53  ;;  %v3547_v28 = vsel %vm3487_vm14, %v3482_v54, %v14275_v14  ;;  %v3549_v42 = vsel %vm3487_vm14, %v3484_v10, %v14276_v32  ;;  %v14280_v15 = vld [vmem:[#allocation165_spill] sm:$0xff]  ;;  %v14281_v54 = vld [vmem:[#allocation80_spill] sm:$0xff] }
 0x33d   : > { %v12065_v9 = vpop.permute.xlu0 %5321  ;;  %7877 = vmatprep.mubr.msk.bf16.mxu0 %vm3959_vm13, %v3935_v47  ;;  %v3612_v37 = vsel %vm3552_vm15, %v3547_v28, %v14277_v17  ;;  %5491 = vrot.lane.b32.xlu0 %v14250_v63, %s8340_s6  ;;  %v3614_v53 = vsel %vm3552_vm15, %v3549_v42, %v14279_v4  ;;  %v14284_v28 = vld [vmem:[#allocation32_spill] sm:$0xff]  ;;  %v14285_v32 = vld [vmem:[#allocation197_spill] sm:$0xff]  ;;  %v14287_v4 = vld [vmem:[#allocation50_spill] sm:$0xff] }
 0x33e   : > { %14273 = vst [vmem:[#allocation54_spill] sm:$0xff] %v12065_v9  ;;  %v12076_v48 = vpop.permute.xlu1 %5311  ;;  %v3677_v2 = vsel %vm3617_vm1, %v3612_v37, %v14280_v15  ;;  %v3679_v47 = vsel %vm3617_vm1, %v3614_v53, %v14281_v54  ;;  %v14286_v17 = vld [vmem:[#allocation193_spill] sm:$0xff]  ;;  %v14309_v9 = vld [vmem:[#allocation203_spill] sm:$0xff] }
 0x33f   : > { %14278 = vst [vmem:[#allocation60_spill] sm:$0xff] %v12076_v48  ;;  %v3742_v10 = vsel %vm3682_vm2, %v3677_v2, %v14282_v36  ;;  %5719 = vrot.lane.b32.xlu1 %v11256_v50, %s8343_s9  ;;  %v3744_v63 = vsel %vm3682_vm2, %v3679_v47, %v14284_v28  ;;  %v14289_v2 = vld [vmem:[#allocation232_spill] sm:$0xff]  ;;  %v14290_v28 = vld [vmem:[#allocation86_spill] sm:$0xff] }
 0x340   : > { %v3807_v42 = vsel %vm3747_vm3, %v3742_v10, %v14285_v32  ;;  %v3809_v37 = vsel %vm3747_vm3, %v3744_v63, %v14286_v17  ;;  %v8220_v36 = vld [vmem:[#allocation2 + $0x134] sm:$0xff]   ;;  %v14291_v32 = vld [vmem:[#allocation210_spill] sm:$0xff] }
 0x341   : > { %v12090_v14 = vpop.permute.xlu0 %5325  ;;  %v3872_v53 = vsel %vm3812_vm7, %v3807_v42, %v14287_v4  ;;  %5578 = vrot.lane.b32.xlu0 %v14259_v52, %s8341_s7  ;;  %v3874_v54 = vsel %vm3812_vm7, %v3809_v37, %v14289_v2  ;;  %v3486_v10 = vsel %vm3422_vm11, %v8220_v36, %v14290_v28  ;;  %v14292_v52 = vld [vmem:[#allocation116_spill] sm:$0xff]  ;;  %v14296_v2 = vld [vmem:[#allocation114_spill] sm:$0xff] }
 0x342   : > { %14283 = vst [vmem:[#allocation11_spill] sm:$0xff] %v12090_v14  ;;  %v12100_v15 = vpop.permute.xlu1 %5315  ;;  %v3937_v47 = vsel %vm3877_vm12, %v3872_v53, %v11733_v20  ;;  %v3939_v63 = vsel %vm3877_vm12, %v3874_v54, %v11645_v11  ;;  %v3551_v17 = vsel %vm3487_vm14, %v3486_v10, %v14292_v52  ;;  %v14293_v20 = vld [vmem:[#allocation137_spill] sm:$0xff]  ;;  %v14295_v11 = vld [vmem:[#allocation167_spill] sm:$0xff]  ;;  %v14298_v28 = vld [vmem:[#allocation198_spill] sm:$0xff] }
 0x343   : > { %14288 = vst [vmem:[#allocation93_spill] sm:$0xff] %v12100_v15  ;;  %5806 = vrot.lane.b32.xlu1 %v14291_v32, %s8344_s10  ;;  %v3616_v37 = vsel %vm3552_vm15, %v3551_v17, %v14293_v20  ;;  %v14307_v14 = vld [vmem:[#allocation53_spill] sm:$0xff] }
 0x344   : > { %7878 = vmatmul.mubr.msk.bf16.gmra.mxu0 %vm3959_vm13, %v3937_v47  ;;  %v3681_v53 = vsel %vm3617_vm1, %v3616_v37, %v14295_v11  ;;  %v14297_v47 = vld [vmem:[#allocation141_spill] sm:$0xff] }
 0x345   : > { %v12115_v42 = vpop.permute.xlu0 %5409  ;;  %7881 = vmatprep.mubr.msk.bf16.mxu0 %vm3959_vm13, %v3939_v63  ;;  %5647 = vrot.lane.b32.xlu0 %v14270_v29, %s8342_s8  ;;  %v3746_v54 = vsel %vm3682_vm2, %v3681_v53, %v14296_v2  ;;  %v14299_v63 = vld [vmem:[#allocation34_spill] sm:$0xff]  ;;  %v14303_v53 = vld [vmem:[#allocation201_spill] sm:$0xff] }
 0x346   : > { %v12122_v4 = vpop.permute.xlu1 %5319  ;;  %v3811_v10 = vsel %vm3747_vm3, %v3746_v54, %v14298_v28  ;;  %v14301_v29 = vld [vmem:[#allocation174_spill] sm:$0xff]  ;;  %v14311_v15 = vld [vmem:[#allocation85_spill] sm:$0xff] }
 0x347   : > { %14294 = vst [vmem:[#allocation38_spill] sm:$0xff] %v12122_v4  ;;  %5875 = vrot.lane.b32.xlu1 %v14297_v47, %s8345_s11  ;;  %v3876_v52 = vsel %vm3812_vm7, %v3811_v10, %v14299_v63  ;;  %v14305_v63 = vld [vmem:[#allocation213_spill] sm:$0xff] }
 0x348   : > { %v3941_v20 = vsel %vm3877_vm12, %v3876_v52, %v11765_v8  ;;  %v14304_v8 = vld [vmem:[#allocation48_spill] sm:$0xff] }
 0x349   : > { %v12132_v36 = vpop.permute.xlu0 %5413  ;;  %5721 = vrot.lane.b32.xlu0 %v14301_v29, %s8343_s9 }
 0x34a   : > { %v12138_v17 = vpop.permute.xlu1 %5323 }
 0x34b   : > { %14300 = vst [vmem:[#allocation118_spill] sm:$0xff] %v12138_v17  ;;  %5493 = vrot.lane.b32.xlu1 %v11256_v50, %s8340_s6 }
 0x34c   : > { %7882 = vmatmul.mubr.msk.bf16.gmra.mxu0 %vm3959_vm13, %v3941_v20 }
 0x34d   : > { %v12147_v37 = vpop.permute.xlu0 %5417  ;;  %5808 = vrot.lane.b32.xlu0 %v14303_v53, %s8344_s10 }
 0x34e   : > { %v12149_v11 = vpop.permute.xlu1 %5327 }
 0x34f   : > { %14302 = vst [vmem:[#allocation140_spill] sm:$0xff] %v12149_v11  ;;  %5580 = vrot.lane.b32.xlu1 %v14291_v32, %s8341_s7 }
 0x351   : > { %v12155_v2 = vpop.permute.xlu0 %5421  ;;  %5877 = vrot.lane.b32.xlu0 %v14304_v8, %s8345_s11 }
 0x352   : > { %v12157_v54 = vpop.permute.xlu1 %5411 }
 0x353   : > { %5649 = vrot.lane.b32.xlu1 %v14297_v47, %s8342_s8 }
 0x355   : > { %v12163_v50 = vpop.permute.xlu0 %5425  ;;  %5495 = vrot.lane.b32.xlu0 %v14301_v29, %s8340_s6  ;;  %v14306_v29 = vld [vmem:[#allocation170_spill] sm:$0xff] }
 0x356   : > { %v12165_v28 = vpop.permute.xlu1 %5415 }
 0x357   : > { %5723 = vrot.lane.b32.xlu1 %v11291_v0, %s8343_s9 }
 0x359   : > { %v12171_v32 = vpop.permute.xlu0 %5429  ;;  %5582 = vrot.lane.b32.xlu0 %v14303_v53, %s8341_s7 }
 0x35a   : > { %v12173_v10 = vpop.permute.xlu1 %5419 }
 0x35b   : > { %5810 = vrot.lane.b32.xlu1 %v14305_v63, %s8344_s10 }
 0x35d   : > { %v12179_v47 = vpop.permute.xlu0 %5433  ;;  %5651 = vrot.lane.b32.xlu0 %v14304_v8, %s8342_s8 }
 0x35e   : > { %v12181_v52 = vpop.permute.xlu1 %5423 }
 0x35f   : > { %5879 = vrot.lane.b32.xlu1 %v14306_v29, %s8345_s11 }
 0x361   : > { %v12187_v20 = vpop.permute.xlu0 %5437  ;;  %5725 = vrot.lane.b32.xlu0 %v14307_v14, %s8343_s9 }
 0x362   : > { %v12189_v11 = vpop.permute.xlu1 %5427 }
 0x363   : > { %5497 = vrot.lane.b32.xlu1 %v11291_v0, %s8340_s6 }
 0x365   : > { %v12195_v53 = vpop.permute.xlu0 %5441  ;;  %5812 = vrot.lane.b32.xlu0 %v14309_v9, %s8344_s10 }
 0x366   : > { %14308 = vst [vmem:[#allocation146_spill] sm:$0xff] %v12195_v53  ;;  %v12197_v17 = vpop.permute.xlu1 %5431 }
 0x367   : > { %5584 = vrot.lane.b32.xlu1 %v14305_v63, %s8341_s7 }
 0x369   : > { %v12203_v8 = vpop.permute.xlu0 %5445  ;;  %5881 = vrot.lane.b32.xlu0 %v14311_v15, %s8345_s11 }
 0x36a   : > { %14310 = vst [vmem:[#allocation10_spill] sm:$0xff] %v12203_v8  ;;  %v12205_v4 = vpop.permute.xlu1 %5435 }
 0x36b   : > { %5653 = vrot.lane.b32.xlu1 %v14306_v29, %s8342_s8 }
 0x36d   : > { %v12211_v0 = vpop.permute.xlu0 %5449  ;;  %5499 = vrot.lane.b32.xlu0 %v14307_v14, %s8340_s6 }
 0x36e   : > { %14312 = vst [vmem:[#allocation172_spill] sm:$0xff] %v12211_v0  ;;  %v12213_v48 = vpop.permute.xlu1 %5439 }
 0x36f   : > { %5727 = vrot.lane.b32.xlu1 %v11331_v23, %s8343_s9 }
 0x371   : > { %v12219_v63 = vpop.permute.xlu0 %5453  ;;  %5586 = vrot.lane.b32.xlu0 %v14309_v9, %s8341_s7 }
 0x372   : > { %14313 = vst [vmem:[#allocation175_spill] sm:$0xff] %v12219_v63  ;;  %v12221_v22 = vpop.permute.xlu1 %5443 }
 0x373   : > { %14314 = vst [vmem:[#allocation58_spill] sm:$0xff] %v12221_v22  ;;  %5814 = vrot.lane.b32.xlu1 %v14315_v49, %s8344_s10 }
 0x375   : > { %v12227_v29 = vpop.permute.xlu0 %5457  ;;  %5655 = vrot.lane.b32.xlu0 %v14311_v15, %s8342_s8 }
 0x376   : > { %14316 = vst [vmem:[#allocation204_spill] sm:$0xff] %v12227_v29  ;;  %v12229_v0 = vpop.permute.xlu1 %5447 }
 0x377   : > { %14317 = vst [vmem:[#allocation208_spill] sm:$0xff] %v12229_v0  ;;  %5883 = vrot.lane.b32.xlu1 %v11502_v58, %s8345_s11  ;;  %v14323_v0 = vld [vmem:[#allocation211_spill] sm:$0xff] }
 0x379   : > { %v12235_v14 = vpop.permute.xlu0 %5461  ;;  %5729 = vrot.lane.b32.xlu0 %v14320_v30, %s8343_s9 }
 0x37a   : > { %14318 = vst [vmem:[#allocation206_spill] sm:$0xff] %v12235_v14  ;;  %v12237_v63 = vpop.permute.xlu1 %5451 }
 0x37b   : > { %14319 = vst [vmem:[#allocation62_spill] sm:$0xff] %v12237_v63  ;;  %5501 = vrot.lane.b32.xlu1 %v11331_v23, %s8340_s6  ;;  %v14325_v63 = vld [vmem:[#allocation39_spill] sm:$0xff] }
 0x37d   : > { %v12243_v9 = vpop.permute.xlu0 %5465  ;;  %5816 = vrot.lane.b32.xlu0 %v14323_v0, %s8344_s10 }
 0x37e   : > { %14321 = vst [vmem:[#allocation90_spill] sm:$0xff] %v12243_v9  ;;  %v12245_v29 = vpop.permute.xlu1 %5455 }
 0x37f   : > { %14322 = vst [vmem:[#allocation94_spill] sm:$0xff] %v12245_v29  ;;  %5588 = vrot.lane.b32.xlu1 %v14315_v49, %s8341_s7 }
 0x381   : > { %v5484_v15 = vpop.permute.xlu0 %5483  ;;  %5885 = vrot.lane.b32.xlu0 %v14325_v63, %s8345_s11 }
 0x382   : > { %v12251_v14 = vpop.permute.xlu1 %5459 }
 0x383   : > { %14324 = vst [vmem:[#allocation40_spill] sm:$0xff] %v12251_v14  ;;  %5657 = vrot.lane.b32.xlu1 %v11502_v58, %s8342_s8  ;;  %v14328_v14 = vld [vmem:[#allocation226_spill] sm:$0xff] }
 0x385   : > { %v5571_v23 = vpop.permute.xlu0 %5570  ;;  %5503 = vrot.lane.b32.xlu0 %v14320_v30, %s8340_s6 }
 0x386   : > { %v12257_v9 = vpop.permute.xlu1 %5463 }
 0x387   : > { %14326 = vst [vmem:[#allocation205_spill] sm:$0xff] %v12257_v9  ;;  %5731 = vrot.lane.b32.xlu1 %v11369_v21, %s8343_s9  ;;  %v5934_v9 = vsel %vm3422_vm11, %v8221_v31, %v11681_v1  ;;  %v12284_v1 = vld [vmem:[%s13447_s2] ss:$0 sm:$0xff]  ;;  %v14329_v31 = vld [vmem:[#allocation136_spill] sm:$0xff] }
 0x388   : > { %v5998_v30 = vsel %vm3487_vm14, %v5934_v9, %v12115_v42 }
 0x389   : > { %v5640_v49 = vpop.permute.xlu0 %5639  ;;  %5590 = vrot.lane.b32.xlu0 %v14323_v0, %s8341_s7 }
 0x38a   : > { %v12263_v29 = vpop.permute.xlu1 %5467 }
 0x38b   : > { %14327 = vst [vmem:[#allocation119_spill] sm:$0xff] %v12263_v29  ;;  %5818 = vrot.lane.b32.xlu1 %v14328_v14, %s8344_s10  ;;  %v6062_v29 = vsel %vm3552_vm15, %v5998_v30, %v5484_v15  ;;  %v14330_v30 = vld [vmem:[#allocation218_spill] sm:$0xff] }
 0x38c   : > { %v6126_v38 = vsel %vm3617_vm1, %v6062_v29, %v5571_v23 }
 0x38d   : > { %v5714_v58 = vpop.permute.xlu0 %5713  ;;  %5659 = vrot.lane.b32.xlu0 %v14325_v63, %s8342_s8  ;;  %v6190_v22 = vsel %vm3682_vm2, %v6126_v38, %v5640_v49 }
 0x38e   : > { %v5486_v8 = vpop.permute.xlu1 %5485  ;;  %v6254_v42 = vsel %vm3747_vm3, %v6190_v22, %v5714_v58 }
 0x38f   : > { %5887 = vrot.lane.b32.xlu1 %v11543_v56, %s8345_s11 }
 0x391   : > { %v5801_v0 = vpop.permute.xlu0 %5800  ;;  %5733 = vrot.lane.b32.xlu0 %v14329_v31, %s8343_s9 }
 0x392   : > { %v5573_v44 = vpop.permute.xlu1 %5572  ;;  %v6318_v29 = vsel %vm3812_vm7, %v6254_v42, %v5801_v0 }
 0x393   : > { %5505 = vrot.lane.b32.xlu1 %v11369_v21, %s8340_s6 }
 0x394   : > { %v7823_v63 = vpop.f32.mrf.mxu0 }
 0x395   : > { %v5870_v38 = vpop.permute.xlu0 %5869  ;;  %v4074_v9 = vadd.f32 %v7823_v63, %v12284_v1  ;;  %5820 = vrot.lane.b32.xlu0 %v14330_v30, %s8344_s10 }
 0x396   : > { %v6382_v15 = vsel %vm3877_vm12, %v6318_v29, %v5870_v38  ;;  %v4065_v23 = vpop.f32.mrf.mxu0  ;;  %v5642_v49 = vpop.permute.xlu1 %5641  ;;  %v14331_v38 = vld [vmem:[#allocation166_spill] sm:$0xff] }
 0x397   : > { %7889 = vmatprep.mubr.msk.bf16.mxu1 %vm3959_vm13, %v6382_v15  ;;  %v7622_v22 = vpack.c.bf16 %v4074_v9, %v4074_v9  ;;  %v4066_v58 = vadd.f32 %v12284_v1, %v4065_v23  ;;  %5592 = vrot.lane.b32.xlu1 %v14328_v14, %s8341_s7  ;;  %v8222_v15 = vld [vmem:[#allocation2 + $0x148] sm:$0xff]  }
 0x398   : > { %v7824_v45 = vpop.f32.mrf.mxu0  ;;  %v5936_v23 = vsel %vm3422_vm11, %v8222_v15, %v11795_v59  ;;  %v8223_v15 = vld [vmem:[#allocation2 + $0x1d4] sm:$0xff]  }
 0x399   : > { %v5488_v21 = vpop.permute.xlu0 %5487  ;;  %4582 = vst.msk [vmem:[%s12302_s4 + $0x8] sm:$0xf] %vm4579_vm6, %v7622_v22  ;;  %v7620_v0 = vpack.c.bf16 %v4066_v58, %v4066_v58  ;;  %v4077_v42 = vadd.f32 %v7824_v45, %v12284_v1  ;;  %5889 = vrot.lane.b32.xlu0 %v14331_v38, %s8345_s11  ;;  %v6000_v22 = vsel %vm3487_vm14, %v5936_v23, %v12157_v54 }
 0x39a   : > { %v4068_v63 = vpop.f32.mrf.mxu0  ;;  %v5716_v29 = vpop.permute.xlu1 %5715 }
 0x39b   : > { %4580 = vst.msk [vmem:[%s12302_s4] sm:$0xf] %vm4579_vm6, %v7620_v0  ;;  %v7623_v9 = vpack.c.bf16 %v4077_v42, %v4077_v42  ;;  %v4069_v14 = vadd.f32 %v12284_v1, %v4068_v63  ;;  %5661 = vrot.lane.b32.xlu1 %v11543_v56, %s8342_s8  ;;  %v6064_v42 = vsel %vm3552_vm15, %v6000_v22, %v5486_v8 }
 0x39c   : > { %v7827_v53 = vpop.f32.mrf.mxu0  ;;  %v6128_v59 = vsel %vm3617_vm1, %v6064_v42, %v5573_v44 }
 0x39d   : > { %v5575_v45 = vpop.permute.xlu0 %5574  ;;  %4583 = vst.msk [vmem:[%s12302_s4 + $0xc] sm:$0xf] %vm4579_vm6, %v7623_v9  ;;  %v7621_v58 = vpack.c.bf16 %v4069_v14, %v4069_v14  ;;  %v4090_v0 = vadd.f32 %v7827_v53, %v12284_v1  ;;  %5507 = vrot.lane.b32.xlu0 %v14329_v31, %s8340_s6  ;;  %v6192_v9 = vsel %vm3682_vm2, %v6128_v59, %v5642_v49 }
 0x39e   : > { %v4081_v63 = vpop.f32.mrf.mxu0  ;;  %v5803_v33 = vpop.permute.xlu1 %5802  ;;  %v6256_v8 = vsel %vm3747_vm3, %v6192_v9, %v5716_v29 }
 0x39f   : > { %4581 = vst.msk [vmem:[%s12302_s4 + $0x4] sm:$0xf] %vm4579_vm6, %v7621_v58  ;;  %v7626_v56 = vpack.c.bf16 %v4090_v0, %v4090_v0  ;;  %v4082_v54 = vadd.f32 %v12284_v1, %v4081_v63  ;;  %5735 = vrot.lane.b32.xlu1 %v8223_v15, %s8343_s9  ;;  %v6320_v23 = vsel %vm3812_vm7, %v6256_v8, %v5803_v33  ;;  %v14332_v63 = vld [vmem:[#allocation111_spill] sm:$0xff] }
 0x3a0   : > { %v7828_v14 = vpop.f32.mrf.mxu0 }
 0x3a1   : > { %v5644_v53 = vpop.permute.xlu0 %5643  ;;  %4586 = vst.msk [vmem:[%s12302_s4 + $0x18] sm:$0xf] %vm4579_vm6, %v7626_v56  ;;  %v7624_v31 = vpack.c.bf16 %v4082_v54, %v4082_v54  ;;  %v4093_v44 = vadd.f32 %v7828_v14, %v12284_v1  ;;  %5594 = vrot.lane.b32.xlu0 %v14330_v30, %s8341_s7  ;;  %v8224_v56 = vld [vmem:[#allocation2 + $0x154] sm:$0xff]  }
 0x3a2   : > { %v4084_v22 = vpop.f32.mrf.mxu0  ;;  %v5872_v58 = vpop.permute.xlu1 %5871  ;;  %v5938_v54 = vsel %vm3422_vm11, %v8224_v56, %v11717_v41 }
 0x3a3   : > { %4584 = vst.msk [vmem:[%s12302_s4 + $0x10] sm:$0xf] %vm4579_vm6, %v7624_v31  ;;  %v7627_v49 = vpack.c.bf16 %v4093_v44, %v4093_v44  ;;  %v4085_v0 = vadd.f32 %v12284_v1, %v4084_v22  ;;  %v6384_v29 = vsel %vm3877_vm12, %v6320_v23, %v5872_v58  ;;  %5822 = vrot.lane.b32.xlu1 %v14332_v63, %s8344_s10 }
 0x3a4   : > { %v7831_v42 = vpop.f32.mrf.mxu0  ;;  %7890 = vmatmul.mubr.msk.bf16.vlgmr.msra.gmra.mxu1 %vm3959_vm13, %v6384_v29  ;;  %v6002_v8 = vsel %vm3487_vm14, %v5938_v54, %v12132_v36 }
 0x3a5   : > { %v5718_v33 = vpop.permute.xlu0 %5717  ;;  %4587 = vst.msk [vmem:[%s12302_s4 + $0x1c] sm:$0xf] %vm4579_vm6, %v7627_v49  ;;  %v7625_v59 = vpack.c.bf16 %v4085_v0, %v4085_v0  ;;  %v4106_v30 = vadd.f32 %v7831_v42, %v12284_v1  ;;  %5663 = vrot.lane.b32.xlu0 %v14331_v38, %s8342_s8  ;;  %v6066_v23 = vsel %vm3552_vm15, %v6002_v8, %v5488_v21  ;;  %v8225_v42 = vld [vmem:[#allocation2 + $0x1e0] sm:$0xff]  }
 0x3a6   : > { %v4097_v9 = vpop.f32.mrf.mxu0  ;;  %v5490_v14 = vpop.permute.xlu1 %5489  ;;  %v6130_v58 = vsel %vm3617_vm1, %v6066_v23, %v5575_v45 }
 0x3a7   : > { %4585 = vst.msk [vmem:[%s12302_s4 + $0x14] sm:$0xf] %vm4579_vm6, %v7625_v59  ;;  %v7630_v31 = vpack.c.bf16 %v4106_v30, %v4106_v30  ;;  %v4098_v44 = vadd.f32 %v12284_v1, %v4097_v9  ;;  %5891 = vrot.lane.b32.xlu1 %v11578_v19, %s8345_s11  ;;  %v6194_v49 = vsel %vm3682_vm2, %v6130_v58, %v5644_v53 }
 0x3a8   : > { %v7832_v22 = vpop.f32.mrf.mxu0  ;;  %v6258_v59 = vsel %vm3747_vm3, %v6194_v49, %v5718_v33  ;;  %v14333_v33 = vld [vmem:[#allocation221_spill] sm:$0xff] }
 0x3a9   : > { %v5805_v41 = vpop.permute.xlu0 %5804  ;;  %4590 = vst.msk [vmem:[%s12302_s4 + $0x28] sm:$0xf] %vm4579_vm6, %v7630_v31  ;;  %v7628_v38 = vpack.c.bf16 %v4098_v44, %v4098_v44  ;;  %v4109_v36 = vadd.f32 %v7832_v22, %v12284_v1  ;;  %5737 = vrot.lane.b32.xlu0 %v8225_v42, %s8343_s9 }
 0x3aa   : > { %v4100_v0 = vpop.f32.mrf.mxu0  ;;  %v5577_v29 = vpop.permute.xlu1 %5576  ;;  %v6322_v56 = vsel %vm3812_vm7, %v6258_v59, %v5805_v41 }
 0x3ab   : > { %4588 = vst.msk [vmem:[%s12302_s4 + $0x20] sm:$0xf] %vm4579_vm6, %v7628_v38  ;;  %v7631_v21 = vpack.c.bf16 %v4109_v36, %v4109_v36  ;;  %v4101_v45 = vadd.f32 %v12284_v1, %v4100_v0  ;;  %5509 = vrot.lane.b32.xlu1 %v8223_v15, %s8340_s6  ;;  %v14334_v0 = vld [vmem:[#allocation35_spill] sm:$0xff] }
 0x3ac   : > { %v7835_v30 = vpop.f32.mrf.mxu0 }
 0x3ad   : > { %v5874_v53 = vpop.permute.xlu0 %5873  ;;  %4591 = vst.msk [vmem:[%s12302_s4 + $0x2c] sm:$0xf] %vm4579_vm6, %v7631_v21  ;;  %v7629_v54 = vpack.c.bf16 %v4101_v45, %v4101_v45  ;;  %v4122_v9 = vadd.f32 %v7835_v30, %v12284_v1  ;;  %5824 = vrot.lane.b32.xlu0 %v14333_v33, %s8344_s10  ;;  %v8226_v45 = vld [vmem:[#allocation2 + $0x15c] sm:$0xff]  }
 0x3ae   : > { %v6386_v8 = vsel %vm3877_vm12, %v6322_v56, %v5874_v53  ;;  %v4113_v31 = vpop.f32.mrf.mxu0  ;;  %v5646_v44 = vpop.permute.xlu1 %5645 }
 0x3af   : > { %7893 = vmatprep.mubr.msk.bf16.mxu1 %vm3959_vm13, %v6386_v8  ;;  %4589 = vst.msk [vmem:[%s12302_s4 + $0x24] sm:$0xf] %vm4579_vm6, %v7629_v54  ;;  %v7634_v15 = vpack.c.bf16 %v4122_v9, %v4122_v9  ;;  %v4114_v23 = vadd.f32 %v12284_v1, %v4113_v31  ;;  %5596 = vrot.lane.b32.xlu1 %v14332_v63, %s8341_s7 }
 0x3b0   : > { %v7836_v22 = vpop.f32.mrf.mxu0  ;;  %v5940_v63 = vsel %vm3422_vm11, %v8226_v45, %v11826_v7 }
 0x3b1   : > { %v5492_v41 = vpop.permute.xlu0 %5491  ;;  %4594 = vst.msk [vmem:[%s12302_s4 + $0x38] sm:$0xf] %vm4579_vm6, %v7634_v15  ;;  %v7632_v58 = vpack.c.bf16 %v4114_v23, %v4114_v23  ;;  %v4125_v38 = vadd.f32 %v7836_v22, %v12284_v1  ;;  %5893 = vrot.lane.b32.xlu0 %v14334_v0, %s8345_s11  ;;  %v6004_v53 = vsel %vm3487_vm14, %v5940_v63, %v12165_v28 }
 0x3b2   : > { %v4116_v36 = vpop.f32.mrf.mxu0  ;;  %v5720_v49 = vpop.permute.xlu1 %5719  ;;  %v6068_v8 = vsel %vm3552_vm15, %v6004_v53, %v5490_v14 }
 0x3b3   : > { %4592 = vst.msk [vmem:[%s12302_s4 + $0x30] sm:$0xf] %vm4579_vm6, %v7632_v58  ;;  %v7635_v21 = vpack.c.bf16 %v4125_v38, %v4125_v38  ;;  %v4117_v59 = vadd.f32 %v12284_v1, %v4116_v36  ;;  %5665 = vrot.lane.b32.xlu1 %v11578_v19, %s8342_s8  ;;  %v6132_v7 = vsel %vm3617_vm1, %v6068_v8, %v5577_v29  ;;  %v8227_v58 = vld [vmem:[#allocation2 + $0x1e8] sm:$0xff]  }
 0x3b4   : > { %v7839_v30 = vpop.f32.mrf.mxu0  ;;  %v6196_v23 = vsel %vm3682_vm2, %v6132_v7, %v5646_v44 }
 0x3b5   : > { %v5579_v56 = vpop.permute.xlu0 %5578  ;;  %4595 = vst.msk [vmem:[%s12302_s4 + $0x3c] sm:$0xf] %vm4579_vm6, %v7635_v21  ;;  %v7633_v54 = vpack.c.bf16 %v4117_v59, %v4117_v59  ;;  %v4138_v9 = vadd.f32 %v7839_v30, %v12284_v1  ;;  %5511 = vrot.lane.b32.xlu0 %v8225_v42, %s8340_s6  ;;  %v6260_v14 = vsel %vm3747_vm3, %v6196_v23, %v5720_v49  ;;  %v14335_v30 = vld [vmem:[#allocation230_spill] sm:$0xff] }
 0x3b6   : > { %v4129_v31 = vpop.f32.mrf.mxu0  ;;  %v5807_v15 = vpop.permute.xlu1 %5806 }
 0x3b7   : > { %4593 = vst.msk [vmem:[%s12302_s4 + $0x34] sm:$0xf] %vm4579_vm6, %v7633_v54  ;;  %v7638_v19 = vpack.c.bf16 %v4138_v9, %v4138_v9  ;;  %v4130_v28 = vadd.f32 %v12284_v1, %v4129_v31  ;;  %5739 = vrot.lane.b32.xlu1 %v8227_v58, %s8343_s9  ;;  %v6324_v36 = vsel %vm3812_vm7, %v6260_v14, %v5807_v15  ;;  %v8228_v9 = vld [vmem:[#allocation2 + $0x168] sm:$0xff]  }
 0x3b8   : > { %v7840_v22 = vpop.f32.mrf.mxu0  ;;  %v5942_v8 = vsel %vm3422_vm11, %v8228_v9, %v11748_v55 }
 0x3b9   : > { %v5648_v38 = vpop.permute.xlu0 %5647  ;;  %4598 = vst.msk [vmem:[%s12302_s4 + $0x48] sm:$0xf] %vm4579_vm6, %v7638_v19  ;;  %v7636_v42 = vpack.c.bf16 %v4130_v28, %v4130_v28  ;;  %v4141_v29 = vadd.f32 %v7840_v22, %v12284_v1  ;;  %5598 = vrot.lane.b32.xlu0 %v14333_v33, %s8341_s7  ;;  %v6006_v7 = vsel %vm3487_vm14, %v5942_v8, %v12147_v37 }
 0x3ba   : > { %v4132_v21 = vpop.f32.mrf.mxu0  ;;  %v5876_v59 = vpop.permute.xlu1 %5875  ;;  %v6070_v23 = vsel %vm3552_vm15, %v6006_v7, %v5492_v41 }
 0x3bb   : > { %4596 = vst.msk [vmem:[%s12302_s4 + $0x40] sm:$0xf] %vm4579_vm6, %v7636_v42  ;;  %v7639_v44 = vpack.c.bf16 %v4141_v29, %v4141_v29  ;;  %v4133_v45 = vadd.f32 %v12284_v1, %v4132_v21  ;;  %v6388_v49 = vsel %vm3877_vm12, %v6324_v36, %v5876_v59  ;;  %5826 = vrot.lane.b32.xlu1 %v14335_v30, %s8344_s10  ;;  %v12442_v21 = vld [vmem:[#allocation2 + $0x1f4] sm:$0xff]  }
 0x3bc   : > { %v7843_v63 = vpop.f32.mrf.mxu0  ;;  %7894 = vmatmul.mubr.msk.bf16.gmra.mxu1 %vm3959_vm13, %v6388_v49  ;;  %v6134_v14 = vsel %vm3617_vm1, %v6070_v23, %v5579_v56 }
 0x3bd   : > { %v5722_v53 = vpop.permute.xlu0 %5721  ;;  %4599 = vst.msk [vmem:[%s12302_s4 + $0x4c] sm:$0xf] %vm4579_vm6, %v7639_v44  ;;  %v7637_v54 = vpack.c.bf16 %v4133_v45, %v4133_v45  ;;  %v4154_v33 = vadd.f32 %v7843_v63, %v12284_v1  ;;  %5667 = vrot.lane.b32.xlu0 %v14334_v0, %s8342_s8  ;;  %v6198_v42 = vsel %vm3682_vm2, %v6134_v14, %v5648_v38 }
 0x3be   : > { %v4145_v31 = vpop.f32.mrf.mxu0  ;;  %v5494_v15 = vpop.permute.xlu1 %5493  ;;  %v6262_v56 = vsel %vm3747_vm3, %v6198_v42, %v5722_v53  ;;  %v14336_v53 = vld [vmem:[#allocation223_spill] sm:$0xff] }
 0x3bf   : > { %4597 = vst.msk [vmem:[%s12302_s4 + $0x44] sm:$0xf] %vm4579_vm6, %v7637_v54  ;;  %v7642_v19 = vpack.c.bf16 %v4154_v33, %v4154_v33  ;;  %v4146_v28 = vadd.f32 %v12284_v1, %v4145_v31  ;;  %5895 = vrot.lane.b32.xlu1 %v11619_v24, %s8345_s11 }
 0x3c0   : > { %v7844_v22 = vpop.f32.mrf.mxu0 }
 0x3c1   : > { %v5809_v55 = vpop.permute.xlu0 %5808  ;;  %4602 = vst.msk [vmem:[%s12302_s4 + $0x58] sm:$0xf] %vm4579_vm6, %v7642_v19  ;;  %v7640_v0 = vpack.c.bf16 %v4146_v28, %v4146_v28  ;;  %v4157_v37 = vadd.f32 %v7844_v22, %v12284_v1  ;;  %5741 = vrot.lane.b32.xlu0 %v12442_v21, %s8343_s9 }
 0x3c2   : > { %v4148_v29 = vpop.f32.mrf.mxu0  ;;  %v5581_v36 = vpop.permute.xlu1 %5580  ;;  %v6326_v38 = vsel %vm3812_vm7, %v6262_v56, %v5809_v55  ;;  %v14337_v55 = vld [vmem:[#allocation51_spill] sm:$0xff] }
 0x3c3   : > { %4600 = vst.msk [vmem:[%s12302_s4 + $0x50] sm:$0xf] %vm4579_vm6, %v7640_v0  ;;  %v7643_v41 = vpack.c.bf16 %v4157_v37, %v4157_v37  ;;  %v4149_v59 = vadd.f32 %v12284_v1, %v4148_v29  ;;  %5513 = vrot.lane.b32.xlu1 %v8227_v58, %s8340_s6  ;;  %v8230_v37 = vld [vmem:[#allocation2 + $0x170] sm:$0xff]  }
 0x3c4   : > { %v7847_v44 = vpop.f32.mrf.mxu0 }
 0x3c5   : > { %v5878_v45 = vpop.permute.xlu0 %5877  ;;  %4603 = vst.msk [vmem:[%s12302_s4 + $0x5c] sm:$0xf] %vm4579_vm6, %v7643_v41  ;;  %v7641_v49 = vpack.c.bf16 %v4149_v59, %v4149_v59  ;;  %v4170_v63 = vadd.f32 %v7847_v44, %v12284_v1  ;;  %5828 = vrot.lane.b32.xlu0 %v14336_v53, %s8344_s10 }
 0x3c6   : > { %v6390_v54 = vsel %vm3877_vm12, %v6326_v38, %v5878_v45  ;;  %v4161_v33 = vpop.f32.mrf.mxu0  ;;  %v5650_v9 = vpop.permute.xlu1 %5649 }
 0x3c7   : > { %7897 = vmatprep.mubr.msk.bf16.mxu1 %vm3959_vm13, %v6390_v54  ;;  %4601 = vst.msk [vmem:[%s12302_s4 + $0x54] sm:$0xf] %vm4579_vm6, %v7641_v49  ;;  %v7646_v58 = vpack.c.bf16 %v4170_v63, %v4170_v63  ;;  %v4162_v8 = vadd.f32 %v12284_v1, %v4161_v33  ;;  %5600 = vrot.lane.b32.xlu1 %v14335_v30, %s8341_s7  ;;  %v12489_v54 = vld [vmem:[#allocation2 + $0x1fc] sm:$0xff]  }
 0x3c8   : > { %v7848_v31 = vpop.f32.mrf.mxu0  ;;  %v5944_v30 = vsel %vm3422_vm11, %v8230_v37, %v11850_v62 }
 0x3c9   : > { %v5496_v7 = vpop.permute.xlu0 %5495  ;;  %4606 = vst.msk [vmem:[%s12302_s4 + $0x68] sm:$0xf] %vm4579_vm6, %v7646_v58  ;;  %v7644_v19 = vpack.c.bf16 %v4162_v8, %v4162_v8  ;;  %v4173_v28 = vadd.f32 %v7848_v31, %v12284_v1  ;;  %5897 = vrot.lane.b32.xlu0 %v14337_v55, %s8345_s11  ;;  %v6008_v41 = vsel %vm3487_vm14, %v5944_v30, %v12173_v10  ;;  %v8232_v30 = vld [vmem:[#allocation2 + $0x17c] sm:$0xff]  }
 0x3ca   : > { %v4164_v23 = vpop.f32.mrf.mxu0  ;;  %v5724_v22 = vpop.permute.xlu1 %5723  ;;  %v6072_v44 = vsel %vm3552_vm15, %v6008_v41, %v5494_v15 }
 0x3cb   : > { %4604 = vst.msk [vmem:[%s12302_s4 + $0x60] sm:$0xf] %vm4579_vm6, %v7644_v19  ;;  %v7647_v14 = vpack.c.bf16 %v4173_v28, %v4173_v28  ;;  %v4165_v0 = vadd.f32 %v12284_v1, %v4164_v23  ;;  %5669 = vrot.lane.b32.xlu1 %v11619_v24, %s8342_s8  ;;  %v6136_v62 = vsel %vm3617_vm1, %v6072_v44, %v5581_v36 }
 0x3cc   : > { %v7851_v42 = vpop.f32.mrf.mxu0  ;;  %v6200_v49 = vsel %vm3682_vm2, %v6136_v62, %v5650_v9 }
 0x3cd   : > { %v5583_v29 = vpop.permute.xlu0 %5582  ;;  %4607 = vst.msk [vmem:[%s12302_s4 + $0x6c] sm:$0xf] %vm4579_vm6, %v7647_v14  ;;  %v7645_v56 = vpack.c.bf16 %v4165_v0, %v4165_v0  ;;  %v4186_v59 = vadd.f32 %v7851_v42, %v12284_v1  ;;  %5515 = vrot.lane.b32.xlu0 %v12442_v21, %s8340_s6  ;;  %v6264_v33 = vsel %vm3747_vm3, %v6200_v49, %v5724_v22  ;;  %v14338_v14 = vld [vmem:[#allocation233_spill] sm:$0xff] }
 0x3ce   : > { %v4177_v38 = vpop.f32.mrf.mxu0  ;;  %v5811_v45 = vpop.permute.xlu1 %5810  ;;  %v5946_v42 = vsel %vm3422_vm11, %v8232_v30, %v11779_v51 }
 0x3cf   : > { %4605 = vst.msk [vmem:[%s12302_s4 + $0x64] sm:$0xf] %vm4579_vm6, %v7645_v56  ;;  %v7650_v24 = vpack.c.bf16 %v4186_v59, %v4186_v59  ;;  %v4178_v10 = vadd.f32 %v12284_v1, %v4177_v38  ;;  %5743 = vrot.lane.b32.xlu1 %v12489_v54, %s8343_s9  ;;  %v6328_v8 = vsel %vm3812_vm7, %v6264_v33, %v5811_v45  ;;  %v12531_v33 = vld [vmem:[#allocation2 + $0x208] sm:$0xff]  }
 0x3d0   : > { %v7852_v63 = vpop.f32.mrf.mxu0  ;;  %v6010_v59 = vsel %vm3487_vm14, %v5946_v42, %v12155_v2  ;;  %v14340_v42 = vld [vmem:[#allocation81_spill] sm:$0xff] }
 0x3d1   : > { %v5652_v15 = vpop.permute.xlu0 %5651  ;;  %4610 = vst.msk [vmem:[%s12302_s4 + $0x78] sm:$0xf] %vm4579_vm6, %v7650_v24  ;;  %v7648_v36 = vpack.c.bf16 %v4178_v10, %v4178_v10  ;;  %v4189_v58 = vadd.f32 %v7852_v63, %v12284_v1  ;;  %5602 = vrot.lane.b32.xlu0 %v14336_v53, %s8341_s7  ;;  %v6074_v45 = vsel %vm3552_vm15, %v6010_v59, %v5496_v7  ;;  %v325_v10 = vld [vmem:[#allocation2 + $0x280] sm:$0x1] }
 0x3d2   : > { %v4180_v31 = vpop.f32.mrf.mxu0  ;;  %v5880_v19 = vpop.permute.xlu1 %5879  ;;  %v6138_v24 = vsel %vm3617_vm1, %v6074_v45, %v5583_v29 }
 0x3d3   : > { %4608 = vst.msk [vmem:[%s12302_s4 + $0x70] sm:$0xf] %vm4579_vm6, %v7648_v36  ;;  %v7651_v9 = vpack.c.bf16 %v4189_v58, %v4189_v58  ;;  %v4181_v28 = vadd.f32 %v12284_v1, %v4180_v31  ;;  %v6392_v23 = vsel %vm3877_vm12, %v6328_v8, %v5880_v19  ;;  %5830 = vrot.lane.b32.xlu1 %v14338_v14, %s8344_s10  ;;  %v326_v36 = vsel %vm8438_vm4, 0, %v325_v10 }
 0x3d4   : > { %v7855_v22 = vpop.f32.mrf.mxu0  ;;  %7898 = vmatmul.mubr.msk.bf16.gmra.mxu1 %vm3959_vm13, %v6392_v23  ;;  %v6202_v49 = vsel %vm3682_vm2, %v6138_v24, %v5652_v15  ;;  %327 = vst [vmem:[#allocation2 + $0x280] sm:$0x1] %v326_v36  ;;  %v551_v23 = vld [vmem:[%s8462_s30 + $0x1f4] sm:$0xf] }
 0x3d5   : > { %v5726_v0 = vpop.permute.xlu0 %5725  ;;  %4611 = vst.msk [vmem:[%s12302_s4 + $0x7c] sm:$0xf] %vm4579_vm6, %v7651_v9  ;;  %v7649_v37 = vpack.c.bf16 %v4181_v28, %v4181_v28  ;;  %v4202_v53 = vadd.f32 %v7855_v22, %v12284_v1  ;;  %5671 = vrot.lane.b32.xlu0 %v14337_v55, %s8342_s8  ;;  %v550_v28 = vld [vmem:[%s8462_s30 + $0x1f0] sm:$0xf]  ;;  %v1650_v59 = vshrl.u32 %v551_v23, 16  ;;  %v1653_v10 = vshll.u32 %v551_v23, 16 }
 0x3d6   : > { %v4193_v41 = vpop.f32.mrf.mxu0  ;;  %v12512_v56 = vpop.permute.xlu1 %5497  ;;  %v6266_v8 = vsel %vm3747_vm3, %v6202_v49, %v5726_v0  ;;  %v8234_v49 = vld [vmem:[#allocation2 + $0x184] sm:$0xff]  }
 0x3d7   : > { %4609 = vst.msk [vmem:[%s12302_s4 + $0x74] sm:$0xf] %vm4579_vm6, %v7649_v37  ;;  %v7654_v44 = vpack.c.bf16 %v4202_v53, %v4202_v53  ;;  %v4194_v38 = vadd.f32 %v12284_v1, %v4193_v41  ;;  %5899 = vrot.lane.b32.xlu1 %v11654_v26, %s8345_s11  ;;  %v1642_v41 = vshrl.u32 %v550_v28, 16 }
 0x3d8   : > { %v7856_v62 = vpop.f32.mrf.mxu0 }
 0x3d9   : > { %v5813_v51 = vpop.permute.xlu0 %5812  ;;  %4614 = vst.msk [vmem:[%s12302_s4 + $0x88] sm:$0xf] %vm4579_vm6, %v7654_v44  ;;  %v7652_v55 = vpack.c.bf16 %v4194_v38, %v4194_v38  ;;  %v4205_v2 = vadd.f32 %v7856_v62, %v12284_v1  ;;  %5745 = vrot.lane.b32.xlu0 %v12531_v33, %s8343_s9  ;;  %v552_v44 = vld [vmem:[%s8462_s30 + $0x1f8] sm:$0xf]  ;;  %v1645_v62 = vshll.u32 %v550_v28, 16 }
 0x3da   : > { %v4196_v63 = vpop.f32.mrf.mxu0  ;;  %v12529_v7 = vpop.permute.xlu1 %5584  ;;  %v6330_v19 = vsel %vm3812_vm7, %v6266_v8, %v5813_v51  ;;  %v553_v8 = vld [vmem:[%s8462_s30 + $0x1fc] sm:$0xf] }
 0x3db   : > { %4612 = vst.msk [vmem:[%s12302_s4 + $0x80] sm:$0xf] %vm4579_vm6, %v7652_v55  ;;  %v7655_v58 = vpack.c.bf16 %v4205_v2, %v4205_v2  ;;  %v4197_v15 = vadd.f32 %v12284_v1, %v4196_v63  ;;  %5517 = vrot.lane.b32.xlu1 %v12489_v54, %s8340_s6  ;;  %v1644_v55 = vrot.slane %v1642_v41, 7  ;;  %v1652_v2 = vrot.slane %v1650_v59, 7  ;;  %v2117_v23 = vld [vmem:[#allocation2 + $0x280] sm:$0xf] }
 0x3dc   : > { %v7859_v31 = vpop.f32.mrf.mxu0  ;;  %v5948_v63 = vsel %vm3422_vm11, %v8234_v49, %v11876_v34 }
 0x3dd   : > { %v5882_v9 = vpop.permute.xlu0 %5881  ;;  %4615 = vst.msk [vmem:[%s12302_s4 + $0x8c] sm:$0xf] %vm4579_vm6, %v7655_v58  ;;  %v7653_v22 = vpack.c.bf16 %v4197_v15, %v4197_v15  ;;  %v4218_v37 = vadd.f32 %v7859_v31, %v12284_v1  ;;  %5832 = vrot.lane.b32.xlu0 %v14340_v42, %s8344_s10  ;;  %v1659_v15 = vshrl.u32 %v552_v44, 16  ;;  %v1655_v28 = vor.u32 %v1653_v10, %v1652_v2 }
 0x3de   : > { %v6394_v0 = vsel %vm3877_vm12, %v6330_v19, %v5882_v9  ;;  %v4209_v53 = vpop.f32.mrf.mxu0  ;;  %v5654_v30 = vpop.permute.xlu1 %5653  ;;  %v1648_v9 = vrot.slane %v1644_v55, 4  ;;  %v6012_v34 = vsel %vm3487_vm14, %v5948_v63, %v12181_v52  ;;  %v1668_v52 = vshrl.u32 %v553_v8, 16 }
 0x3df   : > { %7901 = vmatprep.mubr.msk.bf16.mxu1 %vm3959_vm13, %v6394_v0  ;;  %4613 = vst.msk [vmem:[%s12302_s4 + $0x84] sm:$0xf] %vm4579_vm6, %v7653_v22  ;;  %v7658_v38 = vpack.c.bf16 %v4218_v37, %v4218_v37  ;;  %v4210_v45 = vadd.f32 %v12284_v1, %v4209_v53  ;;  %5604 = vrot.lane.b32.xlu1 %v14338_v14, %s8341_s7  ;;  %v1662_v22 = vshll.u32 %v552_v44, 16  ;;  %v1657_v53 = vrot.slane %v1652_v2, 4 }
 0x3e0   : > { %v7860_v51 = vpop.f32.mrf.mxu0  ;;  %v1647_v14 = vor.u32 %v1645_v62, %v1644_v55  ;;  %v6076_v55 = vsel %vm3552_vm15, %v6012_v34, %v12512_v56  ;;  %v12596_v34 = vld [vmem:[#allocation2 + $0x210] sm:$0xff]  }
 0x3e1   : > { %v12559_v24 = vpop.permute.xlu0 %5499  ;;  %4618 = vst.msk [vmem:[%s12302_s4 + $0x98] sm:$0xf] %vm4579_vm6, %v7658_v38  ;;  %v7656_v36 = vpack.c.bf16 %v4210_v45, %v4210_v45  ;;  %v4221_v58 = vadd.f32 %v7860_v51, %v12284_v1  ;;  %5901 = vrot.lane.b32.xlu0 %v11559_v13, %s8345_s11  ;;  %v1656_v45 = vsel %vm8472_vm8, %v1648_v9, %v1655_v28  ;;  %v1661_v51 = vrot.slane %v1659_v15, 7 }
 0x3e2   : > { %v4212_v31 = vpop.f32.mrf.mxu0  ;;  %v5728_v19 = vpop.permute.xlu1 %5727  ;;  %v2118_v44 = vsel %vm8478_vm9, %v1647_v14, %v2117_v23  ;;  %2120 = vst.msk [vmem:[#allocation2 + $0x284] sm:$0xf] %vm215_vm0, %v1656_v45  ;;  %v1670_v15 = vrot.slane %v1668_v52, 7  ;;  %v6140_v56 = vsel %vm3617_vm1, %v6076_v55, %v12529_v7 }
 0x3e3   : > { %4616 = vst.msk [vmem:[%s12302_s4 + $0x90] sm:$0xf] %vm4579_vm6, %v7656_v36  ;;  %v7659_v37 = vpack.c.bf16 %v4221_v58, %v4221_v58  ;;  %v4213_v0 = vadd.f32 %v12284_v1, %v4212_v31  ;;  %5673 = vrot.lane.b32.xlu1 %v11654_v26, %s8342_s8  ;;  %2119 = vst [vmem:[#allocation2 + $0x280] sm:$0xf] %v2118_v44  ;;  %v423_v26 = vld [vmem:[#allocation2 + $0x290] sm:$0x1]  ;;  %v1664_v36 = vor.u32 %v1662_v22, %v1661_v51 }
 0x3e4   : > { %v7863_v41 = vpop.f32.mrf.mxu0  ;;  %v1666_v58 = vrot.slane %v1661_v51, 4  ;;  %v1671_v31 = vshll.u32 %v553_v8, 16  ;;  %v6204_v28 = vsel %vm3682_vm2, %v6140_v56, %v5654_v30 }
 0x3e5   : > { %v12576_v59 = vpop.permute.xlu0 %5586  ;;  %4619 = vst.msk [vmem:[%s12302_s4 + $0x9c] sm:$0xf] %vm4579_vm6, %v7659_v37  ;;  %v7657_v2 = vpack.c.bf16 %v4213_v0, %v4213_v0  ;;  %v4234_v10 = vadd.f32 %v7863_v41, %v12284_v1  ;;  %5519 = vrot.lane.b32.xlu0 %v12531_v33, %s8340_s6  ;;  %v1665_v8 = vsel %vm8472_vm8, %v1657_v53, %v1664_v36  ;;  %v424_v0 = vsel %vm8444_vm5, 0, %v423_v26 }
 0x3e6   : > { %v4225_v49 = vpop.f32.mrf.mxu0  ;;  %v5815_v63 = vpop.permute.xlu1 %5814  ;;  %v1673_v37 = vor.u32 %v1671_v31, %v1670_v15  ;;  %v6268_v41 = vsel %vm3747_vm3, %v6204_v28, %v5728_v19  ;;  %2121 = vst.msk [vmem:[#allocation2 + $0x288] sm:$0xf] %vm215_vm0, %v1665_v8  ;;  %425 = vst [vmem:[#allocation2 + $0x290] sm:$0x1] %v424_v0 }
 0x3e7   : > { %4617 = vst.msk [vmem:[%s12302_s4 + $0x94] sm:$0xf] %vm4579_vm6, %v7657_v2  ;;  %v7662_v14 = vpack.c.bf16 %v4234_v10, %v4234_v10  ;;  %v4226_v9 = vadd.f32 %v12284_v1, %v4225_v49  ;;  %5747 = vrot.lane.b32.xlu1 %v12596_v34, %s8343_s9  ;;  %v6332_v62 = vsel %vm3812_vm7, %v6268_v41, %v5815_v63  ;;  %v14344_v10 = vld [vmem:[#allocation236_spill] sm:$0xff]  ;;  %v1675_v49 = vrot.slane %v1670_v15, 4  ;;  %v8236_v63 = vld [vmem:[#allocation2 + $0x190] sm:$0xff]  }
 0x3e8   : > { %v7864_v23 = vpop.f32.mrf.mxu0  ;;  %v1674_v53 = vsel %vm8472_vm8, %v1666_v58, %v1673_v37  ;;  %v5950_v36 = vsel %vm3422_vm11, %v8236_v63, %v11810_v3  ;;  %v12648_v41 = vld [vmem:[#allocation2 + $0x21c] sm:$0xff]  }
 0x3e9   : > { %v5656_v22 = vpop.permute.xlu0 %5655  ;;  %4622 = vst.msk [vmem:[%s12302_s4 + $0xa8] sm:$0xf] %vm4579_vm6, %v7662_v14  ;;  %v7660_v30 = vpack.c.bf16 %v4226_v9, %v4226_v9  ;;  %v4237_v45 = vadd.f32 %v7864_v23, %v12284_v1  ;;  %5606 = vrot.lane.b32.xlu0 %v14340_v42, %s8341_s7  ;;  %v6014_v56 = vsel %vm3487_vm14, %v5950_v36, %v12163_v50 }
 0x3ea   : > { %v4228_v44 = vpop.f32.mrf.mxu0  ;;  %v5884_v51 = vpop.permute.xlu1 %5883  ;;  %2122 = vst.msk [vmem:[#allocation2 + $0x28c] sm:$0xf] %vm215_vm0, %v1674_v53  ;;  %v6078_v15 = vsel %vm3552_vm15, %v6014_v56, %v12559_v24  ;;  %vm14362_vm0 = vsmask.f32 7424 }
 0x3eb   : > { %4620 = vst.msk [vmem:[%s12302_s4 + $0xa0] sm:$0xf] %vm4579_vm6, %v7660_v30  ;;  %v7663_v19 = vpack.c.bf16 %v4237_v45, %v4237_v45  ;;  %v4229_v52 = vadd.f32 %v12284_v1, %v4228_v44  ;;  %v6396_v55 = vsel %vm3877_vm12, %v6332_v62, %v5884_v51  ;;  %5834 = vrot.lane.b32.xlu1 %v14344_v10, %s8344_s10  ;;  %vm14368_vm5 = vmmov %vm14362_vm0 }
 0x3ec   : > { %v7867_v2 = vpop.f32.mrf.mxu0  ;;  %7902 = vmatmul.mubr.msk.bf16.gmra.mxu1 %vm3959_vm13, %v6396_v55  ;;  %v14345_v55 = vld [vmem:[#allocation132_spill] sm:$0xff]  ;;  %vm14371_vm8 = vmmov %vm14362_vm0 }
 0x3ed   : > { %v5730_v42 = vpop.permute.xlu0 %5729  ;;  %4623 = vst.msk [vmem:[%s12302_s4 + $0xac] sm:$0xf] %vm4579_vm6, %v7663_v19  ;;  %v7661_v38 = vpack.c.bf16 %v4229_v52, %v4229_v52  ;;  %v4250_v26 = vadd.f32 %v7867_v2, %v12284_v1  ;;  %5675 = vrot.lane.b32.xlu0 %v11559_v13, %s8342_s8  ;;  %v2123_v23 = vld [vmem:[#allocation2 + $0x290] sm:$0x1]  ;;  %v6142_v13 = vsel %vm3617_vm1, %v6078_v15, %v12576_v59 }
 0x3ee   : > { %v4241_v58 = vpop.f32.mrf.mxu0  ;;  %v12627_v31 = vpop.permute.xlu1 %5501  ;;  %v2124_v37 = vsel %vm8438_vm4, %v1675_v49, %v2123_v23  ;;  %v6206_v24 = vsel %vm3682_vm2, %v6142_v13, %v5656_v22  ;;  %vm14365_vm4 = vmmov %vm14362_vm0 }
 0x3ef   : > { %4621 = vst.msk [vmem:[%s12302_s4 + $0xa4] sm:$0xf] %vm4579_vm6, %v7661_v38  ;;  %v7666_v14 = vpack.c.bf16 %v4250_v26, %v4250_v26  ;;  %v4242_v9 = vadd.f32 %v12284_v1, %v4241_v58  ;;  %5903 = vrot.lane.b32.xlu1 %v11691_v61, %s8345_s11  ;;  %2125 = vst [vmem:[#allocation2 + $0x290] sm:$0x1] %v2124_v37  ;;  %v6270_v30 = vsel %vm3747_vm3, %v6206_v24, %v5730_v42 }
 0x3f0   : > { %v7868_v28 = vpop.f32.mrf.mxu0 }
 0x3f1   : > { %v5817_v3 = vpop.permute.xlu0 %5816  ;;  %4626 = vst.msk [vmem:[%s12302_s4 + $0xb8] sm:$0xf] %vm4579_vm6, %v7666_v14  ;;  %v7664_v50 = vpack.c.bf16 %v4242_v9, %v4242_v9  ;;  %v4253_v8 = vadd.f32 %v7868_v28, %v12284_v1  ;;  %5749 = vrot.lane.b32.xlu0 %v12648_v41, %s8343_s9  ;;  %v8238_v9 = vld [vmem:[#allocation2 + $0x198] sm:$0xff]  }
 0x3f2   : > { %v4244_v7 = vpop.f32.mrf.mxu0  ;;  %v5589_v0 = vpop.permute.xlu1 %5588  ;;  %v6334_v22 = vsel %vm3812_vm7, %v6270_v30, %v5817_v3 }
 0x3f3   : > { %4624 = vst.msk [vmem:[%s12302_s4 + $0xb0] sm:$0xf] %vm4579_vm6, %v7664_v50  ;;  %v7667_v59 = vpack.c.bf16 %v4253_v8, %v4253_v8  ;;  %v4245_v29 = vadd.f32 %v12284_v1, %v4244_v7  ;;  %5521 = vrot.lane.b32.xlu1 %v12596_v34, %s8340_s6 }
 0x3f4   : > { %v7871_v45 = vpop.f32.mrf.mxu0 }
 0x3f5   : > { %v5886_v62 = vpop.permute.xlu0 %5885  ;;  %4627 = vst.msk [vmem:[%s12302_s4 + $0xbc] sm:$0xf] %vm4579_vm6, %v7667_v59  ;;  %v7665_v44 = vpack.c.bf16 %v4245_v29, %v4245_v29  ;;  %v4266_v51 = vadd.f32 %v7871_v45, %v12284_v1  ;;  %5836 = vrot.lane.b32.xlu0 %v14345_v55, %s8344_s10  ;;  %v12697_v59 = vld [vmem:[#allocation2 + $0x224] sm:$0xff]  }
 0x3f6   : > { %v6398_v53 = vsel %vm3877_vm12, %v6334_v22, %v5886_v62  ;;  %v4257_v19 = vpop.f32.mrf.mxu0  ;;  %v5658_v52 = vpop.permute.xlu1 %5657 }
 0x3f7   : > { %7905 = vmatprep.mubr.msk.bf16.mxu1 %vm3959_vm13, %v6398_v53  ;;  %4625 = vst.msk [vmem:[%s12302_s4 + $0xb4] sm:$0xf] %vm4579_vm6, %v7665_v44  ;;  %v7670_v2 = vpack.c.bf16 %v4266_v51, %v4266_v51  ;;  %v4258_v42 = vadd.f32 %v12284_v1, %v4257_v19  ;;  %5608 = vrot.lane.b32.xlu1 %v14344_v10, %s8341_s7 }
 0x3f8   : > { %v7872_v38 = vpop.f32.mrf.mxu0  ;;  %v5952_v10 = vsel %vm3422_vm11, %v8238_v9, %v11900_v6 }
 0x3f9   : > { %v5504_v26 = vpop.permute.xlu0 %5503  ;;  %4630 = vst.msk [vmem:[%s12302_s4 + $0xc8] sm:$0xf] %vm4579_vm6, %v7670_v2  ;;  %v7668_v49 = vpack.c.bf16 %v4258_v42, %v4258_v42  ;;  %v4269_v63 = vadd.f32 %v7872_v38, %v12284_v1  ;;  %5905 = vrot.lane.b32.xlu0 %v11596_v16, %s8345_s11  ;;  %v6016_v3 = vsel %vm3487_vm14, %v5952_v10, %v12189_v11  ;;  %v8240_v38 = vld [vmem:[#allocation2 + $0x1a4] sm:$0xff]  }
 0x3fa   : > { %v4260_v36 = vpop.f32.mrf.mxu0  ;;  %v5732_v58 = vpop.permute.xlu1 %5731  ;;  %v6080_v50 = vsel %vm3552_vm15, %v6016_v3, %v12627_v31 }
 0x3fb   : > { %4628 = vst.msk [vmem:[%s12302_s4 + $0xc0] sm:$0xf] %vm4579_vm6, %v7668_v49  ;;  %v7671_v56 = vpack.c.bf16 %v4269_v63, %v4269_v63  ;;  %v4261_v14 = vadd.f32 %v12284_v1, %v4260_v36  ;;  %5677 = vrot.lane.b32.xlu1 %v11691_v61, %s8342_s8  ;;  %v6144_v61 = vsel %vm3617_vm1, %v6080_v50, %v5589_v0  ;;  %v12735_v50 = vld [vmem:[#allocation2 + $0x230] sm:$0xff]  }
 0x3fc   : > { %v7875_v15 = vpop.f32.mrf.mxu0  ;;  %v6208_v24 = vsel %vm3682_vm2, %v6144_v61, %v5658_v52  ;;  %v14346_v52 = vld [vmem:[#allocation47_spill] sm:$0xff]  ;;  %v5954_v49 = vsel %vm3422_vm11, %v8240_v38, %v11840_v27 }
 0x3fd   : > { %v5591_v28 = vpop.permute.xlu0 %5590  ;;  %4631 = vst.msk [vmem:[%s12302_s4 + $0xcc] sm:$0xf] %vm4579_vm6, %v7671_v56  ;;  %v7669_v23 = vpack.c.bf16 %v4261_v14, %v4261_v14  ;;  %v4282_v13 = vadd.f32 %v7875_v15, %v12284_v1  ;;  %5523 = vrot.lane.b32.xlu0 %v12648_v41, %s8340_s6  ;;  %v6272_v30 = vsel %vm3747_vm3, %v6208_v24, %v5732_v58 }
 0x3fe   : > { %v4273_v8 = vpop.f32.mrf.mxu0  ;;  %v5819_v37 = vpop.permute.xlu1 %5818  ;;  %v6018_v58 = vsel %vm3487_vm14, %v5954_v49, %v12171_v32 }
 0x3ff   : > { %4629 = vst.msk [vmem:[%s12302_s4 + $0xc4] sm:$0xf] %vm4579_vm6, %v7669_v23  ;;  %v7674_v6 = vpack.c.bf16 %v4282_v13, %v4282_v13  ;;  %v4274_v11 = vadd.f32 %v12284_v1, %v4273_v8  ;;  %5751 = vrot.lane.b32.xlu1 %v12697_v59, %s8343_s9  ;;  %v6336_v45 = vsel %vm3812_vm7, %v6272_v30, %v5819_v37 }
 0x400   : > { %v7876_v7 = vpop.f32.mrf.mxu0  ;;  %v6082_v9 = vsel %vm3552_vm15, %v6018_v58, %v5504_v26 }
 0x401   : > { %v5660_v31 = vpop.permute.xlu0 %5659  ;;  %4634 = vst.msk [vmem:[%s12302_s4 + $0xd8] sm:$0xf] %vm4579_vm6, %v7674_v6  ;;  %v7672_v0 = vpack.c.bf16 %v4274_v11, %v4274_v11  ;;  %v4285_v29 = vadd.f32 %v7876_v7, %v12284_v1  ;;  %5610 = vrot.lane.b32.xlu0 %v14345_v55, %s8341_s7  ;;  %v6146_v15 = vsel %vm3617_vm1, %v6082_v9, %v5591_v28 }
 0x402   : > { %v4276_v22 = vpop.f32.mrf.mxu0  ;;  %v5888_v62 = vpop.permute.xlu1 %5887  ;;  %v6210_v3 = vsel %vm3682_vm2, %v6146_v15, %v5660_v31  ;;  %v14348_v15 = vld [vmem:[#allocation88_spill] sm:$0xff] }
 0x403   : > { %4632 = vst.msk [vmem:[%s12302_s4 + $0xd0] sm:$0xf] %vm4579_vm6, %v7672_v0  ;;  %v7675_v44 = vpack.c.bf16 %v4285_v29, %v4285_v29  ;;  %v4277_v51 = vadd.f32 %v12284_v1, %v4276_v22  ;;  %v6400_v53 = vsel %vm3877_vm12, %v6336_v45, %v5888_v62  ;;  %5838 = vrot.lane.b32.xlu1 %v14346_v52, %s8344_s10  ;;  %v14347_v0 = vld [vmem:[#allocation162_spill] sm:$0xff]  ;;  %v12758_v45 = vld [vmem:[%s13447_s2] ss:$0 sm:$0xff] }
 0x404   : > { %v7879_v19 = vpop.f32.mrf.mxu0  ;;  %7906 = vmatmul.mubr.msk.bf16.gmra.mxu1 %vm3959_vm13, %v6400_v53 }
 0x405   : > { %v5734_v2 = vpop.permute.xlu0 %5733  ;;  %4635 = vst.msk [vmem:[%s12302_s4 + $0xdc] sm:$0xf] %vm4579_vm6, %v7675_v44  ;;  %v7673_v42 = vpack.c.bf16 %v4277_v51, %v4277_v51  ;;  %v4298_v55 = vadd.f32 %v7879_v19, %v12284_v1  ;;  %5679 = vrot.lane.b32.xlu0 %v11596_v16, %s8342_s8 }
 0x406   : > { %v4289_v63 = vpop.f32.mrf.mxu0  ;;  %v5506_v36 = vpop.permute.xlu1 %5505  ;;  %v6274_v28 = vsel %vm3747_vm3, %v6210_v3, %v5734_v2 }
 0x407   : > { %4633 = vst.msk [vmem:[%s12302_s4 + $0xd4] sm:$0xf] %vm4579_vm6, %v7673_v42  ;;  %v7678_v56 = vpack.c.bf16 %v4298_v55, %v4298_v55  ;;  %v4290_v14 = vadd.f32 %v12284_v1, %v4289_v63  ;;  %5907 = vrot.lane.b32.xlu1 %v11726_v12, %s8345_s11  ;;  %v8243_v55 = vld [vmem:[#allocation2 + $0x1ac] sm:$0xff]  }
 0x408   : > { %v7880_v10 = vpop.f32.mrf.mxu0 }
 0x409   : > { %v5821_v27 = vpop.permute.xlu0 %5820  ;;  %4638 = vst.msk [vmem:[%s12302_s4 + $0xe8] sm:$0xf] %vm4579_vm6, %v7678_v56  ;;  %v7676_v16 = vpack.c.bf16 %v4290_v14, %v4290_v14  ;;  %v4301_v32 = vadd.f32 %v7880_v10, %v12284_v1  ;;  %5753 = vrot.lane.b32.xlu0 %v12735_v50, %s8343_s9 }
 0x40a   : > { %v4292_v23 = vpop.f32.mrf.mxu0  ;;  %v5593_v13 = vpop.permute.xlu1 %5592  ;;  %v6338_v61 = vsel %vm3812_vm7, %v6274_v28, %v5821_v27 }
 0x40b   : > { %4636 = vst.msk [vmem:[%s12302_s4 + $0xe0] sm:$0xf] %vm4579_vm6, %v7676_v16  ;;  %v7679_v26 = vpack.c.bf16 %v4301_v32, %v4301_v32  ;;  %v4293_v8 = vadd.f32 %v12284_v1, %v4292_v23  ;;  %5525 = vrot.lane.b32.xlu1 %v12697_v59, %s8340_s6  ;;  %v8245_v32 = vld [vmem:[#allocation2 + $0x1b8] sm:$0xff]  }
 0x40c   : > { %v7883_v37 = vpop.f32.mrf.mxu0  ;;  %v5958_v3 = vsel %vm3422_vm11, %v8245_v32, %v11865_v35 }
 0x40d   : > { %v5890_v6 = vpop.permute.xlu0 %5889  ;;  %4639 = vst.msk [vmem:[%s12302_s4 + $0xec] sm:$0xf] %vm4579_vm6, %v7679_v26  ;;  %v7677_v11 = vpack.c.bf16 %v4293_v8, %v4293_v8  ;;  %v4314_v24 = vadd.f32 %v7883_v37, %v12284_v1  ;;  %5840 = vrot.lane.b32.xlu0 %v14347_v0, %s8344_s10 }
 0x40e   : > { %v6402_v7 = vsel %vm3877_vm12, %v6338_v61, %v5890_v6  ;;  %v4305_v31 = vpop.f32.mrf.mxu0  ;;  %v5662_v30 = vpop.permute.xlu1 %5661  ;;  %v12809_v6 = vld [vmem:[#allocation2 + $0x244] sm:$0xff]  }
 0x40f   : > { %7909 = vmatprep.mubr.msk.bf16.mxu1 %vm3959_vm13, %v6402_v7  ;;  %4637 = vst.msk [vmem:[%s12302_s4 + $0xe4] sm:$0xf] %vm4579_vm6, %v7677_v11  ;;  %v7682_v29 = vpack.c.bf16 %v4314_v24, %v4314_v24  ;;  %v4306_v1 = vadd.f32 %v12758_v45, %v4305_v31  ;;  %5612 = vrot.lane.b32.xlu1 %v14346_v52, %s8341_s7  ;;  %v14349_v7 = vld [vmem:[#allocation235_spill] sm:$0xff] }
 0x410   : > { %v7884_v22 = vpop.f32.mrf.mxu0  ;;  %v5956_v52 = vsel %vm3422_vm11, %v8243_v55, %v11926_v40  ;;  %v14350_v55 = vld [vmem:[#allocation117_spill] sm:$0xff] }
 0x411   : > { %v5508_v62 = vpop.permute.xlu0 %5507  ;;  %4642 = vst.msk [vmem:[%s12302_s4 + $0xf8] sm:$0xf] %vm4579_vm6, %v7682_v29  ;;  %v7680_v44 = vpack.c.bf16 %v4306_v1, %v4306_v1  ;;  %v4317_v51 = vadd.f32 %v12758_v45, %v7884_v22  ;;  %5909 = vrot.lane.b32.xlu0 %v11635_v25, %s8345_s11  ;;  %v6020_v49 = vsel %vm3487_vm14, %v5956_v52, %v12197_v17 }
 0x412   : > { %v4308_v53 = vpop.f32.mrf.mxu0  ;;  %v5736_v19 = vpop.permute.xlu1 %5735  ;;  %v6084_v58 = vsel %vm3552_vm15, %v6020_v49, %v5506_v36 }
 0x413   : > { %4640 = vst.msk [vmem:[%s12302_s4 + $0xf0] sm:$0xf] %vm4579_vm6, %v7680_v44  ;;  %v7683_v2 = vpack.c.bf16 %v4317_v51, %v4317_v51  ;;  %v4309_v42 = vadd.f32 %v12758_v45, %v4308_v53  ;;  %5681 = vrot.lane.b32.xlu1 %v11726_v12, %s8342_s8  ;;  %v6148_v14 = vsel %vm3617_vm1, %v6084_v58, %v5593_v13  ;;  %v12786_v12 = vld [vmem:[#allocation2 + $0x238] sm:$0xff]  }
 0x414   : > { %v6212_v40 = vsel %vm3682_vm2, %v6148_v14, %v5662_v30  ;;  %v6022_v13 = vsel %vm3487_vm14, %v5958_v3, %v12179_v47  ;;  %v8251_v3 = vld [vmem:[#allocation2 + $0x1d4] sm:$0xff]  }
 0x415   : > { %v5595_v38 = vpop.permute.xlu0 %5594  ;;  %4643 = vst.msk [vmem:[%s12302_s4 + $0xfc] sm:$0xf] %vm4579_vm6, %v7683_v2  ;;  %v7681_v63 = vpack.c.bf16 %v4309_v42, %v4309_v42  ;;  %5527 = vrot.lane.b32.xlu0 %v12735_v50, %s8340_s6  ;;  %v6276_v9 = vsel %vm3747_vm3, %v6212_v40, %v5736_v19  ;;  %v6086_v26 = vsel %vm3552_vm15, %v6022_v13, %v5508_v62  ;;  %v12836_v19 = vld [vmem:[#allocation2 + $0x24c] sm:$0xff]  }
 0x416   : > { %v5823_v56 = vpop.permute.xlu1 %5822  ;;  %v6150_v8 = vsel %vm3617_vm1, %v6086_v26, %v5595_v38  ;;  %v8249_v38 = vld [vmem:[#allocation2 + $0x1cc] sm:$0xff]  }
 0x417   : > { %4641 = vst.msk [vmem:[%s12302_s4 + $0xf4] sm:$0xf] %vm4579_vm6, %v7681_v63  ;;  %5755 = vrot.lane.b32.xlu1 %v12786_v12, %s8343_s9  ;;  %v6340_v36 = vsel %vm3812_vm7, %v6276_v9, %v5823_v56  ;;  %v5962_v49 = vsel %vm3422_vm11, %v8249_v38, %v11890_v57 }
 0x418   : > { %v6026_v58 = vsel %vm3487_vm14, %v5962_v49, %v12187_v20 }
 0x419   : > { %v5664_v17 = vpop.permute.xlu0 %5663  ;;  %5614 = vrot.lane.b32.xlu0 %v14347_v0, %s8341_s7  ;;  %v8247_v0 = vld [vmem:[#allocation2 + $0x1c0] sm:$0xff]  }
 0x41a   : > { %v5892_v10 = vpop.permute.xlu1 %5891  ;;  %v6214_v37 = vsel %vm3682_vm2, %v6150_v8, %v5664_v17  ;;  %v5960_v29 = vsel %vm3422_vm11, %v8247_v0, %v11950_v5 }
 0x41b   : > { %v6404_v27 = vsel %vm3877_vm12, %v6340_v36, %v5892_v10  ;;  %5842 = vrot.lane.b32.xlu1 %v14348_v15, %s8344_s10  ;;  %v6024_v22 = vsel %vm3487_vm14, %v5960_v29, %v12205_v4  ;;  %v12859_v36 = vld [vmem:[#allocation2 + $0x258] sm:$0xff]   ;;  %v14354_v29 = vld [vmem:[#allocation146_spill] sm:$0xff] }
 0x41c   : > { %7910 = vmatmul.mubr.msk.bf16.gmra.mxu1 %vm3959_vm13, %v6404_v27 }
 0x41d   : > { %v5738_v16 = vpop.permute.xlu0 %5737  ;;  %5683 = vrot.lane.b32.xlu0 %v11635_v25, %s8342_s8 }
 0x41e   : > { %v5510_v23 = vpop.permute.xlu1 %5509  ;;  %v6278_v25 = vsel %vm3747_vm3, %v6214_v37, %v5738_v16 }
 0x41f   : > { %5911 = vrot.lane.b32.xlu1 %v11758_v18, %s8345_s11  ;;  %v6088_v62 = vsel %vm3552_vm15, %v6024_v22, %v5510_v23  ;;  %v5964_v23 = vsel %vm3422_vm11, %v8251_v3, %v11976_v60 }
 0x420   : > { %v6028_v26 = vsel %vm3487_vm14, %v5964_v23, %v12213_v48 }
 0x421   : > { %v5825_v28 = vpop.permute.xlu0 %5824  ;;  %5757 = vrot.lane.b32.xlu0 %v12809_v6, %s8343_s9 }
 0x422   : > { %v5597_v61 = vpop.permute.xlu1 %5596  ;;  %v6342_v35 = vsel %vm3812_vm7, %v6278_v25, %v5825_v28  ;;  %v12886_v25 = vld [vmem:[#allocation2 + $0x260] sm:$0xff]  }
 0x423   : > { %5529 = vrot.lane.b32.xlu1 %v12786_v12, %s8340_s6  ;;  %v6152_v51 = vsel %vm3617_vm1, %v6088_v62, %v5597_v61  ;;  %v14355_v62 = vld [vmem:[#allocation57_spill] sm:$0xff] }
 0x425   : > { %v5894_v47 = vpop.permute.xlu0 %5893  ;;  %5844 = vrot.lane.b32.xlu0 %v14349_v7, %s8344_s10 }
 0x426   : > { %v6406_v11 = vsel %vm3877_vm12, %v6342_v35, %v5894_v47  ;;  %v5666_v24 = vpop.permute.xlu1 %5665 }
 0x427   : > { %7913 = vmatprep.mubr.msk.bf16.mxu1 %vm3959_vm13, %v6406_v11  ;;  %5616 = vrot.lane.b32.xlu1 %v14348_v15, %s8341_s7  ;;  %v6216_v53 = vsel %vm3682_vm2, %v6152_v51, %v5666_v24  ;;  %v14351_v15 = vld [vmem:[#allocation238_spill] sm:$0xff] }
 0x428   : > { %v14352_v11 = vld [vmem:[#allocation134_spill] sm:$0xff] }
 0x429   : > { %v5512_v31 = vpop.permute.xlu0 %5511  ;;  %5913 = vrot.lane.b32.xlu0 %v11670_v43, %s8345_s11 }
 0x42a   : > { %v5740_v30 = vpop.permute.xlu1 %5739  ;;  %v6090_v56 = vsel %vm3552_vm15, %v6026_v58, %v5512_v31  ;;  %v14353_v31 = vld [vmem:[#allocation87_spill] sm:$0xff] }
 0x42b   : > { %5685 = vrot.lane.b32.xlu1 %v11758_v18, %s8342_s8  ;;  %v6280_v5 = vsel %vm3747_vm3, %v6216_v53, %v5740_v30 }
 0x42d   : > { %v5599_v1 = vpop.permute.xlu0 %5598  ;;  %5531 = vrot.lane.b32.xlu0 %v12809_v6, %s8340_s6 }
 0x42e   : > { %v5827_v44 = vpop.permute.xlu1 %5826  ;;  %v6154_v40 = vsel %vm3617_vm1, %v6090_v56, %v5599_v1 }
 0x42f   : > { %5759 = vrot.lane.b32.xlu1 %v12836_v19, %s8343_s9  ;;  %v6344_v4 = vsel %vm3812_vm7, %v6280_v5, %v5827_v44  ;;  %v12909_v5 = vld [vmem:[#allocation2 + $0x26c] sm:$0xff]  }
 0x431   : > { %v5668_v18 = vpop.permute.xlu0 %5667  ;;  %5618 = vrot.lane.b32.xlu0 %v14349_v7, %s8341_s7  ;;  %v8253_v7 = vld [vmem:[#allocation2 + $0x1e0] sm:$0xff]  }
 0x432   : > { %v5896_v2 = vpop.permute.xlu1 %5895  ;;  %v6218_v17 = vsel %vm3682_vm2, %v6154_v40, %v5668_v18  ;;  %v5966_v30 = vsel %vm3422_vm11, %v8253_v7, %v14353_v31  ;;  %v12932_v40 = vld [vmem:[#allocation2 + $0x280] sm:$0xff]   ;;  %v14360_v7 = vld [vmem:[#allocation91_spill] sm:$0xff] }
 0x433   : > { %v6408_v42 = vsel %vm3877_vm12, %v6344_v4, %v5896_v2  ;;  %5846 = vrot.lane.b32.xlu1 %v14350_v55, %s8344_s10  ;;  %v6030_v1 = vsel %vm3487_vm14, %v5966_v30, %v14354_v29  ;;  %v5404_v4 = vrot.slane %v12909_v5, 1  ;;  %v12915_v2 = vld [vmem:[#allocation2 + $0x274] sm:$0xff]   ;;  %v5553_v3 = vshll.u32 %v12932_v40, 16  ;;  %v14361_v29 = vld [vmem:[#allocation10_spill] sm:$0xff] }
 0x434   : > { %7914 = vmatmul.mubr.msk.bf16.gmra.mxu1 %vm3959_vm13, %v6408_v42  ;;  %v5405_v42 = vrot.slane %v12915_v2, 1  ;;  %v5970_v31 = vsel %vm3422_vm11, %v12442_v21, %v14360_v7  ;;  %v13014_v7 = vld [vmem:[#allocation2 + $0x294] sm:$0xff]  }
 0x435   : > { %v5742_v52 = vpop.permute.xlu0 %5741  ;;  %5687 = vrot.lane.b32.xlu0 %v11670_v43, %s8342_s8 }
 0x436   : > { %v5514_v63 = vpop.permute.xlu1 %5513  ;;  %v6282_v43 = vsel %vm3747_vm3, %v6218_v17, %v5742_v52  ;;  %v12926_v58 = vsel %vm2817_vm10, %v5404_v4, %v5405_v42  ;;  %v8256_v17 = vld [vmem:[#allocation2 + $0x1e8] sm:$0xff]  }
 0x437   : > { %5915 = vrot.lane.b32.xlu1 %v11788_v46, %s8345_s11  ;;  %v6092_v28 = vsel %vm3552_vm15, %v6028_v26, %v5514_v63  ;;  %v14356_v63 = vld [vmem:[#allocation83_spill] sm:$0xff] }
 0x439   : > { %v5829_v14 = vpop.permute.xlu0 %5828  ;;  %5761 = vrot.lane.b32.xlu0 %v12859_v36, %s8343_s9 }
 0x43a   : > { %v5601_v9 = vpop.permute.xlu1 %5600  ;;  %v6346_v57 = vsel %vm3812_vm7, %v6282_v43, %v5829_v14 }
 0x43b   : > { %5533 = vrot.lane.b32.xlu1 %v12836_v19, %s8340_s6  ;;  %v6156_v37 = vsel %vm3617_vm1, %v6092_v28, %v5601_v9  ;;  %v14357_v9 = vld [vmem:[#allocation138_spill] sm:$0xff]  ;;  %v8257_v28 = vld [vmem:[#allocation2 + $0x27c] ss:$0 sps:$4 sm:$0x11]  }
 0x43c   : > { %v5968_v43 = vsel %vm3422_vm11, %v8256_v17, %v14357_v9 }
 0x43d   : > { %v5898_v20 = vpop.permute.xlu0 %5897  ;;  %5848 = vrot.lane.b32.xlu0 %v14351_v15, %s8344_s10 }
 0x43e   : > { %v6410_v10 = vsel %vm3877_vm12, %v6346_v57, %v5898_v20  ;;  %v5670_v27 = vpop.permute.xlu1 %5669  ;;  %v14358_v20 = vld [vmem:[#allocation58_spill] sm:$0xff] }
 0x43f   : > { %7917 = vmatprep.mubr.msk.bf16.mxu1 %vm3959_vm13, %v6410_v10  ;;  %5620 = vrot.lane.b32.xlu1 %v14350_v55, %s8341_s7  ;;  %v6220_v61 = vsel %vm3682_vm2, %v6156_v37, %v5670_v27  ;;  %v6032_v10 = vsel %vm3487_vm14, %v5968_v43, %v14358_v20 }
 0x441   : > { %v5516_v16 = vpop.permute.xlu0 %5515  ;;  %5917 = vrot.lane.b32.xlu0 %v11709_v39, %s8345_s11 }
 0x442   : > { %v5744_v32 = vpop.permute.xlu1 %5743  ;;  %v6094_v22 = vsel %vm3552_vm15, %v6030_v1, %v5516_v16  ;;  %v6034_v1 = vsel %vm3487_vm14, %v5970_v31, %v14361_v29 }
 0x443   : > { %5689 = vrot.lane.b32.xlu1 %v11788_v46, %s8342_s8  ;;  %v6284_v60 = vsel %vm3747_vm3, %v6220_v61, %v5744_v32  ;;  %v12944_v32 = vld [vmem:[#allocation2 + $0x288] sm:$0xff]  }
 0x445   : > { %v5603_v13 = vpop.permute.xlu0 %5602  ;;  %5535 = vrot.lane.b32.xlu0 %v12859_v36, %s8340_s6 }
 0x446   : > { %v5831_v8 = vpop.permute.xlu1 %5830  ;;  %v6158_v51 = vsel %vm3617_vm1, %v6094_v22, %v5603_v13 }
 0x447   : > { %5763 = vrot.lane.b32.xlu1 %v12886_v25, %s8343_s9  ;;  %v6348_v48 = vsel %vm3812_vm7, %v6284_v60, %v5831_v8  ;;  %v5407_v8 = vrot.slane %v8257_v28, 1  ;;  %v5551_v60 = vshrl.u32 %v12932_v40, 16 }
 0x449   : > { %v5672_v46 = vpop.permute.xlu0 %5671  ;;  %5622 = vrot.lane.b32.xlu0 %v14351_v15, %s8341_s7 }
 0x44a   : > { %v5900_v35 = vpop.permute.xlu1 %5899  ;;  %v6222_v53 = vsel %vm3682_vm2, %v6158_v51, %v5672_v46 }
 0x44b   : > { %v6412_v47 = vsel %vm3877_vm12, %v6348_v48, %v5900_v35  ;;  %5850 = vrot.lane.b32.xlu1 %v14352_v11, %s8344_s10  ;;  %v5555_v48 = vrot.slane %v5553_v3, 1  ;;  %v5558_v35 = vshll.u32 %v12944_v32, 16 }
 0x44c   : > { %7918 = vmatmul.mubr.msk.bf16.gmra.mxu1 %vm3959_vm13, %v6412_v47 }
 0x44d   : > { %v5746_v24 = vpop.permute.xlu0 %5745  ;;  %5691 = vrot.lane.b32.xlu0 %v11709_v39, %s8342_s8  ;;  %v5560_v21 = vrot.slane %v5558_v35, 1 }
 0x44e   : > { %v5518_v0 = vpop.permute.xlu1 %5517  ;;  %v6286_v39 = vsel %vm3747_vm3, %v6222_v53, %v5746_v24  ;;  %v5556_v53 = vor.u32 %v5555_v48, %v5551_v60  ;;  %v14364_v60 = vld [vmem:[#allocation208_spill] sm:$0xff] }
 0x44f   : > { %5919 = vrot.lane.b32.xlu1 %v14355_v62, %s8345_s11  ;;  %v6096_v27 = vsel %vm3552_vm15, %v6032_v10, %v5518_v0  ;;  %v12965_v0 = vsel %vm2817_vm10, %v5405_v42, %v5407_v8 }
 0x451   : > { %v5833_v44 = vpop.permute.xlu0 %5832  ;;  %5765 = vrot.lane.b32.xlu0 %v12909_v5, %s8343_s9 }
 0x452   : > { %v5605_v18 = vpop.permute.xlu1 %5604  ;;  %v6350_v55 = vsel %vm3812_vm7, %v6286_v39, %v5833_v44 }
 0x453   : > { %5537 = vrot.lane.b32.xlu1 %v12886_v25, %s8340_s6  ;;  %v6160_v16 = vsel %vm3617_vm1, %v6096_v27, %v5605_v18 }
 0x455   : > { %v5902_v52 = vpop.permute.xlu0 %5901  ;;  %5852 = vrot.lane.b32.xlu0 %v14356_v63, %s8344_s10 }
 0x456   : > { %v6414_v38 = vsel %vm3877_vm12, %v6350_v55, %v5902_v52  ;;  %v5674_v49 = vpop.permute.xlu1 %5673 }
 0x457   : > { %7921 = vmatprep.mubr.msk.bf16.mxu1 %vm3959_vm13, %v6414_v38  ;;  %5624 = vrot.lane.b32.xlu1 %v14352_v11, %s8341_s7  ;;  %v6224_v23 = vsel %vm3682_vm2, %v6160_v16, %v5674_v49  ;;  %v14359_v11 = vld [vmem:[#allocation164_spill] sm:$0xff]  ;;  %v8126_v16 = vld [vmem:[#allocation2 + $0x290] ss:$0 sps:$4 sm:$0x11]  }
 0x458   : > { %v5566_v28 = vshll.u32 %v8126_v16, 16 }
 0x459   : > { %v5520_v56 = vpop.permute.xlu0 %5519  ;;  %5921 = vrot.lane.b32.xlu0 %v12926_v58, %s8345_s11 }
 0x45a   : > { %v5748_v14 = vpop.permute.xlu1 %5747  ;;  %v6098_v18 = vsel %vm3552_vm15, %v6034_v1, %v5520_v56  ;;  %v5634_v56 = vrot.slane %v12932_v40, 1 }
 0x45b   : > { %5693 = vrot.lane.b32.xlu1 %v14355_v62, %s8342_s8  ;;  %v6288_v26 = vsel %vm3747_vm3, %v6224_v23, %v5748_v14  ;;  %v5635_v14 = vrot.slane %v12944_v32, 1 }
 0x45d   : > { %v5607_v57 = vpop.permute.xlu0 %5606  ;;  %5539 = vrot.lane.b32.xlu0 %v12909_v5, %s8340_s6  ;;  %v5636_v23 = vsel %vm2817_vm10, %v5634_v56, %v5635_v14 }
 0x45e   : > { %v5835_v15 = vpop.permute.xlu1 %5834  ;;  %v6162_v42 = vsel %vm3617_vm1, %v6098_v18, %v5607_v57  ;;  %v5561_v57 = vsel %vm14362_vm0, %v5556_v53, %v5560_v21  ;;  %v13029_v53 = vld [vmem:[#allocation2 + $0x29c] sm:$0xff]  }
 0x45f   : > { %5767 = vrot.lane.b32.xlu1 %v12915_v2, %s8343_s9  ;;  %v6352_v37 = vsel %vm3812_vm7, %v6288_v26, %v5835_v15  ;;  %v5562_v26 = vshrl.u32 %v12944_v32, 16 }
 0x461   : > { %v5676_v13 = vpop.permute.xlu0 %5675  ;;  %5626 = vrot.lane.b32.xlu0 %v14356_v63, %s8341_s7  ;;  %v5564_v35 = vor.u32 %v5562_v26, %v5560_v21 }
 0x462   : > { %v5904_v61 = vpop.permute.xlu1 %5903  ;;  %v6226_v38 = vsel %vm3682_vm2, %v6162_v42, %v5676_v13  ;;  %v14366_v42 = vld [vmem:[#allocation37_spill] sm:$0xff] }
 0x463   : > { %v6416_v46 = vsel %vm3877_vm12, %v6352_v37, %v5904_v61  ;;  %5854 = vrot.lane.b32.xlu1 %v14359_v11, %s8344_s10  ;;  %v14363_v37 = vld [vmem:[#allocation168_spill] sm:$0xff] }
 0x464   : > { %v7891_v47 = vpop.f32.mrf.mxu1  ;;  %7922 = vmatmul.mubr.msk.bf16.gmra.mxu1 %vm3959_vm13, %v6416_v46  ;;  %v5972_v61 = vsel %vm3422_vm11, %v12489_v54, %v14363_v37 }
 0x465   : > { %v5750_v24 = vpop.permute.xlu0 %5749  ;;  %v6552_v30 = vadd.f32 %v12758_v45, %v7891_v47  ;;  %5695 = vrot.lane.b32.xlu0 %v12926_v58, %s8342_s8  ;;  %v6036_v48 = vsel %vm3487_vm14, %v5972_v61, %v14364_v60  ;;  %v5568_v47 = vrot.slane %v5566_v28, 1 }
 0x466   : > { %v6543_v22 = vpop.f32.mrf.mxu1  ;;  %v5522_v62 = vpop.permute.xlu1 %5521  ;;  %v6290_v9 = vsel %vm3747_vm3, %v6226_v38, %v5750_v24  ;;  %v5781_v38 = vshrl.u32 %v13014_v7, 16 }
 0x467   : > { %v7686_v44 = vpack.c.bf16 %v6552_v30, %v6552_v30  ;;  %v6544_v51 = vadd.f32 %v12758_v45, %v6543_v22  ;;  %5923 = vrot.lane.b32.xlu1 %v12965_v0, %s8345_s11  ;;  %v13022_v1 = vsel %vm14365_vm4, %v5564_v35, %v5568_v47  ;;  %v5637_v22 = vrot.slane %v8126_v16, 1 }
 0x468   : > { %v7892_v39 = vpop.f32.mrf.mxu1  ;;  %v5865_v47 = vrot.slane %v13029_v53, 1 }
 0x469   : > { %v5837_v4 = vpop.permute.xlu0 %5836  ;;  %7552 = vst.msk [vmem:[%s12302_s4 + $0x108] sm:$0xf] %vm4579_vm6, %v7686_v44  ;;  %v7684_v55 = vpack.c.bf16 %v6544_v51, %v6544_v51  ;;  %v6555_v52 = vadd.f32 %v12758_v45, %v7892_v39  ;;  %5769 = vrot.lane.b32.xlu0 %v12932_v40, %s8343_s9 }
 0x46a   : > { %v6546_v49 = vpop.f32.mrf.mxu1  ;;  %v5609_v63 = vpop.permute.xlu1 %5608  ;;  %v6354_v20 = vsel %vm3812_vm7, %v6290_v9, %v5837_v4  ;;  %v5638_v4 = vsel %vm2817_vm10, %v5635_v14, %v5637_v22  ;;  %v5788_v14 = vshll.u32 %v13029_v53, 16  ;;  %v14370_v22 = vld [vmem:[#allocation62_spill] sm:$0xff] }
 0x46b   : > { %7550 = vst.msk [vmem:[%s12302_s4 + $0x100] sm:$0xf] %vm4579_vm6, %v7684_v55  ;;  %v7687_v17 = vpack.c.bf16 %v6555_v52, %v6555_v52  ;;  %v6547_v43 = vadd.f32 %v12758_v45, %v6546_v49  ;;  %5541 = vrot.lane.b32.xlu1 %v12915_v2, %s8340_s6 }
 0x46c   : > { %v5790_v37 = vrot.slane %v5788_v14, 1 }
 0x46d   : > { %v5906_v10 = vpop.permute.xlu0 %5905  ;;  %7553 = vst.msk [vmem:[%s12302_s4 + $0x10c] sm:$0xf] %vm4579_vm6, %v7687_v17  ;;  %v7685_v27 = vpack.c.bf16 %v6547_v43, %v6547_v43  ;;  %5856 = vrot.lane.b32.xlu0 %v5561_v57, %s8344_s10 }
 0x46e   : > { %v6418_v15 = vsel %vm3877_vm12, %v6354_v20, %v5906_v10  ;;  %v5678_v3 = vpop.permute.xlu1 %5677 }
 0x46f   : > { %7925 = vmatprep.mubr.msk.bf16.mxu1 %vm3959_vm13, %v6418_v15  ;;  %7551 = vst.msk [vmem:[%s12302_s4 + $0x104] sm:$0xf] %vm4579_vm6, %v7685_v27  ;;  %5628 = vrot.lane.b32.xlu1 %v14359_v11, %s8341_s7  ;;  %v6100_v11 = vsel %vm3552_vm15, %v6036_v48, %v5522_v62 }
 0x470   : > { %v6164_v31 = vsel %vm3617_vm1, %v6100_v11, %v5609_v63  ;;  %v14367_v63 = vld [vmem:[#allocation172_spill] sm:$0xff] }
 0x471   : > { %v5524_v13 = vpop.permute.xlu0 %5523  ;;  %5925 = vrot.lane.b32.xlu0 %v5636_v23, %s8345_s11  ;;  %v6228_v54 = vsel %vm3682_vm2, %v6164_v31, %v5678_v3 }
 0x472   : > { %v5752_v8 = vpop.permute.xlu1 %5751 }
 0x473   : > { %5697 = vrot.lane.b32.xlu1 %v12965_v0, %s8342_s8  ;;  %v6292_v29 = vsel %vm3747_vm3, %v6228_v54, %v5752_v8 }
 0x475   : > { %v5611_v46 = vpop.permute.xlu0 %5610  ;;  %5469 = vrot.lane.b32.xlu0 %v12926_v58, %s8339_s5  ;;  %v5783_v58 = vshll.u32 %v13014_v7, 16 }
 0x476   : > { %v5839_v24 = vpop.permute.xlu1 %5838 }
 0x477   : > { %5771 = vrot.lane.b32.xlu1 %v12944_v32, %s8343_s9  ;;  %v6356_v62 = vsel %vm3812_vm7, %v6292_v29, %v5839_v24  ;;  %v5785_v49 = vrot.slane %v5783_v58, 1  ;;  %v8129_v24 = vld [vmem:[#allocation2 + $0x2a4] ss:$0 sps:$4 sm:$0x11]  }
 0x479   : > { %v5680_v30 = vpop.permute.xlu0 %5679  ;;  %5543 = vrot.lane.b32.xlu0 %v12932_v40, %s8340_s6  ;;  %v5974_v40 = vsel %vm3422_vm11, %v12531_v33, %v14366_v42 }
 0x47a   : > { %v5908_v44 = vpop.permute.xlu1 %5907  ;;  %v6038_v56 = vsel %vm3487_vm14, %v5974_v40, %v14367_v63 }
 0x47b   : > { %v6420_v51 = vsel %vm3877_vm12, %v6356_v62, %v5908_v44  ;;  %5858 = vrot.lane.b32.xlu1 %v13022_v1, %s8344_s10  ;;  %v6102_v43 = vsel %vm3552_vm15, %v6038_v56, %v5524_v13  ;;  %v5786_v13 = vor.u32 %v5785_v49, %v5781_v38  ;;  %v5796_v44 = vshll.u32 %v8129_v24, 16 }
 0x47c   : > { %v7895_v21 = vpop.f32.mrf.mxu1  ;;  %7926 = vmatmul.mubr.msk.bf16.gmra.mxu1 %vm3959_vm13, %v6420_v51  ;;  %v5867_v56 = vrot.slane %v8129_v24, 1  ;;  %v14374_v24 = vld [vmem:[#allocation60_spill] sm:$0xff] }
 0x47d   : > { %v5754_v18 = vpop.permute.xlu0 %5753  ;;  %v6568_v39 = vadd.f32 %v12758_v45, %v7895_v21  ;;  %5630 = vrot.lane.b32.xlu0 %v5561_v57, %s8341_s7  ;;  %v6166_v57 = vsel %vm3617_vm1, %v6102_v43, %v5611_v46  ;;  %v5791_v35 = vsel %vm14368_vm5, %v5786_v13, %v5790_v37  ;;  %v5798_v42 = vrot.slane %v5796_v44, 1 }
 0x47e   : > { %v6559_v55 = vpop.f32.mrf.mxu1  ;;  %v5526_v52 = vpop.permute.xlu1 %5525  ;;  %v6230_v15 = vsel %vm3682_vm2, %v6166_v57, %v5680_v30  ;;  %v14369_v30 = vld [vmem:[#allocation173_spill] sm:$0xff]  ;;  %v5868_v13 = vsel %vm2817_vm10, %v5865_v47, %v5867_v56 }
 0x47f   : > { %v7690_v17 = vpack.c.bf16 %v6568_v39, %v6568_v39  ;;  %v6560_v9 = vadd.f32 %v12758_v45, %v6559_v55  ;;  %5927 = vrot.lane.b32.xlu1 %v5638_v4, %s8345_s11  ;;  %v6294_v28 = vsel %vm3747_vm3, %v6230_v15, %v5754_v18  ;;  %v5976_v29 = vsel %vm3422_vm11, %v12596_v34, %v14369_v30  ;;  %v14375_v30 = vld [vmem:[#allocation94_spill] sm:$0xff] }
 0x480   : > { %v7896_v20 = vpop.f32.mrf.mxu1  ;;  %v6040_v62 = vsel %vm3487_vm14, %v5976_v29, %v14370_v22 }
 0x481   : > { %v5841_v33 = vpop.permute.xlu0 %5840  ;;  %7556 = vst.msk [vmem:[%s12302_s4 + $0x118] sm:$0xf] %vm4579_vm6, %v7690_v17  ;;  %v7688_v10 = vpack.c.bf16 %v6560_v9, %v6560_v9  ;;  %v6571_v27 = vadd.f32 %v12758_v45, %v7896_v20  ;;  %5699 = vrot.lane.b32.xlu0 %v5636_v23, %s8342_s8  ;;  %v6104_v58 = vsel %vm3552_vm15, %v6040_v62, %v5526_v52  ;;  %v14372_v17 = vld [vmem:[#allocation41_spill] sm:$0xff]  ;;  %v14373_v20 = vld [vmem:[#allocation175_spill] sm:$0xff] }
 0x482   : > { %v6562_v16 = vpop.f32.mrf.mxu1  ;;  %v5613_v3 = vpop.permute.xlu1 %5612  ;;  %v6358_v61 = vsel %vm3812_vm7, %v6294_v28, %v5841_v33  ;;  %v5978_v9 = vsel %vm3422_vm11, %v12648_v41, %v14372_v17 }
 0x483   : > { %7554 = vst.msk [vmem:[%s12302_s4 + $0x110] sm:$0xf] %vm4579_vm6, %v7688_v10  ;;  %v7691_v26 = vpack.c.bf16 %v6571_v27, %v6571_v27  ;;  %v6563_v8 = vadd.f32 %v12758_v45, %v6562_v16  ;;  %5471 = vrot.lane.b32.xlu1 %v12965_v0, %s8339_s5  ;;  %v5864_v0 = vrot.slane %v13014_v7, 1  ;;  %v6168_v21 = vsel %vm3617_vm1, %v6104_v58, %v5613_v3 }
 0x484   : > { %v6042_v33 = vsel %vm3487_vm14, %v5978_v9, %v14373_v20 }
 0x485   : > { %v5910_v46 = vpop.permute.xlu0 %5909  ;;  %7557 = vst.msk [vmem:[%s12302_s4 + $0x11c] sm:$0xf] %vm4579_vm6, %v7691_v26  ;;  %v7689_v60 = vpack.c.bf16 %v6563_v8, %v6563_v8  ;;  %5773 = vrot.lane.b32.xlu0 %v13014_v7, %s8343_s9  ;;  %v5866_v54 = vsel %vm2817_vm10, %v5864_v0, %v5865_v47 }
 0x486   : > { %v6422_v23 = vsel %vm3877_vm12, %v6358_v61, %v5910_v46  ;;  %v5682_v48 = vpop.permute.xlu1 %5681 }
 0x487   : > { %7929 = vmatprep.mubr.msk.bf16.mxu1 %vm3959_vm13, %v6422_v23  ;;  %7555 = vst.msk [vmem:[%s12302_s4 + $0x114] sm:$0xf] %vm4579_vm6, %v7689_v60  ;;  %5545 = vrot.lane.b32.xlu1 %v12944_v32, %s8340_s6  ;;  %v5792_v32 = vshrl.u32 %v13029_v53, 16  ;;  %v6232_v18 = vsel %vm3682_vm2, %v6168_v21, %v5682_v48 }
 0x489   : > { %v5528_v11 = vpop.permute.xlu0 %5527  ;;  %5860 = vrot.lane.b32.xlu0 %v5791_v35, %s8344_s10  ;;  %v5794_v39 = vor.u32 %v5792_v32, %v5790_v37 }
 0x48a   : > { %v5756_v31 = vpop.permute.xlu1 %5755  ;;  %v6106_v10 = vsel %vm3552_vm15, %v6042_v33, %v5528_v11 }
 0x48b   : > { %5632 = vrot.lane.b32.xlu1 %v13022_v1, %s8341_s7  ;;  %v6296_v1 = vsel %vm3747_vm3, %v6232_v18, %v5756_v31  ;;  %v5799_v63 = vsel %vm14371_vm8, %v5794_v39, %v5798_v42  ;;  %v5980_v31 = vsel %vm3422_vm11, %v12697_v59, %v14374_v24  ;;  %v14376_v39 = vld [vmem:[#allocation144_spill] sm:$0xff]  ;;  %s7748_s7 = sshll.u32 %s8327_s15, 13  ;;  %s13400_s15 = scalar_lea.sflag [#allocation4], %s199_s26 }
 0x48c   : > { %v6044_v29 = vsel %vm3487_vm14, %v5980_v31, %v14375_v30  ;;  %v5982_v42 = vsel %vm3422_vm11, %v12735_v50, %v14376_v39 }
 0x48d   : > { %v5615_v7 = vpop.permute.xlu0 %5614  ;;  %5929 = vrot.lane.b32.xlu0 %v5866_v54, %s8345_s11 }
 0x48e   : > { %v5843_v51 = vpop.permute.xlu1 %5842  ;;  %v6170_v16 = vsel %vm3617_vm1, %v6106_v10, %v5615_v7 }
 0x48f   : > { %5701 = vrot.lane.b32.xlu1 %v5638_v4, %s8342_s8  ;;  %v6360_v40 = vsel %vm3812_vm7, %v6296_v1, %v5843_v51  ;;  %s7136_s8 = sshll.u32 %s12302_s4, 4  ;;  %s13392_s8 = int_to_ptr.vmem [resolvable:$true] %s7136_s8 }
 0x490   : > { %s8259_s19 = scalar_lea.vmem %s13392_s8, 8192  ;;  %p8266_p1 = scmp.lt.s32.totalorder %s13392_s8, %s8264_s23 }
 0x491   : > { %v5684_v34 = vpop.permute.xlu0 %5683  ;;  %p8260_p12 = scmp.ne.s32.totalorder %s13392_s8, %s8259_s19  ;;  %p8267_p2 = scmp.lt.s32.totalorder %s8265_s27, %s8259_s19 }
 0x492   : > { %v5912_v55 = vpop.permute.xlu1 %5911  ;;  %v6234_v26 = vsel %vm3682_vm2, %v6170_v16, %v5684_v34 }
 0x493   : > { %v6424_v38 = vsel %vm3877_vm12, %v6360_v40, %v5912_v55  ;;  %5775 = vrot.lane.b32.xlu1 %v13029_v53, %s8343_s9  ;;  %p8261_p13 = pnand %p8260_p12, %p8410_p4  ;;  %p8268_p3 = por %p8267_p2, %p8266_p1 }
 0x494   : > { %v7899_v52 = vpop.f32.mrf.mxu1  ;;  %7930 = vmatmul.mubr.msk.bf16.gmra.mxu1 %vm3959_vm13, %v6424_v38  ;;  %v14377_v38 = vld [vmem:[#allocation204_spill] sm:$0xff] }
 0x495   : > { %v5758_v49 = vpop.permute.xlu0 %5757  ;;  %v6584_v4 = vadd.f32 %v12758_v45, %v7899_v52  ;;  %v6046_v52 = vsel %vm3487_vm14, %v5982_v42, %v14377_v38  ;;  %p8262_p0 = pneg %p8261_p13 }
 0x496   : > { %v6575_v14 = vpop.f32.mrf.mxu1  ;;  %v5530_v43 = vpop.permute.xlu1 %5529  ;;  %v6298_v61 = vsel %vm3747_vm3, %v6234_v26, %v5758_v49 }
 0x497   : > { %v7694_v53 = vpack.c.bf16 %v6584_v4, %v6584_v4  ;;  %v6576_v57 = vadd.f32 %v12758_v45, %v6575_v14  ;;  %5862 = vrot.lane.b32.xlu1 %v5799_v63, %s8344_s10  ;;  %v6108_v7 = vsel %vm3552_vm15, %v6044_v29, %v5530_v43  ;;  %v14380_v29 = vld [vmem:[#allocation171_spill] sm:$0xff]  ;;  %p8269_p5 = pnand %p8268_p3, %p8262_p0 }
 0x498   : > { %v7900_v27 = vpop.f32.mrf.mxu1 }
 0x499   : > { %v5845_v15 = vpop.permute.xlu0 %5844  ;;  %7560 = vst.msk [vmem:[%s12302_s4 + $0x128] sm:$0xf] %vm4579_vm6, %v7694_v53  ;;  %v7692_v41 = vpack.c.bf16 %v6576_v57, %v6576_v57  ;;  %v6587_v3 = vadd.f32 %v12758_v45, %v7900_v27 }
 0x49a   : > { %v6578_v28 = vpop.f32.mrf.mxu1  ;;  %v5617_v8 = vpop.permute.xlu1 %5616  ;;  %v6362_v60 = vsel %vm3812_vm7, %v6298_v61, %v5845_v15  ;;  %v14379_v61 = vld [vmem:[#allocation40_spill] sm:$0xff] }
 0x49b   : > { %7558 = vst.msk [vmem:[%s12302_s4 + $0x120] sm:$0xf] %vm4579_vm6, %v7692_v41  ;;  %v7695_v37 = vpack.c.bf16 %v6587_v3, %v6587_v3  ;;  %v6579_v46 = vadd.f32 %v12758_v45, %v6578_v28  ;;  %5931 = vrot.lane.b32.xlu1 %v5868_v13, %s8345_s11  ;;  %v6172_v62 = vsel %vm3617_vm1, %v6108_v7, %v5617_v8  ;;  %v14378_v28 = vld [vmem:[#allocation93_spill] sm:$0xff]  ;;  %s13390_s11 = scalar_lea.hbm %s13448_s3, %s7748_s7 }
 0x49c   : > { %v5984_v8 = vsel %vm3422_vm11, %v12786_v12, %v14378_v28  ;;  %v5986_v7 = vsel %vm3422_vm11, %v12809_v6, %v14380_v29 }
 0x49d   : > { %v5914_v23 = vpop.permute.xlu0 %5913  ;;  %7561 = vst.msk [vmem:[%s12302_s4 + $0x12c] sm:$0xf] %vm4579_vm6, %v7695_v37  ;;  %v7693_v48 = vpack.c.bf16 %v6579_v46, %v6579_v46  ;;  %v6048_v46 = vsel %vm3487_vm14, %v5984_v8, %v14379_v61 }
 0x49e   : > { %v6426_v35 = vsel %vm3877_vm12, %v6362_v60, %v5914_v23  ;;  %v5686_v0 = vpop.permute.xlu1 %5685 }
 0x49f   : > { %7933 = vmatprep.mubr.msk.bf16.mxu1 %vm3959_vm13, %v6426_v35  ;;  %7559 = vst.msk [vmem:[%s12302_s4 + $0x124] sm:$0xf] %vm4579_vm6, %v7693_v48  ;;  %v6236_v32 = vsel %vm3682_vm2, %v6172_v62, %v5686_v0 }
 0x4a1   : > { %v5532_v47 = vpop.permute.xlu0 %5531 }
 0x4a2   : > { %v5760_v11 = vpop.permute.xlu1 %5759  ;;  %v6110_v63 = vsel %vm3552_vm15, %v6046_v52, %v5532_v47 }
 0x4a3   : > { %v6300_v58 = vsel %vm3747_vm3, %v6236_v32, %v5760_v11  ;;  %v14381_v32 = vld [vmem:[#allocation206_spill] sm:$0xff] }
 0x4a5   : > { %v5619_v54 = vpop.permute.xlu0 %5618 }
 0x4a6   : > { %v5847_v22 = vpop.permute.xlu1 %5846  ;;  %v6174_v9 = vsel %vm3617_vm1, %v6110_v63, %v5619_v54 }
 0x4a7   : > { %v6364_v51 = vsel %vm3812_vm7, %v6300_v58, %v5847_v22 }
 0x4a9   : > { %v5688_v44 = vpop.permute.xlu0 %5687 }
 0x4aa   : > { %v5916_v21 = vpop.permute.xlu1 %5915  ;;  %v6238_v43 = vsel %vm3682_vm2, %v6174_v9, %v5688_v44  ;;  %v6050_v44 = vsel %vm3487_vm14, %v5986_v7, %v14381_v32 }
 0x4ab   : > { %v6428_v59 = vsel %vm3877_vm12, %v6364_v51, %v5916_v21 }
 0x4ac   : > { %v7903_v18 = vpop.f32.mrf.mxu1  ;;  %7934 = vmatmul.mubr.msk.bf16.gmra.mxu1 %vm3959_vm13, %v6428_v59 }
 0x4ad   : > { %v5762_v34 = vpop.permute.xlu0 %5761  ;;  %v6600_v1 = vadd.f32 %v12758_v45, %v7903_v18 }
 0x4ae   : > { %v6591_v40 = vpop.f32.mrf.mxu1  ;;  %v5534_v55 = vpop.permute.xlu1 %5533  ;;  %v6302_v57 = vsel %vm3747_vm3, %v6238_v43, %v5762_v34 }
 0x4af   : > { %v7698_v49 = vpack.c.bf16 %v6600_v1, %v6600_v1  ;;  %v6592_v4 = vadd.f32 %v12758_v45, %v6591_v40  ;;  %v6112_v60 = vsel %vm3552_vm15, %v6048_v46, %v5534_v55 }
 0x4b0   : > { %v7904_v56 = vpop.f32.mrf.mxu1 }
 0x4b1   : > { %v5849_v17 = vpop.permute.xlu0 %5848  ;;  %7564 = vst.msk [vmem:[%s12302_s4 + $0x138] sm:$0xf] %vm4579_vm6, %v7698_v49  ;;  %v7696_v14 = vpack.c.bf16 %v6592_v4, %v6592_v4  ;;  %v6603_v50 = vadd.f32 %v12758_v45, %v7904_v56 }
 0x4b2   : > { %v6594_v20 = vpop.f32.mrf.mxu1  ;;  %v5621_v33 = vpop.permute.xlu1 %5620  ;;  %v6366_v27 = vsel %vm3812_vm7, %v6302_v57, %v5849_v17 }
 0x4b3   : > { %7562 = vst.msk [vmem:[%s12302_s4 + $0x130] sm:$0xf] %vm4579_vm6, %v7696_v14  ;;  %v7699_v53 = vpack.c.bf16 %v6603_v50, %v6603_v50  ;;  %v6595_v10 = vadd.f32 %v12758_v45, %v6594_v20  ;;  %v6176_v48 = vsel %vm3617_vm1, %v6112_v60, %v5621_v33  ;;  %v14382_v50 = vld [vmem:[#allocation38_spill] sm:$0xff]  ;;  %v14383_v33 = vld [vmem:[#allocation205_spill] sm:$0xff] }
 0x4b4   : > { %v5988_v43 = vsel %vm3422_vm11, %v12836_v19, %v14382_v50 }
 0x4b5   : > { %v5918_v15 = vpop.permute.xlu0 %5917  ;;  %7565 = vst.msk [vmem:[%s12302_s4 + $0x13c] sm:$0xf] %vm4579_vm6, %v7699_v53  ;;  %v7697_v16 = vpack.c.bf16 %v6595_v10, %v6595_v10  ;;  %v6052_v53 = vsel %vm3487_vm14, %v5988_v43, %v14383_v33  ;;  %v13246_v33 = vld [vmem:[%s13447_s2] ss:$0 sm:$0xff] }
 0x4b6   : > { %v6430_v41 = vsel %vm3877_vm12, %v6366_v27, %v5918_v15  ;;  %v5690_v3 = vpop.permute.xlu1 %5689 }
 0x4b7   : > { %7937 = vmatprep.mubr.msk.bf16.mxu1 %vm3959_vm13, %v6430_v41  ;;  %7563 = vst.msk [vmem:[%s12302_s4 + $0x134] sm:$0xf] %vm4579_vm6, %v7697_v16  ;;  %v6240_v35 = vsel %vm3682_vm2, %v6176_v48, %v5690_v3 }
 0x4b9   : > { %v5536_v13 = vpop.permute.xlu0 %5535 }
 0x4ba   : > { %v5764_v26 = vpop.permute.xlu1 %5763  ;;  %v6114_v21 = vsel %vm3552_vm15, %v6050_v44, %v5536_v13 }
 0x4bb   : > { %v6304_v47 = vsel %vm3747_vm3, %v6240_v35, %v5764_v26 }
 0x4bd   : > { %v5623_v37 = vpop.permute.xlu0 %5622 }
 0x4be   : > { %v5851_v23 = vpop.permute.xlu1 %5850  ;;  %v6178_v34 = vsel %vm3617_vm1, %v6114_v21, %v5623_v37  ;;  %v14384_v37 = vld [vmem:[#allocation54_spill] sm:$0xff] }
 0x4bf   : > { %v6368_v11 = vsel %vm3812_vm7, %v6304_v47, %v5851_v23  ;;  %v5990_v61 = vsel %vm3422_vm11, %v12859_v36, %v14384_v37  ;;  %v14385_v23 = vld [vmem:[#allocation90_spill] sm:$0xff] }
 0x4c0   : > { %v6054_v48 = vsel %vm3487_vm14, %v5990_v61, %v14385_v23 }
 0x4c1   : > { %v5692_v0 = vpop.permute.xlu0 %5691 }
 0x4c2   : > { %v5920_v24 = vpop.permute.xlu1 %5919  ;;  %v6242_v39 = vsel %vm3682_vm2, %v6178_v34, %v5692_v0  ;;  %v14386_v34 = vld [vmem:[#allocation118_spill] sm:$0xff] }
 0x4c3   : > { %v6432_v12 = vsel %vm3877_vm12, %v6368_v11, %v5920_v24 }
 0x4c4   : > { %v7907_v31 = vpop.f32.mrf.mxu1  ;;  %7938 = vmatmul.mubr.msk.bf16.gmra.mxu1 %vm3959_vm13, %v6432_v12 }
 0x4c5   : > { %v5766_v54 = vpop.permute.xlu0 %5765  ;;  %v6616_v30 = vadd.f32 %v12758_v45, %v7907_v31 }
 0x4c6   : > { %v6607_v22 = vpop.f32.mrf.mxu1  ;;  %v5538_v62 = vpop.permute.xlu1 %5537  ;;  %v6306_v38 = vsel %vm3747_vm3, %v6242_v39, %v5766_v54  ;;  %v14387_v39 = vld [vmem:[#allocation119_spill] sm:$0xff] }
 0x4c7   : > { %v7702_v58 = vpack.c.bf16 %v6616_v30, %v6616_v30  ;;  %v6608_v51 = vadd.f32 %v12758_v45, %v6607_v22  ;;  %v6116_v57 = vsel %vm3552_vm15, %v6052_v53, %v5538_v62 }
 0x4c8   : > { %v7908_v59 = vpop.f32.mrf.mxu1 }
 0x4c9   : > { %v5853_v18 = vpop.permute.xlu0 %5852  ;;  %7568 = vst.msk [vmem:[%s12302_s4 + $0x148] sm:$0xf] %vm4579_vm6, %v7702_v58  ;;  %v7700_v1 = vpack.c.bf16 %v6608_v51, %v6608_v51  ;;  %v6619_v6 = vadd.f32 %v12758_v45, %v7908_v59 }
 0x4ca   : > { %v6610_v42 = vpop.f32.mrf.mxu1  ;;  %v5625_v40 = vpop.permute.xlu1 %5624  ;;  %v6370_v49 = vsel %vm3812_vm7, %v6306_v38, %v5853_v18 }
 0x4cb   : > { %7566 = vst.msk [vmem:[%s12302_s4 + $0x140] sm:$0xf] %vm4579_vm6, %v7700_v1  ;;  %v7703_v55 = vpack.c.bf16 %v6619_v6, %v6619_v6  ;;  %v6611_v52 = vadd.f32 %v12758_v45, %v6610_v42  ;;  %v6180_v27 = vsel %vm3617_vm1, %v6116_v57, %v5625_v40  ;;  %v5992_v1 = vsel %vm3422_vm11, %v12886_v25, %v14386_v34 }
 0x4cc   : > { %v6056_v42 = vsel %vm3487_vm14, %v5992_v1, %v14387_v39 }
 0x4cd   : > { %v5922_v4 = vpop.permute.xlu0 %5921  ;;  %7569 = vst.msk [vmem:[%s12302_s4 + $0x14c] sm:$0xf] %vm4579_vm6, %v7703_v55  ;;  %v7701_v63 = vpack.c.bf16 %v6611_v52, %v6611_v52 }
 0x4ce   : > { %v6434_v56 = vsel %vm3877_vm12, %v6370_v49, %v5922_v4  ;;  %v5694_v17 = vpop.permute.xlu1 %5693 }
 0x4cf   : > { %7941 = vmatprep.mubr.msk.bf16.mxu1 %vm3959_vm13, %v6434_v56  ;;  %7567 = vst.msk [vmem:[%s12302_s4 + $0x144] sm:$0xf] %vm4579_vm6, %v7701_v63  ;;  %v6244_v15 = vsel %vm3682_vm2, %v6180_v27, %v5694_v17 }
 0x4d1   : > { %v5540_v9 = vpop.permute.xlu0 %5539 }
 0x4d2   : > { %v5768_v14 = vpop.permute.xlu1 %5767  ;;  %v6118_v47 = vsel %vm3552_vm15, %v6054_v48, %v5540_v9 }
 0x4d3   : > { %v6308_v41 = vsel %vm3747_vm3, %v6244_v15, %v5768_v14 }
 0x4d5   : > { %v5627_v20 = vpop.permute.xlu0 %5626 }
 0x4d6   : > { %v5855_v10 = vpop.permute.xlu1 %5854  ;;  %v6182_v12 = vsel %vm3617_vm1, %v6118_v47, %v5627_v20 }
 0x4d7   : > { %v6372_v3 = vsel %vm3812_vm7, %v6308_v41, %v5855_v10 }
 0x4d9   : > { %v5696_v16 = vpop.permute.xlu0 %5695 }
 0x4da   : > { %v5924_v13 = vpop.permute.xlu1 %5923  ;;  %v6246_v54 = vsel %vm3682_vm2, %v6182_v12, %v5696_v16 }
 0x4db   : > { %v6436_v19 = vsel %vm3877_vm12, %v6372_v3, %v5924_v13 }
 0x4dc   : > { %v7911_v26 = vpop.f32.mrf.mxu1  ;;  %7942 = vmatmul.mubr.msk.bf16.gmra.mxu1 %vm3959_vm13, %v6436_v19 }
 0x4dd   : > { %v5770_v28 = vpop.permute.xlu0 %5769  ;;  %v6632_v8 = vadd.f32 %v12758_v45, %v7911_v26 }
 0x4de   : > { %v6623_v46 = vpop.f32.mrf.mxu1  ;;  %v5542_v60 = vpop.permute.xlu1 %5541  ;;  %v6310_v22 = vsel %vm3747_vm3, %v6246_v54, %v5770_v28 }
 0x4df   : > { %v7706_v35 = vpack.c.bf16 %v6632_v8, %v6632_v8  ;;  %v6624_v0 = vadd.f32 %v12758_v45, %v6623_v46  ;;  %v6120_v40 = vsel %vm3552_vm15, %v6056_v42, %v5542_v60 }
 0x4e0   : > { %v7912_v11 = vpop.f32.mrf.mxu1 }
 0x4e1   : > { %v5857_v24 = vpop.permute.xlu0 %5856  ;;  %7572 = vst.msk [vmem:[%s12302_s4 + $0x158] sm:$0xf] %vm4579_vm6, %v7706_v35  ;;  %v7704_v31 = vpack.c.bf16 %v6624_v0, %v6624_v0  ;;  %v6635_v36 = vadd.f32 %v12758_v45, %v7912_v11  ;;  %v14389_v11 = vld [vmem:[#allocation140_spill] sm:$0xff] }
 0x4e2   : > { %v6626_v30 = vpop.f32.mrf.mxu1  ;;  %v5629_v29 = vpop.permute.xlu1 %5628  ;;  %v6374_v32 = vsel %vm3812_vm7, %v6310_v22, %v5857_v24  ;;  %v5996_v24 = vsel %vm3422_vm11, %v12915_v2, %v14389_v11 }
 0x4e3   : > { %7570 = vst.msk [vmem:[%s12302_s4 + $0x150] sm:$0xf] %vm4579_vm6, %v7704_v31  ;;  %v7707_v7 = vpack.c.bf16 %v6635_v36, %v6635_v36  ;;  %v6627_v62 = vadd.f32 %v12758_v45, %v6626_v30  ;;  %v6184_v38 = vsel %vm3617_vm1, %v6120_v40, %v5629_v29 }
 0x4e5   : > { %v5926_v44 = vpop.permute.xlu0 %5925  ;;  %7573 = vst.msk [vmem:[%s12302_s4 + $0x15c] sm:$0xf] %vm4579_vm6, %v7707_v7  ;;  %v7705_v58 = vpack.c.bf16 %v6627_v62, %v6627_v62 }
 0x4e6   : > { %v6438_v51 = vsel %vm3877_vm12, %v6374_v32, %v5926_v44  ;;  %v5698_v21 = vpop.permute.xlu1 %5697 }
 0x4e7   : > { %7945 = vmatprep.mubr.msk.bf16.mxu1 %vm3959_vm13, %v6438_v51  ;;  %7571 = vst.msk [vmem:[%s12302_s4 + $0x154] sm:$0xf] %vm4579_vm6, %v7705_v58  ;;  %v6248_v52 = vsel %vm3682_vm2, %v6184_v38, %v5698_v21 }
 0x4e9   : > { %v5470_v59 = vpop.permute.xlu0 %5469 }
 0x4ea   : > { %v5772_v18 = vpop.permute.xlu1 %5771 }
 0x4eb   : > { %v6312_v4 = vsel %vm3747_vm3, %v6248_v52, %v5772_v18 }
 0x4ed   : > { %v5544_v6 = vpop.permute.xlu0 %5543 }
 0x4ee   : > { %v5859_v55 = vpop.permute.xlu1 %5858 }
 0x4ef   : > { %v6376_v63 = vsel %vm3812_vm7, %v6312_v4, %v5859_v55 }
 0x4f1   : > { %v5631_v49 = vpop.permute.xlu0 %5630 }
 0x4f2   : > { %v5928_v56 = vpop.permute.xlu1 %5927 }
 0x4f3   : > { %v6440_v25 = vsel %vm3877_vm12, %v6376_v63, %v5928_v56 }
 0x4f4   : > { %v7915_v17 = vpop.f32.mrf.mxu1  ;;  %7946 = vmatmul.mubr.msk.bf16.gmra.mxu1 %vm3959_vm13, %v6440_v25 }
 0x4f5   : > { %v5700_v9 = vpop.permute.xlu0 %5699  ;;  %v6648_v14 = vadd.f32 %v12758_v45, %v7915_v17  ;;  %v14388_v45 = vld [vmem:[#allocation11_spill] sm:$0xff] }
 0x4f6   : > { %v6639_v50 = vpop.f32.mrf.mxu1  ;;  %v5472_v43 = vpop.permute.xlu1 %5471  ;;  %v5994_v16 = vsel %vm3422_vm11, %v12909_v5, %v14388_v45 }
 0x4f7   : > { %v7710_v20 = vpack.c.bf16 %v6648_v14, %v6648_v14  ;;  %v6640_v53 = vadd.f32 %v13246_v33, %v6639_v50  ;;  %v6058_v13 = vsel %vm3487_vm14, %v5994_v16, %v5470_v59  ;;  %v6060_v12 = vsel %vm3487_vm14, %v5996_v24, %v5472_v43 }
 0x4f8   : > { %v7916_v57 = vpop.f32.mrf.mxu1  ;;  %v6122_v28 = vsel %vm3552_vm15, %v6058_v13, %v5544_v6 }
 0x4f9   : > { %v5774_v10 = vpop.permute.xlu0 %5773  ;;  %7576 = vst.msk [vmem:[%s12302_s4 + $0x168] sm:$0xf] %vm4579_vm6, %v7710_v20  ;;  %v7708_v27 = vpack.c.bf16 %v6640_v53, %v6640_v53  ;;  %v6651_v15 = vadd.f32 %v13246_v33, %v7916_v57  ;;  %v6186_v37 = vsel %vm3617_vm1, %v6122_v28, %v5631_v49 }
 0x4fa   : > { %v6642_v41 = vpop.f32.mrf.mxu1  ;;  %v5546_v3 = vpop.permute.xlu1 %5545  ;;  %v6250_v46 = vsel %vm3682_vm2, %v6186_v37, %v5700_v9 }
 0x4fb   : > { %7574 = vst.msk [vmem:[%s12302_s4 + $0x160] sm:$0xf] %vm4579_vm6, %v7708_v27  ;;  %v7711_v19 = vpack.c.bf16 %v6651_v15, %v6651_v15  ;;  %v6643_v26 = vadd.f32 %v13246_v33, %v6642_v41  ;;  %v6314_v60 = vsel %vm3747_vm3, %v6250_v46, %v5774_v10  ;;  %v6124_v31 = vsel %vm3552_vm15, %v6060_v12, %v5546_v3 }
 0x4fd   : > { %v5861_v8 = vpop.permute.xlu0 %5860  ;;  %7577 = vst.msk [vmem:[%s12302_s4 + $0x16c] sm:$0xf] %vm4579_vm6, %v7711_v19  ;;  %v7709_v61 = vpack.c.bf16 %v6643_v26, %v6643_v26 }
 0x4fe   : > { %v5633_v5 = vpop.permute.xlu1 %5632  ;;  %v6378_v23 = vsel %vm3812_vm7, %v6314_v60, %v5861_v8 }
 0x4ff   : > { %7575 = vst.msk [vmem:[%s12302_s4 + $0x164] sm:$0xf] %vm4579_vm6, %v7709_v61  ;;  %v6188_v54 = vsel %vm3617_vm1, %v6124_v31, %v5633_v5 }
 0x501   : > { %v5930_v48 = vpop.permute.xlu0 %5929 }
 0x502   : > { %v6442_v35 = vsel %vm3877_vm12, %v6378_v23, %v5930_v48  ;;  %v5702_v0 = vpop.permute.xlu1 %5701 }
 0x503   : > { %7949 = vmatprep.mubr.msk.bf16.mxu1 %vm3959_vm13, %v6442_v35  ;;  %v6252_v30 = vsel %vm3682_vm2, %v6188_v54, %v5702_v0 }
 0x506   : > { %v5776_v47 = vpop.permute.xlu1 %5775 }
 0x507   : > { %v6316_v7 = vsel %vm3747_vm3, %v6252_v30, %v5776_v47 }
 0x50a   : > { %v5863_v36 = vpop.permute.xlu1 %5862 }
 0x50b   : > { %v6380_v62 = vsel %vm3812_vm7, %v6316_v7, %v5863_v36 }
 0x50c   : > { %v7919_v29 = vpop.f32.mrf.mxu1 }
 0x50d   : > { %v6664_v22 = vadd.f32 %v13246_v33, %v7919_v29 }
 0x50e   : > { %v6655_v2 = vpop.f32.mrf.mxu1  ;;  %v5932_v32 = vpop.permute.xlu1 %5931 }
 0x50f   : > { %v7714_v44 = vpack.c.bf16 %v6664_v22, %v6664_v22  ;;  %v6656_v58 = vadd.f32 %v13246_v33, %v6655_v2  ;;  %v6444_v51 = vsel %vm3877_vm12, %v6380_v62, %v5932_v32 }
 0x510   : > { %v7920_v21 = vpop.f32.mrf.mxu1  ;;  %7950 = vmatmul.mubr.msk.bf16.gmra.mxu1 %vm3959_vm13, %v6444_v51 }
 0x511   : > { %7580 = vst.msk [vmem:[%s12302_s4 + $0x178] sm:$0xf] %vm4579_vm6, %v7714_v44  ;;  %v7712_v59 = vpack.c.bf16 %v6656_v58, %v6656_v58  ;;  %v6667_v18 = vadd.f32 %v13246_v33, %v7920_v21 }
 0x512   : > { %v6658_v34 = vpop.f32.mrf.mxu1 }
 0x513   : > { %7578 = vst.msk [vmem:[%s12302_s4 + $0x170] sm:$0xf] %vm4579_vm6, %v7712_v59  ;;  %v7715_v1 = vpack.c.bf16 %v6667_v18, %v6667_v18  ;;  %v6659_v6 = vadd.f32 %v13246_v33, %v6658_v34 }
 0x515   : > { %7581 = vst.msk [vmem:[%s12302_s4 + $0x17c] sm:$0xf] %vm4579_vm6, %v7715_v1  ;;  %v7713_v39 = vpack.c.bf16 %v6659_v6, %v6659_v6 }
 0x517   : > { %7579 = vst.msk [vmem:[%s12302_s4 + $0x174] sm:$0xf] %vm4579_vm6, %v7713_v39 }
 0x524   : > { %v7923_v42 = vpop.f32.mrf.mxu1 }
 0x525   : > { %v6680_v40 = vadd.f32 %v13246_v33, %v7923_v42 }
 0x526   : > { %v6671_v55 = vpop.f32.mrf.mxu1 }
 0x527   : > { %v7718_v38 = vpack.c.bf16 %v6680_v40, %v6680_v40  ;;  %v6672_v52 = vadd.f32 %v13246_v33, %v6671_v55 }
 0x528   : > { %v7924_v49 = vpop.f32.mrf.mxu1 }
 0x529   : > { %7584 = vst.msk [vmem:[%s12302_s4 + $0x188] sm:$0xf] %vm4579_vm6, %v7718_v38  ;;  %v7716_v4 = vpack.c.bf16 %v6672_v52, %v6672_v52  ;;  %v6683_v63 = vadd.f32 %v13246_v33, %v7924_v49 }
 0x52a   : > { %v6674_v56 = vpop.f32.mrf.mxu1 }
 0x52b   : > { %7582 = vst.msk [vmem:[%s12302_s4 + $0x180] sm:$0xf] %vm4579_vm6, %v7716_v4  ;;  %v7719_v25 = vpack.c.bf16 %v6683_v63, %v6683_v63  ;;  %v6675_v17 = vadd.f32 %v13246_v33, %v6674_v56 }
 0x52d   : > { %7585 = vst.msk [vmem:[%s12302_s4 + $0x18c] sm:$0xf] %vm4579_vm6, %v7719_v25  ;;  %v7717_v9 = vpack.c.bf16 %v6675_v17, %v6675_v17 }
 0x52f   : > { %7583 = vst.msk [vmem:[%s12302_s4 + $0x184] sm:$0xf] %vm4579_vm6, %v7717_v9 }
 0x53c   : > { %v7927_v14 = vpop.f32.mrf.mxu1 }
 0x53d   : > { %v6696_v50 = vadd.f32 %v13246_v33, %v7927_v14 }
 0x53e   : > { %v6687_v43 = vpop.f32.mrf.mxu1 }
 0x53f   : > { %v7722_v20 = vpack.c.bf16 %v6696_v50, %v6696_v50  ;;  %v6688_v53 = vadd.f32 %v13246_v33, %v6687_v43 }
 0x540   : > { %v7928_v57 = vpop.f32.mrf.mxu1 }
 0x541   : > { %7588 = vst.msk [vmem:[%s12302_s4 + $0x198] sm:$0xf] %vm4579_vm6, %v7722_v20  ;;  %v7720_v10 = vpack.c.bf16 %v6688_v53, %v6688_v53  ;;  %v6699_v27 = vadd.f32 %v13246_v33, %v7928_v57 }
 0x542   : > { %v6690_v15 = vpop.f32.mrf.mxu1 }
 0x543   : > { %7586 = vst.msk [vmem:[%s12302_s4 + $0x190] sm:$0xf] %vm4579_vm6, %v7720_v10  ;;  %v7723_v45 = vpack.c.bf16 %v6699_v27, %v6699_v27  ;;  %v6691_v16 = vadd.f32 %v13246_v33, %v6690_v15 }
 0x545   : > { %7589 = vst.msk [vmem:[%s12302_s4 + $0x19c] sm:$0xf] %vm4579_vm6, %v7723_v45  ;;  %v7721_v41 = vpack.c.bf16 %v6691_v16, %v6691_v16 }
 0x547   : > { %7587 = vst.msk [vmem:[%s12302_s4 + $0x194] sm:$0xf] %vm4579_vm6, %v7721_v41 }
 0x554   : > { %v7931_v3 = vpop.f32.mrf.mxu1 }
 0x555   : > { %v6712_v13 = vadd.f32 %v13246_v33, %v7931_v3 }
 0x556   : > { %v6703_v19 = vpop.f32.mrf.mxu1 }
 0x557   : > { %v7726_v26 = vpack.c.bf16 %v6712_v13, %v6712_v13  ;;  %v6704_v28 = vadd.f32 %v13246_v33, %v6703_v19 }
 0x558   : > { %v7932_v8 = vpop.f32.mrf.mxu1 }
 0x559   : > { %7592 = vst.msk [vmem:[%s12302_s4 + $0x1a8] sm:$0xf] %vm4579_vm6, %v7726_v26  ;;  %v7724_v37 = vpack.c.bf16 %v6704_v28, %v6704_v28  ;;  %v6715_v61 = vadd.f32 %v13246_v33, %v7932_v8 }
 0x55a   : > { %v6706_v46 = vpop.f32.mrf.mxu1 }
 0x55b   : > { %7590 = vst.msk [vmem:[%s12302_s4 + $0x1a0] sm:$0xf] %vm4579_vm6, %v7724_v37  ;;  %v7727_v5 = vpack.c.bf16 %v6715_v61, %v6715_v61  ;;  %v6707_v60 = vadd.f32 %v13246_v33, %v6706_v46 }
 0x55d   : > { %7593 = vst.msk [vmem:[%s12302_s4 + $0x1ac] sm:$0xf] %vm4579_vm6, %v7727_v5  ;;  %v7725_v23 = vpack.c.bf16 %v6707_v60, %v6707_v60 }
 0x55f   : > { %7591 = vst.msk [vmem:[%s12302_s4 + $0x1a4] sm:$0xf] %vm4579_vm6, %v7725_v23 }
 0x56c   : > { %v7935_v48 = vpop.f32.mrf.mxu1 }
 0x56d   : > { %v6728_v35 = vadd.f32 %v13246_v33, %v7935_v48 }
 0x56e   : > { %v6719_v0 = vpop.f32.mrf.mxu1 }
 0x56f   : > { %v7730_v47 = vpack.c.bf16 %v6728_v35, %v6728_v35  ;;  %v6720_v11 = vadd.f32 %v13246_v33, %v6719_v0 }
 0x570   : > { %v7936_v24 = vpop.f32.mrf.mxu1 }
 0x571   : > { %7596 = vst.msk [vmem:[%s12302_s4 + $0x1b8] sm:$0xf] %vm4579_vm6, %v7730_v47  ;;  %v7728_v12 = vpack.c.bf16 %v6720_v11, %v6720_v11  ;;  %v6731_v31 = vadd.f32 %v13246_v33, %v7936_v24 }
 0x572   : > { %v6722_v36 = vpop.f32.mrf.mxu1 }
 0x573   : > { %7594 = vst.msk [vmem:[%s12302_s4 + $0x1b0] sm:$0xf] %vm4579_vm6, %v7728_v12  ;;  %v7731_v54 = vpack.c.bf16 %v6731_v31, %v6731_v31  ;;  %v6723_v30 = vadd.f32 %v13246_v33, %v6722_v36 }
 0x575   : > { %7597 = vst.msk [vmem:[%s12302_s4 + $0x1bc] sm:$0xf] %vm4579_vm6, %v7731_v54  ;;  %v7729_v29 = vpack.c.bf16 %v6723_v30, %v6723_v30 }
 0x577   : > { %7595 = vst.msk [vmem:[%s12302_s4 + $0x1b4] sm:$0xf] %vm4579_vm6, %v7729_v29 }
 0x584   : > { %v7939_v7 = vpop.f32.mrf.mxu1 }
 0x585   : > { %v6744_v22 = vadd.f32 %v13246_v33, %v7939_v7 }
 0x586   : > { %v6735_v62 = vpop.f32.mrf.mxu1 }
 0x587   : > { %v7734_v2 = vpack.c.bf16 %v6744_v22, %v6744_v22  ;;  %v6736_v32 = vadd.f32 %v13246_v33, %v6735_v62 }
 0x588   : > { %v7940_v44 = vpop.f32.mrf.mxu1 }
 0x589   : > { %7600 = vst.msk [vmem:[%s12302_s4 + $0x1c8] sm:$0xf] %vm4579_vm6, %v7734_v2  ;;  %v7732_v58 = vpack.c.bf16 %v6736_v32, %v6736_v32  ;;  %v6747_v51 = vadd.f32 %v13246_v33, %v7940_v44 }
 0x58a   : > { %v6738_v21 = vpop.f32.mrf.mxu1 }
 0x58b   : > { %7598 = vst.msk [vmem:[%s12302_s4 + $0x1c0] sm:$0xf] %vm4579_vm6, %v7732_v58  ;;  %v7735_v59 = vpack.c.bf16 %v6747_v51, %v6747_v51  ;;  %v6739_v18 = vadd.f32 %v13246_v33, %v6738_v21 }
 0x58d   : > { %7601 = vst.msk [vmem:[%s12302_s4 + $0x1cc] sm:$0xf] %vm4579_vm6, %v7735_v59  ;;  %v7733_v34 = vpack.c.bf16 %v6739_v18, %v6739_v18 }
 0x58f   : > { %7599 = vst.msk [vmem:[%s12302_s4 + $0x1c4] sm:$0xf] %vm4579_vm6, %v7733_v34 }
 0x59c   : > { %v7943_v1 = vpop.f32.mrf.mxu1 }
 0x59d   : > { %v6760_v6 = vadd.f32 %v13246_v33, %v7943_v1 }
 0x59e   : > { %v6751_v39 = vpop.f32.mrf.mxu1 }
 0x59f   : > { %v7738_v42 = vpack.c.bf16 %v6760_v6, %v6760_v6  ;;  %v6752_v40 = vadd.f32 %v13246_v33, %v6751_v39 }
 0x5a0   : > { %v7944_v55 = vpop.f32.mrf.mxu1 }
 0x5a1   : > { %7604 = vst.msk [vmem:[%s12302_s4 + $0x1d8] sm:$0xf] %vm4579_vm6, %v7738_v42  ;;  %v7736_v38 = vpack.c.bf16 %v6752_v40, %v6752_v40  ;;  %v6763_v52 = vadd.f32 %v13246_v33, %v7944_v55 }
 0x5a2   : > { %v6754_v49 = vpop.f32.mrf.mxu1 }
 0x5a3   : > { %7602 = vst.msk [vmem:[%s12302_s4 + $0x1d0] sm:$0xf] %vm4579_vm6, %v7736_v38  ;;  %v7739_v4 = vpack.c.bf16 %v6763_v52, %v6763_v52  ;;  %v6755_v63 = vadd.f32 %v13246_v33, %v6754_v49 }
 0x5a5   : > { %7605 = vst.msk [vmem:[%s12302_s4 + $0x1dc] sm:$0xf] %vm4579_vm6, %v7739_v4  ;;  %v7737_v56 = vpack.c.bf16 %v6755_v63, %v6755_v63 }
 0x5a7   : > { %7603 = vst.msk [vmem:[%s12302_s4 + $0x1d4] sm:$0xf] %vm4579_vm6, %v7737_v56 }
 0x5b4   : > { %v7947_v25 = vpop.f32.mrf.mxu1 }
 0x5b5   : > { %v6776_v17 = vadd.f32 %v13246_v33, %v7947_v25 }
 0x5b6   : > { %v6767_v9 = vpop.f32.mrf.mxu1 }
 0x5b7   : > { %v7742_v14 = vpack.c.bf16 %v6776_v17, %v6776_v17  ;;  %v6768_v50 = vadd.f32 %v13246_v33, %v6767_v9 }
 0x5b8   : > { %v7948_v43 = vpop.f32.mrf.mxu1 }
 0x5b9   : > { %7608 = vst.msk [vmem:[%s12302_s4 + $0x1e8] sm:$0xf] %vm4579_vm6, %v7742_v14  ;;  %v7740_v20 = vpack.c.bf16 %v6768_v50, %v6768_v50  ;;  %v6779_v53 = vadd.f32 %v13246_v33, %v7948_v43 }
 0x5ba   : > { %v6770_v57 = vpop.f32.mrf.mxu1 }
 0x5bb   : > { %7606 = vst.msk [vmem:[%s12302_s4 + $0x1e0] sm:$0xf] %vm4579_vm6, %v7740_v20  ;;  %v7743_v10 = vpack.c.bf16 %v6779_v53, %v6779_v53  ;;  %v6771_v27 = vadd.f32 %v13246_v33, %v6770_v57 }
 0x5bd   : > { %7609 = vst.msk [vmem:[%s12302_s4 + $0x1ec] sm:$0xf] %vm4579_vm6, %v7743_v10  ;;  %v7741_v15 = vpack.c.bf16 %v6771_v27, %v6771_v27 }
 0x5bf   : > { %7607 = vst.msk [vmem:[%s12302_s4 + $0x1e4] sm:$0xf] %vm4579_vm6, %v7741_v15 }
 0x5d0   : > { %v7951_v45 = vpop.f32.mrf.mxu1 }
 0x5d1   : > { %v6792_v16 = vadd.f32 %v13246_v33, %v7951_v45 }
 0x5d2   : > { %v6783_v41 = vpop.f32.mrf.mxu1 }
 0x5d3   : > { %v7746_v3 = vpack.c.bf16 %v6792_v16, %v6792_v16  ;;  %v6784_v13 = vadd.f32 %v13246_v33, %v6783_v41 }
 0x5d4   : > { %v7952_v19 = vpop.f32.mrf.mxu1 }
 0x5d5   : > { %7612 = vst.msk [vmem:[%s12302_s4 + $0x1f8] sm:$0xf] %vm4579_vm6, %v7746_v3  ;;  %v7744_v26 = vpack.c.bf16 %v6784_v13, %v6784_v13  ;;  %v6795_v28 = vadd.f32 %v13246_v33, %v7952_v19 }
 0x5d6   : > { %v6786_v8 = vpop.f32.mrf.mxu1 }
 0x5d7   : > { %7610 = vst.msk [vmem:[%s12302_s4 + $0x1f0] sm:$0xf] %vm4579_vm6, %v7744_v26  ;;  %v7747_v37 = vpack.c.bf16 %v6795_v28, %v6795_v28  ;;  %v6787_v61 = vadd.f32 %v13246_v33, %v6786_v8 }
 0x5d9   : > { %7613 = vst.msk [vmem:[%s12302_s4 + $0x1fc] sm:$0xf] %vm4579_vm6, %v7747_v37  ;;  %v7745_v46 = vpack.c.bf16 %v6787_v61, %v6787_v61 }
 0x5db   : > { %7611 = vst.msk [vmem:[%s12302_s4 + $0x1f4] sm:$0xf] %vm4579_vm6, %v7745_v46 }
 0x5dc   : > { %8272 = shalt.err (!%p8269_p5)
}
 0x5dd   : > { %s8273_s26 = scalar_lea.hbm %s13390_s11, 8192  ;;  %s8277_s4 = scalar_lea.hbm %s13448_s3, 16384 }
 0x5de   : > { %p8274_p6 = scmp.ne.s32.totalorder %s13390_s11, %s8273_s26  ;;  %p8278_p10 = scmp.lt.s32.totalorder %s13390_s11, %s13448_s3 }
 0x5df   : > { %p8279_p11 = scmp.lt.s32.totalorder %s8277_s4, %s8273_s26 }
 0x5e0   : > { %p8275_p7 = pnand %p8274_p6, %p8410_p4 }
 0x5e1   : > { %p8280_p12 = por %p8279_p11, %p8278_p10 }
 0x5e2   : > { %p8276_p9 = pneg %p8275_p7 }
 0x5e4   : > { %p8281_p13 = pnand %p8280_p12, %p8276_p9 }
 0x5e6   : > { %8284 = shalt.err (!%p8281_p13)
}
 0x5e7   : > { %s8348_s5 = smov 64   ;;  %s8349_s6 = smov 4  }
 0x5e8   : > { %7953 = dma.vmem_to_hbm [thread:$0]  (%p8410_p4), %s13392_s8, 8192, %s13390_s11, %s13400_s15, %s8348_s5, %s8348_s5, %s8349_s6  }
 0x5e9 PF: > { %p7959_p0 = scmp.ge.s32.totalorder %s8335_s17, 2  ;;  %s7151_s7 = sand.u32 1, %s8315_s12  }
 0x5ea   : > { %s7152_s9 = scalar_lea.sflag [#allocation4], %s7151_s7 }
 0x5eb   : > { %p7956_p1 = pnand %p7959_p0, %p8417_p8 }
 0x5ed   : > { %p7957_p2 = pneg %p7956_p1 }
 0x5ef   : > { %8310 = dma.done.wait (%p7957_p2), %s7152_s9, 8192  }
 0x5f0   : > { %8312 = vsyncadd (%p7957_p2), %s7152_s9, 4294959104  ;;  %s16_s17 = sadd.s32 1, %s8335_s17   ;;  %s14390_s12 = smov %s8319_s13 }
 0x5f1   : > { %p13_p3 = scmp.ge.s32.totalorder %s16_s17, 4   ;;  %s14391_s13 = smov %s8323_s14 }
 0x5f2   : > { %s14392_s14 = smov %s8423_s25  ;;  %s14393_s15 = smov %s8331_s16 }
 0x5f3   : > { %s14394_s16 = smov %s14396_s20  ;;  %15 = sbr.rel (!%p13_p3) target bundleno = 4 (0x4), region = 79 }
 0x5f8   :  { %7157 = vsyncpa [#allocation4], 1 }
 0x5f9   :  { %7159 = vsyncpa [#allocation4 + $0x1], 1 }

</bundles_post_ra>
